<compile_context>
chip_gen: v5e
topology: v5e:2x2
jax: 0.10.0
libtpu: 0.0.40
codegen_flags: <defaults>
</compile_context>

<pallas_src>
import functools
import math
from types import SimpleNamespace

import jax
import jax.numpy as jnp
from jax.experimental import pallas as pl
from jax.experimental.pallas import tpu as pltpu

# ----------------------------------------------------------------------------- FLAGS
FLAGS = SimpleNamespace(
    fsnet_loss_type="l1",
    rot_1_w=1.0, rot_2_w=1.0, rot_regular=1.0, prop_sym_w=1.0, recon_w=1.0,
    tran_w=1.0, size_w=1.0, r_con_w=1.0, h1_w=1.0, h2_w=1.0, DCD_align=1.0,
)


# ------------------------------------------------------------------- VMEM budget helper
def _dcd_vmem_limit_bytes(n_pred, n_gt):
    """Scoped-VMEM budget for the untiled per-batch DCD kernel."""
    big = 4 * n_pred * n_gt                                   # one (Ng, Np) f32 temp
    # d + argmin/one-hot temps (~4 live big temps) + double-buffered blocks + slack
    need = 5 * big + 4 * (n_gt * 128 * 4) + 4 * (8 * n_pred * 4) + (4 << 20)
    try:
        cap = int(pltpu.get_tpu_info().vmem_capacity_bytes)
    except Exception:                                         # pragma: no cover
        cap = 64 << 20                                        # v7x per-TC physical VMEM
    return int(min(max(need, 32 << 20), int(cap * 0.85)))


# ------------------------------------------------------------- fused rigid + DCD kernel
def _dcd_kernel(ga_ref, pT_ref, rk_ref, t_ref, s_ref, l1_ref, l2_ref, paug_ref, *,
                alpha, n_lambda, frac_12, frac_21):
    ga = ga_ref[0]                    # (Ng, 8)  augmented gt rows: [-2g, |g|^2, 1, 0,0,0]
    p3 = pT_ref[0]                    # (3, Np)  pred point cloud, lane-dense
    Rk = rk_ref[0]                    # (3, 3)   = R^T
    t = t_ref[0]                      # (3, 1)
    s = s_ref[0]                      # (3, 1)
    f32 = jnp.float32
    Ng = ga.shape[0]
    Np = p3.shape[1]

    # fused rigid transform, lane-dense: p = (R^T (pred - t)) * s  == ((pred - t) @ R) * s
    x = p3 - t
    p = (Rk[:, 0:1] * x[0:1, :]
         + Rk[:, 1:2] * x[1:2, :]
         + Rk[:, 2:3] * x[2:3, :]) * s                                   # (3, Np)
    pn = jnp.sum(p * p, axis=0, keepdims=True)                           # (1, Np)

    # augmented rhs for the distance matmul: rows [p, 1, |p|^2, 0, 0, 0]
    paug_ref[0:3, :] = p
    paug_ref[3:4, :] = jnp.ones((1, Np), f32)
    paug_ref[4:5, :] = pn
    paug_ref[5:8, :] = jnp.zeros((3, Np), f32)

    # d[g, p] = |g|^2 + |p|^2 - 2 g.p   in a single MXU matmul (K = 8)
    d = jnp.maximum(
        jnp.dot(ga, paug_ref[...], preferred_element_type=f32), 0.0)     # (Ng, Np)

    iota_g = jax.lax.broadcasted_iota(jnp.int32, (Ng, 1), 0)
    iota_p = jax.lax.broadcasted_iota(jnp.int32, (1, Np), 1)
    dn = (((1,), (1,)), ((), ()))     # contract minor (lane) dims: "a @ b.T" pattern

    # ---- direction 1: each pred point -> nearest gt point ----------------------------
    dmin1 = jnp.min(d, axis=0, keepdims=True)                                   # (1, Np)
    idx1 = jnp.min(jnp.where(d <= dmin1, iota_g, Ng), axis=0, keepdims=True)    # (1, Np)
    m1 = (iota_g == idx1).astype(f32)                      # (Ng, Np) one-hot per column
    e1 = jnp.exp(-alpha * dmin1)                                                # EUP
    # MXU: count1[g] = #preds assigned to g ;  S1[g] = sum of e1 over those preds
    count1 = jax.lax.dot_general(m1, jnp.ones((1, Np), f32), dn,
                                 preferred_element_type=f32)                    # (Ng, 1)
    s1 = jax.lax.dot_general(m1, e1, dn, preferred_element_type=f32)            # (Ng, 1)
    c1 = jnp.maximum(count1, 1.0)       # rows with count==0 have s1==0; keep log finite
    w1 = frac_21 * pl.reciprocal(jnp.exp(n_lambda * jnp.log(c1)) + 1e-6, approx=True)
    # mean_p(-e1 * w + 1) == 1 - (1/Np) * sum_g S1[g] * w1[g]
    l1_ref[0] = 1.0 - jnp.sum(s1 * w1, axis=0, keepdims=True) * (1.0 / Np)

    # ---- direction 2: each gt point -> nearest pred point ----------------------------
    dmin2 = jnp.min(d, axis=1, keepdims=True)                                   # (Ng, 1)
    idx2 = jnp.min(jnp.where(d <= dmin2, iota_p, Np), axis=1, keepdims=True)    # (Ng, 1)
    m2 = (iota_p == idx2).astype(f32)                      # (Ng, Np) one-hot per row
    e2 = jnp.exp(-alpha * dmin2)                                                # EUP
    # MXU: count2[p] = #gts assigned to p ; cnt2[g] = count2[idx2[g]] (gather as matmul)
    count2 = jnp.dot(jnp.ones((1, Ng), f32), m2, preferred_element_type=f32)    # (1, Np)
    cnt2 = jax.lax.dot_general(m2, count2, dn, preferred_element_type=f32)      # (Ng, 1)
    w2 = frac_12 * pl.reciprocal(
        jnp.exp(n_lambda * jnp.log(jnp.maximum(cnt2, 1.0))) + 1e-6, approx=True)
    l2_ref[0] = 1.0 - jnp.sum(e2 * w2, axis=0, keepdims=True) * (1.0 / Ng)


def dcd_pallas(pred, gt, R, t, s, alpha, n_lambda, frac_12, frac_21):
    """Fused (rigid transform -> chamfer -> DCD weighting) kernel.

    pred (B,Np,3), gt (B,Ng,3), R (B,3,3), t (B,1,3), s (B,1,3).
    Returns per-batch (loss1 (B,), loss2 (B,)) matching calc_dcd's inner loop.
    """
    pred = pred.astype(jnp.float32)
    gt = gt.astype(jnp.float32)
    B, Np, _ = pred.shape
    _, Ng, _ = gt.shape

    pT = jnp.transpose(pred, (0, 2, 1))                              # (B, 3, Np)
    Rk = jnp.transpose(R.astype(jnp.float32), (0, 2, 1))             # (B, 3, 3)  = R^T
    tT = jnp.transpose(t.astype(jnp.float32), (0, 2, 1))             # (B, 3, 1)
    sT = jnp.transpose(s.astype(jnp.float32), (0, 2, 1))             # (B, 3, 1)
    gn = jnp.sum(gt * gt, axis=-1, keepdims=True)                    # (B, Ng, 1)
    ga = jnp.concatenate(
        [-2.0 * gt, gn, jnp.ones((B, Ng, 1), jnp.float32),
         jnp.zeros((B, Ng, 3), jnp.float32)], axis=-1)               # (B, Ng, 8)

    kernel = functools.partial(
        _dcd_kernel, alpha=float(alpha), n_lambda=float(n_lambda),
        frac_12=float(frac_12), frac_21=float(frac_21))

    l1, l2 = pl.pallas_call(
        kernel,
        out_shape=(jax.ShapeDtypeStruct((B, 1, 1), jnp.float32),
                   jax.ShapeDtypeStruct((B, 1, 1), jnp.float32)),
        grid=(B,),
        in_specs=[pl.BlockSpec((1, Ng, 8), lambda b: (b, 0, 0)),
                  pl.BlockSpec((1, 3, Np), lambda b: (b, 0, 0)),
                  pl.BlockSpec((1, 3, 3), lambda b: (b, 0, 0)),
                  pl.BlockSpec((1, 3, 1), lambda b: (b, 0, 0)),
                  pl.BlockSpec((1, 3, 1), lambda b: (b, 0, 0))],
        out_specs=(pl.BlockSpec((1, 1, 1), lambda b: (b, 0, 0)),
                   pl.BlockSpec((1, 1, 1), lambda b: (b, 0, 0))),
        scratch_shapes=[pltpu.VMEM((8, Np), jnp.float32)],
        compiler_params=pltpu.CompilerParams(
            dimension_semantics=("parallel",),
            vmem_limit_bytes=_dcd_vmem_limit_bytes(Np, Ng)),
    )(ga, pT, Rk, tT, sT)
    return l1[:, 0, 0], l2[:, 0, 0]


# --------------------------------------------------------- prop_sym reconstruction kernel
def _prop_sym_kernel(pcT_ref, pcreT_ref, mk_ref, tsub_ref, tadd_ref, scale_ref, out_ref):
    pc = pcT_ref[0]          # (3, N)  GT point cloud (lane-dense)
    pcre = pcreT_ref[0]      # (3, N)  predicted reconstruction (lane-dense)
    Mk = mk_ref[0]           # (3, 3)  = M^T  (per-batch combined reflection map)
    tsub = tsub_ref[0]       # (3, 1)
    tadd = tadd_ref[0]       # (3, 1)
    sc = scale_ref[0]        # (1, 1)  0 or 1 (fully-symmetric "zero" branch)

    x = pc - tsub
    target = (Mk[:, 0:1] * x[0:1, :]
              + Mk[:, 1:2] * x[1:2, :]
              + Mk[:, 2:3] * x[2:3, :]) + tadd
    out_ref[0] = jnp.sum(jnp.abs(target - pcre * sc), axis=1, keepdims=True)   # (3, 1)


def prop_sym_loss_pallas(PC, PC_re, gt_R, gt_t, sym):
    B, N, _ = PC.shape
    sym0 = sym[:, 0]
    sym_rest = jnp.sum(sym[:, 1:], axis=-1)
    flag_y = (sym0 == 1) & (sym_rest > 0)
    flag_yx = (sym0 == 0) & (sym[:, 1] == 1)
    flag_no = (sym0 == 0) & (sym[:, 1] != 1)
    flag_zero = (sym0 == 1) & (sym_rest == 0)

    R = gt_R.astype(jnp.float32)
    d_y = jnp.array([-1.0, 1.0, -1.0], jnp.float32)     # y-axis reflection (cano frame)
    d_yx = jnp.array([1.0, 1.0, -1.0], jnp.float32)     # yx reflection (cano frame)
    # combined camera-frame map:  (pc - t) @ (R diag(d) R^T) + t
    A_y = jnp.einsum("bij,j,bkj->bik", R, d_y, R)
    A_yx = jnp.einsum("bij,j,bkj->bik", R, d_yx, R)
    eye = jnp.broadcast_to(jnp.eye(3, dtype=jnp.float32), (B, 3, 3))
    zero = jnp.zeros((B, 3, 3), jnp.float32)

    fy = flag_y[:, None, None]
    fyx = flag_yx[:, None, None]
    fno = flag_no[:, None, None]
    M = jnp.where(fy, A_y, jnp.where(fyx, A_yx, jnp.where(fno, eye, zero)))

    t = gt_t.astype(jnp.float32)[:, None, :]                              # (B, 1, 3)
    use_t = (flag_y | flag_yx)[:, None, None]
    t_sub = jnp.where(use_t, t, 0.0)
    scale = jnp.where(flag_zero, 0.0, 1.0).astype(jnp.float32)[:, None, None]  # (B,1,1)

    Mk = jnp.transpose(M, (0, 2, 1))                        # kernel applies M^T in cols
    tsubT = jnp.transpose(t_sub, (0, 2, 1))                 # (B, 3, 1)
    taddT = tsubT
    pcT = jnp.transpose(PC.astype(jnp.float32), (0, 2, 1))      # (B, 3, N) lane-dense
    pcreT = jnp.transpose(PC_re.astype(jnp.float32), (0, 2, 1))

    partial = pl.pallas_call(
        _prop_sym_kernel,
        out_shape=jax.ShapeDtypeStruct((B, 3, 1), jnp.float32),
        grid=(B,),
        in_specs=[pl.BlockSpec((1, 3, N), lambda b: (b, 0, 0)),
                  pl.BlockSpec((1, 3, N), lambda b: (b, 0, 0)),
                  pl.BlockSpec((1, 3, 3), lambda b: (b, 0, 0)),
                  pl.BlockSpec((1, 3, 1), lambda b: (b, 0, 0)),
                  pl.BlockSpec((1, 3, 1), lambda b: (b, 0, 0)),
                  pl.BlockSpec((1, 1, 1), lambda b: (b, 0, 0))],
        out_specs=pl.BlockSpec((1, 3, 1), lambda b: (b, 0, 0)),
        compiler_params=pltpu.CompilerParams(dimension_semantics=("parallel",)),
    )(pcT, pcreT, Mk, tsubT, taddT, scale)
    # nn.L1Loss() -> mean over all elements of (B, N, 3)
    return jnp.sum(partial) / (B * N * 3)


# --------------------------------------------------------------------- JAX glue (math)
def _l1(a, b):
    return jnp.mean(jnp.abs(a - b))


def _normalize(v, eps=1e-12):
    n = jnp.linalg.norm(v, axis=-1, keepdims=True)
    return v / jnp.maximum(n, eps)


def has_nan_or_inf(x):
    return jnp.any(jnp.isnan(x)) | jnp.any(jnp.isinf(x))


def get_rot_mat_y_first(y, x):
    y = _normalize(y)
    z = jnp.cross(x, y)
    z = _normalize(z)
    x = jnp.cross(y, z)
    return jnp.stack((x, y, z), axis=-1)


def to_rot_matrix_in_batch(rot_x, s, c):
    rx0, rx1, rx2 = rot_x[:, 0:1], rot_x[:, 1:2], rot_x[:, 2:3]
    r1 = jnp.concatenate([rx0 * rx0 * (1 - c) + c,
                          rx0 * rx1 * (1 - c) - rx2 * s,
                          rx0 * rx2 * (1 - c) + rx1 * s], axis=-1)[:, None, :]
    r2 = jnp.concatenate([rx1 * rx0 * (1 - c) + rx2 * s,
                          rx1 * rx1 * (1 - c) + c,
                          rx1 * rx2 * (1 - c) - rx0 * s], axis=-1)[:, None, :]
    r3 = jnp.concatenate([rx0 * rx2 * (1 - c) - rx1 * s,
                          rx2 * rx1 * (1 - c) + rx0 * s,
                          rx2 * rx2 * (1 - c) + c], axis=-1)[:, None, :]
    return jnp.concatenate([r1, r2, r3], axis=-2)


def get_vertical_rot_vec_in_batch(c1, c2, y, z):
    c1 = c1[:, None]
    c2 = c2[:, None]
    rot_x = jnp.cross(y, z)
    rot_x = rot_x / (jnp.linalg.norm(rot_x, axis=-1, keepdims=True) + 1e-8)
    y_z_cos = jnp.sum(y * z, axis=-1, keepdims=True)
    y_z_cos = jnp.clip(y_z_cos, -1 + 1e-6, 1 - 1e-6)
    y_z_theta = jnp.arccos(y_z_cos)
    theta_2 = c1 / (c1 + c2) * (y_z_theta - math.pi / 2)
    theta_1 = c2 / (c1 + c2) * (y_z_theta - math.pi / 2)
    c = jnp.cos(theta_1)
    s = jnp.sin(theta_1)
    rotmat_y = to_rot_matrix_in_batch(rot_x, s, c)
    new_y = jnp.matmul(rotmat_y, y[..., None])[..., 0]
    c = jnp.cos(-theta_2)
    s = jnp.sin(-theta_2)
    rotmat_z = to_rot_matrix_in_batch(rot_x, s, c)
    new_z = jnp.matmul(rotmat_z, z[..., None])[..., 0]
    return new_y, new_z


# ------------------------------------------------------------------------- loss module
class TDALossJAX:
    """JAX/Pallas re-implementation of TDA_loss (fsnet_loss_type == 'l1')."""

    def __init__(self):
        assert FLAGS.fsnet_loss_type == "l1"

    # -------- forward (mirrors torch forward) --------
    def forward(self, name_list, pred_list, gt_list, sym, gt_pred_flag=False):
        loss_list = {}
        if "Rot1" in name_list:
            loss_list["Rot1"] = FLAGS.rot_1_w * _l1(pred_list["Rot1"], gt_list["Rot1"])
        if "Rot1_cos" in name_list:
            loss_list["Rot1_cos"] = FLAGS.rot_1_w * self.cal_cosine_dis(
                pred_list["Rot1"], gt_list["Rot1"])
        if "Rot2" in name_list:
            loss_list["Rot2"] = FLAGS.rot_2_w * self.cal_loss_Rot2(
                pred_list["Rot2"], gt_list["Rot2"], sym)
        if "Rot2_cos" in name_list:
            loss_list["Rot2_cos"] = FLAGS.rot_2_w * self.cal_cosine_dis_sym(
                pred_list["Rot2"], gt_list["Rot2"], sym)
        if "Rot_regular" in name_list:
            loss_list["Rot_r_a"] = FLAGS.rot_regular * self.cal_rot_regular_angle(
                pred_list["Rot1"], pred_list["Rot2"], sym)
        if "Prop_sym" in name_list and FLAGS.prop_sym_w > 0:
            prop_sym_recon = prop_sym_loss_pallas(
                gt_list["Recon"], pred_list["Recon"], gt_list["R"], gt_list["Tran"], sym)
            loss_list["Prop_sym"] = FLAGS.prop_sym_w * prop_sym_recon
        if "recon_completion" in name_list and FLAGS.recon_w > 0:
            rc = self.recon_completion_loss(gt_list["Recon"], pred_list["Recon"])
            loss_list["recon_completion"] = FLAGS.recon_w * rc
        if "Tran" in name_list:
            loss_list["Tran"] = FLAGS.tran_w * _l1(pred_list["Tran"], gt_list["Tran"])
        if "Size" in name_list:
            loss_list["Size"] = FLAGS.size_w * _l1(pred_list["Size"], gt_list["Size"])
        if "R_con" in name_list:
            loss_list["R_con"] = FLAGS.r_con_w * self.cal_loss_R_con(
                pred_list["Rot1"], pred_list["Rot2"], gt_list["Rot1"], gt_list["Rot2"],
                pred_list["Rot1_f"], pred_list["Rot2_f"], sym)
        if "TDA_h1_cate" in name_list:
            loss_list["TDA_h1_cate"] = self.ph_loss_fn_cate(
                pred_list["TDA_h1"], gt_list["pdh1_category"], gt_list["h1"])
        if "TDA_h1" in name_list:
            loss_list["TDA_h1"] = FLAGS.h1_w * self.ph_loss_fn(
                pred_list["TDA_h1"], gt_list["h1"])
        if "TDA_h2_cate" in name_list:
            loss_list["TDA_h2_cate"] = self.ph_loss_fn_cate(
                pred_list["TDA_h2"], gt_list["pdh2_category"], gt_list["h2"])
        if "TDA_h2" in name_list:
            loss_list["TDA_h2"] = FLAGS.h2_w * self.ph_loss_fn(
                pred_list["TDA_h2"], gt_list["h2"])
        if "R_DCD_cate_pred" in name_list:
            loss_list["R_DCD_cate_pred"] = FLAGS.DCD_align * self.R_DCD(
                gt_list["points_category"], pred_list["Recon"], gt_list["R"],
                pred_list["Rot1"], pred_list["Rot1_f"], pred_list["Rot2"],
                pred_list["Rot2_f"], pred_list["Tran"], pred_list["Size"], sym)
        return loss_list

    # -------- simple losses --------
    def cal_cosine_dis(self, pred_v, gt_v):
        return jnp.mean((1.0 - jnp.sum(pred_v * gt_v, axis=1)) * 2.0)

    def cal_loss_Rot2(self, pred_v, gt_v, sym):
        per = jnp.mean(jnp.abs(pred_v - gt_v), axis=-1)
        mask = (sym[:, 0] != 1).astype(jnp.float32)
        res = jnp.sum(per * mask)
        valid = jnp.sum(mask)
        return jnp.where(valid > 0, res / jnp.maximum(valid, 1.0), res)

    def cal_cosine_dis_sym(self, pred_v, gt_v, sym):
        per = (1.0 - jnp.sum(pred_v * gt_v, axis=-1)) * 2.0
        mask = (sym[:, 0] != 1).astype(jnp.float32)
        res = jnp.sum(per * mask)
        valid = jnp.sum(mask)
        return jnp.where(valid > 0, res / jnp.maximum(valid, 1.0), res)

    def cal_rot_regular_angle(self, pred_v1, pred_v2, sym):
        residual = jnp.sum(pred_v1 * pred_v2, axis=-1)
        mask = (sym[:, 0] != 1).astype(jnp.float32)
        res = jnp.sum(jnp.abs(residual) * mask)
        valid = jnp.sum(mask)
        return jnp.where(valid > 0, res / jnp.maximum(valid, 1.0), res)

    def cal_loss_R_con(self, p_rot_g, p_rot_r, g_rot_g, g_rot_r, p_g_con, p_r_con, sym):
        dis_g_norm = jnp.linalg.norm(p_rot_g - g_rot_g, axis=-1)
        p_g_con_gt = jnp.exp(-13.7 * dis_g_norm * dis_g_norm)
        res_g = jnp.mean(jnp.abs(p_g_con_gt - p_g_con))
        dis_r_norm = jnp.linalg.norm(p_rot_r - g_rot_r, axis=-1)
        p_r_con_gt = jnp.exp(-13.7 * dis_r_norm * dis_r_norm)
        mask = (sym[:, 0] == 0).astype(jnp.float32)
        bs = p_rot_g.shape[0]
        res_r = jnp.sum(jnp.abs(p_r_con_gt - p_r_con) * mask) / bs
        return res_g + res_r

    # -------- TDA (persistent homology) losses --------
    def ph_loss_fn(self, ph, gt_ph):
        w = (jnp.sum(gt_ph, axis=1, keepdims=True) > 0).astype(jnp.float32)
        bad = has_nan_or_inf(ph) | has_nan_or_inf(gt_ph)
        loss_good = jnp.mean(jnp.abs(ph - gt_ph) * w)
        loss_bad = jnp.mean(jnp.abs(ph - ph) * w)
        return jnp.where(bad, loss_bad, loss_good)

    def omega(self, gt_h1, cate_h1, k, lam):
        w = (jnp.sum(cate_h1, axis=1, keepdims=True) > 0).astype(jnp.float32)
        bad = has_nan_or_inf(gt_h1) | has_nan_or_inf(cate_h1)
        loss_good = jnp.mean(jnp.abs(gt_h1 - cate_h1) * w)
        loss_bad = jnp.mean(jnp.abs(gt_h1 - gt_h1) * w)
        loss = jnp.where(bad, loss_bad, loss_good)
        return k * jnp.exp(-lam * loss)

    def ph_loss_fn_cate(self, ph, gt_ph, cate_ph):
        loss = self.ph_loss_fn(ph, gt_ph)
        return loss * self.omega(gt_ph, cate_ph, 2, 1)

    # -------- DCD based losses (fully fused in the Pallas kernel) --------
    def _dcd_losses(self, pred_recon, cate_gt, R, t, s, alpha, n_lambda, non_reg=False):
        B, n_pred, _ = pred_recon.shape
        _, n_gt, _ = cate_gt.shape
        if non_reg:
            frac_12 = max(1.0, n_pred / n_gt)
            frac_21 = max(1.0, n_gt / n_pred)
        else:
            frac_12 = n_pred / n_gt
            frac_21 = n_gt / n_pred
        return dcd_pallas(pred_recon, cate_gt, R, t, s, alpha, n_lambda, frac_12, frac_21)

    def recon_completion_loss(self, pcl_in, recon):
        B = pcl_in.shape[0]
        eyeR = jnp.broadcast_to(jnp.eye(3, dtype=jnp.float32), (B, 3, 3))
        zt = jnp.zeros((B, 1, 3), jnp.float32)
        ones = jnp.ones((B, 1, 3), jnp.float32)
        loss1, loss2 = self._dcd_losses(pcl_in, recon, eyeR, zt, ones,
                                        alpha=70.0, n_lambda=0.3)
        return 0.9 * jnp.mean(loss1) + 0.1 * jnp.mean(loss2)

    def R_DCD(self, cate_ori, points, g_R, p_g_vec, f_g_vec, p_r_vec, f_r_vec,
              p_t, p_s, sym):
        near_zeros = jnp.full(f_g_vec.shape, 1e-5, dtype=jnp.float32)
        new_y_sym, new_x_sym = get_vertical_rot_vec_in_batch(
            f_g_vec, near_zeros, p_g_vec, g_R[..., 0])
        new_y, new_x = get_vertical_rot_vec_in_batch(f_g_vec, f_r_vec, p_g_vec, p_r_vec)
        sym_flag = (sym[:, 0:1] == 1)
        new_y = jnp.where(sym_flag, new_y_sym, new_y)
        new_x = jnp.where(sym_flag, new_x_sym, new_x)
        p_R = get_rot_mat_y_first(new_y, new_x)
        # rigid transform ((points - p_t) @ p_R) * p_s is fused inside the DCD kernel
        loss1, loss2 = self._dcd_losses(points, cate_ori, p_R,
                                        p_t[:, None, :], p_s[:, None, :],
                                        alpha=70.0, n_lambda=0.3)
        return jnp.mean(loss1 + 0.5 * loss2)


# --------------------------------------------------------------------------------- main
if __name__ == "__main__":
    key = jax.random.PRNGKey(0)
    B, N, Ng, Dh = 2, 128, 256, 32
    ks = jax.random.split(key, 20)

    def unit(v):
        return v / jnp.linalg.norm(v, axis=-1, keepdims=True)

    # deterministic "gt" rotation matrices via Gram-Schmidt
    a = jax.random.normal(ks[9], (B, 3))
    b = jax.random.normal(ks[10], (B, 3))
    gy = unit(a)
    gz = unit(jnp.cross(b, gy))
    gx = jnp.cross(gy, gz)
    gt_R = jnp.stack([gx, gy, gz], axis=-1)          # columns x, y, z

    pred_list = {
        "Rot1": unit(jax.random.normal(ks[0], (B, 3))),
        "Rot2": unit(jax.random.normal(ks[1], (B, 3))),
        "Tran": jax.random.normal(ks[2], (B, 3)) * 0.1,
        "Size": jnp.abs(jax.random.normal(ks[3], (B, 3))) + 0.5,
        "Recon": jax.random.normal(ks[4], (B, N, 3)),
        "Rot1_f": jax.nn.sigmoid(jax.random.normal(ks[5], (B,))),
        "Rot2_f": jax.nn.sigmoid(jax.random.normal(ks[6], (B,))),
        "TDA_h1": jax.random.normal(ks[7], (B, Dh)),
        "TDA_h2": jax.random.normal(ks[8], (B, Dh)),
    }
    gt_list = {
        "Rot1": gy,
        "Rot2": gx,
        "Tran": jax.random.normal(ks[11], (B, 3)) * 0.1,
        "Size": jnp.abs(jax.random.normal(ks[12], (B, 3))) + 0.5,
        "Recon": jax.random.normal(ks[13], (B, N, 3)),
        "R": gt_R,
        "h1": jnp.abs(jax.random.normal(ks[14], (B, Dh))),
        "h2": jnp.abs(jax.random.normal(ks[15], (B, Dh))),
        "pdh1_category": jnp.abs(jax.random.normal(ks[16], (B, Dh))),
        "pdh2_category": jnp.abs(jax.random.normal(ks[17], (B, Dh))),
        "points_category": jax.random.normal(ks[18], (B, Ng, 3)),
    }
    # sym[:,0]==1 -> y-symmetric object; second row hits the yx-reflection branch
    sym = jnp.array([[1, 1, 1, 0],
                     [0, 1, 0, 0]], dtype=jnp.float32)

    name_list = ["Rot1", "Rot1_cos", "Rot2", "Rot2_cos", "Rot_regular",
                 "Prop_sym", "recon_completion", "Tran", "Size", "R_con",
                 "TDA_h1_cate", "TDA_h1", "TDA_h2_cate", "TDA_h2",
                 "R_DCD_cate_pred"]

    loss_mod = TDALossJAX()
    fwd = jax.jit(lambda p, g, s: loss_mod.forward(name_list, p, g, s))

    out = fwd(pred_list, gt_list, sym)
    out = jax.block_until_ready(out)
    # force host materialization of every loss term
    _ = {k: float(v) for k, v in out.items()}
    print("KERNEL_OK")
</pallas_src>

<mosaic_0001>
module attributes {stable_mosaic.version = 11 : i64} {
  func.func @_dcd_kernel(%arg0: i32, %arg1: memref<1x256x8xf32, #tpu.memory_space<vmem>>, %arg2: memref<1x3x128xf32, #tpu.memory_space<vmem>>, %arg3: memref<1x3x3xf32, #tpu.memory_space<vmem>>, %arg4: memref<1x3x1xf32, #tpu.memory_space<vmem>>, %arg5: memref<1x3x1xf32, #tpu.memory_space<vmem>>, %arg6: memref<1x1x1xf32, #tpu.memory_space<vmem>>, %arg7: memref<1x1x1xf32, #tpu.memory_space<vmem>>, %arg8: memref<8x128xf32, #tpu.memory_space<vmem>>) attributes {dimension_semantics = [#tpu.dimension_semantics<parallel>], iteration_bounds = array<i64: 2>, scalar_prefetch = 0 : i64, scratch_operands = 1 : i64, tpu.core_type = #tpu.core_type<tc>, window_params = [{transform_indices = @transform_0, window_bounds = array<i64: 1, 256, 8>}, {transform_indices = @transform_1, window_bounds = array<i64: 1, 3, 128>}, {transform_indices = @transform_2, window_bounds = array<i64: 1, 3, 3>}, {transform_indices = @transform_3, window_bounds = array<i64: 1, 3, 1>}, {transform_indices = @transform_4, window_bounds = array<i64: 1, 3, 1>}, {transform_indices = @transform_5, window_bounds = array<i64: 1, 1, 1>}, {transform_indices = @transform_6, window_bounds = array<i64: 1, 1, 1>}]} {
    %c0 = arith.constant 0 : index
    %c0_0 = arith.constant 0 : index
    %c0_1 = arith.constant 0 : index
    %0 = vector.load %arg1[%c0, %c0_0, %c0_1] : memref<1x256x8xf32, #tpu.memory_space<vmem>>, vector<1x256x8xf32>
    %1 = vector.shape_cast %0 : vector<1x256x8xf32> to vector<256x8xf32>
    %c0_2 = arith.constant 0 : index
    %c0_3 = arith.constant 0 : index
    %c0_4 = arith.constant 0 : index
    %2 = vector.load %arg2[%c0_2, %c0_3, %c0_4] : memref<1x3x128xf32, #tpu.memory_space<vmem>>, vector<1x3x128xf32>
    %3 = vector.shape_cast %2 : vector<1x3x128xf32> to vector<3x128xf32>
    %c0_5 = arith.constant 0 : index
    %c0_6 = arith.constant 0 : index
    %c0_7 = arith.constant 0 : index
    %4 = vector.load %arg3[%c0_5, %c0_6, %c0_7] : memref<1x3x3xf32, #tpu.memory_space<vmem>>, vector<1x3x3xf32>
    %5 = vector.shape_cast %4 : vector<1x3x3xf32> to vector<3x3xf32>
    %c0_8 = arith.constant 0 : index
    %c0_9 = arith.constant 0 : index
    %c0_10 = arith.constant 0 : index
    %6 = vector.load %arg4[%c0_8, %c0_9, %c0_10] : memref<1x3x1xf32, #tpu.memory_space<vmem>>, vector<1x3x1xf32>
    %7 = vector.shape_cast %6 : vector<1x3x1xf32> to vector<3x1xf32>
    %c0_11 = arith.constant 0 : index
    %c0_12 = arith.constant 0 : index
    %c0_13 = arith.constant 0 : index
    %8 = vector.load %arg5[%c0_11, %c0_12, %c0_13] : memref<1x3x1xf32, #tpu.memory_space<vmem>>, vector<1x3x1xf32>
    %9 = vector.shape_cast %8 : vector<1x3x1xf32> to vector<3x1xf32>
    %10 = vector.broadcast %7 : vector<3x1xf32> to vector<3x128xf32>
    %11 = arith.subf %3, %10 : vector<3x128xf32>
    %12 = vector.extract_strided_slice %5 {offsets = [0, 0], sizes = [3, 1], strides = [1, 1]} : vector<3x3xf32> to vector<3x1xf32>
    %13 = vector.extract_strided_slice %11 {offsets = [0, 0], sizes = [1, 128], strides = [1, 1]} : vector<3x128xf32> to vector<1x128xf32>
    %14 = vector.broadcast %12 : vector<3x1xf32> to vector<3x128xf32>
    %15 = vector.broadcast %13 : vector<1x128xf32> to vector<3x128xf32>
    %16 = arith.mulf %14, %15 : vector<3x128xf32>
    %17 = vector.extract_strided_slice %5 {offsets = [0, 1], sizes = [3, 1], strides = [1, 1]} : vector<3x3xf32> to vector<3x1xf32>
    %18 = vector.extract_strided_slice %11 {offsets = [1, 0], sizes = [1, 128], strides = [1, 1]} : vector<3x128xf32> to vector<1x128xf32>
    %19 = vector.broadcast %17 : vector<3x1xf32> to vector<3x128xf32>
    %20 = vector.broadcast %18 : vector<1x128xf32> to vector<3x128xf32>
    %21 = arith.mulf %19, %20 : vector<3x128xf32>
    %22 = arith.addf %16, %21 : vector<3x128xf32>
    %23 = vector.extract_strided_slice %5 {offsets = [0, 2], sizes = [3, 1], strides = [1, 1]} : vector<3x3xf32> to vector<3x1xf32>
    %24 = vector.extract_strided_slice %11 {offsets = [2, 0], sizes = [1, 128], strides = [1, 1]} : vector<3x128xf32> to vector<1x128xf32>
    %25 = vector.broadcast %23 : vector<3x1xf32> to vector<3x128xf32>
    %26 = vector.broadcast %24 : vector<1x128xf32> to vector<3x128xf32>
    %27 = arith.mulf %25, %26 : vector<3x128xf32>
    %28 = arith.addf %22, %27 : vector<3x128xf32>
    %29 = vector.broadcast %9 : vector<3x1xf32> to vector<3x128xf32>
    %30 = arith.mulf %28, %29 : vector<3x128xf32>
    %31 = arith.mulf %30, %30 : vector<3x128xf32>
    %cst = arith.constant dense<0.000000e+00> : vector<128xf32>
    %32 = vector.multi_reduction <add>, %31, %cst [0] : vector<3x128xf32> to vector<128xf32>
    %33 = vector.shape_cast %32 : vector<128xf32> to vector<1x128xf32>
    %c0_14 = arith.constant 0 : index
    %c0_15 = arith.constant 0 : index
    %34 = vector.load %arg8[%c0_14, %c0_15] : memref<8x128xf32, #tpu.memory_space<vmem>>, vector<3x128xf32>
    tpu.vector_store %arg8[%c0_14, %c0_15], %30 {strides = array<i32>} : memref<8x128xf32, #tpu.memory_space<vmem>>, vector<3x128xf32>,
    %cst_16 = arith.constant 1.000000e+00 : f32
    %35 = vector.broadcast %cst_16 : f32 to vector<1x128xf32>
    %c3 = arith.constant 3 : index
    %c0_17 = arith.constant 0 : index
    %36 = vector.load %arg8[%c3, %c0_17] : memref<8x128xf32, #tpu.memory_space<vmem>>, vector<1x128xf32>
    tpu.vector_store %arg8[%c3, %c0_17], %35 {strides = array<i32>} : memref<8x128xf32, #tpu.memory_space<vmem>>, vector<1x128xf32>,
    %c4 = arith.constant 4 : index
    %c0_18 = arith.constant 0 : index
    %37 = vector.load %arg8[%c4, %c0_18] : memref<8x128xf32, #tpu.memory_space<vmem>>, vector<1x128xf32>
    tpu.vector_store %arg8[%c4, %c0_18], %33 {strides = array<i32>} : memref<8x128xf32, #tpu.memory_space<vmem>>, vector<1x128xf32>,
    %cst_19 = arith.constant 0.000000e+00 : f32
    %38 = vector.broadcast %cst_19 : f32 to vector<3x128xf32>
    %c5 = arith.constant 5 : index
    %c0_20 = arith.constant 0 : index
    %39 = vector.load %arg8[%c5, %c0_20] : memref<8x128xf32, #tpu.memory_space<vmem>>, vector<3x128xf32>
    tpu.vector_store %arg8[%c5, %c0_20], %38 {strides = array<i32>} : memref<8x128xf32, #tpu.memory_space<vmem>>, vector<3x128xf32>,
    %c0_21 = arith.constant 0 : index
    %c0_22 = arith.constant 0 : index
    %40 = vector.load %arg8[%c0_21, %c0_22] : memref<8x128xf32, #tpu.memory_space<vmem>>, vector<8x128xf32>
    %cst_23 = arith.constant dense<0.000000e+00> : vector<256x128xf32>
    %41 = tpu.matmul %1, %40, %cst_23 {dimension_numbers = #tpu.dot_dimension_numbers<[1], [0], [0], [1], [0, 0, 1, 1], [], []>} : vector<256x8xf32>, vector<8x128xf32>, vector<256x128xf32> -> vector<256x128xf32>
    %cst_24 = arith.constant 0.000000e+00 : f32
    %42 = vector.broadcast %cst_24 : f32 to vector<256x128xf32>
    %43 = arith.maximumf %41, %42 : vector<256x128xf32>
    %44 = tpu.iota {dimensions = array<i32: 0>} : vector<256x1xi32>
    %45 = tpu.iota {dimensions = array<i32: 1>} : vector<1x128xi32>
    %cst_25 = arith.constant dense<0x7F800000> : vector<128xf32>
    %46 = vector.multi_reduction <minimumf>, %43, %cst_25 [0] : vector<256x128xf32> to vector<128xf32>
    %47 = vector.shape_cast %46 : vector<128xf32> to vector<1x128xf32>
    %48 = vector.broadcast %47 : vector<1x128xf32> to vector<256x128xf32>
    %49 = arith.cmpf ole, %43, %48 : vector<256x128xf32>
    %c256_i32 = arith.constant 256 : i32
    %50 = vector.shape_cast %44 : vector<256x1xi32> to vector<256x1xi32>
    %51 = vector.broadcast %50 : vector<256x1xi32> to vector<256x128xi32>
    %52 = vector.broadcast %c256_i32 : i32 to vector<256x128xi32>
    %53 = arith.select %49, %51, %52 : vector<256x128xi1>, vector<256x128xi32>
    %cst_26 = arith.constant dense<2147483647> : vector<128xi32>
    %54 = vector.multi_reduction <minsi>, %53, %cst_26 [0] : vector<256x128xi32> to vector<128xi32>
    %55 = vector.shape_cast %54 : vector<128xi32> to vector<1x128xi32>
    %56 = vector.broadcast %44 : vector<256x1xi32> to vector<256x128xi32>
    %57 = vector.broadcast %55 : vector<1x128xi32> to vector<256x128xi32>
    %58 = arith.cmpi eq, %56, %57 : vector<256x128xi32>
    %59 = arith.extui %58 : vector<256x128xi1> to vector<256x128xi32>
    %60 = arith.sitofp %59 : vector<256x128xi32> to vector<256x128xf32>
    %cst_27 = arith.constant -7.000000e+01 : f32
    %61 = vector.broadcast %cst_27 : f32 to vector<1x128xf32>
    %62 = arith.mulf %61, %47 : vector<1x128xf32>
    %63 = math.exp %62 : vector<1x128xf32>
    %cst_28 = arith.constant 1.000000e+00 : f32
    %64 = vector.broadcast %cst_28 : f32 to vector<1x128xf32>
    %cst_29 = arith.constant dense<0.000000e+00> : vector<256x1xf32>
    %65 = tpu.matmul %60, %64, %cst_29 {dimension_numbers = #tpu.dot_dimension_numbers<[1], [1], [0], [0], [0, 0, 1, 0], [], []>} : vector<256x128xf32>, vector<1x128xf32>, vector<256x1xf32> -> vector<256x1xf32>
    %cst_30 = arith.constant dense<0.000000e+00> : vector<256x1xf32>
    %66 = tpu.matmul %60, %63, %cst_30 {dimension_numbers = #tpu.dot_dimension_numbers<[1], [1], [0], [0], [0, 0, 1, 0], [], []>} : vector<256x128xf32>, vector<1x128xf32>, vector<256x1xf32> -> vector<256x1xf32>
    %cst_31 = arith.constant 1.000000e+00 : f32
    %67 = vector.broadcast %cst_31 : f32 to vector<256x1xf32>
    %68 = arith.maximumf %65, %67 : vector<256x1xf32>
    %69 = math.log %68 : vector<256x1xf32>
    %cst_32 = arith.constant 3.000000e-01 : f32
    %70 = vector.broadcast %cst_32 : f32 to vector<256x1xf32>
    %71 = arith.mulf %70, %69 : vector<256x1xf32>
    %72 = math.exp %71 : vector<256x1xf32>
    %cst_33 = arith.constant 9.99999997E-7 : f32
    %73 = vector.broadcast %cst_33 : f32 to vector<256x1xf32>
    %74 = arith.addf %72, %73 : vector<256x1xf32>
    %75 = tpu.reciprocal %74 {approx = true} : vector<256x1xf32> -> vector<256x1xf32>
    %cst_34 = arith.constant 2.000000e+00 : f32
    %76 = vector.broadcast %cst_34 : f32 to vector<256x1xf32>
    %77 = arith.mulf %76, %75 : vector<256x1xf32>
    %78 = arith.mulf %66, %77 : vector<256x1xf32>
    %cst_35 = arith.constant dense<0.000000e+00> : vector<1xf32>
    %79 = vector.multi_reduction <add>, %78, %cst_35 [0] : vector<256x1xf32> to vector<1xf32>
    %80 = vector.shape_cast %79 : vector<1xf32> to vector<1x1xf32>
    %cst_36 = arith.constant 7.812500e-03 : f32
    %81 = vector.broadcast %cst_36 : f32 to vector<1x1xf32>
    %82 = arith.mulf %80, %81 : vector<1x1xf32>
    %cst_37 = arith.constant 1.000000e+00 : f32
    %83 = vector.broadcast %cst_37 : f32 to vector<1x1xf32>
    %84 = arith.subf %83, %82 : vector<1x1xf32>
    %c0_38 = arith.constant 0 : index
    %c0_39 = arith.constant 0 : index
    %c0_40 = arith.constant 0 : index
    %85 = vector.load %arg6[%c0_38, %c0_39, %c0_40] : memref<1x1x1xf32, #tpu.memory_space<vmem>>, vector<1x1x1xf32>
    %86 = vector.shape_cast %85 : vector<1x1x1xf32> to vector<1x1xf32>
    %87 = vector.shape_cast %84 : vector<1x1xf32> to vector<1x1x1xf32>
    tpu.vector_store %arg6[%c0_38, %c0_39, %c0_40], %87 {strides = array<i32>} : memref<1x1x1xf32, #tpu.memory_space<vmem>>, vector<1x1x1xf32>,
    %cst_41 = arith.constant dense<0x7F800000> : vector<256xf32>
    %88 = vector.multi_reduction <minimumf>, %43, %cst_41 [1] : vector<256x128xf32> to vector<256xf32>
    %89 = vector.shape_cast %88 : vector<256xf32> to vector<256x1xf32>
    %90 = vector.broadcast %89 : vector<256x1xf32> to vector<256x128xf32>
    %91 = arith.cmpf ole, %43, %90 : vector<256x128xf32>
    %c128_i32 = arith.constant 128 : i32
    %92 = vector.shape_cast %45 : vector<1x128xi32> to vector<1x128xi32>
    %93 = vector.broadcast %92 : vector<1x128xi32> to vector<256x128xi32>
    %94 = vector.broadcast %c128_i32 : i32 to vector<256x128xi32>
    %95 = arith.select %91, %93, %94 : vector<256x128xi1>, vector<256x128xi32>
    %cst_42 = arith.constant dense<2147483647> : vector<256xi32>
    %96 = vector.multi_reduction <minsi>, %95, %cst_42 [1] : vector<256x128xi32> to vector<256xi32>
    %97 = vector.shape_cast %96 : vector<256xi32> to vector<256x1xi32>
    %98 = vector.broadcast %45 : vector<1x128xi32> to vector<256x128xi32>
    %99 = vector.broadcast %97 : vector<256x1xi32> to vector<256x128xi32>
    %100 = arith.cmpi eq, %98, %99 : vector<256x128xi32>
    %101 = arith.extui %100 : vector<256x128xi1> to vector<256x128xi32>
    %102 = arith.sitofp %101 : vector<256x128xi32> to vector<256x128xf32>
    %cst_43 = arith.constant -7.000000e+01 : f32
    %103 = vector.broadcast %cst_43 : f32 to vector<256x1xf32>
    %104 = arith.mulf %103, %89 : vector<256x1xf32>
    %105 = math.exp %104 : vector<256x1xf32>
    %cst_44 = arith.constant 1.000000e+00 : f32
    %106 = vector.broadcast %cst_44 : f32 to vector<1x256xf32>
    %cst_45 = arith.constant dense<0.000000e+00> : vector<1x128xf32>
    %107 = tpu.matmul %106, %102, %cst_45 {dimension_numbers = #tpu.dot_dimension_numbers<[1], [0], [0], [1], [0, 0, 1, 1], [], []>} : vector<1x256xf32>, vector<256x128xf32>, vector<1x128xf32> -> vector<1x128xf32>
    %cst_46 = arith.constant dense<0.000000e+00> : vector<256x1xf32>
    %108 = tpu.matmul %102, %107, %cst_46 {dimension_numbers = #tpu.dot_dimension_numbers<[1], [1], [0], [0], [0, 0, 1, 0], [], []>} : vector<256x128xf32>, vector<1x128xf32>, vector<256x1xf32> -> vector<256x1xf32>
    %cst_47 = arith.constant 1.000000e+00 : f32
    %109 = vector.broadcast %cst_47 : f32 to vector<256x1xf32>
    %110 = arith.maximumf %108, %109 : vector<256x1xf32>
    %111 = math.log %110 : vector<256x1xf32>
    %cst_48 = arith.constant 3.000000e-01 : f32
    %112 = vector.broadcast %cst_48 : f32 to vector<256x1xf32>
    %113 = arith.mulf %112, %111 : vector<256x1xf32>
    %114 = math.exp %113 : vector<256x1xf32>
    %cst_49 = arith.constant 9.99999997E-7 : f32
    %115 = vector.broadcast %cst_49 : f32 to vector<256x1xf32>
    %116 = arith.addf %114, %115 : vector<256x1xf32>
    %117 = tpu.reciprocal %116 {approx = true} : vector<256x1xf32> -> vector<256x1xf32>
    %cst_50 = arith.constant 5.000000e-01 : f32
    %118 = vector.broadcast %cst_50 : f32 to vector<256x1xf32>
    %119 = arith.mulf %118, %117 : vector<256x1xf32>
    %120 = arith.mulf %105, %119 : vector<256x1xf32>
    %cst_51 = arith.constant dense<0.000000e+00> : vector<1xf32>
    %121 = vector.multi_reduction <add>, %120, %cst_51 [0] : vector<256x1xf32> to vector<1xf32>
    %122 = vector.shape_cast %121 : vector<1xf32> to vector<1x1xf32>
    %cst_52 = arith.constant 3.906250e-03 : f32
    %123 = vector.broadcast %cst_52 : f32 to vector<1x1xf32>
    %124 = arith.mulf %122, %123 : vector<1x1xf32>
    %cst_53 = arith.constant 1.000000e+00 : f32
    %125 = vector.broadcast %cst_53 : f32 to vector<1x1xf32>
    %126 = arith.subf %125, %124 : vector<1x1xf32>
    %c0_54 = arith.constant 0 : index
    %c0_55 = arith.constant 0 : index
    %c0_56 = arith.constant 0 : index
    %127 = vector.load %arg7[%c0_54, %c0_55, %c0_56] : memref<1x1x1xf32, #tpu.memory_space<vmem>>, vector<1x1x1xf32>
    %128 = vector.shape_cast %127 : vector<1x1x1xf32> to vector<1x1xf32>
    %129 = vector.shape_cast %126 : vector<1x1xf32> to vector<1x1x1xf32>
    tpu.vector_store %arg7[%c0_54, %c0_55, %c0_56], %129 {strides = array<i32>} : memref<1x1x1xf32, #tpu.memory_space<vmem>>, vector<1x1x1xf32>,
    return
  }
  func.func @transform_0(%arg0: i32) -> (i32, i32, i32) {
    %c0_i32 = arith.constant 0 : i32
    %c0_i32_0 = arith.constant 0 : i32
    %c0_i32_1 = arith.constant 0 : i32
    return %arg0, %c0_i32, %c0_i32_0 : i32, i32, i32
  }
  func.func @transform_1(%arg0: i32) -> (i32, i32, i32) {
    %c0_i32 = arith.constant 0 : i32
    %c0_i32_0 = arith.constant 0 : i32
    %c0_i32_1 = arith.constant 0 : i32
    return %arg0, %c0_i32, %c0_i32_0 : i32, i32, i32
  }
  func.func @transform_2(%arg0: i32) -> (i32, i32, i32) {
    %c0_i32 = arith.constant 0 : i32
    %c0_i32_0 = arith.constant 0 : i32
    %c0_i32_1 = arith.constant 0 : i32
    return %arg0, %c0_i32, %c0_i32_0 : i32, i32, i32
  }
  func.func @transform_3(%arg0: i32) -> (i32, i32, i32) {
    %c0_i32 = arith.constant 0 : i32
    %c0_i32_0 = arith.constant 0 : i32
    %c0_i32_1 = arith.constant 0 : i32
    return %arg0, %c0_i32, %c0_i32_0 : i32, i32, i32
  }
  func.func @transform_4(%arg0: i32) -> (i32, i32, i32) {
    %c0_i32 = arith.constant 0 : i32
    %c0_i32_0 = arith.constant 0 : i32
    %c0_i32_1 = arith.constant 0 : i32
    return %arg0, %c0_i32, %c0_i32_0 : i32, i32, i32
  }
  func.func @transform_5(%arg0: i32) -> (i32, i32, i32) {
    %c0_i32 = arith.constant 0 : i32
    %c0_i32_0 = arith.constant 0 : i32
    %c0_i32_1 = arith.constant 0 : i32
    return %arg0, %c0_i32, %c0_i32_0 : i32, i32, i32
  }
  func.func @transform_6(%arg0: i32) -> (i32, i32, i32) {
    %c0_i32 = arith.constant 0 : i32
    %c0_i32_0 = arith.constant 0 : i32
    %c0_i32_1 = arith.constant 0 : i32
    return %arg0, %c0_i32, %c0_i32_0 : i32, i32, i32
  }
}

module attributes {stable_mosaic.version = 11 : i64} {
  func.func @_prop_sym_kernel(%arg0: i32, %arg1: memref<1x3x128xf32, #tpu.memory_space<vmem>>, %arg2: memref<1x3x128xf32, #tpu.memory_space<vmem>>, %arg3: memref<1x3x3xf32, #tpu.memory_space<vmem>>, %arg4: memref<1x3x1xf32, #tpu.memory_space<vmem>>, %arg5: memref<1x3x1xf32, #tpu.memory_space<vmem>>, %arg6: memref<1x1x1xf32, #tpu.memory_space<vmem>>, %arg7: memref<1x3x1xf32, #tpu.memory_space<vmem>>) attributes {dimension_semantics = [#tpu.dimension_semantics<parallel>], iteration_bounds = array<i64: 2>, scalar_prefetch = 0 : i64, scratch_operands = 0 : i64, tpu.core_type = #tpu.core_type<tc>, window_params = [{transform_indices = @transform_0, window_bounds = array<i64: 1, 3, 128>}, {transform_indices = @transform_1, window_bounds = array<i64: 1, 3, 128>}, {transform_indices = @transform_2, window_bounds = array<i64: 1, 3, 3>}, {transform_indices = @transform_3, window_bounds = array<i64: 1, 3, 1>}, {transform_indices = @transform_4, window_bounds = array<i64: 1, 3, 1>}, {transform_indices = @transform_5, window_bounds = array<i64: 1, 1, 1>}, {transform_indices = @transform_6, window_bounds = array<i64: 1, 3, 1>}]} {
    %c0 = arith.constant 0 : index
    %c0_0 = arith.constant 0 : index
    %c0_1 = arith.constant 0 : index
    %0 = vector.load %arg1[%c0, %c0_0, %c0_1] : memref<1x3x128xf32, #tpu.memory_space<vmem>>, vector<1x3x128xf32>
    %1 = vector.shape_cast %0 : vector<1x3x128xf32> to vector<3x128xf32>
    %c0_2 = arith.constant 0 : index
    %c0_3 = arith.constant 0 : index
    %c0_4 = arith.constant 0 : index
    %2 = vector.load %arg2[%c0_2, %c0_3, %c0_4] : memref<1x3x128xf32, #tpu.memory_space<vmem>>, vector<1x3x128xf32>
    %3 = vector.shape_cast %2 : vector<1x3x128xf32> to vector<3x128xf32>
    %c0_5 = arith.constant 0 : index
    %c0_6 = arith.constant 0 : index
    %c0_7 = arith.constant 0 : index
    %4 = vector.load %arg3[%c0_5, %c0_6, %c0_7] : memref<1x3x3xf32, #tpu.memory_space<vmem>>, vector<1x3x3xf32>
    %5 = vector.shape_cast %4 : vector<1x3x3xf32> to vector<3x3xf32>
    %c0_8 = arith.constant 0 : index
    %c0_9 = arith.constant 0 : index
    %c0_10 = arith.constant 0 : index
    %6 = vector.load %arg4[%c0_8, %c0_9, %c0_10] : memref<1x3x1xf32, #tpu.memory_space<vmem>>, vector<1x3x1xf32>
    %7 = vector.shape_cast %6 : vector<1x3x1xf32> to vector<3x1xf32>
    %c0_11 = arith.constant 0 : index
    %c0_12 = arith.constant 0 : index
    %c0_13 = arith.constant 0 : index
    %8 = vector.load %arg5[%c0_11, %c0_12, %c0_13] : memref<1x3x1xf32, #tpu.memory_space<vmem>>, vector<1x3x1xf32>
    %9 = vector.shape_cast %8 : vector<1x3x1xf32> to vector<3x1xf32>
    %c0_14 = arith.constant 0 : index
    %c0_15 = arith.constant 0 : index
    %c0_16 = arith.constant 0 : index
    %10 = vector.load %arg6[%c0_14, %c0_15, %c0_16] : memref<1x1x1xf32, #tpu.memory_space<vmem>>, vector<1x1x1xf32>
    %11 = vector.shape_cast %10 : vector<1x1x1xf32> to vector<1x1xf32>
    %12 = vector.broadcast %7 : vector<3x1xf32> to vector<3x128xf32>
    %13 = arith.subf %1, %12 : vector<3x128xf32>
    %14 = vector.extract_strided_slice %5 {offsets = [0, 0], sizes = [3, 1], strides = [1, 1]} : vector<3x3xf32> to vector<3x1xf32>
    %15 = vector.extract_strided_slice %13 {offsets = [0, 0], sizes = [1, 128], strides = [1, 1]} : vector<3x128xf32> to vector<1x128xf32>
    %16 = vector.broadcast %14 : vector<3x1xf32> to vector<3x128xf32>
    %17 = vector.broadcast %15 : vector<1x128xf32> to vector<3x128xf32>
    %18 = arith.mulf %16, %17 : vector<3x128xf32>
    %19 = vector.extract_strided_slice %5 {offsets = [0, 1], sizes = [3, 1], strides = [1, 1]} : vector<3x3xf32> to vector<3x1xf32>
    %20 = vector.extract_strided_slice %13 {offsets = [1, 0], sizes = [1, 128], strides = [1, 1]} : vector<3x128xf32> to vector<1x128xf32>
    %21 = vector.broadcast %19 : vector<3x1xf32> to vector<3x128xf32>
    %22 = vector.broadcast %20 : vector<1x128xf32> to vector<3x128xf32>
    %23 = arith.mulf %21, %22 : vector<3x128xf32>
    %24 = arith.addf %18, %23 : vector<3x128xf32>
    %25 = vector.extract_strided_slice %5 {offsets = [0, 2], sizes = [3, 1], strides = [1, 1]} : vector<3x3xf32> to vector<3x1xf32>
    %26 = vector.extract_strided_slice %13 {offsets = [2, 0], sizes = [1, 128], strides = [1, 1]} : vector<3x128xf32> to vector<1x128xf32>
    %27 = vector.broadcast %25 : vector<3x1xf32> to vector<3x128xf32>
    %28 = vector.broadcast %26 : vector<1x128xf32> to vector<3x128xf32>
    %29 = arith.mulf %27, %28 : vector<3x128xf32>
    %30 = arith.addf %24, %29 : vector<3x128xf32>
    %31 = vector.broadcast %9 : vector<3x1xf32> to vector<3x128xf32>
    %32 = arith.addf %30, %31 : vector<3x128xf32>
    %33 = vector.broadcast %11 : vector<1x1xf32> to vector<3x128xf32>
    %34 = arith.mulf %3, %33 : vector<3x128xf32>
    %35 = arith.subf %32, %34 : vector<3x128xf32>
    %36 = math.absf %35 : vector<3x128xf32>
    %cst = arith.constant dense<0.000000e+00> : vector<3xf32>
    %37 = vector.multi_reduction <add>, %36, %cst [1] : vector<3x128xf32> to vector<3xf32>
    %38 = vector.shape_cast %37 : vector<3xf32> to vector<3x1xf32>
    %c0_17 = arith.constant 0 : index
    %c0_18 = arith.constant 0 : index
    %c0_19 = arith.constant 0 : index
    %39 = vector.load %arg7[%c0_17, %c0_18, %c0_19] : memref<1x3x1xf32, #tpu.memory_space<vmem>>, vector<1x3x1xf32>
    %40 = vector.shape_cast %39 : vector<1x3x1xf32> to vector<3x1xf32>
    %41 = vector.shape_cast %38 : vector<3x1xf32> to vector<1x3x1xf32>
    tpu.vector_store %arg7[%c0_17, %c0_18, %c0_19], %41 {strides = array<i32>} : memref<1x3x1xf32, #tpu.memory_space<vmem>>, vector<1x3x1xf32>,
    return
  }
  func.func @transform_0(%arg0: i32) -> (i32, i32, i32) {
    %c0_i32 = arith.constant 0 : i32
    %c0_i32_0 = arith.constant 0 : i32
    %c0_i32_1 = arith.constant 0 : i32
    return %arg0, %c0_i32, %c0_i32_0 : i32, i32, i32
  }
  func.func @transform_1(%arg0: i32) -> (i32, i32, i32) {
    %c0_i32 = arith.constant 0 : i32
    %c0_i32_0 = arith.constant 0 : i32
    %c0_i32_1 = arith.constant 0 : i32
    return %arg0, %c0_i32, %c0_i32_0 : i32, i32, i32
  }
  func.func @transform_2(%arg0: i32) -> (i32, i32, i32) {
    %c0_i32 = arith.constant 0 : i32
    %c0_i32_0 = arith.constant 0 : i32
    %c0_i32_1 = arith.constant 0 : i32
    return %arg0, %c0_i32, %c0_i32_0 : i32, i32, i32
  }
  func.func @transform_3(%arg0: i32) -> (i32, i32, i32) {
    %c0_i32 = arith.constant 0 : i32
    %c0_i32_0 = arith.constant 0 : i32
    %c0_i32_1 = arith.constant 0 : i32
    return %arg0, %c0_i32, %c0_i32_0 : i32, i32, i32
  }
  func.func @transform_4(%arg0: i32) -> (i32, i32, i32) {
    %c0_i32 = arith.constant 0 : i32
    %c0_i32_0 = arith.constant 0 : i32
    %c0_i32_1 = arith.constant 0 : i32
    return %arg0, %c0_i32, %c0_i32_0 : i32, i32, i32
  }
  func.func @transform_5(%arg0: i32) -> (i32, i32, i32) {
    %c0_i32 = arith.constant 0 : i32
    %c0_i32_0 = arith.constant 0 : i32
    %c0_i32_1 = arith.constant 0 : i32
    return %arg0, %c0_i32, %c0_i32_0 : i32, i32, i32
  }
  func.func @transform_6(%arg0: i32) -> (i32, i32, i32) {
    %c0_i32 = arith.constant 0 : i32
    %c0_i32_0 = arith.constant 0 : i32
    %c0_i32_1 = arith.constant 0 : i32
    return %arg0, %c0_i32, %c0_i32_0 : i32, i32, i32
  }
}

module attributes {stable_mosaic.version = 11 : i64} {
  func.func @_dcd_kernel(%arg0: i32, %arg1: memref<1x128x8xf32, #tpu.memory_space<vmem>>, %arg2: memref<1x3x128xf32, #tpu.memory_space<vmem>>, %arg3: memref<1x3x3xf32, #tpu.memory_space<vmem>>, %arg4: memref<1x3x1xf32, #tpu.memory_space<vmem>>, %arg5: memref<1x3x1xf32, #tpu.memory_space<vmem>>, %arg6: memref<1x1x1xf32, #tpu.memory_space<vmem>>, %arg7: memref<1x1x1xf32, #tpu.memory_space<vmem>>, %arg8: memref<8x128xf32, #tpu.memory_space<vmem>>) attributes {dimension_semantics = [#tpu.dimension_semantics<parallel>], iteration_bounds = array<i64: 2>, scalar_prefetch = 0 : i64, scratch_operands = 1 : i64, tpu.core_type = #tpu.core_type<tc>, window_params = [{transform_indices = @transform_0, window_bounds = array<i64: 1, 128, 8>}, {transform_indices = @transform_1, window_bounds = array<i64: 1, 3, 128>}, {transform_indices = @transform_2, window_bounds = array<i64: 1, 3, 3>}, {transform_indices = @transform_3, window_bounds = array<i64: 1, 3, 1>}, {transform_indices = @transform_4, window_bounds = array<i64: 1, 3, 1>}, {transform_indices = @transform_5, window_bounds = array<i64: 1, 1, 1>}, {transform_indices = @transform_6, window_bounds = array<i64: 1, 1, 1>}]} {
    %c0 = arith.constant 0 : index
    %c0_0 = arith.constant 0 : index
    %c0_1 = arith.constant 0 : index
    %0 = vector.load %arg1[%c0, %c0_0, %c0_1] : memref<1x128x8xf32, #tpu.memory_space<vmem>>, vector<1x128x8xf32>
    %1 = vector.shape_cast %0 : vector<1x128x8xf32> to vector<128x8xf32>
    %c0_2 = arith.constant 0 : index
    %c0_3 = arith.constant 0 : index
    %c0_4 = arith.constant 0 : index
    %2 = vector.load %arg2[%c0_2, %c0_3, %c0_4] : memref<1x3x128xf32, #tpu.memory_space<vmem>>, vector<1x3x128xf32>
    %3 = vector.shape_cast %2 : vector<1x3x128xf32> to vector<3x128xf32>
    %c0_5 = arith.constant 0 : index
    %c0_6 = arith.constant 0 : index
    %c0_7 = arith.constant 0 : index
    %4 = vector.load %arg3[%c0_5, %c0_6, %c0_7] : memref<1x3x3xf32, #tpu.memory_space<vmem>>, vector<1x3x3xf32>
    %5 = vector.shape_cast %4 : vector<1x3x3xf32> to vector<3x3xf32>
    %c0_8 = arith.constant 0 : index
    %c0_9 = arith.constant 0 : index
    %c0_10 = arith.constant 0 : index
    %6 = vector.load %arg4[%c0_8, %c0_9, %c0_10] : memref<1x3x1xf32, #tpu.memory_space<vmem>>, vector<1x3x1xf32>
    %7 = vector.shape_cast %6 : vector<1x3x1xf32> to vector<3x1xf32>
    %c0_11 = arith.constant 0 : index
    %c0_12 = arith.constant 0 : index
    %c0_13 = arith.constant 0 : index
    %8 = vector.load %arg5[%c0_11, %c0_12, %c0_13] : memref<1x3x1xf32, #tpu.memory_space<vmem>>, vector<1x3x1xf32>
    %9 = vector.shape_cast %8 : vector<1x3x1xf32> to vector<3x1xf32>
    %10 = vector.broadcast %7 : vector<3x1xf32> to vector<3x128xf32>
    %11 = arith.subf %3, %10 : vector<3x128xf32>
    %12 = vector.extract_strided_slice %5 {offsets = [0, 0], sizes = [3, 1], strides = [1, 1]} : vector<3x3xf32> to vector<3x1xf32>
    %13 = vector.extract_strided_slice %11 {offsets = [0, 0], sizes = [1, 128], strides = [1, 1]} : vector<3x128xf32> to vector<1x128xf32>
    %14 = vector.broadcast %12 : vector<3x1xf32> to vector<3x128xf32>
    %15 = vector.broadcast %13 : vector<1x128xf32> to vector<3x128xf32>
    %16 = arith.mulf %14, %15 : vector<3x128xf32>
    %17 = vector.extract_strided_slice %5 {offsets = [0, 1], sizes = [3, 1], strides = [1, 1]} : vector<3x3xf32> to vector<3x1xf32>
    %18 = vector.extract_strided_slice %11 {offsets = [1, 0], sizes = [1, 128], strides = [1, 1]} : vector<3x128xf32> to vector<1x128xf32>
    %19 = vector.broadcast %17 : vector<3x1xf32> to vector<3x128xf32>
    %20 = vector.broadcast %18 : vector<1x128xf32> to vector<3x128xf32>
    %21 = arith.mulf %19, %20 : vector<3x128xf32>
    %22 = arith.addf %16, %21 : vector<3x128xf32>
    %23 = vector.extract_strided_slice %5 {offsets = [0, 2], sizes = [3, 1], strides = [1, 1]} : vector<3x3xf32> to vector<3x1xf32>
    %24 = vector.extract_strided_slice %11 {offsets = [2, 0], sizes = [1, 128], strides = [1, 1]} : vector<3x128xf32> to vector<1x128xf32>
    %25 = vector.broadcast %23 : vector<3x1xf32> to vector<3x128xf32>
    %26 = vector.broadcast %24 : vector<1x128xf32> to vector<3x128xf32>
    %27 = arith.mulf %25, %26 : vector<3x128xf32>
    %28 = arith.addf %22, %27 : vector<3x128xf32>
    %29 = vector.broadcast %9 : vector<3x1xf32> to vector<3x128xf32>
    %30 = arith.mulf %28, %29 : vector<3x128xf32>
    %31 = arith.mulf %30, %30 : vector<3x128xf32>
    %cst = arith.constant dense<0.000000e+00> : vector<128xf32>
    %32 = vector.multi_reduction <add>, %31, %cst [0] : vector<3x128xf32> to vector<128xf32>
    %33 = vector.shape_cast %32 : vector<128xf32> to vector<1x128xf32>
    %c0_14 = arith.constant 0 : index
    %c0_15 = arith.constant 0 : index
    %34 = vector.load %arg8[%c0_14, %c0_15] : memref<8x128xf32, #tpu.memory_space<vmem>>, vector<3x128xf32>
    tpu.vector_store %arg8[%c0_14, %c0_15], %30 {strides = array<i32>} : memref<8x128xf32, #tpu.memory_space<vmem>>, vector<3x128xf32>,
    %cst_16 = arith.constant 1.000000e+00 : f32
    %35 = vector.broadcast %cst_16 : f32 to vector<1x128xf32>
    %c3 = arith.constant 3 : index
    %c0_17 = arith.constant 0 : index
    %36 = vector.load %arg8[%c3, %c0_17] : memref<8x128xf32, #tpu.memory_space<vmem>>, vector<1x128xf32>
    tpu.vector_store %arg8[%c3, %c0_17], %35 {strides = array<i32>} : memref<8x128xf32, #tpu.memory_space<vmem>>, vector<1x128xf32>,
    %c4 = arith.constant 4 : index
    %c0_18 = arith.constant 0 : index
    %37 = vector.load %arg8[%c4, %c0_18] : memref<8x128xf32, #tpu.memory_space<vmem>>, vector<1x128xf32>
    tpu.vector_store %arg8[%c4, %c0_18], %33 {strides = array<i32>} : memref<8x128xf32, #tpu.memory_space<vmem>>, vector<1x128xf32>,
    %cst_19 = arith.constant 0.000000e+00 : f32
    %38 = vector.broadcast %cst_19 : f32 to vector<3x128xf32>
    %c5 = arith.constant 5 : index
    %c0_20 = arith.constant 0 : index
    %39 = vector.load %arg8[%c5, %c0_20] : memref<8x128xf32, #tpu.memory_space<vmem>>, vector<3x128xf32>
    tpu.vector_store %arg8[%c5, %c0_20], %38 {strides = array<i32>} : memref<8x128xf32, #tpu.memory_space<vmem>>, vector<3x128xf32>,
    %c0_21 = arith.constant 0 : index
    %c0_22 = arith.constant 0 : index
    %40 = vector.load %arg8[%c0_21, %c0_22] : memref<8x128xf32, #tpu.memory_space<vmem>>, vector<8x128xf32>
    %cst_23 = arith.constant dense<0.000000e+00> : vector<128x128xf32>
    %41 = tpu.matmul %1, %40, %cst_23 {dimension_numbers = #tpu.dot_dimension_numbers<[1], [0], [0], [1], [0, 0, 1, 1], [], []>} : vector<128x8xf32>, vector<8x128xf32>, vector<128x128xf32> -> vector<128x128xf32>
    %cst_24 = arith.constant 0.000000e+00 : f32
    %42 = vector.broadcast %cst_24 : f32 to vector<128x128xf32>
    %43 = arith.maximumf %41, %42 : vector<128x128xf32>
    %44 = tpu.iota {dimensions = array<i32: 0>} : vector<128x1xi32>
    %45 = tpu.iota {dimensions = array<i32: 1>} : vector<1x128xi32>
    %cst_25 = arith.constant dense<0x7F800000> : vector<128xf32>
    %46 = vector.multi_reduction <minimumf>, %43, %cst_25 [0] : vector<128x128xf32> to vector<128xf32>
    %47 = vector.shape_cast %46 : vector<128xf32> to vector<1x128xf32>
    %48 = vector.broadcast %47 : vector<1x128xf32> to vector<128x128xf32>
    %49 = arith.cmpf ole, %43, %48 : vector<128x128xf32>
    %c128_i32 = arith.constant 128 : i32
    %50 = vector.shape_cast %44 : vector<128x1xi32> to vector<128x1xi32>
    %51 = vector.broadcast %50 : vector<128x1xi32> to vector<128x128xi32>
    %52 = vector.broadcast %c128_i32 : i32 to vector<128x128xi32>
    %53 = arith.select %49, %51, %52 : vector<128x128xi1>, vector<128x128xi32>
    %cst_26 = arith.constant dense<2147483647> : vector<128xi32>
    %54 = vector.multi_reduction <minsi>, %53, %cst_26 [0] : vector<128x128xi32> to vector<128xi32>
    %55 = vector.shape_cast %54 : vector<128xi32> to vector<1x128xi32>
    %56 = vector.broadcast %44 : vector<128x1xi32> to vector<128x128xi32>
    %57 = vector.broadcast %55 : vector<1x128xi32> to vector<128x128xi32>
    %58 = arith.cmpi eq, %56, %57 : vector<128x128xi32>
    %59 = arith.extui %58 : vector<128x128xi1> to vector<128x128xi32>
    %60 = arith.sitofp %59 : vector<128x128xi32> to vector<128x128xf32>
    %cst_27 = arith.constant -7.000000e+01 : f32
    %61 = vector.broadcast %cst_27 : f32 to vector<1x128xf32>
    %62 = arith.mulf %61, %47 : vector<1x128xf32>
    %63 = math.exp %62 : vector<1x128xf32>
    %cst_28 = arith.constant 1.000000e+00 : f32
    %64 = vector.broadcast %cst_28 : f32 to vector<1x128xf32>
    %cst_29 = arith.constant dense<0.000000e+00> : vector<128x1xf32>
    %65 = tpu.matmul %60, %64, %cst_29 {dimension_numbers = #tpu.dot_dimension_numbers<[1], [1], [0], [0], [0, 0, 1, 0], [], []>} : vector<128x128xf32>, vector<1x128xf32>, vector<128x1xf32> -> vector<128x1xf32>
    %cst_30 = arith.constant dense<0.000000e+00> : vector<128x1xf32>
    %66 = tpu.matmul %60, %63, %cst_30 {dimension_numbers = #tpu.dot_dimension_numbers<[1], [1], [0], [0], [0, 0, 1, 0], [], []>} : vector<128x128xf32>, vector<1x128xf32>, vector<128x1xf32> -> vector<128x1xf32>
    %cst_31 = arith.constant 1.000000e+00 : f32
    %67 = vector.broadcast %cst_31 : f32 to vector<128x1xf32>
    %68 = arith.maximumf %65, %67 : vector<128x1xf32>
    %69 = math.log %68 : vector<128x1xf32>
    %cst_32 = arith.constant 3.000000e-01 : f32
    %70 = vector.broadcast %cst_32 : f32 to vector<128x1xf32>
    %71 = arith.mulf %70, %69 : vector<128x1xf32>
    %72 = math.exp %71 : vector<128x1xf32>
    %cst_33 = arith.constant 9.99999997E-7 : f32
    %73 = vector.broadcast %cst_33 : f32 to vector<128x1xf32>
    %74 = arith.addf %72, %73 : vector<128x1xf32>
    %75 = tpu.reciprocal %74 {approx = true} : vector<128x1xf32> -> vector<128x1xf32>
    %cst_34 = arith.constant 1.000000e+00 : f32
    %76 = vector.broadcast %cst_34 : f32 to vector<128x1xf32>
    %77 = arith.mulf %76, %75 : vector<128x1xf32>
    %78 = arith.mulf %66, %77 : vector<128x1xf32>
    %cst_35 = arith.constant dense<0.000000e+00> : vector<1xf32>
    %79 = vector.multi_reduction <add>, %78, %cst_35 [0] : vector<128x1xf32> to vector<1xf32>
    %80 = vector.shape_cast %79 : vector<1xf32> to vector<1x1xf32>
    %cst_36 = arith.constant 7.812500e-03 : f32
    %81 = vector.broadcast %cst_36 : f32 to vector<1x1xf32>
    %82 = arith.mulf %80, %81 : vector<1x1xf32>
    %cst_37 = arith.constant 1.000000e+00 : f32
    %83 = vector.broadcast %cst_37 : f32 to vector<1x1xf32>
    %84 = arith.subf %83, %82 : vector<1x1xf32>
    %c0_38 = arith.constant 0 : index
    %c0_39 = arith.constant 0 : index
    %c0_40 = arith.constant 0 : index
    %85 = vector.load %arg6[%c0_38, %c0_39, %c0_40] : memref<1x1x1xf32, #tpu.memory_space<vmem>>, vector<1x1x1xf32>
    %86 = vector.shape_cast %85 : vector<1x1x1xf32> to vector<1x1xf32>
    %87 = vector.shape_cast %84 : vector<1x1xf32> to vector<1x1x1xf32>
    tpu.vector_store %arg6[%c0_38, %c0_39, %c0_40], %87 {strides = array<i32>} : memref<1x1x1xf32, #tpu.memory_space<vmem>>, vector<1x1x1xf32>,
    %cst_41 = arith.constant dense<0x7F800000> : vector<128xf32>
    %88 = vector.multi_reduction <minimumf>, %43, %cst_41 [1] : vector<128x128xf32> to vector<128xf32>
    %89 = vector.shape_cast %88 : vector<128xf32> to vector<128x1xf32>
    %90 = vector.broadcast %89 : vector<128x1xf32> to vector<128x128xf32>
    %91 = arith.cmpf ole, %43, %90 : vector<128x128xf32>
    %c128_i32_42 = arith.constant 128 : i32
    %92 = vector.shape_cast %45 : vector<1x128xi32> to vector<1x128xi32>
    %93 = vector.broadcast %92 : vector<1x128xi32> to vector<128x128xi32>
    %94 = vector.broadcast %c128_i32_42 : i32 to vector<128x128xi32>
    %95 = arith.select %91, %93, %94 : vector<128x128xi1>, vector<128x128xi32>
    %cst_43 = arith.constant dense<2147483647> : vector<128xi32>
    %96 = vector.multi_reduction <minsi>, %95, %cst_43 [1] : vector<128x128xi32> to vector<128xi32>
    %97 = vector.shape_cast %96 : vector<128xi32> to vector<128x1xi32>
    %98 = vector.broadcast %45 : vector<1x128xi32> to vector<128x128xi32>
    %99 = vector.broadcast %97 : vector<128x1xi32> to vector<128x128xi32>
    %100 = arith.cmpi eq, %98, %99 : vector<128x128xi32>
    %101 = arith.extui %100 : vector<128x128xi1> to vector<128x128xi32>
    %102 = arith.sitofp %101 : vector<128x128xi32> to vector<128x128xf32>
    %cst_44 = arith.constant -7.000000e+01 : f32
    %103 = vector.broadcast %cst_44 : f32 to vector<128x1xf32>
    %104 = arith.mulf %103, %89 : vector<128x1xf32>
    %105 = math.exp %104 : vector<128x1xf32>
    %cst_45 = arith.constant 1.000000e+00 : f32
    %106 = vector.broadcast %cst_45 : f32 to vector<1x128xf32>
    %cst_46 = arith.constant dense<0.000000e+00> : vector<1x128xf32>
    %107 = tpu.matmul %106, %102, %cst_46 {dimension_numbers = #tpu.dot_dimension_numbers<[1], [0], [0], [1], [0, 0, 1, 1], [], []>} : vector<1x128xf32>, vector<128x128xf32>, vector<1x128xf32> -> vector<1x128xf32>
    %cst_47 = arith.constant dense<0.000000e+00> : vector<128x1xf32>
    %108 = tpu.matmul %102, %107, %cst_47 {dimension_numbers = #tpu.dot_dimension_numbers<[1], [1], [0], [0], [0, 0, 1, 0], [], []>} : vector<128x128xf32>, vector<1x128xf32>, vector<128x1xf32> -> vector<128x1xf32>
    %cst_48 = arith.constant 1.000000e+00 : f32
    %109 = vector.broadcast %cst_48 : f32 to vector<128x1xf32>
    %110 = arith.maximumf %108, %109 : vector<128x1xf32>
    %111 = math.log %110 : vector<128x1xf32>
    %cst_49 = arith.constant 3.000000e-01 : f32
    %112 = vector.broadcast %cst_49 : f32 to vector<128x1xf32>
    %113 = arith.mulf %112, %111 : vector<128x1xf32>
    %114 = math.exp %113 : vector<128x1xf32>
    %cst_50 = arith.constant 9.99999997E-7 : f32
    %115 = vector.broadcast %cst_50 : f32 to vector<128x1xf32>
    %116 = arith.addf %114, %115 : vector<128x1xf32>
    %117 = tpu.reciprocal %116 {approx = true} : vector<128x1xf32> -> vector<128x1xf32>
    %cst_51 = arith.constant 1.000000e+00 : f32
    %118 = vector.broadcast %cst_51 : f32 to vector<128x1xf32>
    %119 = arith.mulf %118, %117 : vector<128x1xf32>
    %120 = arith.mulf %105, %119 : vector<128x1xf32>
    %cst_52 = arith.constant dense<0.000000e+00> : vector<1xf32>
    %121 = vector.multi_reduction <add>, %120, %cst_52 [0] : vector<128x1xf32> to vector<1xf32>
    %122 = vector.shape_cast %121 : vector<1xf32> to vector<1x1xf32>
    %cst_53 = arith.constant 7.812500e-03 : f32
    %123 = vector.broadcast %cst_53 : f32 to vector<1x1xf32>
    %124 = arith.mulf %122, %123 : vector<1x1xf32>
    %cst_54 = arith.constant 1.000000e+00 : f32
    %125 = vector.broadcast %cst_54 : f32 to vector<1x1xf32>
    %126 = arith.subf %125, %124 : vector<1x1xf32>
    %c0_55 = arith.constant 0 : index
    %c0_56 = arith.constant 0 : index
    %c0_57 = arith.constant 0 : index
    %127 = vector.load %arg7[%c0_55, %c0_56, %c0_57] : memref<1x1x1xf32, #tpu.memory_space<vmem>>, vector<1x1x1xf32>
    %128 = vector.shape_cast %127 : vector<1x1x1xf32> to vector<1x1xf32>
    %129 = vector.shape_cast %126 : vector<1x1xf32> to vector<1x1x1xf32>
    tpu.vector_store %arg7[%c0_55, %c0_56, %c0_57], %129 {strides = array<i32>} : memref<1x1x1xf32, #tpu.memory_space<vmem>>, vector<1x1x1xf32>,
    return
  }
  func.func @transform_0(%arg0: i32) -> (i32, i32, i32) {
    %c0_i32 = arith.constant 0 : i32
    %c0_i32_0 = arith.constant 0 : i32
    %c0_i32_1 = arith.constant 0 : i32
    return %arg0, %c0_i32, %c0_i32_0 : i32, i32, i32
  }
  func.func @transform_1(%arg0: i32) -> (i32, i32, i32) {
    %c0_i32 = arith.constant 0 : i32
    %c0_i32_0 = arith.constant 0 : i32
    %c0_i32_1 = arith.constant 0 : i32
    return %arg0, %c0_i32, %c0_i32_0 : i32, i32, i32
  }
  func.func @transform_2(%arg0: i32) -> (i32, i32, i32) {
    %c0_i32 = arith.constant 0 : i32
    %c0_i32_0 = arith.constant 0 : i32
    %c0_i32_1 = arith.constant 0 : i32
    return %arg0, %c0_i32, %c0_i32_0 : i32, i32, i32
  }
  func.func @transform_3(%arg0: i32) -> (i32, i32, i32) {
    %c0_i32 = arith.constant 0 : i32
    %c0_i32_0 = arith.constant 0 : i32
    %c0_i32_1 = arith.constant 0 : i32
    return %arg0, %c0_i32, %c0_i32_0 : i32, i32, i32
  }
  func.func @transform_4(%arg0: i32) -> (i32, i32, i32) {
    %c0_i32 = arith.constant 0 : i32
    %c0_i32_0 = arith.constant 0 : i32
    %c0_i32_1 = arith.constant 0 : i32
    return %arg0, %c0_i32, %c0_i32_0 : i32, i32, i32
  }
  func.func @transform_5(%arg0: i32) -> (i32, i32, i32) {
    %c0_i32 = arith.constant 0 : i32
    %c0_i32_0 = arith.constant 0 : i32
    %c0_i32_1 = arith.constant 0 : i32
    return %arg0, %c0_i32, %c0_i32_0 : i32, i32, i32
  }
  func.func @transform_6(%arg0: i32) -> (i32, i32, i32) {
    %c0_i32 = arith.constant 0 : i32
    %c0_i32_0 = arith.constant 0 : i32
    %c0_i32_1 = arith.constant 0 : i32
    return %arg0, %c0_i32, %c0_i32_0 : i32, i32, i32
  }
}

</mosaic_0001>

<bundles_post_ra>
// kernel: _lambda_.3
= control target key start
LH: loop header
LB: loop body
LE: loop exit
PB: predicated region body
PF: predicated region fallthrough
CT: control target
= control target key end

     0   :  { %s568_s21 = smov 0   ;;  %s608_s0 = inlined_call_operand.vmem [shape: f32[2,3,128], index: 0, kind: input, shape index: {}]   ;;  %s609_s1 = inlined_call_operand.vmem [shape: f32[2,3,128], index: 1, kind: input, shape index: {}]   ;;  %s610_s2 = inlined_call_operand.vmem [shape: f32[2,3,3], index: 2, kind: input, shape index: {}]   ;;  %s611_s3 = inlined_call_operand.vmem [shape: f32[2,3,1], index: 3, kind: input, shape index: {}, may-alias: {3,4}]   ;;  %s612_s4 = inlined_call_operand.vmem [shape: f32[2,3,1], index: 4, kind: input, shape index: {}, may-alias: {3,4}]   ;;  %s613_s5 = inlined_call_operand.vmem [shape: f32[2,1,1], index: 5, kind: input, shape index: {}]   ;;  %s614_s6 = inlined_call_operand.vmem [shape: f32[2,3,1], index: 6, kind: output, shape index: {}]  }
   0x1 LB: > { %s493_s22 = sadd.s32 4294967295, %s528_s21   ;;  %p497_p0 = scmp.ge.s32.totalorder %s528_s21, 1  ;;  %s528_s21 = sphi %s568_s21, %s16_s21  }
   0x2   : > { %p255_p1 = scmp.lt.s32.totalorder %s528_s21, 3 }
   0x4   : > { %p256_p2 = pnand %p497_p0, %p255_p1 }
   0x5   : > { %p302_p3 = scmp.lt.s32.totalorder (!%p256_p2), %s493_s22, 1 }
   0x6   : > { %259 = sbr.rel (%p256_p2) target bundleno = 268 (0x10c), region = 44 }
   0xb   : > { %v530_v0 = vmov 1   ;;  %v531_v1 = vmov 0   ;;  %s616_s22 = smov (!%p302_p3, %s493_s22), 1  ;;  %v532_v6 = vmov 2   ;;  %vm377_vm0 = vcmask 1042432  }
   0xc   : > { %518 = vset.pattern.permute.xlu1 %v530_v0  ;;  %517 = vset.pattern.permute.xlu0 %v531_v1  ;;  %s576_s23 = sshll.u32 %s616_s22, 2  ;;  %s324_s26 = scalar_lea.vmem %s613_s5, %s616_s22  ;;  %vm381_vm1 = vcmask 2048  }
   0xd   : > { %520 = vset.pattern.permute.xlu2 %v531_v1  ;;  %s317_s29 = scalar_lea.vmem %s611_s3, %s576_s23  ;;  %s313_s8 = scalar_lea.vmem %s610_s2, %s576_s23  ;;  %v521_v5 = vld [vmem:[%s324_s26] ss:$0 sm:$0xff] }
   0xe   : > { %v332_v2 = vld [vmem:[%s317_s29] sm:$0x7]  ;;  %s321_s11 = scalar_lea.vmem %s612_s4, %s576_s23  ;;  %s305_s14 = scalar_lea.vmem %s608_s0, %s576_s23 }
   0xf   : > { %v331_v3 = vld [vmem:[%s313_s8] sm:$0x7]  ;;  %337 = vperm.xlu0 %517, %v332_v2   ;;  %s309_s17 = scalar_lea.vmem %s609_s1, %s576_s23  ;;  %s328_s20 = scalar_lea.vmem %s614_s6, %s576_s23 }
  0x10   : > { %349 = vperm.xlu1 %518, %v331_v3   ;;  %v333_v4 = vld [vmem:[%s321_s11] sm:$0x7] }
  0x11   : > { %364 = vperm.xlu2 %520, %v333_v4   ;;  %v329_v7 = vld [vmem:[%s305_s14] sm:$0x7] }
  0x12   : > { %v330_v22 = vld [vmem:[%s309_s17] sm:$0x7] }
  0x17   : > { %343 = vperm.xlu0 %517, %v331_v3  }
  0x18   : > { %519 = vset.pattern.permute.xlu1 %v532_v6 }
  0x19   : > { %356 = vperm.xlu1 %519, %v331_v3   ;;  %371 = vperm.xlu2 %520, %v521_v5  }
  0x6b   : > { %v365_v11 = vpop.permute.xlu2 %364 }
  0x73   : > { %v372_v21 = vpop.permute.xlu2 %371 }
  0x74   : > { %v374_v24 = vmul.f32 %v372_v21, %v330_v22 }
  0x81   : > { %v338_v8 = vpop.permute.xlu0 %337 }
  0x82   : > { %v350_v9 = vpop.permute.xlu1 %349  ;;  %v340_v10 = vsub.f32 %v329_v7, %v338_v8 }
  0x84   : > { %v352_v12 = vperm.slane %v340_v10, 1  ;;  %v346_v13 = vperm.slane %v340_v10, 0  ;;  %v359_v15 = vperm.slane %v340_v10, 2 }
  0x86   : > { %v353_v16 = vmul.f32 %v352_v12, %v350_v9 }
  0x89   : > { %v344_v14 = vpop.permute.xlu0 %343 }
  0x8a   : > { %v347_v17 = vmul.f32 %v346_v13, %v344_v14 }
  0x8b   : > { %v357_v18 = vpop.permute.xlu1 %356 }
  0x8c   : > { %v360_v19 = vmul.f32 %v359_v15, %v357_v18  ;;  %v354_v20 = vadd.f32 %v353_v16, %v347_v17 }
  0x8e   : > { %v361_v23 = vadd.f32 %v360_v19, %v354_v20 }
  0x90   : > { %v367_v25 = vadd.f32 %v365_v11, %v361_v23 }
  0x92   : > { %v375_v26 = vsub.f32 %v367_v25, %v374_v24 }
  0x94   : > { %v376_v27 = vand.u32 2147483647, %v375_v26 }
  0x96   : > { %v378_v28 = vsel %vm377_vm0, %v376_v27, 0.0 }
  0x97   : > { %379 = vadd.xlane.f32.xlu0 %v378_v28 }
 0x10a   : > { %v380_v29 = vpop.xlane.xlu0 %379 }
 0x10b   : > { %382 = vst.msk [vmem:[%s328_s20] sm:$0x7] %vm381_vm1, %v380_v29 }
 0x10c PF: > { %s16_s21 = sadd.s32 1, %s528_s21  }
 0x10d   : > { %p13_p4 = scmp.ge.s32.totalorder %s16_s21, 4  }
 0x10f   :  { %15 = sbr.rel (!%p13_p4) target bundleno = 1 (0x1), region = 89 }

// kernel: _lambda_.5
= control target key start
LH: loop header
LB: loop body
LE: loop exit
PB: predicated region body
PF: predicated region fallthrough
CT: control target
= control target key end

     0   :  { %s3522_s21 = smov 0   ;;  %s5667_s0 = inlined_call_operand.vmem [shape: f32[2,256,8], index: 0, kind: input, shape index: {}]   ;;  %s5668_s1 = inlined_call_operand.vmem [shape: f32[2,3,128], index: 1, kind: input, shape index: {}]   ;;  %s5669_s2 = inlined_call_operand.vmem [shape: f32[2,3,3], index: 2, kind: input, shape index: {}]   ;;  %s5670_s3 = inlined_call_operand.vmem [shape: f32[2,3,1], index: 3, kind: input, shape index: {}]   ;;  %s5671_s4 = inlined_call_operand.vmem [shape: f32[2,3,1], index: 4, kind: input, shape index: {}]   ;;  %s5672_s5 = inlined_call_operand.vmem [shape: f32[2,1,1], index: 5, kind: output, shape index: {0}]   ;;  %s5673_s6 = inlined_call_operand.vmem [shape: f32[2,1,1], index: 6, kind: output, shape index: {1}]  }
   0x1 LB: > { %s2862_s22 = sadd.s32 4294967295, %s3480_s21   ;;  %p2866_p0 = scmp.ge.s32.totalorder %s3480_s21, 1  ;;  %s3480_s21 = sphi %s3522_s21, %s17_s21  }
   0x2   : > { %p251_p1 = scmp.lt.s32.totalorder %s3480_s21, 3 }
   0x4   : > { %p252_p2 = pnand %p2866_p0, %p251_p1 }
   0x6   : > { %255 = sbr.rel (%p252_p2) target bundleno = 1349 (0x545), region = 40 }
   0xb   : > { %p298_p3 = scmp.lt.s32.totalorder %s2862_s22, 1  ;;  %v3482_v0 = vmov 1   ;;  %v3483_v1 = vmov 0   ;;  %v3484_v5 = vmov 2   ;;  %v5674_v10 = vmov 1.0  }
   0xc   : > { %3021 = vset.pattern.permute.xlu1 %v3482_v0  ;;  %3020 = vset.pattern.permute.xlu0 %v3483_v1  ;;  %404 = vst [vmem:[#allocation2 + $0x3] sm:$0x1] %v5674_v10  ;;  %v5676_v11 = vmov 0.0   ;;  %vm395_vm0 = vcmask 1042432   ;;  %vm408_vm1 = vcmask 64512  }
   0xd   : > { %s6097_s22 = smov (!%p298_p3, %s2862_s22), 1  ;;  %3023 = vset.pattern.permute.xlu2 %v3483_v1  ;;  %406 = vst [vmem:[#allocation2 + $0x5] sm:$0x7] %v5676_v11 }
   0xe   : > { %s2869_s23 = sshll.u32 %s6097_s22, 2  ;;  %s3003_s12 = sshll.u32 %s6097_s22, 8 }
   0xf   : > { %s314_s26 = scalar_lea.vmem %s5670_s3, %s2869_s23  ;;  %s310_s29 = scalar_lea.vmem %s5669_s2, %s2869_s23 }
  0x10   : > { %v359_v2 = vld [vmem:[%s314_s26] sm:$0x7]  ;;  %s318_s8 = scalar_lea.vmem %s5671_s4, %s2869_s23  ;;  %s306_s11 = scalar_lea.vmem %s5668_s1, %s2869_s23 }
  0x11   : > { %363 = vperm.xlu0 %3020, %v359_v2   ;;  %v358_v3 = vld [vmem:[%s310_s29] sm:$0x7]  ;;  %s3551_s15 = scalar_lea.vmem %s5667_s0, %s3003_s12  ;;  %s324_s18 = scalar_lea.vmem %s5673_s6, %s6097_s22 }
  0x12   : > { %375 = vperm.xlu1 %3021, %v358_v3   ;;  %v360_v4 = vld [vmem:[%s318_s8] sm:$0x7]  ;;  %v336_v34 = vld [vmem:[%s3551_s15 + $0x58] sm:$0xff]  ;;  %v347_v36 = vld [vmem:[%s3551_s15 + $0xb0] sm:$0xff]  ;;  %s321_s23 = scalar_lea.vmem %s5672_s5, %s6097_s22 }
  0x13   : > { %390 = vperm.xlu2 %3023, %v360_v4   ;;  %v357_v6 = vld [vmem:[%s306_s11] sm:$0x7]  ;;  %v340_v35 = vld [vmem:[%s3551_s15 + $0x78] sm:$0xff]  ;;  %v326_v37 = vld [vmem:[%s3551_s15 + $0x8] sm:$0xff] }
  0x14   : > { %v325_v33 = vld [vmem:[%s3551_s15] sm:$0xff]  ;;  %v348_v39 = vld [vmem:[%s3551_s15 + $0xb8] sm:$0xff]  ;;  %v327_v41 = vld [vmem:[%s3551_s15 + $0x10] sm:$0xff] }
  0x15   : > { %v337_v38 = vld [vmem:[%s3551_s15 + $0x60] sm:$0xff]  ;;  %v338_v42 = vld [vmem:[%s3551_s15 + $0x68] sm:$0xff]  ;;  %v328_v45 = vld [vmem:[%s3551_s15 + $0x18] sm:$0xff] }
  0x16   : > { %v341_v40 = vld [vmem:[%s3551_s15 + $0x80] sm:$0xff]  ;;  %v342_v44 = vld [vmem:[%s3551_s15 + $0x88] sm:$0xff]  ;;  %v339_v46 = vld [vmem:[%s3551_s15 + $0x70] sm:$0xff] }
  0x17   : > { %v349_v43 = vld [vmem:[%s3551_s15 + $0xc0] sm:$0xff]  ;;  %v350_v47 = vld [vmem:[%s3551_s15 + $0xc8] sm:$0xff]  ;;  %v343_v48 = vld [vmem:[%s3551_s15 + $0x90] sm:$0xff] }
  0x18   : > { %v329_v49 = vld [vmem:[%s3551_s15 + $0x20] sm:$0xff]  ;;  %v351_v50 = vld [vmem:[%s3551_s15 + $0xd0] sm:$0xff]  ;;  %v344_v51 = vld [vmem:[%s3551_s15 + $0x98] sm:$0xff] }
  0x19   : > { %369 = vperm.xlu0 %3020, %v358_v3   ;;  %v330_v52 = vld [vmem:[%s3551_s15 + $0x28] sm:$0xff]  ;;  %v352_v53 = vld [vmem:[%s3551_s15 + $0xd8] sm:$0xff]  ;;  %v345_v54 = vld [vmem:[%s3551_s15 + $0xa0] sm:$0xff] }
  0x1a   : > { %3022 = vset.pattern.permute.xlu1 %v3484_v5  ;;  %v331_v55 = vld [vmem:[%s3551_s15 + $0x30] sm:$0xff]  ;;  %v353_v56 = vld [vmem:[%s3551_s15 + $0xe0] sm:$0xff]  ;;  %v346_v57 = vld [vmem:[%s3551_s15 + $0xa8] sm:$0xff] }
  0x1b   : > { %382 = vperm.xlu1 %3022, %v358_v3   ;;  %v332_v58 = vld [vmem:[%s3551_s15 + $0x38] sm:$0xff]  ;;  %v354_v59 = vld [vmem:[%s3551_s15 + $0xe8] sm:$0xff]  ;;  %v333_v60 = vld [vmem:[%s3551_s15 + $0x40] sm:$0xff] }
  0x1c   : > { %v355_v61 = vld [vmem:[%s3551_s15 + $0xf0] sm:$0xff]  ;;  %v334_v62 = vld [vmem:[%s3551_s15 + $0x48] sm:$0xff]  ;;  %v356_v63 = vld [vmem:[%s3551_s15 + $0xf8] sm:$0xff] }
  0x1d   : > { %v335_v0 = vld [vmem:[%s3551_s15 + $0x50] sm:$0xff] }
  0x6d   : > { %v391_v21 = vpop.permute.xlu2 %390 }
  0x83   : > { %v364_v7 = vpop.permute.xlu0 %363 }
  0x84   : > { %v366_v8 = vsub.f32 %v357_v6, %v364_v7  ;;  %v376_v9 = vpop.permute.xlu1 %375 }
  0x86   : > { %v378_v12 = vperm.slane %v366_v8, 1  ;;  %v372_v13 = vperm.slane %v366_v8, 0  ;;  %v385_v17 = vperm.slane %v366_v8, 2 }
  0x88   : > { %v379_v15 = vmul.f32 %v378_v12, %v376_v9 }
  0x8b   : > { %v370_v14 = vpop.permute.xlu0 %369 }
  0x8c   : > { %v373_v16 = vmul.f32 %v372_v13, %v370_v14 }
  0x8d   : > { %v383_v18 = vpop.permute.xlu1 %382 }
  0x8e   : > { %v380_v19 = vadd.f32 %v379_v15, %v373_v16  ;;  %v386_v20 = vmul.f32 %v385_v17, %v383_v18 }
  0x90   : > { %v387_v22 = vadd.f32 %v386_v20, %v380_v19 }
  0x92   : > { %v393_v23 = vmul.f32 %v391_v21, %v387_v22 }
  0x94   : > { %v394_v24 = vmul.f32 %v393_v23, %v393_v23  ;;  %403 = vst [vmem:[#allocation2] sm:$0x7] %v393_v23 }
  0x96   : > { %v396_v25 = vsel %vm395_vm0, %v394_v24, 0.0 }
  0x97   : > { %v397_v26 = vrot.slane %v396_v25, 4 }
  0x99   : > { %v398_v27 = vadd.f32 %v397_v26, %v396_v25 }
  0x9b   : > { %v399_v28 = vrot.slane %v398_v27, 2 }
  0x9d   : > { %v400_v29 = vadd.f32 %v399_v28, %v398_v27 }
  0x9f   : > { %v401_v30 = vrot.slane %v400_v29, 1 }
  0xa1   : > { %v402_v31 = vadd.f32 %v401_v30, %v400_v29 }
  0xa3   : > { %405 = vst [vmem:[#allocation2 + $0x4] sm:$0x1] %v402_v31 }
  0xaa   : > { %v407_v32 = vld [vmem:[#allocation2] sm:$0xff] }
  0xab   : > { %520 = vmatpush.msra.mxu0 %v407_v32  ;;  %3004 = vmatpush.msra.mxu1 %v407_v32 }
  0xac   : > { %3005 = vmatpush.msra.mxu2 %v407_v32  ;;  %3006 = vmatpush.msra.mxu3 %v407_v32 }
  0xad   : > { %2873 = vmatmul.msk.f32.vlgmr.msra.gmra.mxu0 %vm408_vm1, %v325_v33  ;;  %2884 = vmatmul.msk.f32.vlgmr.msra.gmra.mxu1 %vm408_vm1, %v336_v34 }
  0xae   : > { %2888 = vmatmul.msk.f32.vlgmr.msra.gmra.mxu2 %vm408_vm1, %v340_v35  ;;  %2895 = vmatmul.msk.f32.vlgmr.msra.gmra.mxu3 %vm408_vm1, %v347_v36 }
  0xb5   : > { %2874 = vmatmul.msk.f32.gmra.mxu0 %vm408_vm1, %v326_v37  ;;  %2885 = vmatmul.msk.f32.gmra.mxu1 %vm408_vm1, %v337_v38 }
  0xb6   : > { %2896 = vmatmul.msk.f32.gmra.mxu3 %vm408_vm1, %v348_v39  ;;  %2889 = vmatmul.msk.f32.gmra.mxu2 %vm408_vm1, %v341_v40 }
  0xbd   : > { %2875 = vmatmul.msk.f32.gmra.mxu0 %vm408_vm1, %v327_v41  ;;  %2886 = vmatmul.msk.f32.gmra.mxu1 %vm408_vm1, %v338_v42 }
  0xbe   : > { %2897 = vmatmul.msk.f32.gmra.mxu3 %vm408_vm1, %v349_v43  ;;  %2890 = vmatmul.msk.f32.gmra.mxu2 %vm408_vm1, %v342_v44 }
  0xc5   : > { %2876 = vmatmul.msk.f32.gmra.mxu0 %vm408_vm1, %v328_v45  ;;  %2887 = vmatmul.msk.f32.gmra.mxu1 %vm408_vm1, %v339_v46 }
  0xc6   : > { %2898 = vmatmul.msk.f32.gmra.mxu3 %vm408_vm1, %v350_v47  ;;  %2891 = vmatmul.msk.f32.gmra.mxu2 %vm408_vm1, %v343_v48 }
  0xcd   : > { %2877 = vmatmul.msk.f32.gmra.mxu0 %vm408_vm1, %v329_v49 }
  0xce   : > { %2899 = vmatmul.msk.f32.gmra.mxu3 %vm408_vm1, %v351_v50  ;;  %2892 = vmatmul.msk.f32.gmra.mxu2 %vm408_vm1, %v344_v51 }
  0xd5   : > { %2878 = vmatmul.msk.f32.gmra.mxu0 %vm408_vm1, %v330_v52 }
  0xd6   : > { %2900 = vmatmul.msk.f32.gmra.mxu3 %vm408_vm1, %v352_v53  ;;  %2893 = vmatmul.msk.f32.gmra.mxu2 %vm408_vm1, %v345_v54 }
  0xdd   : > { %2879 = vmatmul.msk.f32.gmra.mxu0 %vm408_vm1, %v331_v55 }
  0xde   : > { %2901 = vmatmul.msk.f32.gmra.mxu3 %vm408_vm1, %v353_v56  ;;  %2894 = vmatmul.msk.f32.gmra.mxu2 %vm408_vm1, %v346_v57 }
  0xe5   : > { %2880 = vmatmul.msk.f32.gmra.mxu0 %vm408_vm1, %v332_v58 }
  0xe6   : > { %2902 = vmatmul.msk.f32.gmra.mxu3 %vm408_vm1, %v354_v59 }
  0xed   : > { %2881 = vmatmul.msk.f32.gmra.mxu0 %vm408_vm1, %v333_v60 }
  0xee   : > { %2903 = vmatmul.msk.f32.gmra.mxu3 %vm408_vm1, %v355_v61 }
  0xf5   : > { %2882 = vmatmul.msk.f32.gmra.mxu0 %vm408_vm1, %v334_v62 }
  0xf6   : > { %2904 = vmatmul.msk.f32.gmra.mxu3 %vm408_vm1, %v356_v63 }
  0xfd   : > { %2883 = vmatmul.msk.f32.gmra.mxu0 %vm408_vm1, %v335_v0 }
 0x12a   : > { %v522_v1 = vpop.f32.mrf.mxu0  ;;  %v555_v2 = vpop.f32.mrf.mxu1 }
 0x12b   : > { %v3617_v3 = vmax.f32 %v522_v1, 0.0  ;;  %v3619_v4 = vmax.f32 %v555_v2, 0.0 }
 0x12d   : > { %1499 = vmin.xlane.f32.xlu2 %v3619_v4  ;;  %1477 = vmin.xlane.f32.xlu1 %v3617_v3 }
 0x131   : > { %v567_v5 = vpop.f32.mrf.mxu2  ;;  %v588_v6 = vpop.f32.mrf.mxu3 }
 0x132   : > { %v3623_v7 = vmax.f32 %v567_v5, 0.0  ;;  %v3625_v8 = vmax.f32 %v588_v6, 0.0  ;;  %v525_v9 = vpop.f32.mrf.mxu0  ;;  %v558_v12 = vpop.f32.mrf.mxu1 }
 0x133   : > { %v3631_v16 = vmax.f32 %v558_v12, 0.0  ;;  %v3641_v22 = vmax.f32 %v525_v9, 0.0 }
 0x134   : > { %1507 = vmin.xlane.f32.xlu0 %v3623_v7  ;;  %v692_v13 = vmin.f32 %v3623_v7, %v3619_v4 }
 0x135   : > { %1521 = vmin.xlane.f32.xlu1 %v3625_v8 }
 0x136   : > { %v696_v20 = vmin.f32 %v692_v13, %v3625_v8 }
 0x138   : > { %v693_v24 = vmin.f32 %v696_v20, %v3631_v16 }
 0x139   : > { %v591_v14 = vpop.f32.mrf.mxu3  ;;  %v570_v15 = vpop.f32.mrf.mxu2 }
 0x13a   : > { %v3633_v17 = vmax.f32 %v591_v14, 0.0  ;;  %v528_v18 = vpop.f32.mrf.mxu0  ;;  %v3635_v19 = vmax.f32 %v570_v15, 0.0  ;;  %v561_v21 = vpop.f32.mrf.mxu1 }
 0x13b   : > { %v3643_v23 = vmax.f32 %v528_v18, 0.0  ;;  %v3646_v26 = vmax.f32 %v561_v21, 0.0 }
 0x13c   : > { %1523 = vmin.xlane.f32.xlu2 %v3633_v17  ;;  %1501 = vmin.xlane.f32.xlu0 %v3631_v16  ;;  %v697_v28 = vmin.f32 %v693_v24, %v3633_v17 }
 0x13d   : > { %1509 = vmin.xlane.f32.xlu1 %v3635_v19 }
 0x13e   : > { %v701_v31 = vmin.f32 %v697_v28, %v3635_v19 }
 0x141   : > { %v594_v25 = vpop.f32.mrf.mxu3  ;;  %v573_v29 = vpop.f32.mrf.mxu2 }
 0x142   : > { %v531_v27 = vpop.f32.mrf.mxu0  ;;  %v3651_v30 = vmax.f32 %v594_v25, 0.0  ;;  %v3656_v34 = vmax.f32 %v573_v29, 0.0  ;;  %v564_v39 = vpop.f32.mrf.mxu1 }
 0x143   : > { %v3664_v40 = vmax.f32 %v531_v27, 0.0  ;;  %v3667_v43 = vmax.f32 %v564_v39, 0.0 }
 0x144   : > { %1479 = vmin.xlane.f32.xlu0 %v3641_v22  ;;  %1481 = vmin.xlane.f32.xlu2 %v3643_v23  ;;  %v705_v32 = vmin.f32 %v701_v31, %v3651_v30 }
 0x145   : > { %1503 = vmin.xlane.f32.xlu1 %v3646_v26  ;;  %5787 = vst [vmem:[#allocation3_spill] sm:$0xff] %v3664_v40 }
 0x146   : > { %v709_v38 = vmin.f32 %v705_v32, %v3646_v26 }
 0x148   : > { %v694_v41 = vmin.f32 %v3656_v34, %v709_v38 }
 0x149   : > { %v597_v33 = vpop.f32.mrf.mxu3  ;;  %v576_v37 = vpop.f32.mrf.mxu2 }
 0x14a   : > { %v534_v35 = vpop.f32.mrf.mxu0  ;;  %v3658_v36 = vmax.f32 %v597_v33, 0.0  ;;  %v3679_v51 = vmax.f32 %v576_v37, 0.0 }
 0x14b   : > { %v3670_v46 = vmax.f32 %v534_v35, 0.0 }
 0x14c   : > { %1525 = vmin.xlane.f32.xlu0 %v3651_v30  ;;  %1511 = vmin.xlane.f32.xlu2 %v3656_v34  ;;  %v698_v45 = vmin.f32 %v694_v41, %v3658_v36 }
 0x14d   : > { %1527 = vmin.xlane.f32.xlu1 %v3658_v36  ;;  %5788 = vst [vmem:[#allocation4_spill] sm:$0xff] %v3670_v46  ;;  %v685_v14 = vmin.f32 %v3617_v3, %v3670_v46 }
 0x14e   : > { %v702_v49 = vmin.f32 %v698_v45, %v3667_v43 }
 0x151   : > { %v600_v42 = vpop.f32.mrf.mxu3  ;;  %v579_v48 = vpop.f32.mrf.mxu2 }
 0x152   : > { %v537_v44 = vpop.f32.mrf.mxu0  ;;  %v3674_v47 = vmax.f32 %v600_v42, 0.0  ;;  %v3681_v53 = vmax.f32 %v579_v48, 0.0 }
 0x153   : > { %v3690_v59 = vmax.f32 %v537_v44, 0.0 }
 0x154   : > { %1505 = vmin.xlane.f32.xlu2 %v3667_v43  ;;  %1483 = vmin.xlane.f32.xlu0 %v3664_v40  ;;  %v706_v50 = vmin.f32 %v702_v49, %v3674_v47 }
 0x155   : > { %1485 = vmin.xlane.f32.xlu1 %v3670_v46  ;;  %5789 = vst [vmem:[#allocation5_spill] sm:$0xff] %v3690_v59  ;;  %v686_v35 = vmin.f32 %v3641_v22, %v3690_v59 }
 0x156   : > { %v710_v56 = vmin.f32 %v706_v50, %v3679_v51 }
 0x159   : > { %v603_v52 = vpop.f32.mrf.mxu3  ;;  %v582_v0 = vpop.f32.mrf.mxu2 }
 0x15a   : > { %v540_v54 = vpop.f32.mrf.mxu0  ;;  %v3683_v55 = vmax.f32 %v603_v52, 0.0  ;;  %v3703_v6 = vmax.f32 %v582_v0, 0.0 }
 0x15b   : > { %v3705_v12 = vmax.f32 %v540_v54, 0.0 }
 0x15c   : > { %1529 = vmin.xlane.f32.xlu2 %v3674_v47  ;;  %1513 = vmin.xlane.f32.xlu0 %v3679_v51  ;;  %v713_v57 = vmin.f32 %v3683_v55, %v710_v56 }
 0x15d   : > { %1515 = vmin.xlane.f32.xlu1 %v3681_v53  ;;  %v687_v45 = vmin.f32 %v3643_v23, %v3705_v12 }
 0x15e   : > { %v700_v62 = vmin.f32 %v713_v57, %v3681_v53 }
 0x161   : > { %v606_v58 = vpop.f32.mrf.mxu3  ;;  %v585_v24 = vpop.f32.mrf.mxu2 }
 0x162   : > { %v3692_v60 = vmax.f32 %v606_v58, 0.0  ;;  %v543_v61 = vpop.f32.mrf.mxu0  ;;  %v3719_v28 = vmax.f32 %v585_v24, 0.0 }
 0x163   : > { %v3695_v63 = vmax.f32 %v543_v61, 0.0  ;;  %v650_v61 = vlaneseq }
 0x164   : > { %1531 = vmin.xlane.f32.xlu0 %v3683_v55  ;;  %1487 = vmin.xlane.f32.xlu2 %v3690_v59  ;;  %v704_v1 = vmin.f32 %v700_v62, %v3692_v60  ;;  %5792 = vst [vmem:[#allocation8_spill] sm:$0xff] %v3719_v28 }
 0x165   : > { %5790 = vst [vmem:[#allocation6_spill] sm:$0xff] %v3695_v63  ;;  %v688_v2 = vmin.f32 %v3664_v40, %v3695_v63  ;;  %1533 = vmin.xlane.f32.xlu1 %v3692_v60  ;;  %v3745_v0 = vshrl.u32 %v650_v61, 7 }
 0x167   : > { %v708_v5 = vmin.f32 %v704_v1, %v688_v2  ;;  %v3748_v2 = vadd.s32 88, %v3745_v0  ;;  %v3768_v24 = vadd.s32 128, %v3745_v0 }
 0x169   : > { %v609_v9 = vpop.f32.mrf.mxu3  ;;  %v712_v15 = vmin.f32 %v708_v5, %v3703_v6  ;;  %v3751_v5 = vadd.s32 120, %v3745_v0 }
 0x16a   : > { %v546_v13 = vpop.f32.mrf.mxu0  ;;  %v3710_v18 = vmax.f32 %v609_v9, 0.0  ;;  %v3754_v9 = vadd.s32 176, %v3745_v0 }
 0x16b   : > { %v3712_v20 = vmax.f32 %v546_v13, 0.0  ;;  %v3757_v13 = vadd.s32 8, %v3745_v0 }
 0x16c   : > { %1517 = vmin.xlane.f32.xlu2 %v3703_v6  ;;  %1489 = vmin.xlane.f32.xlu0 %v3705_v12  ;;  %v695_v25 = vmin.f32 %v3710_v18, %v712_v15  ;;  %v3762_v15 = vadd.s32 96, %v3745_v0 }
 0x16d   : > { %5791 = vst [vmem:[#allocation7_spill] sm:$0xff] %v3712_v20  ;;  %v689_v21 = vmin.f32 %v685_v14, %v3712_v20  ;;  %1491 = vmin.xlane.f32.xlu1 %v3695_v63 }
 0x16e   : > { %5795 = vst [vmem:[#allocation11_spill] sm:$0xff] %v3757_v13 }
 0x16f   : > { %v699_v27 = vmin.f32 %v695_v25, %v689_v21  ;;  %v3765_v21 = vadd.s32 184, %v3745_v0  ;;  %v3771_v25 = vadd.s32 192, %v3745_v0 }
 0x171   : > { %v612_v29 = vpop.f32.mrf.mxu3  ;;  %v703_v37 = vmin.f32 %v699_v27, %v3719_v28  ;;  %v3774_v27 = vadd.s32 24, %v3745_v0 }
 0x172   : > { %v549_v31 = vpop.f32.mrf.mxu0  ;;  %v3721_v32 = vmax.f32 %v612_v29, 0.0  ;;  %v3777_v29 = vadd.s32 104, %v3745_v0 }
 0x173   : > { %v3723_v33 = vmax.f32 %v549_v31, 0.0  ;;  %5796 = vst [vmem:[#allocation12_spill] sm:$0xff] %v3774_v27  ;;  %v3780_v31 = vadd.s32 136, %v3745_v0 }
 0x174   : > { %1535 = vmin.xlane.f32.xlu2 %v3710_v18  ;;  %1519 = vmin.xlane.f32.xlu0 %v3719_v28  ;;  %v707_v39 = vmin.f32 %v703_v37, %v3721_v32  ;;  %v3786_v37 = vadd.s32 32, %v3745_v0 }
 0x175   : > { %5793 = vst [vmem:[#allocation9_spill] sm:$0xff] %v3723_v33  ;;  %1537 = vmin.xlane.f32.xlu1 %v3721_v32  ;;  %v690_v38 = vmin.f32 %v686_v35, %v3723_v33  ;;  %v3783_v35 = vadd.s32 200, %v3745_v0 }
 0x176   : > { %5797 = vst [vmem:[#allocation13_spill] sm:$0xff] %v3786_v37 }
 0x177   : > { %v711_v48 = vmin.f32 %v707_v39, %v690_v38  ;;  %v3789_v38 = vadd.s32 112, %v3745_v0  ;;  %v3792_v39 = vadd.s32 208, %v3745_v0 }
 0x179   : > { %v615_v41 = vpop.f32.mrf.mxu3  ;;  %5798 = vst [vmem:[#allocation14_spill] sm:$0xff] %v3792_v39 }
 0x17a   : > { %v3733_v42 = vmax.f32 %v615_v41, 0.0  ;;  %v552_v44 = vpop.f32.mrf.mxu0  ;;  %v3795_v41 = vadd.s32 40, %v3745_v0 }
 0x17b   : > { %v3737_v49 = vmax.f32 %v552_v44, 0.0  ;;  %v3798_v44 = vadd.s32 144, %v3745_v0 }
 0x17c   : > { %5794 = vst [vmem:[#allocation10_spill] sm:$0xff] %v3733_v42  ;;  %1493 = vmin.xlane.f32.xlu2 %v3712_v20  ;;  %1495 = vmin.xlane.f32.xlu0 %v3723_v33  ;;  %v714_v50 = vmin.f32 %v711_v48, %v3733_v42  ;;  %v3816_v48 = vadd.s32 216, %v3745_v0 }
 0x17d   : > { %v691_v52 = vmin.f32 %v687_v45, %v3737_v49  ;;  %1497 = vmin.xlane.f32.xlu1 %v3737_v49  ;;  %5799 = vst [vmem:[#allocation15_spill] sm:$0xff] %v3795_v41  ;;  %v3801_v45 = vadd.s32 56, %v3745_v0 }
 0x17f   : > { %v715_v54 = vmin.f32 %v691_v52, %v714_v50  ;;  %5800 = vst [vmem:[#allocation16_spill] sm:$0xff] %v3801_v45  ;;  %v3819_v50 = vadd.s32 152, %v3745_v0  ;;  %v3822_v52 = vadd.s32 224, %v3745_v0 }
 0x181   : > { %v716_v56 = vrot.slane %v715_v54, 4 }
 0x183   : > { %v717_v57 = vmin.f32 %v715_v54, %v716_v56  ;;  %v3825_v54 = vadd.s32 64, %v3745_v0  ;;  %v3828_v56 = vadd.s32 72, %v3745_v0 }
 0x184   : > { %1539 = vmin.xlane.f32.xlu0 %v3733_v42 }
 0x185   : > { %v718_v58 = vrot.slane %v717_v57, 2  ;;  %5801 = vst [vmem:[#allocation17_spill] sm:$0xff] %v3825_v54 }
 0x187   : > { %v719_v62 = vmin.f32 %v717_v57, %v718_v58 }
 0x189   : > { %v720_v1 = vrot.slane %v719_v62, 1 }
 0x18b   : > { %v3759_v14 = vmin.f32 %v719_v62, %v720_v1 }
 0x18d   : > { %vm722_vm2 = vcmp.le.f32.partialorder %v3617_v3, %v3759_v14  ;;  %vm723_vm3 = vcmp.le.f32.partialorder %v3641_v22, %v3759_v14  ;;  %vm725_vm4 = vcmp.le.f32.partialorder %v3664_v40, %v3759_v14  ;;  %vm726_vm5 = vcmp.le.f32.partialorder %v3670_v46, %v3759_v14 }
 0x18e   : > { %vm727_vm6 = vcmp.le.f32.partialorder %v3690_v59, %v3759_v14  ;;  %vm729_vm7 = vcmp.le.f32.partialorder %v3695_v63, %v3759_v14  ;;  %vm730_vm8 = vcmp.le.f32.partialorder %v3712_v20, %v3759_v14  ;;  %v754_v57 = vsel %vm722_vm2, %v3745_v0, 256 }
 0x18f   : > { %v755_v58 = vsel %vm723_vm3, %v3757_v13, 256  ;;  %v757_v62 = vsel %vm725_vm4, %v3774_v27, 256  ;;  %v758_v1 = vsel %vm726_vm5, %v3786_v37, 256  ;;  %v759_v10 = vsel %vm727_vm6, %v3795_v41, 256 }
 0x190   : > { %v761_v11 = vsel %vm729_vm7, %v3801_v45, 256  ;;  %v3839_v63 = vadd.s32 160, %v3745_v0  ;;  %v3842_v59 = vadd.s32 232, %v3745_v0  ;;  %v3845_v20 = vadd.s32 168, %v3745_v0 }
 0x191   : > { %vm731_vm9 = vcmp.le.f32.partialorder %v3723_v33, %v3759_v14  ;;  %v3850_v40 = vadd.s32 240, %v3745_v0  ;;  %v3853_v46 = vadd.s32 248, %v3745_v0  ;;  %vm733_vm10 = vcmp.le.f32.partialorder %v3619_v4, %v3759_v14 }
 0x192   : > { %vm734_vm11 = vcmp.le.f32.partialorder %v3631_v16, %v3759_v14  ;;  %v762_v45 = vsel %vm730_vm8, %v3825_v54, 256  ;;  %vm786_vm12 = vcmp.lt.s32.totalorder %v754_v57, %v758_v1  ;;  %vm788_vm13 = vcmp.lt.s32.totalorder %v755_v58, %v759_v10 }
 0x193   : > { %5802 = vst [vmem:[#allocation18_spill] sm:$0xff] %v3850_v40  ;;  %vm792_vm14 = vcmp.lt.s32.totalorder %v757_v62, %v761_v11  ;;  %v763_v37 = vsel %vm731_vm9, %v3828_v56, 256  ;;  %v787_v33 = vsel %vm786_vm12, %v754_v57, %v758_v1  ;;  %v789_v41 = vsel %vm788_vm13, %v755_v58, %v759_v10 }
 0x194   : > { %5803 = vst [vmem:[#allocation19_spill] sm:$0xff] %v3853_v46  ;;  %v793_v27 = vsel %vm792_vm14, %v757_v62, %v761_v11  ;;  %vm735_vm15 = vcmp.le.f32.partialorder %v3646_v26, %v3759_v14  ;;  %vm794_vm0 = vcmp.lt.s32.totalorder %v787_v33, %v762_v45  ;;  %vm796_vm1 = vcmp.lt.s32.totalorder %v789_v41, %v763_v37 }
 0x195   : > { %v3863_v13 = vand.u32 127, %v650_v61  ;;  %v3866_v40 = vadd.s32 80, %v3745_v0  ;;  %v765_v54 = vsel %vm733_vm10, %v3748_v2, 256  ;;  %v795_v39 = vsel %vm794_vm0, %v787_v33, %v762_v45 }
 0x196   : > { %v797_v46 = vsel %vm796_vm1, %v789_v41, %v763_v37  ;;  %vm737_vm2 = vcmp.le.f32.partialorder %v3623_v7, %v3759_v14  ;;  %v766_v10 = vsel %vm734_vm11, %v3762_v15, 256  ;;  %vm800_vm3 = vcmp.lt.s32.totalorder %v793_v27, %v765_v54 }
 0x197   : > { %v3880_v57 = vadd.s32 16, %v3745_v0  ;;  %v767_v58 = vsel %vm735_vm15, %v3777_v29, 256  ;;  %vm802_vm6 = vcmp.lt.s32.totalorder %v795_v39, %v766_v10  ;;  %vm732_vm7 = vcmp.le.f32.partialorder %v3737_v49, %v3759_v14 }
 0x198   : > { %vm804_vm8 = vcmp.lt.s32.totalorder %v797_v46, %v767_v58  ;;  %v3893_v37 = vadd.s32 48, %v3745_v0  ;;  %vm738_vm9 = vcmp.le.f32.partialorder %v3635_v19, %v3759_v14  ;;  %vm739_vm10 = vcmp.le.f32.partialorder %v3656_v34, %v3759_v14 }
 0x199   : > { %v769_v41 = vsel %vm737_vm2, %v3751_v5, 256  ;;  %v803_v45 = vsel %vm802_vm6, %v795_v39, %v766_v10  ;;  %vm724_vm11 = vcmp.le.f32.partialorder %v3643_v23, %v3759_v14  ;;  %v805_v1 = vsel %vm804_vm8, %v797_v46, %v767_v58 }
 0x19a   : > { %vm728_vm12 = vcmp.le.f32.partialorder %v3705_v12, %v3759_v14  ;;  %vm736_vm13 = vcmp.le.f32.partialorder %v3667_v43, %v3759_v14  ;;  %v770_v39 = vsel %vm738_vm9, %v3768_v24, 256  ;;  %vm741_vm15 = vcmp.le.f32.partialorder %v3681_v53, %v3759_v14 }
 0x19b   : > { %v771_v46 = vsel %vm739_vm10, %v3780_v31, 256  ;;  %vm810_vm0 = vcmp.lt.s32.totalorder %v803_v45, %v770_v39  ;;  %vm745_vm6 = vcmp.le.f32.partialorder %v3633_v17, %v3759_v14  ;;  %vm746_vm10 = vcmp.le.f32.partialorder %v3651_v30, %v3759_v14 }
 0x19c   : > { %vm812_vm2 = vcmp.lt.s32.totalorder %v805_v1, %v771_v46 }
 0x1a0   : > { %v3875_v11 = vpop.xlane.xlu2 %1499  ;;  %v3877_v61 = vpop.xlane.xlu1 %1477 }
 0x1a1   : > { %5804 = vst [vmem:[#allocation20_spill] sm:$0xff] %v3875_v11  ;;  %vm1552_vm4 = vcmp.le.f32.partialorder %v3619_v4, %v3875_v11  ;;  %vm1541_vm5 = vcmp.le.f32.partialorder %v3617_v3, %v3877_v61  ;;  %v801_v4 = vsel %vm800_vm3, %v793_v27, %v765_v54  ;;  %v3918_v27 = vsel %vm732_vm7, %v3866_v40, 256 }
 0x1a2   : > { %5805 = vst [vmem:[#allocation21_spill] sm:$0xff] %v3877_v61  ;;  %v3890_v33 = vsel %vm1541_vm5, %v3863_v13, 128  ;;  %v3905_v62 = vsel %vm1552_vm4, %v3863_v13, 128  ;;  %vm808_vm14 = vcmp.lt.s32.totalorder %v801_v4, %v769_v41  ;;  %vm742_vm3 = vcmp.le.f32.partialorder %v3703_v6, %v3759_v14 }
 0x1a3   : > { %5806 = vst [vmem:[#allocation22_spill] sm:$0xff] %v3890_v33  ;;  %v1606_v3 = vshra.s32 %v3890_v33, 16  ;;  %v1760_v11 = vshra.s32 %v3905_v62, 16  ;;  %v760_v33 = vsel %vm728_vm12, %v3893_v37, 256  ;;  %vm743_vm5 = vcmp.le.f32.partialorder %v3719_v28, %v3759_v14 }
 0x1a4   : > { %5807 = vst [vmem:[#allocation23_spill] sm:$0xff] %v3905_v62  ;;  %vm740_vm7 = vcmp.le.f32.partialorder %v3679_v51, %v3759_v14 }
 0x1a5   : > { %v3909_v61 = vcvt.s32.f32 %v1606_v3  ;;  %v3932_v10 = vcvt.s32.f32 %v1760_v11  ;;  %v756_v3 = vsel %vm724_vm11, %v3880_v57, 256  ;;  %v811_v11 = vsel %vm810_vm0, %v803_v45, %v770_v39 }
 0x1a6   : > { %vm790_vm8 = vcmp.lt.s32.totalorder %v756_v3, %v760_v33  ;;  %vm747_vm11 = vcmp.le.f32.partialorder %v3658_v36, %v3759_v14  ;;  %v775_v39 = vsel %vm743_vm5, %v3845_v20, 256  ;;  %vm750_vm0 = vcmp.le.f32.partialorder %v3692_v60, %v3759_v14 }
 0x1a7   : > { %5808 = vst [vmem:[#allocation24_spill] sm:$0xff] %v3909_v61  ;;  %v3929_v54 = vpop.xlane.xlu0 %1507  ;;  %1609 = vmin.xlane.f32.xlu0 %v3909_v61  ;;  %v809_v61 = vsel %vm808_vm14, %v801_v4, %v769_v41  ;;  %1763 = vmin.xlane.f32.xlu1 %v3932_v10  ;;  %v773_v4 = vsel %vm741_vm15, %v3819_v50, 256  ;;  %v813_v41 = vsel %vm812_vm2, %v805_v1, %v771_v46 }
 0x1a8   : > { %5809 = vst [vmem:[#allocation25_spill] sm:$0xff] %v3929_v54  ;;  %vm1556_vm1 = vcmp.le.f32.partialorder %v3623_v7, %v3929_v54  ;;  %v3936_v58 = vpop.xlane.xlu1 %1521  ;;  %vm816_vm9 = vcmp.lt.s32.totalorder %v809_v61, %v773_v4  ;;  %vm749_vm14 = vcmp.le.f32.partialorder %v3683_v55, %v3759_v14  ;;  %vm820_vm15 = vcmp.lt.s32.totalorder %v813_v41, %v775_v39 }
 0x1a9   : > { %5810 = vst [vmem:[#allocation26_spill] sm:$0xff] %v3932_v10  ;;  %vm1563_vm4 = vcmp.le.f32.partialorder %v3625_v8, %v3936_v58  ;;  %v3949_v7 = vsel %vm1556_vm1, %v3863_v13, 128  ;;  %v774_v10 = vsel %vm742_vm3, %v3839_v63, 256  ;;  %v791_v46 = vsel %vm790_vm8, %v756_v3, %v760_v33 }
 0x1aa   : > { %5811 = vst [vmem:[#allocation27_spill] sm:$0xff] %v3936_v58  ;;  %v1816_v54 = vshra.s32 %v3949_v7, 16  ;;  %v3963_v58 = vsel %vm1563_vm4, %v3863_v13, 128  ;;  %vm818_vm12 = vcmp.lt.s32.totalorder %v811_v11, %v774_v10  ;;  %vm744_vm3 = vcmp.le.f32.partialorder %v3625_v8, %v3759_v14 }
 0x1ab   : > { %5812 = vst [vmem:[#allocation28_spill] sm:$0xff] %v3949_v7  ;;  %v1914_v45 = vshra.s32 %v3963_v58, 16  ;;  %v817_v7 = vsel %vm816_vm9, %v809_v61, %v773_v4  ;;  %v821_v61 = vsel %vm820_vm15, %v813_v41, %v775_v39  ;;  %vm748_vm9 = vcmp.le.f32.partialorder %v3674_v47, %v3759_v14 }
 0x1ac   : > { %5813 = vst [vmem:[#allocation29_spill] sm:$0xff] %v3963_v58  ;;  %v3966_v62 = vcvt.s32.f32 %v1816_v54  ;;  %v768_v54 = vsel %vm736_vm13, %v3789_v38, 256  ;;  %v777_v58 = vsel %vm745_vm6, %v3765_v21, 256  ;;  %vm798_vm13 = vcmp.lt.s32.totalorder %v791_v46, %v3918_v27 }
 0x1ad   : > { %v3977_v1 = vcvt.s32.f32 %v1914_v45  ;;  %v819_v45 = vsel %vm818_vm12, %v811_v11, %v774_v10  ;;  %vm824_vm5 = vcmp.lt.s32.totalorder %v817_v7, %v777_v58  ;;  %v799_v41 = vsel %vm798_vm13, %v791_v46, %v3918_v27 }
 0x1ae   : > { %5814 = vst [vmem:[#allocation30_spill] sm:$0xff] %v3966_v62  ;;  %1819 = vmin.xlane.f32.xlu2 %v3966_v62  ;;  %vm753_vm12 = vcmp.le.f32.partialorder %v3733_v42, %v3759_v14  ;;  %v772_v27 = vsel %vm740_vm7, %v3798_v44, 256 }
 0x1af   : > { %5815 = vst [vmem:[#allocation31_spill] sm:$0xff] %v3977_v1  ;;  %v3989_v28 = vpop.xlane.xlu2 %1523  ;;  %v3991_v62 = vpop.xlane.xlu0 %1501  ;;  %1917 = vmin.xlane.f32.xlu0 %v3977_v1 }
 0x1b0   : > { %5816 = vst [vmem:[#allocation32_spill] sm:$0xff] %v3989_v28  ;;  %vm1564_vm1 = vcmp.le.f32.partialorder %v3633_v17, %v3989_v28  ;;  %vm1553_vm2 = vcmp.le.f32.partialorder %v3631_v16, %v3991_v62  ;;  %v3998_v33 = vpop.xlane.xlu1 %1509  ;;  %v778_v16 = vsel %vm746_vm10, %v3771_v25, 256  ;;  %vm751_vm10 = vcmp.le.f32.partialorder %v3710_v18, %v3759_v14 }
 0x1b1   : > { %5817 = vst [vmem:[#allocation33_spill] sm:$0xff] %v3991_v62  ;;  %vm1557_vm4 = vcmp.le.f32.partialorder %v3635_v19, %v3998_v33  ;;  %v4007_v10 = vsel %vm1553_vm2, %v3863_v13, 128  ;;  %v4010_v17 = vsel %vm1564_vm1, %v3863_v13, 128  ;;  %v779_v19 = vsel %vm747_vm11, %v3783_v35, 256 }
 0x1b2   : > { %5818 = vst [vmem:[#allocation34_spill] sm:$0xff] %v3998_v33  ;;  %v1774_v3 = vshra.s32 %v4007_v10, 16  ;;  %v1928_v11 = vshra.s32 %v4010_v17, 16  ;;  %vm826_vm6 = vcmp.lt.s32.totalorder %v819_v45, %v778_v16  ;;  %v4023_v4 = vsel %vm1557_vm4, %v3863_v13, 128 }
 0x1b3   : > { %5819 = vst [vmem:[#allocation35_spill] sm:$0xff] %v4007_v10  ;;  %vm828_vm8 = vcmp.lt.s32.totalorder %v821_v61, %v779_v19  ;;  %v1830_v62 = vshra.s32 %v4023_v4, 16  ;;  %v825_v28 = vsel %vm824_vm5, %v817_v7, %v777_v58  ;;  %vm806_vm11 = vcmp.lt.s32.totalorder %v799_v41, %v768_v54 }
 0x1b4   : > { %5820 = vst [vmem:[#allocation36_spill] sm:$0xff] %v4010_v17  ;;  %v4026_v39 = vcvt.s32.f32 %v1774_v3  ;;  %v4028_v33 = vcvt.s32.f32 %v1928_v11  ;;  %v807_v3 = vsel %vm806_vm11, %v799_v41, %v768_v54  ;;  %v781_v58 = vsel %vm749_vm14, %v3816_v48, 256 }
 0x1b5   : > { %5821 = vst [vmem:[#allocation37_spill] sm:$0xff] %v4023_v4  ;;  %v4043_v46 = vcvt.s32.f32 %v1830_v62  ;;  %v782_v7 = vsel %vm750_vm0, %v3822_v52, 256  ;;  %v827_v11 = vsel %vm826_vm6, %v819_v45, %v778_v16  ;;  %v829_v4 = vsel %vm828_vm8, %v821_v61, %v779_v19 }
 0x1b6   : > { %5822 = vst [vmem:[#allocation38_spill] sm:$0xff] %v4026_v39  ;;  %1777 = vmin.xlane.f32.xlu2 %v4026_v39  ;;  %1931 = vmin.xlane.f32.xlu1 %v4028_v33  ;;  %vm832_vm7 = vcmp.lt.s32.totalorder %v825_v28, %v781_v58  ;;  %vm814_vm0 = vcmp.lt.s32.totalorder %v807_v3, %v772_v27  ;;  %v783_v54 = vsel %vm751_vm10, %v3842_v59, 256  ;;  %v776_v41 = vsel %vm744_vm3, %v3754_v9, 256 }
 0x1b7   : > { %5823 = vst [vmem:[#allocation39_spill] sm:$0xff] %v4028_v33  ;;  %v4055_v1 = vpop.xlane.xlu0 %1479  ;;  %v4057_v33 = vpop.xlane.xlu2 %1481  ;;  %1833 = vmin.xlane.f32.xlu0 %v4043_v46  ;;  %vm834_vm2 = vcmp.lt.s32.totalorder %v827_v11, %v782_v7  ;;  %vm836_vm13 = vcmp.lt.s32.totalorder %v829_v4, %v783_v54  ;;  %vm752_vm4 = vcmp.le.f32.partialorder %v3721_v32, %v3759_v14  ;;  %v953_v39 = vmul.f32 -70.0, %v3759_v14 }
 0x1b8   : > { %5824 = vst [vmem:[#allocation40_spill] sm:$0xff] %v4043_v46  ;;  %vm1542_vm15 = vcmp.le.f32.partialorder %v3641_v22, %v4055_v1  ;;  %vm1543_vm14 = vcmp.le.f32.partialorder %v3643_v23, %v4057_v33  ;;  %v4064_v62 = vpop.xlane.xlu1 %1503  ;;  %v833_v16 = vsel %vm832_vm7, %v825_v28, %v781_v58  ;;  %v835_v58 = vsel %vm834_vm2, %v827_v11, %v782_v7  ;;  %v5836_v7 = vld [vmem:[#allocation18_spill] sm:$0xff] }
 0x1b9   : > { %5825 = vst [vmem:[#allocation41_spill] sm:$0xff] %v4055_v1  ;;  %vm1554_vm1 = vcmp.le.f32.partialorder %v3646_v26, %v4064_v62  ;;  %v4073_v45 = vsel %vm1542_vm15, %v3863_v13, 128  ;;  %v4076_v22 = vsel %vm1543_vm14, %v3863_v13, 128  ;;  %v815_v26 = vsel %vm814_vm0, %v807_v3, %v772_v27  ;;  %v5834_v27 = vld [vmem:[#allocation14_spill] sm:$0xff] }
 0x1ba   : > { %5826 = vst [vmem:[#allocation42_spill] sm:$0xff] %v4057_v33  ;;  %v1620_v23 = vshra.s32 %v4073_v45, 16  ;;  %v1634_v61 = vshra.s32 %v4076_v22, 16  ;;  %v4083_v19 = vsel %vm1554_vm1, %v3863_v13, 128  ;;  %v837_v46 = vsel %vm836_vm13, %v829_v4, %v783_v54 }
 0x1bb   : > { %5827 = vst [vmem:[#allocation43_spill] sm:$0xff] %v4064_v62  ;;  %v1788_v1 = vshra.s32 %v4083_v19, 16  ;;  %vm822_vm5 = vcmp.lt.s32.totalorder %v815_v26, %v776_v41  ;;  %v780_v8 = vsel %vm748_vm9, %v5834_v27, 256  ;;  %vm842_vm8 = vcmp.lt.s32.totalorder %v835_v58, %v837_v46 }
 0x1bc   : > { %5828 = vst [vmem:[#allocation44_spill] sm:$0xff] %v4073_v45  ;;  %v4089_v62 = vcvt.s32.f32 %v1620_v23  ;;  %v4091_v33 = vcvt.s32.f32 %v1634_v61  ;;  %v5833_v45 = vld [vmem:[#allocation19_spill] sm:$0xff]  ;;  %v823_v23 = vsel %vm822_vm5, %v815_v26, %v776_v41  ;;  %v784_v4 = vsel %vm752_vm4, %v5836_v7, 256 }
 0x1bd   : > { %5829 = vst [vmem:[#allocation45_spill] sm:$0xff] %v4076_v22  ;;  %v785_v28 = vsel %vm753_vm12, %v5833_v45, 256  ;;  %v4104_v3 = vcvt.s32.f32 %v1788_v1  ;;  %vm830_vm6 = vcmp.lt.s32.totalorder %v823_v23, %v780_v8  ;;  %v843_v61 = vsel %vm842_vm8, %v835_v58, %v837_v46  ;;  %v5838_v46 = vld [vmem:[#allocation11_spill] sm:$0xff] }
 0x1be   : > { %5830 = vst [vmem:[#allocation46_spill] sm:$0xff] %v4083_v19  ;;  %vm840_vm3 = vcmp.lt.s32.totalorder %v833_v16, %v785_v28  ;;  %1623 = vmin.xlane.f32.xlu2 %v4089_v62  ;;  %1637 = vmin.xlane.f32.xlu1 %v4091_v33  ;;  %v831_v54 = vsel %vm830_vm6, %v823_v23, %v780_v8 }
 0x1bf   : > { %5831 = vst [vmem:[#allocation47_spill] sm:$0xff] %v4089_v62  ;;  %1791 = vmin.xlane.f32.xlu0 %v4104_v3  ;;  %v841_v11 = vsel %vm840_vm3, %v833_v16, %v785_v28  ;;  %vm838_vm9 = vcmp.lt.s32.totalorder %v831_v54, %v784_v4  ;;  %v4114_v16 = vpop.xlane.xlu0 %1525 }
 0x1c0   : > { %5832 = vst [vmem:[#allocation48_spill] sm:$0xff] %v4091_v33  ;;  %v839_v22 = vsel %vm838_vm9, %v831_v54, %v784_v4 }
 0x1c1   : > { %5835 = vst [vmem:[#allocation19_spill] sm:$0xff] %v4104_v3  ;;  %vm844_vm10 = vcmp.lt.s32.totalorder %v839_v22, %v841_v11 }
 0x1c2   : > { %v845_v62 = vsel %vm844_vm10, %v839_v22, %v841_v11  ;;  %5837 = vst [vmem:[#allocation14_spill] sm:$0xff] %v4114_v16  ;;  %v5845_v11 = vld [vmem:[#allocation13_spill] sm:$0xff] }
 0x1c3   : > { %vm846_vm11 = vcmp.lt.s32.totalorder %v843_v61, %v845_v62 }
 0x1c4   : > { %v847_v1 = vsel %vm846_vm11, %v843_v61, %v845_v62  ;;  %v5839_v62 = vmov 0.0   ;;  %v5847_v61 = vld [vmem:[#allocation17_spill] sm:$0xff] }
 0x1c5   : > { %v848_v33 = vrot.slane %v847_v1, 4 }
 0x1c7   : > { %vm849_vm12 = vcmp.lt.s32.totalorder %v847_v1, %v848_v33  ;;  %v4150_v8 = vpop.xlane.xlu0 %1483 }
 0x1c8   : > { %v850_v26 = vsel %vm849_vm12, %v847_v1, %v848_v33  ;;  %v954_v33 = vmul.f32 1.442695, %v953_v39  ;;  %5842 = vst [vmem:[#allocation18_spill] sm:$0xff] %v4150_v8 }
 0x1c9   : > { %v851_v41 = vrot.slane %v850_v26, 2 }
 0x1ca   : > { %3024 = vpow2.f32 %v954_v33  ;;  %v4230_v33 = vpop.xlane.xlu2 %1511 }
 0x1cb   : > { %vm852_vm7 = vcmp.lt.s32.totalorder %v850_v26, %v851_v41  ;;  %5851 = vst [vmem:[#allocation50_spill] sm:$0xff] %v4230_v33 }
 0x1cc   : > { %v853_v3 = vsel %vm852_vm7, %v850_v26, %v851_v41 }
 0x1cd   : > { %v854_v19 = vrot.slane %v853_v3, 1 }
 0x1cf   : > { %vm855_vm15 = vcmp.lt.s32.totalorder %v853_v3, %v854_v19 }
 0x1d0   : > { %v4112_v42 = vsel %vm855_vm15, %v853_v3, %v854_v19  ;;  %v4148_v58 = vpop.eup %3024 }
 0x1d1   : > { %vm859_vm14 = vcmp.eq.s32.totalorder %v3880_v57, %v4112_v42  ;;  %vm857_vm0 = vcmp.eq.s32.totalorder %v3745_v0, %v4112_v42  ;;  %vm858_vm1 = vcmp.eq.s32.totalorder %v5838_v46, %v4112_v42  ;;  %vm863_vm2 = vcmp.eq.s32.totalorder %v3893_v37, %v4112_v42  ;;  %v5840_v0 = vld [vmem:[#allocation12_spill] sm:$0xff]  ;;  %v5841_v57 = vld [vmem:[#allocation15_spill] sm:$0xff] }
 0x1d2   : > { %v4123_v22 = vsel %vm859_vm14, 1.0, %v5839_v62  ;;  %v4126_v14 = vsel %vm857_vm0, 1.0, %v5839_v62  ;;  %v4131_v19 = vsel %vm858_vm1, 1.0, %v5839_v62  ;;  %vm860_vm13 = vcmp.eq.s32.totalorder %v5840_v0, %v4112_v42 }
 0x1d3   : > { %960 = vadd.xlane.f32.xlu1 %v4123_v22  ;;  %956 = vadd.xlane.f32.xlu2 %v4126_v14  ;;  %vm862_vm4 = vcmp.eq.s32.totalorder %v5841_v57, %v4112_v42  ;;  %v4141_v39 = vsel %vm863_vm2, 1.0, %v5839_v62  ;;  %v4144_v28 = vsel %vm860_vm13, 1.0, %v5839_v62  ;;  %vm872_vm5 = vcmp.eq.s32.totalorder %v3751_v5, %v4112_v42 }
 0x1d4   : > { %958 = vadd.xlane.f32.xlu0 %v4131_v19  ;;  %v4155_v37 = vsel %vm862_vm4, 1.0, %v5839_v62  ;;  %v4158_v3 = vsel %vm872_vm5, 1.0, %v5839_v62  ;;  %vm871_vm3 = vcmp.eq.s32.totalorder %v3789_v38, %v4112_v42  ;;  %vm875_vm6 = vcmp.eq.s32.totalorder %v3798_v44, %v4112_v42 }
 0x1d5   : > { %v4165_v5 = vmul.f32 %v4148_v58, %v4158_v3  ;;  %v4168_v23 = vsel %vm871_vm3, 1.0, %v5839_v62  ;;  %vm866_vm8 = vcmp.eq.s32.totalorder %v3828_v56, %v4112_v42  ;;  %v4179_v38 = vsel %vm875_vm6, 1.0, %v5839_v62 }
 0x1d6   : > { %v4176_v4 = vmul.f32 %v4148_v58, %v4168_v23  ;;  %vm861_vm9 = vcmp.eq.s32.totalorder %v5845_v11, %v4112_v42  ;;  %v4185_v54 = vmul.f32 %v4148_v58, %v4179_v38  ;;  %vm865_vm10 = vcmp.eq.s32.totalorder %v5847_v61, %v4112_v42 }
 0x1d7   : > { %5843 = vst [vmem:[#allocation11_spill] sm:$0xff] %v4165_v5  ;;  %vm874_vm11 = vcmp.eq.s32.totalorder %v3780_v31, %v4112_v42  ;;  %vm878_vm12 = vcmp.eq.s32.totalorder %v3845_v20, %v4112_v42  ;;  %vm873_vm7 = vcmp.eq.s32.totalorder %v3768_v24, %v4112_v42  ;;  %v4196_v44 = vsel %vm866_vm8, 1.0, %v5839_v62 }
 0x1d8   : > { %5844 = vst [vmem:[#allocation12_spill] sm:$0xff] %v4176_v4  ;;  %v4199_v56 = vsel %vm874_vm11, 1.0, %v5839_v62  ;;  %v4202_v1 = vsel %vm878_vm12, 1.0, %v5839_v62  ;;  %v4205_v26 = vsel %vm873_vm7, 1.0, %v5839_v62  ;;  %v2909_v31 = vsel %vm861_vm9, 1.0, %v5839_v62 }
 0x1d9   : > { %5846 = vst [vmem:[#allocation15_spill] sm:$0xff] %v4185_v54  ;;  %v4210_v20 = vmul.f32 %v4148_v58, %v4199_v56  ;;  %v4214_v24 = vmul.f32 %v4148_v58, %v4202_v1  ;;  %v4218_v41 = vmul.f32 %v4148_v58, %v4205_v26  ;;  %v4222_v46 = vsel %vm865_vm10, 1.0, %v5839_v62 }
 0x1da   : > { %vm877_vm15 = vcmp.eq.s32.totalorder %v3839_v63, %v4112_v42  ;;  %vm881_vm14 = vcmp.eq.s32.totalorder %v3771_v25, %v4112_v42  ;;  %vm876_vm0 = vcmp.eq.s32.totalorder %v3819_v50, %v4112_v42  ;;  %vm880_vm1 = vcmp.eq.s32.totalorder %v3765_v21, %v4112_v42  ;;  %v4244_v63 = vpop.xlane.xlu0 %1513  ;;  %v4246_v25 = vpop.xlane.xlu1 %1527 }
 0x1db   : > { %968 = vadd.xlane.f32.xlu1 %v4141_v39  ;;  %962 = vadd.xlane.f32.xlu2 %v4144_v28  ;;  %5848 = vst [vmem:[#allocation13_spill] sm:$0xff] %v4210_v20  ;;  %v4234_v0 = vsel %vm877_vm15, 1.0, %v5839_v62  ;;  %v4237_v57 = vsel %vm881_vm14, 1.0, %v5839_v62  ;;  %v4240_v11 = vsel %vm876_vm0, 1.0, %v5839_v62  ;;  %vm869_vm2 = vcmp.eq.s32.totalorder %v3762_v15, %v4112_v42 }
 0x1dc   : > { %966 = vadd.xlane.f32.xlu0 %v4155_v37  ;;  %5849 = vst [vmem:[#allocation17_spill] sm:$0xff] %v4214_v24  ;;  %v4252_v50 = vmul.f32 %v4148_v58, %v4234_v0  ;;  %v4256_v61 = vmul.f32 %v4148_v58, %v4237_v57  ;;  %v5856_v24 = vld [vmem:[#allocation16_spill] sm:$0xff]  ;;  %v4262_v21 = vmul.f32 %v4148_v58, %v4240_v11  ;;  %v4265_v54 = vsel %vm880_vm1, 1.0, %v5839_v62 }
 0x1dd   : > { %5850 = vst [vmem:[#allocation49_spill] sm:$0xff] %v4218_v41  ;;  %vm864_vm13 = vcmp.eq.s32.totalorder %v5856_v24, %v4112_v42  ;;  %vm868_vm4 = vcmp.eq.s32.totalorder %v3748_v2, %v4112_v42  ;;  %v4271_v15 = vmul.f32 %v4148_v58, %v4265_v54  ;;  %vm884_vm5 = vcmp.eq.s32.totalorder %v3816_v48, %v4112_v42  ;;  %v4315_v41 = vpop.xlane.xlu2 %1505 }
 0x1de   : > { %5852 = vst [vmem:[#allocation51_spill] sm:$0xff] %v4244_v63  ;;  %vm879_vm3 = vcmp.eq.s32.totalorder %v3754_v9, %v4112_v42  ;;  %v2917_v24 = vsel %vm869_vm2, 1.0, %v5839_v62  ;;  %vm883_vm6 = vcmp.eq.s32.totalorder %v5834_v27, %v4112_v42  ;;  %v2912_v2 = vsel %vm864_vm13, 1.0, %v5839_v62 }
 0x1df   : > { %5853 = vst [vmem:[#allocation52_spill] sm:$0xff] %v4246_v25  ;;  %v4296_v48 = vsel %vm883_vm6, 1.0, %v5839_v62  ;;  %vm887_vm8 = vcmp.eq.s32.totalorder %v5836_v7, %v4112_v42  ;;  %vm882_vm9 = vcmp.eq.s32.totalorder %v3783_v35, %v4112_v42  ;;  %vm886_vm10 = vcmp.eq.s32.totalorder %v3842_v59, %v4112_v42 }
 0x1e0   : > { %5854 = vst [vmem:[#allocation53_spill] sm:$0xff] %v4252_v50  ;;  %v4282_v50 = vsel %vm879_vm3, 1.0, %v5839_v62  ;;  %v4301_v27 = vmul.f32 %v4148_v58, %v4296_v48  ;;  %v4313_v20 = vmul.f32 %v4148_v58, %v4131_v19  ;;  %vm867_vm11 = vcmp.eq.s32.totalorder %v3866_v40, %v4112_v42 }
 0x1e1   : > { %5855 = vst [vmem:[#allocation54_spill] sm:$0xff] %v4256_v61  ;;  %v4279_v61 = vsel %vm884_vm5, 1.0, %v5839_v62  ;;  %v4293_v9 = vmul.f32 %v4148_v58, %v4282_v50  ;;  %v2934_v5 = vsel %vm886_vm10, 1.0, %v5839_v62  ;;  %vm885_vm12 = vcmp.eq.s32.totalorder %v3822_v52, %v4112_v42 }
 0x1e2   : > { %5857 = vst [vmem:[#allocation16_spill] sm:$0xff] %v4262_v21  ;;  %v2916_v21 = vsel %vm868_vm4, 1.0, %v5839_v62  ;;  %v4323_v35 = vpop.xlane.xlu0 %1531  ;;  %v4330_v59 = vpop.xlane.xlu1 %1485  ;;  %v4333_v19 = vmul.f32 %v4148_v58, %v2934_v5  ;;  %v1024_v40 = vmul.f32 %v4148_v58, %v2909_v31  ;;  %vm888_vm7 = vcmp.eq.s32.totalorder %v5833_v45, %v4112_v42 }
 0x1e3   : > { %974 = vadd.xlane.f32.xlu1 %v4196_v44  ;;  %964 = vadd.xlane.f32.xlu2 %v2909_v31  ;;  %5858 = vst [vmem:[#allocation55_spill] sm:$0xff] %v4271_v15  ;;  %v4289_v15 = vmul.f32 %v4148_v58, %v4279_v61  ;;  %v2915_v52 = vsel %vm867_vm11, 1.0, %v5839_v62  ;;  %v2936_v17 = vsel %vm888_vm7, 1.0, %v5839_v62  ;;  %v1027_v10 = vmul.f32 %v4148_v58, %v2912_v2 }
 0x1e4   : > { %972 = vadd.xlane.f32.xlu0 %v4222_v46  ;;  %5860 = vst [vmem:[#allocation57_spill] sm:$0xff] %v4293_v9  ;;  %v2930_v9 = vsel %vm882_vm9, 1.0, %v5839_v62  ;;  %v1022_v31 = vmul.f32 %v4148_v58, %v4123_v22  ;;  %v1026_v45 = vmul.f32 %v4148_v58, %v4141_v39  ;;  %vm870_vm15 = vcmp.eq.s32.totalorder %v3777_v29, %v4112_v42 }
 0x1e5   : > { %5859 = vst [vmem:[#allocation56_spill] sm:$0xff] %v4289_v15  ;;  %v2935_v15 = vsel %vm887_vm8, 1.0, %v5839_v62  ;;  %v4321_v7 = vmul.f32 %v4148_v58, %v2930_v9  ;;  %v2918_v39 = vsel %vm870_vm15, 1.0, %v5839_v62  ;;  %v4388_v29 = vmul.f32 %v4148_v58, %v4196_v44 }
 0x1e6   : > { %5861 = vst [vmem:[#allocation58_spill] sm:$0xff] %v4301_v27  ;;  %v4318_v27 = vmul.f32 %v4148_v58, %v2935_v15  ;;  %vm1558_vm14 = vcmp.le.f32.partialorder %v3656_v34, %v4230_v33  ;;  %vm1566_vm0 = vcmp.le.f32.partialorder %v3658_v36, %v4246_v25  ;;  %vm1555_vm1 = vcmp.le.f32.partialorder %v3667_v43, %v4315_v41  ;;  %v5895_v36 = vld [vmem:[#allocation4_spill] sm:$0xff] }
 0x1e7   : > { %5862 = vst [vmem:[#allocation59_spill] sm:$0xff] %v4315_v41  ;;  %vm1545_vm2 = vcmp.le.f32.partialorder %v5895_v36, %v4330_v59  ;;  %vm1565_vm13 = vcmp.le.f32.partialorder %v3651_v30, %v4114_v16  ;;  %vm1559_vm9 = vcmp.le.f32.partialorder %v3679_v51, %v4244_v63 }
 0x1e8   : > { %5863 = vst [vmem:[#allocation60_spill] sm:$0xff] %v4318_v27  ;;  %v2933_v27 = vsel %vm885_vm12, 1.0, %v5839_v62  ;;  %v4490_v36 = vsel %vm1565_vm13, %v3863_v13, 128  ;;  %vm1568_vm12 = vcmp.le.f32.partialorder %v3683_v55, %v4323_v35 }
 0x1e9   : > { %5864 = vst [vmem:[#allocation61_spill] sm:$0xff] %v4321_v7  ;;  %v1020_v7 = vmul.f32 %v4148_v58, %v4126_v14  ;;  %v4339_v4 = vmul.f32 %v4148_v58, %v2933_v27  ;;  %v4351_v14 = vmul.f32 %v4148_v58, %v2936_v17 }
 0x1ea   : > { %5865 = vst [vmem:[#allocation62_spill] sm:$0xff] %v4323_v35  ;;  %v4372_v22 = vpop.xlane.xlu1 %1515 }
 0x1eb   : > { %980 = vadd.xlane.f32.xlu1 %v2917_v24  ;;  %970 = vadd.xlane.f32.xlu2 %v2912_v2  ;;  %5866 = vst [vmem:[#allocation63_spill] sm:$0xff] %v4330_v59  ;;  %v4370_v2 = vpop.xlane.xlu0 %1489  ;;  %vm1560_vm5 = vcmp.le.f32.partialorder %v3681_v53, %v4372_v22  ;;  %v1942_v53 = vshra.s32 %v4490_v36, 16 }
 0x1ec   : > { %978 = vadd.xlane.f32.xlu0 %v2916_v21  ;;  %5867 = vst [vmem:[#allocation64_spill] sm:$0xff] %v4333_v19  ;;  %v1023_v19 = vmul.f32 %v4148_v58, %v4144_v28  ;;  %v4364_v28 = vmul.f32 %v4148_v58, %v4222_v46  ;;  %v4397_v46 = vmul.f32 %v4148_v58, %v2915_v52  ;;  %v4495_v30 = vsel %vm1560_vm5, %v3863_v13, 128 }
 0x1ed   : > { %5868 = vst [vmem:[#allocation65_spill] sm:$0xff] %v4339_v4  ;;  %v4360_v4 = vmul.f32 %v4148_v58, %v4155_v37  ;;  %v4515_v41 = vcvt.s32.f32 %v1942_v53 }
 0x1ee   : > { %5869 = vst [vmem:[#allocation66_spill] sm:$0xff] %v4351_v14  ;;  %v1872_v14 = vshra.s32 %v4495_v30, 16 }
 0x1ef   : > { %5871 = vst [vmem:[#allocation68_spill] sm:$0xff] %v4370_v2 }
 0x1f0   : > { %5872 = vst [vmem:[#allocation69_spill] sm:$0xff] %v4372_v22  ;;  %v5899_v22 = vld [vmem:[#allocation3_spill] sm:$0xff]  ;;  %v4517_v25 = vcvt.s32.f32 %v1872_v14 }
 0x1f1   : > { %5876 = vst [vmem:[#allocation73_spill] sm:$0xff] %v4388_v29  ;;  %vm1544_vm3 = vcmp.le.f32.partialorder %v5899_v22, %v4150_v8 }
 0x1f2   : > { %v4383_v42 = vpop.xlane.xlu1 %1533  ;;  %5879 = vst [vmem:[#allocation76_spill] sm:$0xff] %v4397_v46  ;;  %v4523_v16 = vsel %vm1544_vm3, %v3863_v13, 128 }
 0x1f3   : > { %986 = vadd.xlane.f32.xlu1 %v4158_v3  ;;  %976 = vadd.xlane.f32.xlu2 %v2915_v52  ;;  %v4368_v3 = vpop.xlane.xlu2 %1529  ;;  %5875 = vst [vmem:[#allocation72_spill] sm:$0xff] %v4383_v42  ;;  %vm1569_vm8 = vcmp.le.f32.partialorder %v3692_v60, %v4383_v42  ;;  %v1648_v14 = vshra.s32 %v4523_v16, 16 }
 0x1f4   : > { %984 = vadd.xlane.f32.xlu0 %v4168_v23  ;;  %5870 = vst [vmem:[#allocation67_spill] sm:$0xff] %v4368_v3  ;;  %v4379_v23 = vpop.xlane.xlu0 %1519  ;;  %vm1567_vm4 = vcmp.le.f32.partialorder %v3674_v47, %v4368_v3  ;;  %v4528_v22 = vsel %vm1569_vm8, %v3863_v13, 128 }
 0x1f5   : > { %5874 = vst [vmem:[#allocation71_spill] sm:$0xff] %v4379_v23  ;;  %v4548_v62 = vcvt.s32.f32 %v1648_v14 }
 0x1f6   : > { %5901 = vst [vmem:[#allocation3_spill] sm:$0xff] %v4523_v16 }
 0x1fb   : > { %992 = vadd.xlane.f32.xlu1 %v4179_v38  ;;  %982 = vadd.xlane.f32.xlu2 %v2918_v39  ;;  %v4377_v37 = vpop.xlane.xlu2 %1487  ;;  %v4391_v38 = vmul.f32 %v4148_v58, %v2917_v24 }
 0x1fc   : > { %990 = vadd.xlane.f32.xlu0 %v4199_v56  ;;  %5873 = vst [vmem:[#allocation70_spill] sm:$0xff] %v4377_v37  ;;  %v4394_v56 = vmul.f32 %v4148_v58, %v2916_v21  ;;  %v4407_v44 = vpop.xlane.xlu0 %1495 }
 0x1fd   : > { %5877 = vst [vmem:[#allocation74_spill] sm:$0xff] %v4391_v38  ;;  %v4589_v38 = vsel %vm1568_vm12, %v3863_v13, 128 }
 0x1fe   : > { %5878 = vst [vmem:[#allocation75_spill] sm:$0xff] %v4394_v56 }
 0x1ff   : > { %5882 = vst [vmem:[#allocation79_spill] sm:$0xff] %v4407_v44 }
 0x203   : > { %998 = vadd.xlane.f32.xlu1 %v4202_v1  ;;  %988 = vadd.xlane.f32.xlu2 %v4205_v26  ;;  %v4400_v1 = vmul.f32 %v4148_v58, %v2918_v39  ;;  %v4404_v26 = vpop.xlane.xlu2 %1517 }
 0x204   : > { %996 = vadd.xlane.f32.xlu0 %v4234_v0  ;;  %5881 = vst [vmem:[#allocation78_spill] sm:$0xff] %v4404_v26  ;;  %v4409_v0 = vpop.xlane.xlu1 %1491  ;;  %v4416_v21 = vpop.xlane.xlu0 %1539  ;;  %vm1561_vm10 = vcmp.le.f32.partialorder %v3703_v6, %v4404_v26 }
 0x205   : > { %5880 = vst [vmem:[#allocation77_spill] sm:$0xff] %v4400_v1  ;;  %v4553_v46 = vsel %vm1561_vm10, %v3863_v13, 128 }
 0x206   : > { %5883 = vst [vmem:[#allocation80_spill] sm:$0xff] %v4409_v0  ;;  %v1886_v6 = vshra.s32 %v4553_v46, 16 }
 0x207   : > { %5885 = vst [vmem:[#allocation82_spill] sm:$0xff] %v4416_v21 }
 0x208   : > { %v4579_v26 = vcvt.s32.f32 %v1886_v6 }
 0x20b   : > { %1004 = vadd.xlane.f32.xlu1 %v4237_v57  ;;  %994 = vadd.xlane.f32.xlu2 %v4240_v11  ;;  %v4414_v58 = vpop.xlane.xlu2 %1535 }
 0x20c   : > { %1002 = vadd.xlane.f32.xlu0 %v4265_v54  ;;  %5884 = vst [vmem:[#allocation81_spill] sm:$0xff] %v4414_v58  ;;  %v4418_v57 = vpop.xlane.xlu1 %1537  ;;  %vm1570_vm7 = vcmp.le.f32.partialorder %v3710_v18, %v4414_v58 }
 0x20d   : > { %5886 = vst [vmem:[#allocation83_spill] sm:$0xff] %v4418_v57  ;;  %vm1571_vm15 = vcmp.le.f32.partialorder %v3721_v32, %v4418_v57  ;;  %v4586_v56 = vsel %vm1570_vm7, %v3863_v13, 128  ;;  %v1984_v32 = vshra.s32 %v4589_v38, 16  ;;  %v5907_v57 = vld [vmem:[#allocation7_spill] sm:$0xff] }
 0x20e   : > { %v4594_v55 = vsel %vm1571_vm15, %v3863_v13, 128  ;;  %v2012_v18 = vshra.s32 %v4586_v56, 16 }
 0x20f   : > { %v4614_v29 = vcvt.s32.f32 %v1984_v32 }
 0x210   : > { %v4612_v35 = vcvt.s32.f32 %v2012_v18 }
 0x213   : > { %1010 = vadd.xlane.f32.xlu1 %v4279_v61  ;;  %1000 = vadd.xlane.f32.xlu2 %v4282_v50  ;;  %v4422_v11 = vpop.xlane.xlu2 %1493 }
 0x214   : > { %1008 = vadd.xlane.f32.xlu0 %v4296_v48  ;;  %5888 = vst [vmem:[#allocation85_spill] sm:$0xff] %v4422_v11  ;;  %v4424_v24 = vpop.xlane.xlu1 %1497 }
 0x215   : > { %5889 = vst [vmem:[#allocation86_spill] sm:$0xff] %v4424_v24 }
 0x21a   : > { %v4420_v54 = vpop.xlane.xlu0 %1609 }
 0x21b   : > { %1016 = vadd.xlane.f32.xlu1 %v2935_v15  ;;  %1006 = vadd.xlane.f32.xlu2 %v2930_v9  ;;  %5887 = vst [vmem:[#allocation84_spill] sm:$0xff] %v4420_v54  ;;  %v4442_v15 = vsel %vm1558_vm14, %v3863_v13, 128  ;;  %vm1547_vm14 = vcmp.le.f32.partialorder %v3705_v12, %v4370_v2 }
 0x21c   : > { %1014 = vadd.xlane.f32.xlu0 %v2934_v5  ;;  %v4431_v48 = vpop.xlane.xlu1 %1763  ;;  %v1844_v34 = vshra.s32 %v4442_v15, 16 }
 0x21d   : > { %5891 = vst [vmem:[#allocation88_spill] sm:$0xff] %v4431_v48 }
 0x221   : > { %v4427_v50 = vpop.xlane.xlu2 %1819 }
 0x222   : > { %v4429_v61 = vpop.xlane.xlu0 %1917 }
 0x223   : > { %1054 = vadd.xlane.f32.xlu1 %v4313_v20  ;;  %1012 = vadd.xlane.f32.xlu2 %v2933_v27  ;;  %5890 = vst [vmem:[#allocation87_spill] sm:$0xff] %v4429_v61 }
 0x224   : > { %1052 = vadd.xlane.f32.xlu0 %v1020_v7  ;;  %v4455_v7 = vcvt.s32.f32 %v1844_v34 }
 0x229   : > { %v4437_v5 = vpop.xlane.xlu2 %1777  ;;  %v4439_v20 = vpop.xlane.xlu1 %1931 }
 0x22a   : > { %5892 = vst [vmem:[#allocation89_spill] sm:$0xff] %v4437_v5  ;;  %v4444_v9 = vpop.xlane.xlu0 %1833 }
 0x22b   : > { %1060 = vadd.xlane.f32.xlu1 %v1024_v40  ;;  %1018 = vadd.xlane.f32.xlu2 %v2936_v17  ;;  %5893 = vst [vmem:[#allocation90_spill] sm:$0xff] %v4439_v20  ;;  %v4447_v17 = vsel %vm1566_vm0, %v3863_v13, 128  ;;  %v4465_v40 = vsel %vm1545_vm2, %v3863_v13, 128  ;;  %vm1549_vm0 = vcmp.le.f32.partialorder %v5907_v57, %v4422_v11  ;;  %v5912_v11 = vld [vmem:[#allocation8_spill] sm:$0xff] }
 0x22c   : > { %1058 = vadd.xlane.f32.xlu0 %v1023_v19  ;;  %5894 = vst [vmem:[#allocation91_spill] sm:$0xff] %v4444_v9  ;;  %v1956_v27 = vshra.s32 %v4447_v17, 16  ;;  %v4460_v19 = vsel %vm1555_vm1, %v3863_v13, 128  ;;  %v1662_v39 = vshra.s32 %v4465_v40, 16  ;;  %vm1551_vm1 = vcmp.le.f32.partialorder %v3737_v49, %v4424_v24 }
 0x22d   : > { %v4619_v54 = vsel %vm1549_vm0, %v3863_v13, 128  ;;  %v4622_v9 = vsel %vm1547_vm14, %v3863_v13, 128  ;;  %v4627_v12 = vsel %vm1551_vm1, %v3863_v13, 128  ;;  %vm1562_vm2 = vcmp.le.f32.partialorder %v5912_v11, %v4379_v23  ;;  %v5917_v11 = vld [vmem:[#allocation28_spill] sm:$0xff]  ;;  %v5918_v23 = vld [vmem:[#allocation23_spill] sm:$0xff] }
 0x22e   : > { %v4484_v34 = vcvt.s32.f32 %v1662_v39  ;;  %5909 = vst [vmem:[#allocation96_spill] sm:$0xff] %v4622_v9  ;;  %v1718_v49 = vshra.s32 %v4619_v54, 16  ;;  %v1690_v57 = vshra.s32 %v4622_v9, 16  ;;  %v1746_v24 = vshra.s32 %v4627_v12, 16 }
 0x230   : > { %v4647_v9 = vcvt.s32.f32 %v1746_v24 }
 0x231   : > { %v4468_v43 = vpop.xlane.xlu2 %1623  ;;  %v4470_v52 = vpop.xlane.xlu1 %1637 }
 0x232   : > { %5896 = vst [vmem:[#allocation4_spill] sm:$0xff] %v4468_v43  ;;  %v4556_v43 = vsel %vm1559_vm9, %v3863_v13, 128 }
 0x233   : > { %1066 = vadd.xlane.f32.xlu1 %v1027_v10  ;;  %1056 = vadd.xlane.f32.xlu2 %v1022_v31  ;;  %v4457_v10 = vcvt.s32.f32 %v1956_v27  ;;  %5897 = vst [vmem:[#allocation92_spill] sm:$0xff] %v4470_v52  ;;  %v4472_v31 = vpop.xlane.xlu0 %1791  ;;  %v4487_v27 = vsel %vm1567_vm4, %v3863_v13, 128  ;;  %v4643_v52 = vcvt.s32.f32 %v1718_v49 }
 0x234   : > { %1064 = vadd.xlane.f32.xlu0 %v1026_v45  ;;  %5898 = vst [vmem:[#allocation93_spill] sm:$0xff] %v4472_v31  ;;  %v1802_v45 = vshra.s32 %v4460_v19, 16  ;;  %v1970_v47 = vshra.s32 %v4487_v27, 16 }
 0x235   : > { %5915 = vst [vmem:[#allocation100_spill] sm:$0xff] %v4647_v9 }
 0x236   : > { %v4513_v59 = vcvt.s32.f32 %v1970_v47 }
 0x23b   : > { %1847 = vmin.xlane.f32.xlu1 %v4455_v7  ;;  %1062 = vadd.xlane.f32.xlu2 %v4360_v4  ;;  %v4482_v4 = vcvt.s32.f32 %v1802_v45 }
 0x23c   : > { %1959 = vmin.xlane.f32.xlu0 %v4457_v10 }
 0x243   : > { %1805 = vmin.xlane.f32.xlu1 %v4482_v4  ;;  %1068 = vadd.xlane.f32.xlu2 %v4364_v28  ;;  %v5900_v28 = vld [vmem:[#allocation5_spill] sm:$0xff] }
 0x244   : > { %1665 = vmin.xlane.f32.xlu0 %v4484_v34  ;;  %vm1546_vm6 = vcmp.le.f32.partialorder %v5900_v28, %v4377_v37  ;;  %v1998_v28 = vshra.s32 %v4528_v22, 16  ;;  %v5902_v37 = vld [vmem:[#allocation6_spill] sm:$0xff] }
 0x245   : > { %v4520_v33 = vsel %vm1546_vm6, %v3863_v13, 128  ;;  %vm1548_vm11 = vcmp.le.f32.partialorder %v5902_v37, %v4409_v0  ;;  %5904 = vst [vmem:[#allocation6_spill] sm:$0xff] %v4548_v62  ;;  %v1858_v37 = vshra.s32 %v4556_v43, 16 }
 0x246   : > { %v4500_v45 = vpop.xlane.xlu1 %960  ;;  %v4502_v39 = vpop.xlane.xlu2 %956  ;;  %v1676_v60 = vshra.s32 %v4520_v33, 16  ;;  %v4550_v1 = vcvt.s32.f32 %v1998_v28  ;;  %v4561_v51 = vsel %vm1548_vm11, %v3863_v13, 128 }
 0x247   : > { %v4509_v3 = vpop.xlane.xlu0 %958  ;;  %v1704_v28 = vshra.s32 %v4561_v51, 16  ;;  %v4581_v63 = vcvt.s32.f32 %v1858_v37  ;;  %v1116_v2 = vmax.f32 %v4502_v39, 1.0  ;;  %v1815_v39 = vand.u32 65535, %v5917_v11  ;;  %v5924_v11 = vld [vmem:[#allocation26_spill] sm:$0xff] }
 0x248   : > { %v4546_v8 = vcvt.s32.f32 %v1676_v60  ;;  %v1117_v18 = vmax.f32 %v4509_v3, 1.0  ;;  %v4650_v3 = vsel %vm1562_vm2, %v3863_v13, 128  ;;  %vm1765_vm5 = vcmp.eq.f32.partialorder %v5924_v11, %v4431_v48 }
 0x249   : > { %5916 = vst [vmem:[#allocation101_spill] sm:$0xff] %v4650_v3  ;;  %v1900_v49 = vshra.s32 %v4650_v3, 16 }
 0x24a   : > { %5903 = vst [vmem:[#allocation5_spill] sm:$0xff] %v4546_v8  ;;  %3026 = vlog2.f32 %v1117_v18  ;;  %v5921_v18 = vld [vmem:[#allocation9_spill] sm:$0xff] }
 0x24b   : > { %1973 = vmin.xlane.f32.xlu1 %v4513_v59  ;;  %1945 = vmin.xlane.f32.xlu2 %v4515_v41  ;;  %3028 = vlog2.f32 %v1116_v2  ;;  %vm1550_vm13 = vcmp.le.f32.partialorder %v5921_v18, %v4407_v44 }
 0x24c   : > { %1875 = vmin.xlane.f32.xlu0 %v4517_v25 }
 0x24e   : > { %v4533_v47 = vpop.xlane.xlu1 %968  ;;  %v4535_v53 = vpop.xlane.xlu2 %962 }
 0x24f   : > { %v4542_v42 = vpop.xlane.xlu0 %966 }
 0x253   : > { %1679 = vmin.xlane.f32.xlu1 %v4546_v8  ;;  %1651 = vmin.xlane.f32.xlu2 %v4548_v62  ;;  %v4645_v62 = vcvt.s32.f32 %v1690_v57  ;;  %v1759_v57 = vand.u32 65535, %v5918_v23 }
 0x254   : > { %2001 = vmin.xlane.f32.xlu0 %v4550_v1 }
 0x255   : > { %5914 = vst [vmem:[#allocation99_spill] sm:$0xff] %v4645_v62  ;;  %v1761_v23 = vcvt.s32.f32 %v1759_v57 }
 0x256   : > { %v4566_v60 = vpop.xlane.xlu1 %974  ;;  %v4568_v14 = vpop.xlane.xlu2 %964 }
 0x257   : > { %5905 = vst [vmem:[#allocation94_spill] sm:$0xff] %v4566_v60  ;;  %v4575_v0 = vpop.xlane.xlu0 %972  ;;  %v4583_v60 = vcvt.s32.f32 %v1704_v28  ;;  %v2026_v28 = vshra.s32 %v4594_v55, 16  ;;  %v1766_v18 = vsel %vm1765_vm5, %v1761_v23, inf }
 0x25b   : > { %1889 = vmin.xlane.f32.xlu1 %v4579_v26  ;;  %1861 = vmin.xlane.f32.xlu2 %v4581_v63 }
 0x25c   : > { %1707 = vmin.xlane.f32.xlu0 %v4583_v60 }
 0x25e   : > { %v4599_v6 = vpop.xlane.xlu1 %980  ;;  %v4601_v37 = vpop.xlane.xlu2 %970 }
 0x25f   : > { %5906 = vst [vmem:[#allocation95_spill] sm:$0xff] %v4599_v6  ;;  %v4608_v58 = vpop.xlane.xlu0 %978  ;;  %v4616_v6 = vcvt.s32.f32 %v2026_v28 }
 0x260   : > { %5908 = vst [vmem:[#allocation7_spill] sm:$0xff] %v4608_v58 }
 0x263   : > { %2015 = vmin.xlane.f32.xlu1 %v4612_v35  ;;  %1987 = vmin.xlane.f32.xlu2 %v4614_v29 }
 0x264   : > { %2029 = vmin.xlane.f32.xlu0 %v4616_v6 }
 0x266   : > { %v4633_v32 = vpop.xlane.xlu1 %986  ;;  %v4635_v28 = vpop.xlane.xlu2 %976 }
 0x267   : > { %5910 = vst [vmem:[#allocation97_spill] sm:$0xff] %v4633_v32  ;;  %v4641_v58 = vpop.xlane.xlu0 %984 }
 0x268   : > { %5911 = vst [vmem:[#allocation98_spill] sm:$0xff] %v4635_v28  ;;  %v5923_v28 = vld [vmem:[#allocation30_spill] sm:$0xff] }
 0x269   : > { %5913 = vst [vmem:[#allocation8_spill] sm:$0xff] %v4641_v58  ;;  %vm1821_vm4 = vcmp.eq.f32.partialorder %v5923_v28, %v4427_v50  ;;  %v3027_v58 = vpop.eup %3026  ;;  %v5926_v28 = vld [vmem:[#allocation35_spill] sm:$0xff] }
 0x26a   : > { %v3029_v3 = vpop.eup %3028  ;;  %v1151_v16 = vmul.f32 0.6931472, %v3027_v58  ;;  %v5930_v58 = vld [vmem:[#allocation10_spill] sm:$0xff] }
 0x26b   : > { %1721 = vmin.xlane.f32.xlu1 %v4643_v52  ;;  %1693 = vmin.xlane.f32.xlu2 %v4645_v62  ;;  %v1817_v62 = vcvt.s32.f32 %v1815_v39  ;;  %v1149_v44 = vmul.f32 0.6931472, %v3029_v3  ;;  %v1773_v39 = vand.u32 65535, %v5926_v28  ;;  %vm1572_vm3 = vcmp.le.f32.partialorder %v5930_v58, %v4416_v21 }
 0x26c   : > { %1749 = vmin.xlane.f32.xlu0 %v4647_v9  ;;  %v4670_v9 = vcvt.s32.f32 %v1900_v49  ;;  %v5927_v49 = vld [vmem:[#allocation36_spill] sm:$0xff]  ;;  %v1122_v3 = vmax.f32 %v4533_v47, 1.0  ;;  %v1119_v28 = vmax.f32 %v4535_v53, 1.0  ;;  %v4699_v58 = vsel %vm1572_vm3, %v3863_v13, 128 }
 0x26d   : > { %v1927_v48 = vand.u32 65535, %v5927_v49  ;;  %v1775_v49 = vcvt.s32.f32 %v1773_v39  ;;  %5934 = vst [vmem:[#allocation10_spill] sm:$0xff] %v4699_v58 }
 0x26e   : > { %v4658_v32 = vpop.xlane.xlu1 %992  ;;  %v4660_v24 = vpop.xlane.xlu2 %982  ;;  %5925 = vst [vmem:[#allocation30_spill] sm:$0xff] %v4670_v9 }
 0x26f   : > { %5919 = vst [vmem:[#allocation28_spill] sm:$0xff] %v4658_v32  ;;  %v4664_v2 = vpop.xlane.xlu0 %990  ;;  %v1822_v32 = vsel %vm1821_vm4, %v1817_v62, inf  ;;  %v1118_v62 = vmax.f32 %v4500_v45, 1.0  ;;  %v5933_v45 = vld [vmem:[#allocation39_spill] sm:$0xff] }
 0x270   : > { %5920 = vst [vmem:[#allocation23_spill] sm:$0xff] %v4660_v24  ;;  %v4673_v24 = vsel %vm1550_vm13, %v3863_v13, 128  ;;  %vm1933_vm8 = vcmp.eq.f32.partialorder %v5933_v45, %v4439_v20  ;;  %v5939_v45 = vld [vmem:[#allocation29_spill] sm:$0xff] }
 0x271   : > { %5922 = vst [vmem:[#allocation9_spill] sm:$0xff] %v4664_v2  ;;  %v1123_v2 = vmax.f32 %v4601_v37, 1.0  ;;  %v1732_v11 = vshra.s32 %v4673_v24, 16  ;;  %v5932_v37 = vld [vmem:[#allocation38_spill] sm:$0xff] }
 0x272   : > { %vm1779_vm6 = vcmp.eq.f32.partialorder %v5932_v37, %v4437_v5 }
 0x273   : > { %1823 = vmin.xlane.f32.xlu1 %v1822_v32  ;;  %1903 = vmin.xlane.f32.xlu2 %v4670_v9  ;;  %v1213_v32 = vmul.f32 0.3, %v1151_v16  ;;  %3030 = vlog2.f32 %v1123_v2  ;;  %v1120_v16 = vmax.f32 %v4568_v14, 1.0  ;;  %v1780_v47 = vsel %vm1779_vm6, %v1775_v49, inf }
 0x274   : > { %1767 = vmin.xlane.f32.xlu0 %v1766_v18  ;;  %v1212_v18 = vmul.f32 0.3, %v1149_v44  ;;  %3032 = vlog2.f32 %v1118_v62  ;;  %v2040_v2 = vshra.s32 %v4699_v58, 16 }
 0x275   : > { %v1246_v21 = vmul.f32 1.442695, %v1213_v32  ;;  %3034 = vlog2.f32 %v1122_v3 }
 0x276   : > { %v4681_v57 = vpop.xlane.xlu1 %998  ;;  %v4683_v8 = vpop.xlane.xlu2 %988  ;;  %v1244_v53 = vmul.f32 1.442695, %v1212_v18  ;;  %3036 = vlog2.f32 %v1119_v28 }
 0x277   : > { %5928 = vst [vmem:[#allocation26_spill] sm:$0xff] %v4681_v57  ;;  %v4688_v23 = vpop.xlane.xlu0 %996  ;;  %v4695_v57 = vcvt.s32.f32 %v1732_v11  ;;  %3038 = vlog2.f32 %v1120_v16  ;;  %v1913_v16 = vand.u32 65535, %v5939_v45 }
 0x278   : > { %5929 = vst [vmem:[#allocation35_spill] sm:$0xff] %v4683_v8  ;;  %v1929_v8 = vcvt.s32.f32 %v1927_v48  ;;  %v1121_v48 = vmax.f32 %v4542_v42, 1.0  ;;  %3040 = vpow2.f32 %v1246_v21 }
 0x279   : > { %5931 = vst [vmem:[#allocation36_spill] sm:$0xff] %v4688_v23  ;;  %v3031_v11 = vpop.eup %3030  ;;  %3042 = vpow2.f32 %v1244_v53  ;;  %v1915_v45 = vcvt.s32.f32 %v1913_v16 }
 0x27a   : > { %v1934_v44 = vsel %vm1933_vm8, %v1929_v8, inf  ;;  %v3033_v32 = vpop.eup %3032  ;;  %v4710_v8 = vcvt.s32.f32 %v2040_v2  ;;  %3044 = vlog2.f32 %v1121_v48  ;;  %v1163_v18 = vmul.f32 0.6931472, %v3031_v11 }
 0x27b   : > { %1781 = vmin.xlane.f32.xlu1 %v1780_v47  ;;  %1735 = vmin.xlane.f32.xlu2 %v4695_v57  ;;  %v3035_v3 = vpop.eup %3034  ;;  %v1153_v28 = vmul.f32 0.6931472, %v3033_v32  ;;  %v5943_v32 = vld [vmem:[#allocation31_spill] sm:$0xff] }
 0x27c   : > { %1935 = vmin.xlane.f32.xlu0 %v1934_v44  ;;  %5938 = vst [vmem:[#allocation103_spill] sm:$0xff] %v4710_v8  ;;  %v3037_v37 = vpop.eup %3036  ;;  %v1161_v49 = vmul.f32 0.6931472, %v3035_v3  ;;  %vm1919_vm9 = vcmp.eq.f32.partialorder %v5943_v32, %v4429_v61 }
 0x27d   : > { %v3039_v42 = vpop.eup %3038  ;;  %v1155_v44 = vmul.f32 0.6931472, %v3037_v37 }
 0x27e   : > { %v4704_v39 = vpop.xlane.xlu1 %1004  ;;  %v4706_v14 = vpop.xlane.xlu2 %994  ;;  %v1157_v48 = vmul.f32 0.6931472, %v3039_v42  ;;  %v1218_v23 = vmul.f32 0.3, %v1161_v49  ;;  %v5944_v42 = vld [vmem:[#allocation46_spill] sm:$0xff] }
 0x27f   : > { %5935 = vst [vmem:[#allocation38_spill] sm:$0xff] %v4704_v39  ;;  %v4708_v62 = vpop.xlane.xlu0 %1002  ;;  %v3041_v47 = vpop.eup %3040  ;;  %v1214_v39 = vmul.f32 0.3, %v1153_v28  ;;  %v1215_v37 = vmul.f32 0.3, %v1155_v44 }
 0x280   : > { %5936 = vst [vmem:[#allocation39_spill] sm:$0xff] %v4706_v14  ;;  %v3043_v21 = vpop.eup %3042  ;;  %v1219_v14 = vmul.f32 0.3, %v1163_v18  ;;  %v1309_v20 = vadd.f32 1e-06, %v3041_v47  ;;  %v1920_v18 = vsel %vm1919_vm9, %v1915_v45, inf }
 0x281   : > { %5937 = vst [vmem:[#allocation102_spill] sm:$0xff] %v4708_v62  ;;  %v1124_v62 = vmax.f32 %v4575_v0, 1.0  ;;  %v3045_v3 = vpop.eup %3044  ;;  %v1308_v5 = vadd.f32 1e-06, %v3043_v21  ;;  %v1248_v9 = vmul.f32 1.442695, %v1214_v39 }
 0x282   : > { %v1258_v0 = vmul.f32 1.442695, %v1219_v14  ;;  %v1256_v28 = vmul.f32 1.442695, %v1218_v23  ;;  %v5948_v39 = vld [vmem:[#allocation19_spill] sm:$0xff] }
 0x283   : > { %2043 = vmin.xlane.f32.xlu2 %v4710_v8  ;;  %3046 = vlog2.f32 %v1124_v62  ;;  %v1216_v8 = vmul.f32 0.3, %v1157_v48  ;;  %vm1793_vm10 = vcmp.eq.f32.partialorder %v5948_v39, %v4472_v31 }
 0x284   : > { %3048 = vrcp.f32 %v1309_v20 }
 0x285   : > { %3050 = vrcp.f32 %v1308_v5  ;;  %v1252_v62 = vmul.f32 1.442695, %v1216_v8 }
 0x286   : > { %v4715_v53 = vpop.xlane.xlu1 %1010  ;;  %v4717_v2 = vpop.xlane.xlu2 %1000  ;;  %3052 = vpow2.f32 %v1258_v0 }
 0x287   : > { %5940 = vst [vmem:[#allocation29_spill] sm:$0xff] %v4715_v53  ;;  %v4719_v11 = vpop.xlane.xlu0 %1008  ;;  %v1159_v53 = vmul.f32 0.6931472, %v3045_v3  ;;  %3054 = vpow2.f32 %v1248_v9 }
 0x288   : > { %5941 = vst [vmem:[#allocation104_spill] sm:$0xff] %v4717_v2  ;;  %v1787_v2 = vand.u32 65535, %v5944_v42  ;;  %3056 = vpow2.f32 %v1256_v28 }
 0x289   : > { %5942 = vst [vmem:[#allocation105_spill] sm:$0xff] %v4719_v11  ;;  %v1250_v11 = vmul.f32 1.442695, %v1215_v37  ;;  %v1217_v16 = vmul.f32 0.3, %v1159_v53  ;;  %v3047_v47 = vpop.eup %3046 }
 0x28a   : > { %v1789_v23 = vcvt.s32.f32 %v1787_v2  ;;  %v3049_v20 = vpop.eup %3048  ;;  %v1165_v48 = vmul.f32 0.6931472, %v3047_v47 }
 0x28b   : > { %1921 = vmin.xlane.f32.xlu2 %v1920_v18  ;;  %3058 = vpow2.f32 %v1250_v11  ;;  %v3051_v5 = vpop.eup %3050  ;;  %v1254_v21 = vmul.f32 1.442695, %v1217_v16  ;;  %v1373_v53 = vmul.f32 2.0, %v3049_v20 }
 0x28c   : > { %v1794_v44 = vsel %vm1793_vm10, %v1789_v23, inf  ;;  %3060 = vpow2.f32 %v1252_v62  ;;  %v3053_v3 = vpop.eup %3052  ;;  %v1372_v0 = vmul.f32 2.0, %v3051_v5  ;;  %v1220_v28 = vmul.f32 0.3, %v1165_v48 }
 0x28d   : > { %v3055_v9 = vpop.eup %3054  ;;  %3062 = vpow2.f32 %v1254_v21  ;;  %v1315_v42 = vadd.f32 1e-06, %v3053_v3 }
 0x28e   : > { %v4724_v32 = vpop.xlane.xlu1 %1016  ;;  %v4726_v49 = vpop.xlane.xlu2 %1006  ;;  %v1310_v23 = vadd.f32 1e-06, %v3055_v9 }
 0x28f   : > { %5945 = vst [vmem:[#allocation31_spill] sm:$0xff] %v4724_v32  ;;  %v4728_v14 = vpop.xlane.xlu0 %1014  ;;  %v3057_v8 = vpop.eup %3056  ;;  %3064 = vrcp.f32 %v1315_v42 }
 0x290   : > { %5946 = vst [vmem:[#allocation46_spill] sm:$0xff] %v4726_v49  ;;  %v1314_v62 = vadd.f32 1e-06, %v3057_v8  ;;  %3066 = vrcp.f32 %v1310_v23 }
 0x291   : > { %5947 = vst [vmem:[#allocation106_spill] sm:$0xff] %v4728_v14  ;;  %v3059_v18 = vpop.eup %3058  ;;  %v1260_v14 = vmul.f32 1.442695, %v1220_v28 }
 0x292   : > { %v3061_v16 = vpop.eup %3060  ;;  %3068 = vrcp.f32 %v1314_v62 }
 0x293   : > { %1795 = vmin.xlane.f32.xlu2 %v1794_v44  ;;  %v1311_v44 = vadd.f32 1e-06, %v3059_v18  ;;  %v1312_v20 = vadd.f32 1e-06, %v3061_v16  ;;  %v3063_v49 = vpop.eup %3062 }
 0x294   : > { %v1313_v48 = vadd.f32 1e-06, %v3063_v49 }
 0x295   : > { %3070 = vrcp.f32 %v1311_v44  ;;  %v3065_v3 = vpop.eup %3064 }
 0x296   : > { %v1055_v45 = vpop.xlane.xlu1 %1054  ;;  %v4732_v37 = vpop.xlane.xlu2 %1012  ;;  %3072 = vpow2.f32 %v1260_v14 }
 0x297   : > { %5949 = vst [vmem:[#allocation19_spill] sm:$0xff] %v4732_v37  ;;  %v1405_v2 = vmul.f32 %v1373_v53, %v1055_v45  ;;  %v1053_v11 = vpop.xlane.xlu0 %1052  ;;  %3074 = vrcp.f32 %v1312_v20  ;;  %v3067_v9 = vpop.eup %3066 }
 0x298   : > { %v1404_v39 = vmul.f32 %v1372_v0, %v1053_v11  ;;  %v3069_v53 = vpop.eup %3068  ;;  %3076 = vrcp.f32 %v1313_v48  ;;  %v1379_v0 = vmul.f32 2.0, %v3065_v3  ;;  %v1374_v18 = vmul.f32 2.0, %v3067_v9 }
 0x299   : > { %v1378_v42 = vmul.f32 2.0, %v3069_v53  ;;  %v1955_v48 = vand.u32 65535, %v4447_v17 }
 0x29a   : > { %v1436_v47 = vadd.f32 %v1405_v2, %v1404_v39 }
 0x29b   : > { %v3071_v8 = vpop.eup %3070 }
 0x29c   : > { %v3073_v45 = vpop.eup %3072  ;;  %v1375_v39 = vmul.f32 2.0, %v3071_v8 }
 0x29d   : > { %v3075_v28 = vpop.eup %3074  ;;  %v1316_v44 = vadd.f32 1e-06, %v3073_v45 }
 0x29e   : > { %v1061_v37 = vpop.xlane.xlu1 %1060  ;;  %v4734_v5 = vpop.xlane.xlu2 %1018  ;;  %v1376_v20 = vmul.f32 2.0, %v3075_v28 }
 0x29f   : > { %5950 = vst [vmem:[#allocation107_spill] sm:$0xff] %v4734_v5  ;;  %v1059_v21 = vpop.xlane.xlu0 %1058  ;;  %v3077_v32 = vpop.eup %3076  ;;  %3078 = vrcp.f32 %v1316_v44 }
 0x2a0   : > { %v1407_v49 = vmul.f32 %v1375_v39, %v1059_v21  ;;  %v1408_v61 = vmul.f32 %v1376_v20, %v1061_v37  ;;  %v1377_v3 = vmul.f32 2.0, %v3077_v32  ;;  %v1801_v37 = vand.u32 65535, %v4460_v19 }
 0x2a1   : > { %v1941_v39 = vand.u32 65535, %v4490_v36  ;;  %v1969_v19 = vand.u32 65535, %v4487_v27  ;;  %v1997_v27 = vand.u32 65535, %v4528_v22  ;;  %v1983_v22 = vand.u32 65535, %v4589_v38 }
 0x2a2   : > { %v1803_v28 = vcvt.s32.f32 %v1801_v37 }
 0x2a3   : > { %v1985_v37 = vcvt.s32.f32 %v1983_v22 }
 0x2a5   : > { %v3079_v45 = vpop.eup %3078 }
 0x2a6   : > { %v1067_v2 = vpop.xlane.xlu1 %1066  ;;  %v1057_v11 = vpop.xlane.xlu2 %1056 }
 0x2a7   : > { %v1411_v23 = vmul.f32 %v1379_v0, %v1067_v2  ;;  %v1406_v16 = vmul.f32 %v1374_v18, %v1057_v11  ;;  %v1065_v62 = vpop.xlane.xlu0 %1064  ;;  %v1957_v18 = vcvt.s32.f32 %v1955_v48 }
 0x2a8   : > { %v1410_v14 = vmul.f32 %v1378_v42, %v1065_v62  ;;  %v1943_v62 = vcvt.s32.f32 %v1941_v39 }
 0x2a9   : > { %v1437_v5 = vadd.f32 %v1436_v47, %v1406_v16 }
 0x2ab   : > { %v1438_v31 = vadd.f32 %v1437_v5, %v1407_v49  ;;  %v1380_v5 = vmul.f32 2.0, %v3079_v45 }
 0x2ad   : > { %v1439_v9 = vadd.f32 %v1438_v31, %v1408_v61 }
 0x2ae   : > { %v4737_v58 = vpop.xlane.xlu1 %1847  ;;  %v1063_v53 = vpop.xlane.xlu2 %1062 }
 0x2af   : > { %v1409_v8 = vmul.f32 %v1377_v3, %v1063_v53  ;;  %v4739_v0 = vpop.xlane.xlu0 %1959  ;;  %v1999_v3 = vcvt.s32.f32 %v1997_v27  ;;  %vm1849_vm13 = vcmp.eq.f32.partialorder %v4455_v7, %v4737_v58 }
 0x2b0   : > { %vm1961_vm11 = vcmp.eq.f32.partialorder %v4457_v10, %v4739_v0 }
 0x2b1   : > { %v1440_v21 = vadd.f32 %v1439_v9, %v1409_v8  ;;  %v1962_v47 = vsel %vm1961_vm11, %v1957_v18, inf  ;;  %v2011_v8 = vand.u32 65535, %v4586_v56  ;;  %v2025_v18 = vand.u32 65535, %v4594_v55 }
 0x2b2   : > { %1963 = vmin.xlane.f32.xlu2 %v1962_v47  ;;  %v1661_v47 = vand.u32 65535, %v4465_v40 }
 0x2b3   : > { %v1441_v17 = vadd.f32 %v1440_v21, %v1410_v14  ;;  %v1971_v14 = vcvt.s32.f32 %v1969_v19  ;;  %v1843_v21 = vand.u32 65535, %v4442_v15  ;;  %v2027_v38 = vcvt.s32.f32 %v2025_v18 }
 0x2b4   : > { %v1871_v19 = vand.u32 65535, %v4495_v30 }
 0x2b5   : > { %v1442_v32 = vadd.f32 %v1441_v17, %v1411_v23  ;;  %v2013_v17 = vcvt.s32.f32 %v2011_v8  ;;  %v1845_v15 = vcvt.s32.f32 %v1843_v21  ;;  %v5952_v8 = vmov 1.0  }
 0x2b6   : > { %v4744_v61 = vpop.xlane.xlu1 %1805  ;;  %v1069_v31 = vpop.xlane.xlu2 %1068  ;;  %v1873_v27 = vcvt.s32.f32 %v1871_v19  ;;  %v5961_v19 = vld [vmem:[#allocation37_spill] sm:$0xff] }
 0x2b7   : > { %v1412_v2 = vmul.f32 %v1380_v5, %v1069_v31  ;;  %v4746_v11 = vpop.xlane.xlu0 %1665  ;;  %vm1807_vm12 = vcmp.eq.f32.partialorder %v4482_v4, %v4744_v61  ;;  %v1850_v31 = vsel %vm1849_vm13, %v1845_v15, inf  ;;  %v5956_v15 = vld [vmem:[#allocation10_spill] sm:$0xff] }
 0x2b8   : > { %v1808_v10 = vsel %vm1807_vm12, %v1803_v28, inf  ;;  %vm1667_vm4 = vcmp.eq.f32.partialorder %v4484_v34, %v4746_v11  ;;  %v1885_v34 = vand.u32 65535, %v4553_v46 }
 0x2b9   : > { %v4750_v42 = vadd.f32 %v1442_v32, %v1412_v2  ;;  %1809 = vmin.xlane.f32.xlu0 %v1808_v10  ;;  %v1663_v32 = vcvt.s32.f32 %v1661_v47 }
 0x2bb   : > { %v1668_v28 = vsel %vm1667_vm4, %v1663_v32, inf  ;;  %v5957_v32 = vld [vmem:[#allocation6_spill] sm:$0xff] }
 0x2be   : > { %v4754_v16 = vpop.xlane.xlu1 %1973  ;;  %v4756_v23 = vpop.xlane.xlu2 %1945 }
 0x2bf   : > { %v4758_v44 = vpop.xlane.xlu0 %1875  ;;  %vm1947_vm7 = vcmp.eq.f32.partialorder %v4515_v41, %v4756_v23  ;;  %vm1975_vm15 = vcmp.eq.f32.partialorder %v4513_v59, %v4754_v16 }
 0x2c0   : > { %v1948_v4 = vsel %vm1947_vm7, %v1943_v62, inf  ;;  %v1976_v20 = vsel %vm1975_vm15, %v1971_v14, inf  ;;  %v1857_v62 = vand.u32 65535, %v4556_v43  ;;  %vm1877_vm8 = vcmp.eq.f32.partialorder %v4517_v25, %v4758_v44 }
 0x2c1   : > { %1949 = vmin.xlane.f32.xlu1 %v1948_v4  ;;  %1977 = vmin.xlane.f32.xlu0 %v1976_v20  ;;  %v1675_v43 = vand.u32 65535, %v4520_v33  ;;  %v1745_v25 = vand.u32 65535, %v4627_v12  ;;  %v5954_v33 = vld [vmem:[#allocation3_spill] sm:$0xff] }
 0x2c2   : > { %v1859_v30 = vcvt.s32.f32 %v1857_v62  ;;  %v1647_v18 = vand.u32 65535, %v5954_v33  ;;  %v1829_v62 = vand.u32 65535, %v5961_v19 }
 0x2c3   : > { %v1677_v47 = vcvt.s32.f32 %v1675_v43  ;;  %v1747_v12 = vcvt.s32.f32 %v1745_v25  ;;  %v5967_v43 = vld [vmem:[#allocation96_spill] sm:$0xff] }
 0x2c4   : > { %v1689_v25 = vand.u32 65535, %v5967_v43 }
 0x2c6   : > { %v4765_v36 = vpop.xlane.xlu1 %1679  ;;  %v4767_v49 = vpop.xlane.xlu2 %1651 }
 0x2c7   : > { %v4769_v48 = vpop.xlane.xlu0 %2001  ;;  %vm1653_vm15 = vcmp.eq.f32.partialorder %v5957_v32, %v4767_v49 }
 0x2c8   : > { %vm2003_vm14 = vcmp.eq.f32.partialorder %v4550_v1, %v4769_v48 }
 0x2c9   : > { %v2004_v41 = vsel %vm2003_vm14, %v1999_v3, inf }
 0x2ca   : > { %2005 = vmin.xlane.f32.xlu2 %v2004_v41 }
 0x2ce   : > { %v4773_v9 = vpop.xlane.xlu1 %1889  ;;  %v4775_v59 = vpop.xlane.xlu2 %1861 }
 0x2cf   : > { %v4777_v53 = vpop.xlane.xlu0 %1707  ;;  %vm1891_vm6 = vcmp.eq.f32.partialorder %v4579_v26, %v4773_v9  ;;  %v1731_v26 = vand.u32 65535, %v4673_v24  ;;  %vm1863_vm9 = vcmp.eq.f32.partialorder %v4581_v63, %v4775_v59  ;;  %v5953_v24 = vld [vmem:[#allocation5_spill] sm:$0xff] }
 0x2d0   : > { %vm1709_vm5 = vcmp.eq.f32.partialorder %v4583_v60, %v4777_v53  ;;  %v1864_v22 = vsel %vm1863_vm9, %v1859_v30, inf  ;;  %vm1681_vm11 = vcmp.eq.f32.partialorder %v5953_v24, %v4765_v36  ;;  %v1831_v30 = vcvt.s32.f32 %v1829_v62  ;;  %v5968_v24 = vld [vmem:[#allocation22_spill] sm:$0xff] }
 0x2d1   : > { %v1733_v63 = vcvt.s32.f32 %v1731_v26  ;;  %v1605_v33 = vand.u32 65535, %v5968_v24 }
 0x2d6   : > { %v4784_v45 = vpop.xlane.xlu1 %2015  ;;  %v4786_v1 = vpop.xlane.xlu2 %1987 }
 0x2d7   : > { %v4788_v5 = vpop.xlane.xlu0 %2029  ;;  %vm1989_vm0 = vcmp.eq.f32.partialorder %v4614_v29, %v4786_v1  ;;  %vm2017_vm1 = vcmp.eq.f32.partialorder %v4612_v35, %v4784_v45  ;;  %v1717_v29 = vand.u32 65535, %v4619_v54  ;;  %v1703_v35 = vand.u32 65535, %v4561_v51 }
 0x2d8   : > { %v1990_v56 = vsel %vm1989_vm0, %v1985_v37, inf  ;;  %v2018_v55 = vsel %vm2017_vm1, %v2013_v17, inf  ;;  %vm2031_vm2 = vcmp.eq.f32.partialorder %v4616_v6, %v4788_v5  ;;  %v1826_v51 = vcvt.f32.s32 %v4427_v50  ;;  %v5955_v37 = vld [vmem:[#allocation100_spill] sm:$0xff] }
 0x2d9   : > { %1991 = vmin.xlane.f32.xlu1 %v1990_v56  ;;  %2019 = vmin.xlane.f32.xlu0 %v2018_v55  ;;  %v2032_v40 = vsel %vm2031_vm2, %v2027_v38, inf  ;;  %v1719_v10 = vcvt.s32.f32 %v1717_v29  ;;  %v1705_v7 = vcvt.s32.f32 %v1703_v35  ;;  %v1878_v50 = vsel %vm1877_vm8, %v1873_v27, inf }
 0x2da   : > { %2033 = vmin.xlane.f32.xlu2 %v2032_v40  ;;  %v1827_v4 = vshll.u32 %v1826_v51, 16  ;;  %v1682_v38 = vsel %vm1681_vm11, %v1677_v47, inf  ;;  %v1649_v55 = vcvt.s32.f32 %v1647_v18  ;;  %v2039_v40 = vand.u32 65535, %v5956_v15  ;;  %v5969_v18 = vld [vmem:[#allocation99_spill] sm:$0xff]  ;;  %v5970_v47 = vld [vmem:[#allocation84_spill] sm:$0xff] }
 0x2db   : > { %v1710_v39 = vsel %vm1709_vm5, %v1705_v7, inf  ;;  %v5958_v7 = vld [vmem:[#allocation103_spill] sm:$0xff] }
 0x2dc   : > { %v1654_v29 = vsel %vm1653_vm15, %v1649_v55, inf  ;;  %v5973_v55 = vld [vmem:[#allocation74_spill] sm:$0xff]  ;;  %v5974_v15 = vld [vmem:[#allocation75_spill] sm:$0xff] }
 0x2de   : > { %v4802_v2 = vpop.xlane.xlu1 %1721  ;;  %v4804_v6 = vpop.xlane.xlu2 %1693 }
 0x2df   : > { %vm1723_vm3 = vcmp.eq.f32.partialorder %v4643_v52, %v4802_v2  ;;  %v1887_v52 = vcvt.s32.f32 %v1885_v34  ;;  %v4826_v41 = vpop.xlane.xlu0 %1749  ;;  %v5960_v34 = vld [vmem:[#allocation45_spill] sm:$0xff]  ;;  %vm1695_vm13 = vcmp.eq.f32.partialorder %v5969_v18, %v4804_v6 }
 0x2e0   : > { %v1724_v54 = vsel %vm1723_vm3, %v1719_v10, inf  ;;  %vm1751_vm12 = vcmp.eq.f32.partialorder %v5955_v37, %v4826_v41  ;;  %v2041_v10 = vcvt.s32.f32 %v2039_v40  ;;  %v1633_v51 = vand.u32 65535, %v5960_v34  ;;  %v5971_v37 = vld [vmem:[#allocation24_spill] sm:$0xff] }
 0x2e1   : > { %1725 = vmin.xlane.f32.xlu0 %v1724_v54  ;;  %v1892_v46 = vsel %vm1891_vm6, %v1887_v52, inf  ;;  %v1752_v56 = vsel %vm1751_vm12, %v1747_v12, inf  ;;  %v5959_v54 = vld [vmem:[#allocation101_spill] sm:$0xff]  ;;  %v5963_v52 = vld [vmem:[#allocation92_spill] sm:$0xff]  ;;  %vm1611_vm4 = vcmp.eq.f32.partialorder %v5971_v37, %v5970_v47  ;;  %v1607_v12 = vcvt.s32.f32 %v1605_v33 }
 0x2e2   : > { %1711 = vmin.xlane.f32.xlu2 %v1710_v39  ;;  %v1899_v39 = vand.u32 65535, %v5959_v54  ;;  %v1635_v27 = vcvt.s32.f32 %v1633_v51  ;;  %v5975_v40 = vld [vmem:[#allocation12_spill] sm:$0xff] }
 0x2e3   : > { %v5978_v54 = vld [vmem:[#allocation4_spill] sm:$0xff] }
 0x2e6   : > { %v1824_v60 = vpop.xlane.xlu1 %1823  ;;  %v4816_v14 = vpop.xlane.xlu2 %1903 }
 0x2e7   : > { %v1825_v20 = vcvt.f32.s32 %v1824_v60  ;;  %v5962_v60 = vld [vmem:[#allocation30_spill] sm:$0xff]  ;;  %v1768_v32 = vpop.xlane.xlu0 %1767 }
 0x2e8   : > { %vm1905_vm0 = vcmp.eq.f32.partialorder %v5962_v60, %v4816_v14  ;;  %v5981_v60 = vld [vmem:[#allocation93_spill] sm:$0xff] }
 0x2e9   : > { %v4820_v3 = vadd.s32 %v1827_v4, %v1825_v20  ;;  %1893 = vmin.xlane.f32.xlu0 %v1892_v46  ;;  %v5964_v4 = vld [vmem:[#allocation48_spill] sm:$0xff]  ;;  %v1901_v20 = vcvt.s32.f32 %v1899_v39  ;;  %v5965_v46 = vld [vmem:[#allocation91_spill] sm:$0xff] }
 0x2ea   : > { %1879 = vmin.xlane.f32.xlu2 %v1878_v50  ;;  %vm1639_vm1 = vcmp.eq.f32.partialorder %v5964_v4, %v5963_v52  ;;  %v5966_v50 = vld [vmem:[#allocation40_spill] sm:$0xff]  ;;  %v5979_v39 = vld [vmem:[#allocation47_spill] sm:$0xff]  ;;  %v1798_v4 = vcvt.f32.s32 %v5981_v60 }
 0x2eb   : > { %5951 = vst [vmem:[#allocation108_spill] sm:$0xff] %v4820_v3  ;;  %vm5771_vm10 = vcmp.eq.s32.totalorder %v3863_v13, %v4820_v3  ;;  %vm1835_vm2 = vcmp.eq.f32.partialorder %v5966_v50, %v5965_v46  ;;  %vm1625_vm5 = vcmp.eq.f32.partialorder %v5979_v39, %v5978_v54  ;;  %v5992_v60 = vld [vmem:[#allocation7_spill] sm:$0xff] }
 0x2ec   : > { %2969 = vmatpush.msk.msrb.mxu1 %vm5771_vm10, %v5952_v8  ;;  %v1836_v26 = vsel %vm1835_vm2, %v1831_v30, inf  ;;  %v5983_v30 = vld [vmem:[#allocation89_spill] sm:$0xff]  ;;  %v1799_v24 = vshll.u32 %v1798_v4, 16  ;;  %v1127_v4 = vmax.f32 %v5992_v60, 1.0 }
 0x2ee   : > { %v4838_v21 = vpop.xlane.xlu2 %1735  ;;  %v1782_v50 = vpop.xlane.xlu1 %1781 }
 0x2ef   : > { %vm1737_vm7 = vcmp.eq.f32.partialorder %v4695_v57, %v4838_v21  ;;  %v4877_v62 = vpop.xlane.xlu0 %1935  ;;  %v1783_v18 = vcvt.f32.s32 %v1782_v50 }
 0x2f0   : > { %v1738_v17 = vsel %vm1737_vm7, %v1733_v63, inf  ;;  %v1691_v63 = vcvt.s32.f32 %v1689_v25 }
 0x2f1   : > { %1739 = vmin.xlane.f32.xlu1 %v1738_v17  ;;  %1683 = vmin.xlane.f32.xlu0 %v1682_v38  ;;  %v5972_v38 = vld [vmem:[#allocation73_spill] sm:$0xff] }
 0x2f2   : > { %1753 = vmin.xlane.f32.xlu2 %v1752_v56  ;;  %v1696_v17 = vsel %vm1695_vm13, %v1691_v63, inf  ;;  %v1612_v56 = vsel %vm1611_vm4, %v1607_v12, inf  ;;  %v1769_v12 = vcvt.f32.s32 %v1768_v32 }
 0x2f6   : > { %v4847_v35 = vpop.xlane.xlu2 %2043 }
 0x2f7   : > { %vm2045_vm14 = vcmp.eq.f32.partialorder %v5958_v7, %v4847_v35  ;;  %v5977_v7 = vld [vmem:[#allocation44_spill] sm:$0xff] }
 0x2f8   : > { %v2046_v57 = vsel %vm2045_vm14, %v2041_v10, inf  ;;  %v5976_v10 = vld [vmem:[#allocation11_spill] sm:$0xff] }
 0x2f9   : > { %2047 = vmin.xlane.f32.xlu1 %v2046_v57  ;;  %1851 = vmin.xlane.f32.xlu0 %v1850_v31  ;;  %v1906_v31 = vsel %vm1905_vm0, %v1901_v20, inf  ;;  %v1619_v57 = vand.u32 65535, %v5977_v7  ;;  %v1812_v20 = vcvt.f32.s32 %v4744_v61 }
 0x2fa   : > { %1669 = vmin.xlane.f32.xlu2 %v1668_v28  ;;  %v1640_v28 = vsel %vm1639_vm1, %v1635_v27, inf  ;;  %v5982_v27 = vld [vmem:[#allocation76_spill] sm:$0xff] }
 0x2fb   : > { %v1621_v51 = vcvt.s32.f32 %v1619_v57  ;;  %v1813_v33 = vshll.u32 %v1812_v20, 16  ;;  %v5990_v57 = vld [vmem:[#allocation94_spill] sm:$0xff] }
 0x2fc   : > { %v1125_v39 = vmax.f32 %v5990_v57, 1.0 }
 0x2fd   : > { %v1626_v19 = vsel %vm1625_vm5, %v1621_v51, inf }
 0x2fe   : > { %v4874_v34 = vpop.xlane.xlu2 %1921  ;;  %3080 = vlog2.f32 %v1125_v39 }
 0x301   : > { %1907 = vmin.xlane.f32.xlu1 %v1906_v31  ;;  %1641 = vmin.xlane.f32.xlu0 %v1640_v28  ;;  %v1784_v31 = vcvt.f32.s32 %v5983_v30 }
 0x302   : > { %1837 = vmin.xlane.f32.xlu2 %v1836_v26  ;;  %v5984_v26 = vld [vmem:[#allocation88_spill] sm:$0xff] }
 0x303   : > { %v1770_v43 = vcvt.f32.s32 %v5984_v26  ;;  %v1785_v37 = vshll.u32 %v1784_v31, 16 }
 0x304   : > { %v3081_v20 = vpop.eup %3080 }
 0x305   : > { %v1771_v61 = vshll.u32 %v1770_v43, 16  ;;  %v1167_v26 = vmul.f32 0.6931472, %v3081_v20  ;;  %v1756_v20 = vcvt.f32.s32 %v4826_v41 }
 0x309   : > { %1697 = vmin.xlane.f32.xlu1 %v1696_v17  ;;  %1070 = vadd.xlane.f32.xlu0 %v5972_v38 }
 0x30a   : > { %1613 = vmin.xlane.f32.xlu2 %v1612_v56  ;;  %v4888_v56 = vadd.s32 %v1785_v37, %v1783_v18 }
 0x30c   : > { %5987 = vst [vmem:[#allocation100_spill] sm:$0xff] %v4888_v56  ;;  %vm5773_vm8 = vcmp.eq.s32.totalorder %v3863_v13, %v4888_v56 }
 0x311   : > { %1865 = vmin.xlane.f32.xlu1 %v1864_v22  ;;  %1076 = vadd.xlane.f32.xlu0 %v5973_v55  ;;  %v5980_v22 = vld [vmem:[#allocation49_spill] sm:$0xff] }
 0x312   : > { %1074 = vadd.xlane.f32.xlu2 %v5974_v15  ;;  %v5988_v55 = vld [vmem:[#allocation77_spill] sm:$0xff]  ;;  %v4897_v15 = vadd.s32 %v1771_v61, %v1769_v12 }
 0x314   : > { %vm5775_vm9 = vcmp.eq.s32.totalorder %v3863_v13, %v4897_v15 }
 0x319   : > { %1655 = vmin.xlane.f32.xlu1 %v1654_v29  ;;  %1080 = vadd.xlane.f32.xlu0 %v5975_v40  ;;  %v1796_v29 = vpop.xlane.xlu2 %1795  ;;  %v5989_v40 = vld [vmem:[#allocation13_spill] sm:$0xff] }
 0x31a   : > { %1082 = vadd.xlane.f32.xlu2 %v5976_v10  ;;  %v1797_v28 = vcvt.f32.s32 %v1796_v29 }
 0x31c   : > { %v4884_v17 = vadd.s32 %v1799_v24, %v1797_v28  ;;  %v1221_v24 = vmul.f32 0.3, %v1167_v26 }
 0x31e   : > { %5985 = vst [vmem:[#allocation5_spill] sm:$0xff] %v4884_v17  ;;  %vm5774_vm6 = vcmp.eq.s32.totalorder %v3863_v13, %v4884_v17  ;;  %v1262_v57 = vmul.f32 1.442695, %v1221_v24 }
 0x321   : > { %1627 = vmin.xlane.f32.xlu1 %v1626_v19  ;;  %1084 = vadd.xlane.f32.xlu0 %v5980_v22  ;;  %v5991_v22 = vld [vmem:[#allocation95_spill] sm:$0xff] }
 0x322   : > { %v1128_v29 = vmax.f32 %v5991_v22, 1.0  ;;  %v5995_v22 = vld [vmem:[#allocation97_spill] sm:$0xff] }
 0x324   : > { %3082 = vlog2.f32 %v1128_v29  ;;  %v1131_v29 = vmax.f32 %v5995_v22, 1.0 }
 0x325   : > { %v4918_v32 = vpop.xlane.xlu2 %1963  ;;  %3084 = vlog2.f32 %v1127_v4 }
 0x329   : > { %1072 = vadd.xlane.f32.xlu1 %v5982_v27  ;;  %v5993_v27 = vld [vmem:[#allocation8_spill] sm:$0xff] }
 0x32a   : > { %v1130_v50 = vmax.f32 %v5993_v27, 1.0  ;;  %v3083_v43 = vpop.eup %3082  ;;  %v1742_v27 = vcvt.f32.s32 %v4838_v21 }
 0x32c   : > { %v1810_v25 = vpop.xlane.xlu0 %1809  ;;  %3086 = vlog2.f32 %v1130_v50  ;;  %v5996_v50 = vld [vmem:[#allocation87_spill] sm:$0xff]  ;;  %v1743_v21 = vshll.u32 %v1742_v27, 16  ;;  %v2050_v27 = vcvt.f32.s32 %v4847_v35 }
 0x32d   : > { %v1811_v63 = vcvt.f32.s32 %v1810_v25  ;;  %v3085_v25 = vpop.eup %3084  ;;  %v1924_v26 = vcvt.f32.s32 %v5996_v50 }
 0x32e   : > { %v1171_v37 = vmul.f32 0.6931472, %v3085_v25 }
 0x32f   : > { %v4886_v38 = vadd.s32 %v1813_v33, %v1811_v63  ;;  %v1173_v33 = vmul.f32 0.6931472, %v3083_v43  ;;  %v5997_v43 = vld [vmem:[#allocation90_spill] sm:$0xff]  ;;  %v4952_v17 = vshll.u32 %v1924_v26, 16 }
 0x330   : > { %v1223_v60 = vmul.f32 0.3, %v1171_v37  ;;  %v1938_v25 = vcvt.f32.s32 %v5997_v43 }
 0x331   : > { %5986 = vst [vmem:[#allocation3_spill] sm:$0xff] %v4886_v38  ;;  %1078 = vadd.xlane.f32.xlu1 %v5988_v55  ;;  %vm5772_vm3 = vcmp.eq.s32.totalorder %v3863_v13, %v4886_v38  ;;  %v5994_v55 = vld [vmem:[#allocation98_spill] sm:$0xff]  ;;  %v1224_v39 = vmul.f32 0.3, %v1173_v33  ;;  %v1757_v38 = vshll.u32 %v1756_v20, 16  ;;  %v1840_v20 = vcvt.f32.s32 %v5965_v46 }
 0x332   : > { %2970 = vmatpush.msk.msrb.mxu1 %vm5772_vm3, %v5952_v8  ;;  %v3087_v61 = vpop.eup %3086  ;;  %v1266_v22 = vmul.f32 1.442695, %v1223_v60 }
 0x333   : > { %v1177_v4 = vmul.f32 0.6931472, %v3087_v61  ;;  %v1268_v3 = vmul.f32 1.442695, %v1224_v39  ;;  %v1714_v61 = vcvt.f32.s32 %v4777_v53  ;;  %v5998_v39 = vld [vmem:[#allocation23_spill] sm:$0xff] }
 0x334   : > { %2971 = vmatpush.msk.msrb.mxu1 %vm5774_vm6, %v5952_v8  ;;  %v4920_v10 = vpop.xlane.xlu0 %1977  ;;  %v4932_v30 = vpop.xlane.xlu1 %1949 }
 0x335   : > { %v1226_v37 = vmul.f32 0.3, %v1177_v4 }
 0x336   : > { %2972 = vmatpush.msk.msrb.mxu1 %vm5773_vm8, %v5952_v8 }
 0x338   : > { %2973 = vmatpush.msk.msrb.mxu1 %vm5775_vm9, %v5952_v8 }
 0x339   : > { %1086 = vadd.xlane.f32.xlu1 %v5989_v40  ;;  %v1126_v40 = vmax.f32 %v5994_v55, 1.0  ;;  %v1728_v55 = vcvt.f32.s32 %v4802_v2  ;;  %v1129_v2 = vmax.f32 %v5998_v39, 1.0 }
 0x33b   : > { %3088 = vlog2.f32 %v1126_v40  ;;  %v1729_v43 = vshll.u32 %v1728_v55, 16 }
 0x33c   : > { %3090 = vpow2.f32 %v1262_v57  ;;  %v4954_v57 = vshll.u32 %v1938_v25, 16  ;;  %v1715_v25 = vshll.u32 %v1714_v61, 16 }
 0x33d   : > { %v4922_v7 = vpop.xlane.xlu2 %2005  ;;  %3092 = vlog2.f32 %v1131_v29 }
 0x33e   : > { %3094 = vpow2.f32 %v1268_v3  ;;  %v1272_v3 = vmul.f32 1.442695, %v1226_v37 }
 0x33f   : > { %3096 = vpow2.f32 %v1266_v22 }
 0x340   : > { %3098 = vlog2.f32 %v1129_v2  ;;  %v1994_v2 = vcvt.f32.s32 %v4786_v1 }
 0x341   : > { %v3089_v29 = vpop.eup %3088  ;;  %3100 = vpow2.f32 %v1272_v3 }
 0x34c   : > { %v4925_v51 = vpop.xlane.xlu0 %2019  ;;  %v4936_v18 = vpop.xlane.xlu1 %1991 }
 0x34d   : > { %v4927_v19 = vpop.xlane.xlu2 %2033 }
 0x34e   : > { %v2035_v55 = vcvt.f32.s32 %v4927_v19  ;;  %v2021_v19 = vcvt.f32.s32 %v4925_v51  ;;  %v2007_v51 = vcvt.f32.s32 %v4922_v7  ;;  %v1993_v7 = vcvt.f32.s32 %v4936_v18 }
 0x34f   : > { %v1995_v18 = vshll.u32 %v1994_v2, 16 }
 0x354   : > { %v1726_v31 = vpop.xlane.xlu0 %1725 }
 0x355   : > { %v4934_v28 = vpop.xlane.xlu2 %1711  ;;  %v1727_v56 = vcvt.f32.s32 %v1726_v31  ;;  %v2036_v31 = vcvt.f32.s32 %v4788_v5  ;;  %v2008_v5 = vcvt.f32.s32 %v4769_v48  ;;  %v5999_v48 = vld [vmem:[#allocation9_spill] sm:$0xff] }
 0x356   : > { %v1713_v60 = vcvt.f32.s32 %v4934_v28  ;;  %v1169_v28 = vmul.f32 0.6931472, %v3089_v29  ;;  %v1133_v39 = vmax.f32 %v5999_v48, 1.0  ;;  %v1952_v48 = vcvt.f32.s32 %v4756_v23 }
 0x357   : > { %v2009_v3 = vshll.u32 %v2008_v5, 16  ;;  %v1979_v5 = vcvt.f32.s32 %v4920_v10  ;;  %v1686_v23 = vcvt.f32.s32 %v4765_v36 }
 0x358   : > { %v4976_v35 = vadd.s32 %v1715_v25, %v1713_v60  ;;  %v1953_v36 = vshll.u32 %v1952_v48, 16 }
 0x35a   : > { %vm2060_vm15 = vcmp.eq.s32.totalorder %v3863_v13, %v4976_v35 }
 0x35c   : > { %v4938_v63 = vpop.xlane.xlu0 %1893 }
 0x35d   : > { %v4940_v12 = vpop.xlane.xlu2 %1879 }
 0x364   : > { %v1740_v24 = vpop.xlane.xlu1 %1739  ;;  %v4949_v33 = vpop.xlane.xlu0 %1683 }
 0x365   : > { %v1741_v40 = vcvt.f32.s32 %v1740_v24  ;;  %v1754_v41 = vpop.xlane.xlu2 %1753  ;;  %v3091_v24 = vpop.eup %3090 }
 0x366   : > { %v1755_v50 = vcvt.f32.s32 %v1754_v41  ;;  %v3093_v26 = vpop.eup %3092  ;;  %v4965_v41 = vadd.s32 %v1729_v43, %v1727_v56  ;;  %v1317_v37 = vadd.f32 1e-06, %v3091_v24 }
 0x367   : > { %v4958_v4 = vadd.s32 %v1743_v21, %v1741_v40  ;;  %v3095_v61 = vpop.eup %3094  ;;  %v2051_v40 = vshll.u32 %v2050_v27, 16  ;;  %v1980_v27 = vcvt.f32.s32 %v4754_v16  ;;  %v6000_v16 = vld [vmem:[#allocation35_spill] sm:$0xff] }
 0x368   : > { %v4960_v53 = vadd.s32 %v1757_v38, %v1755_v50  ;;  %v2022_v38 = vcvt.f32.s32 %v4784_v45  ;;  %v2037_v45 = vshll.u32 %v2036_v31, 16  ;;  %vm5786_vm7 = vcmp.eq.s32.totalorder %v3863_v13, %v4965_v41  ;;  %v3097_v29 = vpop.eup %3096 }
 0x369   : > { %vm5777_vm12 = vcmp.eq.s32.totalorder %v3863_v13, %v4958_v4  ;;  %v1222_v31 = vmul.f32 0.3, %v1169_v28  ;;  %3102 = vrcp.f32 %v1317_v37  ;;  %v3099_v1 = vpop.eup %3098  ;;  %v5014_v28 = vmul.f32 0.6931472, %v3093_v26 }
 0x36a   : > { %vm5785_vm11 = vcmp.eq.s32.totalorder %v3863_v13, %v4960_v53  ;;  %v2023_v43 = vshll.u32 %v2022_v38, 16  ;;  %v4994_v60 = vadd.s32 %v2037_v45, %v2035_v55  ;;  %3104 = vlog2.f32 %v1133_v39  ;;  %v3101_v26 = vpop.eup %3100 }
 0x36b   : > { %2974 = vmatpush.msk.msrb.mxu1 %vm5785_vm11, %v5952_v8  ;;  %v1132_v38 = vmax.f32 %v6000_v16, 1.0  ;;  %v1966_v55 = vcvt.f32.s32 %v4739_v0  ;;  %v5027_v37 = vmul.f32 1.442695, %v1222_v31  ;;  %v1965_v45 = vcvt.f32.s32 %v4918_v32 }
 0x36c   : > { %v2048_v56 = vpop.xlane.xlu1 %2047  ;;  %v4978_v22 = vpop.xlane.xlu0 %1851  ;;  %v5006_v25 = vadd.s32 %v2023_v43, %v2021_v19  ;;  %vm2083_vm0 = vcmp.eq.s32.totalorder %v3863_v13, %v4994_v60  ;;  %v1320_v10 = vadd.f32 1e-06, %v3095_v61  ;;  %v1319_v19 = vadd.f32 1e-06, %v3097_v29 }
 0x36d   : > { %v2049_v21 = vcvt.f32.s32 %v2048_v56  ;;  %v4983_v50 = vpop.xlane.xlu2 %1669  ;;  %2975 = vmatpush.msk.msrb.mxu1 %vm5777_vm12, %v5952_v8  ;;  %v5023_v56 = vadd.s32 %v2009_v3, %v2007_v51  ;;  %v5039_v39 = vadd.s32 %v1995_v18, %v1993_v7  ;;  %v1175_v43 = vmul.f32 0.6931472, %v3099_v1 }
 0x36e   : > { %vm2082_vm1 = vcmp.eq.s32.totalorder %v3863_v13, %v5006_v25  ;;  %3106 = vlog2.f32 %v1132_v38  ;;  %v1967_v51 = vshll.u32 %v1966_v55, 16  ;;  %v1672_v31 = vcvt.f32.s32 %v4746_v11 }
 0x36f   : > { %v4996_v24 = vadd.s32 %v2051_v40, %v2049_v21  ;;  %2976 = vmatpush.msk.msrb.mxu1 %vm5786_vm7, %v5952_v8  ;;  %v1981_v21 = vshll.u32 %v1980_v27, 16  ;;  %v3103_v32 = vpop.eup %3102  ;;  %v1951_v61 = vcvt.f32.s32 %v4932_v30  ;;  %vm2081_vm2 = vcmp.eq.s32.totalorder %v3863_v13, %v5023_v56 }
 0x370   : > { %v5056_v27 = vpop.eup %3104  ;;  %v1700_v1 = vcvt.f32.s32 %v4804_v6  ;;  %v1937_v11 = vcvt.f32.s32 %v4877_v62  ;;  %v5060_v3 = vadd.s32 %v1967_v51, %v1965_v45  ;;  %3108 = vrcp.f32 %v1320_v10 }
 0x371   : > { %2977 = vmatpush.msk.msrb.mxu1 %vm2060_vm15, %v5952_v8  ;;  %vm2084_vm14 = vcmp.eq.s32.totalorder %v3863_v13, %v4996_v24  ;;  %v5052_v29 = vadd.s32 %v1981_v21, %v1979_v5  ;;  %vm2080_vm13 = vcmp.eq.s32.totalorder %v3863_v13, %v5039_v39  ;;  %v1381_v30 = vmul.f32 2.0, %v3103_v32 }
 0x372   : > { %2985 = vmatpush.msk.msrb.mxu2 %vm2084_vm14, %v5952_v8  ;;  %3110 = vrcp.f32 %v1319_v19  ;;  %v1673_v7 = vshll.u32 %v1672_v31, 16  ;;  %v1910_v16 = vcvt.f32.s32 %v4816_v14  ;;  %v1923_v6 = vcvt.f32.s32 %v4874_v34 }
 0x373   : > { %v1322_v62 = vadd.f32 1e-06, %v3101_v26  ;;  %v1687_v38 = vshll.u32 %v1686_v23, 16  ;;  %v5074_v55 = vadd.s32 %v1953_v36, %v1951_v61  ;;  %v1685_v18 = vcvt.f32.s32 %v4949_v33 }
 0x374   : > { %v5030_v40 = vpop.xlane.xlu1 %1907  ;;  %2986 = vmatpush.msk.msrb.mxu2 %vm2083_vm0, %v5952_v8  ;;  %v5036_v0 = vpop.xlane.xlu0 %1641  ;;  %vm2079_vm4 = vcmp.eq.s32.totalorder %v3863_v13, %v5052_v29  ;;  %v1896_v45 = vcvt.f32.s32 %v4773_v9  ;;  %v1701_v14 = vshll.u32 %v1700_v1, 16  ;;  %v5081_v34 = vadd.s32 %v4954_v57, %v1937_v11 }
 0x375   : > { %v5041_v2 = vpop.xlane.xlu2 %1837  ;;  %v3107_v5 = vpop.eup %3106  ;;  %vm2078_vm5 = vcmp.eq.s32.totalorder %v3863_v13, %v5060_v3  ;;  %v1671_v33 = vcvt.f32.s32 %v4983_v50  ;;  %v1909_v19 = vcvt.f32.s32 %v5030_v40  ;;  %v1882_v32 = vcvt.f32.s32 %v4758_v44 }
 0x376   : > { %2987 = vmatpush.msk.msrb.mxu2 %vm2082_vm1, %v5952_v8  ;;  %v3109_v57 = vpop.eup %3108  ;;  %v1911_v51 = vshll.u32 %v1910_v16, 16  ;;  %v5095_v31 = vadd.s32 %v4952_v17, %v1923_v6  ;;  %v1895_v23 = vcvt.f32.s32 %v4938_v63  ;;  %v5102_v40 = vadd.s32 %v1687_v38, %v1685_v18 }
 0x377   : > { %vm2077_vm10 = vcmp.eq.s32.totalorder %v3863_v13, %v5074_v55  ;;  %3112 = vpow2.f32 %v5027_v37  ;;  %v1897_v44 = vshll.u32 %v1896_v45, 16  ;;  %v1868_v17 = vcvt.f32.s32 %v4775_v59 }
 0x378   : > { %2988 = vmatpush.msk.msrb.mxu2 %vm2081_vm2, %v5952_v8  ;;  %v3111_v50 = vpop.eup %3110  ;;  %v1881_v63 = vcvt.f32.s32 %v4940_v12  ;;  %v5118_v11 = vadd.s32 %v1673_v7, %v1671_v33  ;;  %v5120_v36 = vadd.s32 %v1911_v51, %v1909_v19  ;;  %vm5776_vm8 = vcmp.eq.s32.totalorder %v3863_v13, %v5081_v34 }
 0x379   : > { %v1854_v59 = vcvt.f32.s32 %v4737_v58  ;;  %v1883_v37 = vshll.u32 %v1882_v32, 16  ;;  %3114 = vrcp.f32 %v1322_v62  ;;  %v5135_v12 = vadd.s32 %v1897_v44, %v1895_v23 }
 0x37a   : > { %2989 = vmatpush.msk.msrb.mxu2 %vm2080_vm13, %v5952_v8  ;;  %vm2058_vm6 = vcmp.eq.s32.totalorder %v3863_v13, %v5102_v40  ;;  %vm5778_vm9 = vcmp.eq.s32.totalorder %v3863_v13, %v5095_v31  ;;  %v1384_v58 = vmul.f32 2.0, %v3109_v57  ;;  %v1853_v7 = vcvt.f32.s32 %v4978_v22 }
 0x37b   : > { %v1383_v62 = vmul.f32 2.0, %v3111_v50  ;;  %vm5779_vm12 = vcmp.eq.s32.totalorder %v3863_v13, %v5120_v36  ;;  %v1839_v33 = vcvt.f32.s32 %v5041_v2  ;;  %v1183_v32 = vmul.f32 0.6931472, %v5056_v27 }
 0x37c   : > { %v1698_v10 = vpop.xlane.xlu1 %1697  ;;  %2990 = vmatpush.msk.msrb.mxu2 %vm2079_vm4, %v5952_v8  ;;  %v1071_v26 = vpop.xlane.xlu0 %1070  ;;  %v1841_v2 = vshll.u32 %v1840_v20, 16  ;;  %v1658_v51 = vcvt.f32.s32 %v4767_v49 }
 0x37d   : > { %v1699_v21 = vcvt.f32.s32 %v1698_v10  ;;  %v1413_v9 = vmul.f32 %v1381_v30, %v1071_v26  ;;  %v5091_v48 = vpop.xlane.xlu2 %1613  ;;  %v5141_v30 = vadd.s32 %v1883_v37, %v1881_v63  ;;  %v3113_v22 = vpop.eup %3112  ;;  %v1855_v26 = vshll.u32 %v1854_v59, 16 }
 0x37e   : > { %2991 = vmatpush.msk.msrb.mxu2 %vm2078_vm5, %v5952_v8  ;;  %v5192_v27 = vadd.s32 %v1841_v2, %v1839_v33  ;;  %v1229_v50 = vmul.f32 0.3, %v1183_v32  ;;  %v1659_v63 = vshll.u32 %v1658_v51, 16  ;;  %v1318_v59 = vadd.f32 1e-06, %v3113_v22 }
 0x37f   : > { %v5104_v61 = vadd.s32 %v1701_v14, %v1699_v21  ;;  %v5107_v1 = vadd.f32 %v4750_v42, %v1413_v9  ;;  %v1225_v42 = vmul.f32 0.3, %v1175_v43  ;;  %v1869_v43 = vshll.u32 %v1868_v17, 16 }
 0x380   : > { %2992 = vmatpush.msk.msrb.mxu2 %vm2077_vm10, %v5952_v8  ;;  %v1181_v14 = vmul.f32 0.6931472, %v3107_v5  ;;  %v3115_v5 = vpop.eup %3114  ;;  %v1644_v21 = vcvt.f32.s32 %v5963_v52  ;;  %v1227_v9 = vmul.f32 0.3, %v5014_v28  ;;  %v5183_v23 = vadd.s32 %v1855_v26, %v1853_v7 }
 0x381   : > { %vm2059_vm3 = vcmp.eq.s32.totalorder %v3863_v13, %v5104_v61  ;;  %v1270_v57 = vmul.f32 1.442695, %v1225_v42  ;;  %v1643_v28 = vcvt.f32.s32 %v5036_v0  ;;  %v1386_v46 = vmul.f32 2.0, %v3115_v5 }
 0x382   : > { %2978 = vmatpush.msk.msrb.mxu1 %vm2059_vm3, %v5952_v8  ;;  %2993 = vmatpush.msk.msrb.mxu2 %vm5776_vm8, %v5952_v8  ;;  %vm2057_vm8 = vcmp.eq.s32.totalorder %v3863_v13, %v5118_v11  ;;  %v1228_v52 = vmul.f32 0.3, %v1181_v14  ;;  %v1645_v49 = vshll.u32 %v1644_v21, 16  ;;  %v1274_v20 = vmul.f32 1.442695, %v1227_v9 }
 0x383   : > { %3116 = vpow2.f32 %v1270_v57  ;;  %v1616_v7 = vcvt.f32.s32 %v5970_v47  ;;  %v1615_v47 = vcvt.f32.s32 %v5091_v48 }
 0x384   : > { %v1866_v16 = vpop.xlane.xlu1 %1865  ;;  %2979 = vmatpush.msk.msrb.mxu1 %vm2058_vm6, %v5952_v8  ;;  %2994 = vmatpush.msk.msrb.mxu2 %vm5778_vm9, %v5952_v8  ;;  %v1077_v6 = vpop.xlane.xlu0 %1076  ;;  %vm5780_vm9 = vcmp.eq.s32.totalorder %v3863_v13, %v5135_v12  ;;  %v1276_v37 = vmul.f32 1.442695, %v1228_v52  ;;  %3118 = vpow2.f32 %v1274_v20 }
 0x385   : > { %v1867_v38 = vcvt.f32.s32 %v1866_v16  ;;  %v5152_v18 = vmul.f32 %v1384_v58, %v1077_v6  ;;  %v1075_v45 = vpop.xlane.xlu2 %1074  ;;  %v5208_v58 = vadd.s32 %v1645_v49, %v1643_v28  ;;  %v1630_v16 = vcvt.f32.s32 %v5978_v54 }
 0x386   : > { %v5158_v10 = vmul.f32 %v1383_v62, %v1075_v45  ;;  %2980 = vmatpush.msk.msrb.mxu1 %vm2057_vm8, %v5952_v8  ;;  %2995 = vmatpush.msk.msrb.mxu2 %vm5779_vm12, %v5952_v8  ;;  %vm5781_vm12 = vcmp.eq.s32.totalorder %v3863_v13, %v5141_v30  ;;  %v1278_v6 = vmul.f32 1.442695, %v1229_v50  ;;  %3120 = vrcp.f32 %v1318_v59 }
 0x387   : > { %v5169_v19 = vadd.s32 %v1869_v43, %v1867_v38  ;;  %3122 = vpow2.f32 %v1276_v37  ;;  %v1617_v38 = vshll.u32 %v1616_v7, 16  ;;  %v1631_v45 = vshll.u32 %v1630_v16, 16 }
 0x388   : > { %2996 = vmatpush.msk.msrb.mxu2 %vm5780_vm9, %v5952_v8  ;;  %3124 = vpow2.f32 %v1278_v6 }
 0x389   : > { %vm5782_vm9 = vcmp.eq.s32.totalorder %v3863_v13, %v5169_v19  ;;  %v3117_v62 = vpop.eup %3116  ;;  %v1618_v33 = vadd.s32 %v1617_v38, %v1615_v47 }
 0x38a   : > { %2997 = vmatpush.msk.msrb.mxu2 %vm5781_vm12, %v5952_v8  ;;  %vm5783_vm12 = vcmp.eq.s32.totalorder %v3863_v13, %v5183_v23  ;;  %v1321_v14 = vadd.f32 1e-06, %v3117_v62  ;;  %v3119_v26 = vpop.eup %3118 }
 0x38b   : > { %v1323_v48 = vadd.f32 1e-06, %v3119_v26  ;;  %vm2053_vm7 = vcmp.eq.s32.totalorder %v3863_v13, %v1618_v33 }
 0x38c   : > { %v1656_v44 = vpop.xlane.xlu1 %1655  ;;  %2998 = vmatpush.msk.msrb.mxu2 %vm5782_vm9, %v5952_v8  ;;  %v1081_v17 = vpop.xlane.xlu0 %1080  ;;  %vm5784_vm9 = vcmp.eq.s32.totalorder %v3863_v13, %v5192_v27  ;;  %3126 = vrcp.f32 %v1321_v14 }
 0x38d   : > { %v1657_v42 = vcvt.f32.s32 %v1656_v44  ;;  %v5200_v0 = vmul.f32 %v1386_v46, %v1081_v17  ;;  %v3121_v21 = vpop.eup %3120  ;;  %3128 = vrcp.f32 %v1323_v48  ;;  %v1083_v37 = vpop.xlane.xlu2 %1082 }
 0x38e   : > { %2999 = vmatpush.msk.msrb.mxu2 %vm5783_vm12, %v5952_v8  ;;  %v3123_v9 = vpop.eup %3122  ;;  %v1382_v32 = vmul.f32 2.0, %v3121_v21 }
 0x38f   : > { %v5210_v43 = vadd.s32 %v1659_v63, %v1657_v42  ;;  %v3125_v57 = vpop.eup %3124  ;;  %v1324_v2 = vadd.f32 1e-06, %v3123_v9 }
 0x390   : > { %3000 = vmatpush.msk.msrb.mxu2 %vm5784_vm9, %v5952_v8  ;;  %vm2055_vm9 = vcmp.eq.s32.totalorder %v3863_v13, %v5208_v58  ;;  %v1325_v28 = vadd.f32 1e-06, %v3125_v57  ;;  %v6001_v57 = vmov 0.0  }
 0x391   : > { %vm2056_vm12 = vcmp.eq.s32.totalorder %v3863_v13, %v5210_v43  ;;  %2281 = vmatmul.f32.vlgmr.msrb.gmra.mxu2 %v5952_v8  ;;  %3130 = vrcp.f32 %v1324_v2  ;;  %v2937_v2 = vsel %vm2053_vm7, 1.0, %v6001_v57  ;;  %v2967_v58 = vsel %vm2083_vm0, 1.0, %v6001_v57 }
 0x392   : > { %2981 = vmatpush.msk.msrb.mxu1 %vm2056_vm12, %v5952_v8  ;;  %v3127_v49 = vpop.eup %3126  ;;  %3132 = vrcp.f32 %v1325_v28  ;;  %v2965_v33 = vsel %vm2081_vm2, 1.0, %v6001_v57  ;;  %v2962_v60 = vsel %vm2078_vm5, 1.0, %v6001_v57  ;;  %v2968_v25 = vsel %vm2084_vm14, 1.0, %v6001_v57 }
 0x393   : > { %v1385_v50 = vmul.f32 2.0, %v3127_v49  ;;  %v3129_v17 = vpop.eup %3128  ;;  %v2963_v56 = vsel %vm2079_vm4, 1.0, %v6001_v57  ;;  %v2961_v39 = vsel %vm2077_vm10, 1.0, %v6001_v57  ;;  %v2941_v3 = vsel %vm2057_vm8, 1.0, %v6001_v57 }
 0x394   : > { %v1628_v54 = vpop.xlane.xlu1 %1627  ;;  %2982 = vmatpush.msk.msrb.mxu1 %vm2055_vm9, %v5952_v8  ;;  %v1387_v7 = vmul.f32 2.0, %v3129_v17  ;;  %v1085_v6 = vpop.xlane.xlu0 %1084  ;;  %v2940_v17 = vsel %vm2056_vm12, 1.0, %v6001_v57  ;;  %v2944_v43 = vsel %vm2060_vm15, 1.0, %v6001_v57  ;;  %vm6002_vm10 = vcmp.eq.s32.totalorder %v3863_v13, %v4965_v41 }
 0x395   : > { %v1629_v22 = vcvt.f32.s32 %v1628_v54  ;;  %vm6005_vm8 = vcmp.eq.s32.totalorder %v3863_v13, %v4897_v15  ;;  %vm6015_vm14 = vcmp.eq.s32.totalorder %v3863_v13, %v5183_v23  ;;  %vm6016_vm0 = vcmp.eq.s32.totalorder %v3863_v13, %v5141_v30 }
 0x396   : > { %v1419_v62 = vmul.f32 %v1387_v7, %v1083_v37  ;;  %v2943_v7 = vsel %vm2059_vm3, 1.0, %v6001_v57  ;;  %vm6004_vm3 = vcmp.eq.s32.totalorder %v3863_v13, %v4958_v4  ;;  %vm6018_vm2 = vcmp.eq.s32.totalorder %v3863_v13, %v5135_v12 }
 0x397   : > { %v1632_v5 = vadd.s32 %v1631_v45, %v1629_v22  ;;  %v3131_v59 = vpop.eup %3130  ;;  %v2946_v61 = vsel %vm6004_vm3, 1.0, %v6001_v57  ;;  %vm6020_vm4 = vcmp.eq.s32.totalorder %v3863_v13, %v5120_v36  ;;  %vm6021_vm5 = vcmp.eq.s32.totalorder %v3863_v13, %v5081_v34  ;;  %v6023_v34 = vld [vmem:[#allocation15_spill] sm:$0xff]  ;;  %v6025_v36 = vld [vmem:[#allocation57_spill] sm:$0xff] }
 0x398   : > { %v1388_v47 = vmul.f32 2.0, %v3131_v59 }
 0x399   : > { %vm2054_vm11 = vcmp.eq.s32.totalorder %v3863_v13, %v1632_v5  ;;  %v2966_v5 = vsel %vm2082_vm1, 1.0, %v6001_v57  ;;  %vm6017_vm1 = vcmp.eq.s32.totalorder %v3863_v13, %v5169_v19  ;;  %v2958_v19 = vsel %vm6020_vm4, 1.0, %v6001_v57 }
 0x39a   : > { %2983 = vmatpush.msk.msrb.mxu1 %vm2054_vm11, %v5952_v8  ;;  %v1420_v54 = vmul.f32 %v1388_v47, %v1085_v6 }
 0x39c   : > { %v1073_v51 = vpop.xlane.xlu1 %1072  ;;  %2984 = vmatpush.msk.msrb.mxu1 %vm2053_vm7, %v5952_v8  ;;  %vm6012_vm7 = vcmp.eq.s32.totalorder %v3863_v13, %v5192_v27  ;;  %v2956_v27 = vsel %vm6016_vm0, 1.0, %v6001_v57 }
 0x39d   : > { %v1414_v52 = vmul.f32 %v1382_v32, %v1073_v51  ;;  %2261 = vmatmul.f32.vlgmr.msrb.gmra.mxu1 %v5952_v8  ;;  %v3133_v8 = vpop.eup %3132  ;;  %v2939_v32 = vsel %vm2055_vm9, 1.0, %v6001_v57 }
 0x39e   : > { %v1389_v38 = vmul.f32 2.0, %v3133_v8 }
 0x39f   : > { %v1445_v46 = vadd.f32 %v5107_v1, %v1414_v52 }
 0x3a1   : > { %v1446_v20 = vadd.f32 %v1445_v46, %v5158_v10  ;;  %v2964_v46 = vsel %vm2080_vm13, 1.0, %v6001_v57  ;;  %vm6019_vm13 = vcmp.eq.s32.totalorder %v3863_v13, %v5095_v31  ;;  %v6024_v31 = vld [vmem:[#allocation53_spill] sm:$0xff] }
 0x3a2   : > { %v2959_v30 = vsel %vm6019_vm13, 1.0, %v6001_v57 }
 0x3a3   : > { %v1447_v44 = vadd.f32 %v1446_v20, %v5152_v18 }
 0x3a4   : > { %v1079_v63 = vpop.xlane.xlu1 %1078 }
 0x3a5   : > { %v1417_v42 = vmul.f32 %v1385_v50, %v1079_v63 }
 0x3a7   : > { %v1448_v16 = vadd.f32 %v1447_v44, %v1417_v42  ;;  %v2942_v42 = vsel %vm2058_vm6, 1.0, %v6001_v57  ;;  %vm6003_vm6 = vcmp.eq.s32.totalorder %v3863_v13, %v4960_v53  ;;  %v6006_v53 = vld [vmem:[#allocation5_spill] sm:$0xff] }
 0x3a8   : > { %v2947_v35 = vsel %vm6003_vm6, 1.0, %v6001_v57  ;;  %vm6007_vm9 = vcmp.eq.s32.totalorder %v3863_v13, %v6006_v53 }
 0x3a9   : > { %v1449_v1 = vadd.f32 %v1448_v16, %v5200_v0  ;;  %v2938_v0 = vsel %vm2054_vm11, 1.0, %v6001_v57  ;;  %v2945_v16 = vsel %vm6002_vm10, 1.0, %v6001_v57  ;;  %v2950_v4 = vsel %vm6007_vm9, 1.0, %v6001_v57 }
 0x3aa   : > { %vm1475_vm10 = vcmask 0  }
 0x3ab   : > { %v1450_v10 = vadd.f32 %v1449_v1, %v1419_v62  ;;  %v2948_v62 = vsel %vm6005_vm8, 1.0, %v6001_v57 }
 0x3ac   : > { %v1087_v45 = vpop.xlane.xlu1 %1086 }
 0x3ad   : > { %v1421_v22 = vmul.f32 %v1389_v38, %v1087_v45  ;;  %v1451_v14 = vadd.f32 %v1450_v10, %v1420_v54  ;;  %v6008_v54 = vld [vmem:[#allocation100_spill] sm:$0xff]  ;;  %v6010_v10 = vld [vmem:[#allocation3_spill] sm:$0xff] }
 0x3ae   : > { %vm6009_vm11 = vcmp.eq.s32.totalorder %v3863_v13, %v6008_v54  ;;  %vm6011_vm12 = vcmp.eq.s32.totalorder %v3863_v13, %v6010_v10  ;;  %v6042_v10 = vld [vmem:[#allocation58_spill] sm:$0xff] }
 0x3af   : > { %v5247_v18 = vadd.f32 %v1451_v14, %v1421_v22  ;;  %v2949_v38 = vsel %vm6009_vm11, 1.0, %v6001_v57  ;;  %v2951_v45 = vsel %vm6011_vm12, 1.0, %v6001_v57 }
 0x414   : > { %v2282_v26 = vpop.f32.mrf.mxu2 }
 0x41a   : > { %v2262_v21 = vpop.f32.mrf.mxu1 }
 0x41b   : > { %v2283_v9 = vadd.f32 %v2282_v26, %v2262_v21  ;;  %v2953_v26 = vsel %vm6012_vm7, 1.0, %v6001_v57  ;;  %v6013_v21 = vld [vmem:[#allocation108_spill] sm:$0xff] }
 0x41c   : > { %vm6014_vm15 = vcmp.eq.s32.totalorder %v3863_v13, %v6013_v21  ;;  %v6022_v13 = vld [vmem:[#allocation16_spill] sm:$0xff] }
 0x41d   : > { %v5249_v48 = vperm.slane %v2283_v9, 0  ;;  %v2952_v9 = vsel %vm6014_vm15, 1.0, %v6001_v57 }
 0x41f   : > { %v2286_v51 = vmul.f32 %v2937_v2, %v5249_v48  ;;  %v2287_v52 = vmul.f32 %v2938_v0, %v5249_v48  ;;  %v2288_v28 = vmul.f32 %v2939_v32, %v5249_v48  ;;  %v5301_v49 = vmul.f32 %v2961_v39, %v5249_v48  ;;  %v6028_v39 = vld [vmem:[#allocation25_spill] sm:$0xff] }
 0x420   : > { %v5304_v24 = vmul.f32 %v2962_v60, %v5249_v48  ;;  %v5307_v20 = vmul.f32 %v2963_v56, %v5249_v48  ;;  %v5310_v29 = vmul.f32 %v2964_v46, %v5249_v48  ;;  %v5313_v55 = vmul.f32 %v2965_v33, %v5249_v48 }
 0x421   : > { %2320 = vadd.xlane.f32.xlu2 %v2287_v52  ;;  %2318 = vadd.xlane.f32.xlu1 %v2286_v51  ;;  %v5316_v50 = vmul.f32 %v2966_v5, %v5249_v48  ;;  %v5319_v11 = vmul.f32 %v2967_v58, %v5249_v48  ;;  %v5322_v44 = vmul.f32 %v2968_v25, %v5249_v48  ;;  %v2954_v0 = vsel %vm6015_vm14, 1.0, %v6001_v57  ;;  %v6027_v25 = vld [vmem:[#allocation21_spill] sm:$0xff] }
 0x422   : > { %2322 = vadd.xlane.f32.xlu0 %v2288_v28  ;;  %v2290_v63 = vmul.f32 %v2941_v3, %v5249_v48  ;;  %v2289_v59 = vmul.f32 %v2940_v17, %v5249_v48  ;;  %v2291_v37 = vmul.f32 %v2942_v42, %v5249_v48  ;;  %v2293_v40 = vmul.f32 %v2944_v43, %v5249_v48 }
 0x423   : > { %v2292_v8 = vmul.f32 %v2943_v7, %v5249_v48  ;;  %v2294_v6 = vmul.f32 %v2945_v16, %v5249_v48  ;;  %v2296_v41 = vmul.f32 %v2947_v35, %v5249_v48  ;;  %v2295_v47 = vmul.f32 %v2946_v61, %v5249_v48 }
 0x424   : > { %v2297_v1 = vmul.f32 %v2948_v62, %v5249_v48  ;;  %v2299_v15 = vmul.f32 %v2950_v4, %v5249_v48  ;;  %v2298_v22 = vmul.f32 %v2949_v38, %v5249_v48  ;;  %v2300_v14 = vmul.f32 %v2951_v45, %v5249_v48  ;;  %v6040_v4 = vld [vmem:[#allocation54_spill] sm:$0xff] }
 0x425   : > { %v2302_v32 = vmul.f32 %v2953_v26, %v5249_v48  ;;  %v2301_v2 = vmul.f32 %v2952_v9, %v5249_v48  ;;  %v2303_v51 = vmul.f32 %v2954_v0, %v5249_v48  ;;  %v2955_v52 = vsel %vm6017_vm1, 1.0, %v6001_v57  ;;  %v6041_v38 = vld [vmem:[#allocation50_spill] sm:$0xff]  ;;  %v6044_v26 = vld [vmem:[#allocation65_spill] sm:$0xff]  ;;  %v6045_v9 = vld [vmem:[#allocation59_spill] sm:$0xff] }
 0x426   : > { %v2305_v23 = vmul.f32 %v2956_v27, %v5249_v48  ;;  %v2957_v28 = vsel %vm6018_vm2, 1.0, %v6001_v57  ;;  %v2304_v58 = vmul.f32 %v2955_v52, %v5249_v48  ;;  %v2308_v12 = vmul.f32 %v2959_v30, %v5249_v48 }
 0x427   : > { %v2306_v5 = vmul.f32 %v2957_v28, %v5249_v48  ;;  %v2960_v33 = vsel %vm6021_vm5, 1.0, %v6001_v57  ;;  %v2307_v46 = vmul.f32 %v2958_v19, %v5249_v48  ;;  %v2149_v56 = vmul.f32 -70.0, %v6027_v25  ;;  %v6047_v28 = vld [vmem:[#allocation63_spill] sm:$0xff] }
 0x428   : > { %v2309_v60 = vmul.f32 %v2960_v33, %v5249_v48  ;;  %v6026_v48 = vld [vmem:[#allocation20_spill] sm:$0xff]  ;;  %v2164_v3 = vmul.f32 -70.0, %v6028_v39  ;;  %v6048_v19 = vld [vmem:[#allocation67_spill] sm:$0xff]  ;;  %v6052_v39 = vld [vmem:[#allocation62_spill] sm:$0xff] }
 0x429   : > { %2326 = vadd.xlane.f32.xlu2 %v2290_v63  ;;  %2324 = vadd.xlane.f32.xlu1 %v2289_v59  ;;  %v2160_v57 = vmul.f32 -70.0, %v6026_v48  ;;  %v2181_v17 = vmul.f32 1.442695, %v2149_v56  ;;  %v6034_v63 = vld [vmem:[#allocation33_spill] sm:$0xff] }
 0x42a   : > { %2328 = vadd.xlane.f32.xlu0 %v2291_v37  ;;  %v2161_v42 = vmul.f32 -70.0, %v6034_v63  ;;  %v2211_v59 = vmul.f32 1.442695, %v2164_v3  ;;  %v6035_v37 = vld [vmem:[#allocation34_spill] sm:$0xff]  ;;  %v2176_v3 = vmul.f32 -70.0, %v6052_v39 }
 0x42b   : > { %v2165_v43 = vmul.f32 -70.0, %v6035_v37 }
 0x42c   : > { %v2205_v61 = vmul.f32 1.442695, %v2161_v42  ;;  %v6056_v42 = vld [vmem:[#allocation72_spill] sm:$0xff] }
 0x431   : > { %2332 = vadd.xlane.f32.xlu2 %v2293_v40  ;;  %2330 = vadd.xlane.f32.xlu1 %v2292_v8  ;;  %v6036_v40 = vld [vmem:[#allocation41_spill] sm:$0xff] }
 0x432   : > { %2334 = vadd.xlane.f32.xlu0 %v2294_v6  ;;  %v2150_v16 = vmul.f32 -70.0, %v6036_v40  ;;  %v6037_v6 = vld [vmem:[#allocation42_spill] sm:$0xff] }
 0x433   : > { %v2151_v35 = vmul.f32 -70.0, %v6037_v6  ;;  %v6058_v40 = vld [vmem:[#allocation78_spill] sm:$0xff] }
 0x434   : > { %v2183_v54 = vmul.f32 1.442695, %v2150_v16  ;;  %v2169_v16 = vmul.f32 -70.0, %v6058_v40 }
 0x435   : > { %v2185_v45 = vmul.f32 1.442695, %v2151_v35 }
 0x439   : > { %2338 = vadd.xlane.f32.xlu2 %v2296_v41  ;;  %2336 = vadd.xlane.f32.xlu1 %v2295_v47  ;;  %v6038_v41 = vld [vmem:[#allocation43_spill] sm:$0xff]  ;;  %v2213_v47 = vmul.f32 1.442695, %v2165_v43  ;;  %v2235_v43 = vmul.f32 1.442695, %v2176_v3 }
 0x43a   : > { %2340 = vadd.xlane.f32.xlu0 %v2297_v1  ;;  %v2162_v62 = vmul.f32 -70.0, %v6038_v41  ;;  %v6039_v1 = vld [vmem:[#allocation14_spill] sm:$0xff]  ;;  %v6060_v41 = vld [vmem:[#allocation68_spill] sm:$0xff] }
 0x43b   : > { %v2173_v53 = vmul.f32 -70.0, %v6039_v1 }
 0x43c   : > { %v2207_v21 = vmul.f32 1.442695, %v2162_v62  ;;  %v2155_v62 = vmul.f32 -70.0, %v6060_v41 }
 0x441   : > { %2344 = vadd.xlane.f32.xlu2 %v2299_v15  ;;  %2342 = vadd.xlane.f32.xlu1 %v2298_v22  ;;  %v2166_v15 = vmul.f32 -70.0, %v6041_v38  ;;  %v6043_v22 = vld [vmem:[#allocation52_spill] sm:$0xff] }
 0x442   : > { %2346 = vadd.xlane.f32.xlu0 %v2300_v14  ;;  %v2174_v14 = vmul.f32 -70.0, %v6043_v22  ;;  %v2193_v22 = vmul.f32 1.442695, %v2155_v62 }
 0x444   : > { %v2231_v30 = vmul.f32 1.442695, %v2174_v14  ;;  %v6064_v14 = vld [vmem:[#allocation80_spill] sm:$0xff] }
 0x449   : > { %2350 = vadd.xlane.f32.xlu2 %v2302_v32  ;;  %2348 = vadd.xlane.f32.xlu1 %v2301_v2  ;;  %v2163_v32 = vmul.f32 -70.0, %v6045_v9  ;;  %v2229_v2 = vmul.f32 1.442695, %v2173_v53  ;;  %v6062_v53 = vld [vmem:[#allocation60_spill] sm:$0xff]  ;;  %v6066_v9 = vld [vmem:[#allocation81_spill] sm:$0xff] }
 0x44a   : > { %2352 = vadd.xlane.f32.xlu0 %v2303_v51  ;;  %v6046_v51 = vld [vmem:[#allocation18_spill] sm:$0xff] }
 0x44b   : > { %v2152_v27 = vmul.f32 -70.0, %v6046_v51 }
 0x451   : > { %2356 = vadd.xlane.f32.xlu2 %v2305_v23  ;;  %2354 = vadd.xlane.f32.xlu1 %v2304_v58  ;;  %v2215_v23 = vmul.f32 1.442695, %v2166_v15  ;;  %v2153_v58 = vmul.f32 -70.0, %v6047_v28 }
 0x452   : > { %2358 = vadd.xlane.f32.xlu0 %v2306_v5 }
 0x453   : > { %v2189_v56 = vmul.f32 1.442695, %v2153_v58 }
 0x459   : > { %2362 = vadd.xlane.f32.xlu2 %v2308_v12  ;;  %2360 = vadd.xlane.f32.xlu1 %v2307_v46  ;;  %v2175_v12 = vmul.f32 -70.0, %v6048_v19  ;;  %v2209_v46 = vmul.f32 1.442695, %v2163_v32  ;;  %v2178_v32 = vmul.f32 -70.0, %v6066_v9  ;;  %v6069_v19 = vld [vmem:[#allocation71_spill] sm:$0xff] }
 0x45a   : > { %2364 = vadd.xlane.f32.xlu0 %v2309_v60  ;;  %v6049_v60 = vld [vmem:[#allocation51_spill] sm:$0xff] }
 0x461   : > { %2368 = vadd.xlane.f32.xlu2 %v5304_v24  ;;  %2366 = vadd.xlane.f32.xlu1 %v5301_v49  ;;  %v6029_v49 = vld [vmem:[#allocation17_spill] sm:$0xff]  ;;  %v6030_v24 = vld [vmem:[#allocation27_spill] sm:$0xff] }
 0x462   : > { %2370 = vadd.xlane.f32.xlu0 %v5307_v20  ;;  %v2171_v20 = vmul.f32 -70.0, %v6030_v24 }
 0x464   : > { %v2225_v7 = vmul.f32 1.442695, %v2171_v20  ;;  %v2233_v20 = vmul.f32 1.442695, %v2175_v12  ;;  %v2170_v12 = vmul.f32 -70.0, %v6069_v19 }
 0x469   : > { %2374 = vadd.xlane.f32.xlu2 %v5313_v55  ;;  %2372 = vadd.xlane.f32.xlu1 %v5310_v29  ;;  %v6031_v29 = vld [vmem:[#allocation55_spill] sm:$0xff]  ;;  %v2203_v55 = vmul.f32 1.442695, %v2160_v57  ;;  %v6051_v57 = vld [vmem:[#allocation56_spill] sm:$0xff] }
 0x46a   : > { %2376 = vadd.xlane.f32.xlu0 %v5316_v50  ;;  %v6032_v50 = vld [vmem:[#allocation32_spill] sm:$0xff] }
 0x46b   : > { %3134 = vpow2.f32 %v2203_v55 }
 0x46c   : > { %3136 = vpow2.f32 %v2181_v17 }
 0x46d   : > { %3138 = vpow2.f32 %v2211_v59  ;;  %v2177_v59 = vmul.f32 -70.0, %v6056_v42  ;;  %v6076_v42 = vld [vmem:[#allocation79_spill] sm:$0xff] }
 0x46e   : > { %3140 = vpow2.f32 %v2225_v7 }
 0x46f   : > { %v2237_v1 = vmul.f32 1.442695, %v2177_v59  ;;  %v2158_v59 = vmul.f32 -70.0, %v6076_v42 }
 0x471   : > { %2378 = vadd.xlane.f32.xlu2 %v5319_v11  ;;  %2380 = vadd.xlane.f32.xlu1 %v5322_v44  ;;  %v2172_v11 = vmul.f32 -70.0, %v6032_v50  ;;  %v6033_v44 = vld [vmem:[#allocation61_spill] sm:$0xff]  ;;  %v5457_v0 = vpop.eup %3134 }
 0x472   : > { %1090 = vadd.xlane.f32.xlu0 %v6022_v13  ;;  %v5460_v52 = vpop.eup %3136  ;;  %v2167_v13 = vmul.f32 -70.0, %v6049_v60 }
 0x473   : > { %v2227_v8 = vmul.f32 1.442695, %v2172_v11  ;;  %v5463_v5 = vpop.eup %3138  ;;  %v6055_v11 = vld [vmem:[#allocation70_spill] sm:$0xff] }
 0x474   : > { %v5466_v33 = vpop.eup %3140  ;;  %v2217_v50 = vmul.f32 1.442695, %v2167_v13 }
 0x475   : > { %3142 = vpow2.f32 %v2227_v8  ;;  %v6059_v8 = vld [vmem:[#allocation28_spill] sm:$0xff] }
 0x476   : > { %3144 = vpow2.f32 %v2205_v61  ;;  %v1134_v6 = vmax.f32 %v6059_v8, 1.0 }
 0x477   : > { %3146 = vpow2.f32 %v2213_v47 }
 0x478   : > { %3148 = vpow2.f32 %v2183_v54  ;;  %v6063_v54 = vld [vmem:[#allocation26_spill] sm:$0xff] }
 0x479   : > { %1088 = vadd.xlane.f32.xlu2 %v6023_v34  ;;  %1092 = vadd.xlane.f32.xlu1 %v6024_v31  ;;  %3150 = vpow2.f32 %v2185_v45  ;;  %v2187_v31 = vmul.f32 1.442695, %v2152_v27  ;;  %v1137_v38 = vmax.f32 %v6063_v54, 1.0 }
 0x47a   : > { %1096 = vadd.xlane.f32.xlu0 %v6025_v36  ;;  %3152 = vpow2.f32 %v2207_v21  ;;  %v6050_v36 = vld [vmem:[#allocation69_spill] sm:$0xff] }
 0x47b   : > { %v5469_v34 = vpop.eup %3142  ;;  %3154 = vpow2.f32 %v2229_v2  ;;  %v2168_v48 = vmul.f32 -70.0, %v6050_v36  ;;  %v6067_v2 = vld [vmem:[#allocation36_spill] sm:$0xff] }
 0x47c   : > { %v5473_v25 = vpop.eup %3144  ;;  %3156 = vpow2.f32 %v2215_v23  ;;  %v1136_v51 = vmax.f32 %v6067_v2, 1.0  ;;  %v6068_v23 = vld [vmem:[#allocation38_spill] sm:$0xff] }
 0x47d   : > { %v5477_v24 = vpop.eup %3146  ;;  %3158 = vpow2.f32 %v2231_v30  ;;  %v2219_v63 = vmul.f32 1.442695, %v2168_v48  ;;  %v1140_v28 = vmax.f32 %v6068_v23, 1.0  ;;  %v2239_v48 = vmul.f32 1.442695, %v2178_v32 }
 0x47e   : > { %v5480_v55 = vpop.eup %3148  ;;  %3160 = vpow2.f32 %v2209_v46  ;;  %v6070_v46 = vld [vmem:[#allocation39_spill] sm:$0xff] }
 0x47f   : > { %v5483_v17 = vpop.eup %3150  ;;  %3162 = vpow2.f32 %v2187_v31  ;;  %v1135_v60 = vmax.f32 %v6070_v46, 1.0 }
 0x480   : > { %v5486_v37 = vpop.eup %3152  ;;  %3164 = vpow2.f32 %v2189_v56 }
 0x481   : > { %1094 = vadd.xlane.f32.xlu2 %v6029_v49  ;;  %1098 = vadd.xlane.f32.xlu1 %v6031_v29  ;;  %v6053_v49 = vld [vmem:[#allocation64_spill] sm:$0xff]  ;;  %v6054_v29 = vld [vmem:[#allocation66_spill] sm:$0xff]  ;;  %v5488_v7 = vpop.eup %3154  ;;  %3166 = vpow2.f32 %v2233_v20 }
 0x482   : > { %1102 = vadd.xlane.f32.xlu0 %v6033_v44  ;;  %v2154_v44 = vmul.f32 -70.0, %v6055_v11  ;;  %6057 = vst [vmem:[#allocation10_spill] sm:$0xff] %v5488_v7  ;;  %v5492_v35 = vpop.eup %3156  ;;  %3168 = vpow2.f32 %v2217_v50  ;;  %v2223_v50 = vmul.f32 1.442695, %v2170_v12  ;;  %v6075_v11 = vld [vmem:[#allocation85_spill] sm:$0xff] }
 0x483   : > { %v5495_v47 = vpop.eup %3158  ;;  %3170 = vpow2.f32 %v2219_v63 }
 0x484   : > { %v2191_v61 = vmul.f32 1.442695, %v2154_v44  ;;  %6061 = vst [vmem:[#allocation6_spill] sm:$0xff] %v5495_v47  ;;  %3172 = vpow2.f32 %v2235_v43  ;;  %v2157_v44 = vmul.f32 -70.0, %v6075_v11 }
 0x485   : > { %3174 = vlog2.f32 %v1134_v6 }
 0x486   : > { %3176 = vpow2.f32 %v2191_v61  ;;  %v6077_v61 = vld [vmem:[#allocation86_spill] sm:$0xff]  ;;  %v2197_v54 = vmul.f32 1.442695, %v2157_v44 }
 0x487   : > { %3178 = vpow2.f32 %v2237_v1  ;;  %v2159_v41 = vmul.f32 -70.0, %v6077_v61 }
 0x488   : > { %3180 = vlog2.f32 %v1137_v38 }
 0x489   : > { %1100 = vadd.xlane.f32.xlu2 %v6040_v4  ;;  %1104 = vadd.xlane.f32.xlu1 %v6042_v10  ;;  %v5498_v4 = vpop.eup %3160  ;;  %v2221_v10 = vmul.f32 1.442695, %v2169_v16 }
 0x48a   : > { %1108 = vadd.xlane.f32.xlu0 %v6044_v26  ;;  %v5501_v15 = vpop.eup %3162  ;;  %v2156_v26 = vmul.f32 -70.0, %v6064_v14 }
 0x48b   : > { %v5503_v45 = vpop.eup %3164  ;;  %3182 = vpow2.f32 %v2221_v10 }
 0x48c   : > { %v5506_v21 = vpop.eup %3166  ;;  %3184 = vpow2.f32 %v2193_v22  ;;  %v2195_v31 = vmul.f32 1.442695, %v2156_v26  ;;  %v2199_v22 = vmul.f32 1.442695, %v2158_v59 }
 0x48d   : > { %6065 = vst [vmem:[#allocation103_spill] sm:$0xff] %v5506_v21  ;;  %v5510_v27 = vpop.eup %3168  ;;  %3186 = vlog2.f32 %v1136_v51  ;;  %v2201_v51 = vmul.f32 1.442695, %v2159_v41 }
 0x48e   : > { %v5513_v30 = vpop.eup %3170  ;;  %3188 = vlog2.f32 %v1140_v28 }
 0x48f   : > { %v5517_v13 = vpop.eup %3172  ;;  %3190 = vlog2.f32 %v1135_v60 }
 0x490   : > { %6071 = vst [vmem:[#allocation101_spill] sm:$0xff] %v5517_v13  ;;  %v3175_v36 = vpop.eup %3174  ;;  %3192 = vpow2.f32 %v2195_v31 }
 0x491   : > { %1106 = vadd.xlane.f32.xlu2 %v6051_v57  ;;  %1110 = vadd.xlane.f32.xlu1 %v6053_v49  ;;  %v6072_v57 = vld [vmem:[#allocation83_spill] sm:$0xff]  ;;  %v5520_v3 = vpop.eup %3176  ;;  %v6073_v49 = vld [vmem:[#allocation102_spill] sm:$0xff]  ;;  %v1185_v43 = vmul.f32 0.6931472, %v3175_v36  ;;  %3194 = vpow2.f32 %v2239_v48  ;;  %v6079_v48 = vld [vmem:[#allocation29_spill] sm:$0xff] }
 0x492   : > { %1114 = vadd.xlane.f32.xlu0 %v6054_v29  ;;  %v2179_v56 = vmul.f32 -70.0, %v6072_v57  ;;  %v1139_v20 = vmax.f32 %v6073_v49, 1.0  ;;  %v5523_v29 = vpop.eup %3178  ;;  %v1143_v57 = vmax.f32 %v6079_v48, 1.0 }
 0x493   : > { %6074 = vst [vmem:[#allocation45_spill] sm:$0xff] %v5523_v29  ;;  %v3181_v63 = vpop.eup %3180  ;;  %v1230_v14 = vmul.f32 0.3, %v1185_v43 }
 0x494   : > { %v2319_v58 = vpop.xlane.xlu1 %2318  ;;  %v2321_v39 = vpop.xlane.xlu2 %2320  ;;  %v2241_v8 = vmul.f32 1.442695, %v2179_v56  ;;  %3196 = vlog2.f32 %v1139_v20  ;;  %v1191_v38 = vmul.f32 0.6931472, %v3181_v63  ;;  %v6080_v20 = vld [vmem:[#allocation104_spill] sm:$0xff] }
 0x495   : > { %v2383_v40 = vmax.f32 %v2321_v39, 1.0  ;;  %v5527_v16 = vpop.eup %3182  ;;  %v2382_v62 = vmax.f32 %v2319_v58, 1.0  ;;  %v2323_v1 = vpop.xlane.xlu0 %2322  ;;  %3198 = vpow2.f32 %v2223_v50  ;;  %v1280_v60 = vmul.f32 1.442695, %v1230_v14 }
 0x496   : > { %v5529_v6 = vpop.eup %3184  ;;  %v2384_v32 = vmax.f32 %v2323_v1, 1.0  ;;  %v1233_v58 = vmul.f32 0.3, %v1191_v38  ;;  %v1138_v50 = vmax.f32 %v6080_v20, 1.0 }
 0x497   : > { %3200 = vlog2.f32 %v2383_v40  ;;  %v6082_v40 = vld [vmem:[#allocation105_spill] sm:$0xff] }
 0x498   : > { %3202 = vpow2.f32 %v2241_v8  ;;  %v1286_v44 = vmul.f32 1.442695, %v1233_v58  ;;  %v1142_v8 = vmax.f32 %v6082_v40, 1.0 }
 0x499   : > { %1112 = vadd.xlane.f32.xlu2 %v6062_v53  ;;  %v3187_v53 = vpop.eup %3186  ;;  %3204 = vlog2.f32 %v2382_v62 }
 0x49a   : > { %v3189_v10 = vpop.eup %3188  ;;  %v1189_v23 = vmul.f32 0.6931472, %v3187_v53  ;;  %3206 = vpow2.f32 %v2197_v54 }
 0x49b   : > { %v3191_v9 = vpop.eup %3190  ;;  %v1197_v19 = vmul.f32 0.6931472, %v3189_v10  ;;  %3208 = vpow2.f32 %v2199_v22 }
 0x49c   : > { %v2325_v26 = vpop.xlane.xlu1 %2324  ;;  %v5532_v2 = vpop.eup %3192  ;;  %v1187_v31 = vmul.f32 0.6931472, %v3191_v9  ;;  %3210 = vlog2.f32 %v2384_v32  ;;  %v1232_v49 = vmul.f32 0.3, %v1189_v23 }
 0x49d   : > { %v5534_v28 = vpop.eup %3194  ;;  %v2385_v12 = vmax.f32 %v2325_v26, 1.0  ;;  %v2327_v56 = vpop.xlane.xlu2 %2326  ;;  %3212 = vpow2.f32 %v2201_v51  ;;  %v1236_v63 = vmul.f32 0.3, %v1197_v19 }
 0x49e   : > { %6078 = vst [vmem:[#allocation37_spill] sm:$0xff] %v5534_v28  ;;  %v3197_v46 = vpop.eup %3196  ;;  %v1231_v43 = vmul.f32 0.3, %v1187_v31  ;;  %v2386_v62 = vmax.f32 %v2327_v56, 1.0  ;;  %v1284_v53 = vmul.f32 1.442695, %v1232_v49  ;;  %v2329_v54 = vpop.xlane.xlu0 %2328 }
 0x49f   : > { %v5536_v36 = vpop.eup %3198  ;;  %v1195_v42 = vmul.f32 0.6931472, %v3197_v46  ;;  %3214 = vlog2.f32 %v2385_v12  ;;  %v1292_v10 = vmul.f32 1.442695, %v1236_v63  ;;  %v2387_v58 = vmax.f32 %v2329_v54, 1.0  ;;  %v6086_v28 = vld [vmem:[#allocation19_spill] sm:$0xff] }
 0x4a0   : > { %v3201_v39 = vpop.eup %3200  ;;  %3216 = vpow2.f32 %v1280_v60  ;;  %v1282_v32 = vmul.f32 1.442695, %v1231_v43  ;;  %v1144_v29 = vmax.f32 %v6086_v28, 1.0 }
 0x4a1   : > { %v5540_v11 = vpop.eup %3202  ;;  %3218 = vlog2.f32 %v1143_v57  ;;  %v2417_v41 = vmul.f32 0.6931472, %v3201_v39  ;;  %v1235_v22 = vmul.f32 0.3, %v1195_v42  ;;  %v6083_v39 = vld [vmem:[#allocation31_spill] sm:$0xff] }
 0x4a2   : > { %6081 = vst [vmem:[#allocation30_spill] sm:$0xff] %v5540_v11  ;;  %v3205_v59 = vpop.eup %3204  ;;  %3220 = vlog2.f32 %v1138_v50  ;;  %v1146_v49 = vmax.f32 %v6083_v39, 1.0 }
 0x4a3   : > { %v5543_v61 = vpop.eup %3206  ;;  %3222 = vpow2.f32 %v1286_v44  ;;  %v2415_v14 = vmul.f32 0.6931472, %v3205_v59  ;;  %v2479_v23 = vmul.f32 0.3, %v2417_v41  ;;  %v1290_v31 = vmul.f32 1.442695, %v1235_v22 }
 0x4a4   : > { %v5545_v1 = vpop.eup %3208  ;;  %v2331_v26 = vpop.xlane.xlu1 %2330  ;;  %3224 = vlog2.f32 %v1142_v8 }
 0x4a5   : > { %v3211_v38 = vpop.eup %3210  ;;  %3226 = vlog2.f32 %v2386_v62  ;;  %v2388_v46 = vmax.f32 %v2331_v26, 1.0  ;;  %v2478_v48 = vmul.f32 0.3, %v2415_v14  ;;  %v2333_v57 = vpop.xlane.xlu2 %2332  ;;  %v2512_v44 = vmul.f32 1.442695, %v2479_v23  ;;  %v6085_v26 = vld [vmem:[#allocation106_spill] sm:$0xff] }
 0x4a6   : > { %v5547_v9 = vpop.eup %3212  ;;  %3228 = vpow2.f32 %v1284_v53  ;;  %v2419_v12 = vmul.f32 0.6931472, %v3211_v38  ;;  %v2389_v43 = vmax.f32 %v2333_v57, 1.0  ;;  %v6084_v53 = vld [vmem:[#allocation46_spill] sm:$0xff] }
 0x4a7   : > { %v3215_v51 = vpop.eup %3214  ;;  %3230 = vpow2.f32 %v1292_v10  ;;  %v2510_v41 = vmul.f32 1.442695, %v2478_v48  ;;  %v1141_v54 = vmax.f32 %v6084_v53, 1.0  ;;  %v2335_v10 = vpop.xlane.xlu0 %2334 }
 0x4a8   : > { %v5549_v19 = vpop.eup %3216  ;;  %3232 = vpow2.f32 %v1282_v32  ;;  %v2421_v20 = vmul.f32 0.6931472, %v3215_v51  ;;  %v2480_v59 = vmul.f32 0.3, %v2419_v12  ;;  %v1145_v32 = vmax.f32 %v6085_v26, 1.0 }
 0x4a9   : > { %v3219_v60 = vpop.eup %3218  ;;  %3234 = vlog2.f32 %v2387_v58 }
 0x4aa   : > { %v3221_v56 = vpop.eup %3220  ;;  %v1203_v42 = vmul.f32 0.6931472, %v3219_v60  ;;  %3236 = vlog2.f32 %v2388_v46  ;;  %v2481_v38 = vmul.f32 0.3, %v2421_v20  ;;  %v2514_v58 = vmul.f32 1.442695, %v2480_v59 }
 0x4ab   : > { %v5552_v50 = vpop.eup %3222  ;;  %3238 = vpow2.f32 %v1290_v31  ;;  %v1193_v8 = vmul.f32 0.6931472, %v3221_v56  ;;  %v2390_v31 = vmax.f32 %v2335_v10, 1.0 }
 0x4ac   : > { %v3225_v63 = vpop.eup %3224  ;;  %3240 = vlog2.f32 %v1146_v49  ;;  %v1239_v23 = vmul.f32 0.3, %v1203_v42  ;;  %v2337_v48 = vpop.xlane.xlu1 %2336  ;;  %v2516_v56 = vmul.f32 1.442695, %v2481_v38 }
 0x4ad   : > { %v3227_v40 = vpop.eup %3226  ;;  %v1201_v14 = vmul.f32 0.6931472, %v3225_v63  ;;  %3242 = vpow2.f32 %v2512_v44  ;;  %v1234_v60 = vmul.f32 0.3, %v1193_v8  ;;  %v2339_v20 = vpop.xlane.xlu2 %2338  ;;  %v2391_v44 = vmax.f32 %v2337_v48, 1.0 }
 0x4ae   : > { %v5554_v62 = vpop.eup %3228  ;;  %v2423_v12 = vmul.f32 0.6931472, %v3227_v40  ;;  %3244 = vlog2.f32 %v2389_v43  ;;  %v1298_v53 = vmul.f32 1.442695, %v1239_v23  ;;  %v2392_v10 = vmax.f32 %v2339_v20, 1.0 }
 0x4af   : > { %v5557_v22 = vpop.eup %3230  ;;  %3246 = vpow2.f32 %v2510_v41  ;;  %v1238_v49 = vmul.f32 0.3, %v1201_v14  ;;  %v1288_v40 = vmul.f32 1.442695, %v1234_v60  ;;  %v2341_v48 = vpop.xlane.xlu0 %2340 }
 0x4b0   : > { %v5560_v51 = vpop.eup %3232  ;;  %3248 = vlog2.f32 %v1141_v54  ;;  %v2482_v42 = vmul.f32 0.3, %v2423_v12 }
 0x4b1   : > { %v3235_v46 = vpop.eup %3234  ;;  %3250 = vlog2.f32 %v1145_v32  ;;  %v1296_v38 = vmul.f32 1.442695, %v1238_v49 }
 0x4b2   : > { %v3237_v57 = vpop.eup %3236  ;;  %3252 = vpow2.f32 %v2514_v58  ;;  %v2425_v59 = vmul.f32 0.6931472, %v3235_v46  ;;  %v2518_v14 = vmul.f32 1.442695, %v2482_v42 }
 0x4b3   : > { %v5562_v39 = vpop.eup %3238  ;;  %v2427_v8 = vmul.f32 0.6931472, %v3237_v57  ;;  %3254 = vlog2.f32 %v2390_v31 }
 0x4b4   : > { %v3241_v63 = vpop.eup %3240  ;;  %3256 = vpow2.f32 %v2516_v56  ;;  %v2483_v32 = vmul.f32 0.3, %v2425_v59  ;;  %v2393_v56 = vmax.f32 %v2341_v48, 1.0 }
 0x4b5   : > { %v3243_v43 = vpop.eup %3242  ;;  %3258 = vlog2.f32 %v2391_v44  ;;  %v2484_v46 = vmul.f32 0.3, %v2427_v8 }
 0x4b6   : > { %v3245_v41 = vpop.eup %3244  ;;  %3260 = vpow2.f32 %v1298_v53  ;;  %v2575_v58 = vadd.f32 1e-06, %v3243_v43  ;;  %v2520_v20 = vmul.f32 1.442695, %v2483_v32 }
 0x4b7   : > { %v3247_v54 = vpop.eup %3246  ;;  %3262 = vpow2.f32 %v1288_v40  ;;  %v2429_v12 = vmul.f32 0.6931472, %v3245_v41  ;;  %v2522_v42 = vmul.f32 1.442695, %v2484_v46  ;;  %v2345_v41 = vpop.xlane.xlu2 %2344 }
 0x4b8   : > { %v5564_v26 = vpop.eup %3248  ;;  %v2574_v31 = vadd.f32 1e-06, %v3247_v54  ;;  %3264 = vlog2.f32 %v2392_v10  ;;  %v2343_v10 = vpop.xlane.xlu1 %2342  ;;  %v2395_v11 = vmax.f32 %v2345_v41, 1.0 }
 0x4b9   : > { %v5566_v23 = vpop.eup %3250  ;;  %3266 = vpow2.f32 %v1296_v38  ;;  %v2485_v53 = vmul.f32 0.3, %v2429_v12 }
 0x4ba   : > { %v3253_v60 = vpop.eup %3252  ;;  %3268 = vpow2.f32 %v2518_v14  ;;  %v2394_v14 = vmax.f32 %v2343_v10, 1.0  ;;  %v2347_v10 = vpop.xlane.xlu0 %2346 }
 0x4bb   : > { %v3255_v57 = vpop.eup %3254  ;;  %3270 = vrcp.f32 %v2575_v58  ;;  %v2576_v8 = vadd.f32 1e-06, %v3253_v60  ;;  %v2524_v58 = vmul.f32 1.442695, %v2485_v53  ;;  %v2396_v21 = vmax.f32 %v2347_v10, 1.0 }
 0x4bc   : > { %v3257_v49 = vpop.eup %3256  ;;  %3272 = vrcp.f32 %v2574_v31  ;;  %v2431_v40 = vmul.f32 0.6931472, %v3255_v57 }
 0x4bd   : > { %v3259_v44 = vpop.eup %3258  ;;  %3274 = vlog2.f32 %v2393_v56  ;;  %v2577_v38 = vadd.f32 1e-06, %v3257_v49  ;;  %v1209_v56 = vmul.f32 0.6931472, %v3241_v63 }
 0x4be   : > { %v5568_v59 = vpop.eup %3260  ;;  %3276 = vpow2.f32 %v2520_v20  ;;  %v2433_v48 = vmul.f32 0.6931472, %v3259_v44  ;;  %v2486_v46 = vmul.f32 0.3, %v2431_v40 }
 0x4bf   : > { %v5570_v43 = vpop.eup %3262  ;;  %3278 = vpow2.f32 %v2522_v42 }
 0x4c0   : > { %v3265_v54 = vpop.eup %3264  ;;  %3280 = vlog2.f32 %v2394_v14  ;;  %v2487_v49 = vmul.f32 0.3, %v2433_v48  ;;  %v2526_v53 = vmul.f32 1.442695, %v2486_v46 }
 0x4c1   : > { %v5572_v32 = vpop.eup %3266  ;;  %3282 = vrcp.f32 %v2576_v8  ;;  %v2435_v57 = vmul.f32 0.6931472, %v3265_v54  ;;  %v1242_v54 = vmul.f32 0.3, %v1209_v56 }
 0x4c2   : > { %v3269_v12 = vpop.eup %3268  ;;  %3284 = vrcp.f32 %v2577_v38  ;;  %v2528_v63 = vmul.f32 1.442695, %v2487_v49 }
 0x4c3   : > { %v3271_v31 = vpop.eup %3270  ;;  %v2578_v44 = vadd.f32 1e-06, %v3269_v12  ;;  %3286 = vpow2.f32 %v2524_v58  ;;  %v2488_v14 = vmul.f32 0.3, %v2435_v57 }
 0x4c4   : > { %v3273_v60 = vpop.eup %3272  ;;  %3288 = vlog2.f32 %v2395_v11  ;;  %v2639_v40 = vmul.f32 0.5, %v3271_v31 }
 0x4c5   : > { %v3275_v20 = vpop.eup %3274  ;;  %v2638_v41 = vmul.f32 0.5, %v3273_v60  ;;  %3290 = vlog2.f32 %v1144_v29  ;;  %v2530_v31 = vmul.f32 1.442695, %v2488_v14  ;;  %v1304_v60 = vmul.f32 1.442695, %v1242_v54 }
 0x4c6   : > { %v3277_v13 = vpop.eup %3276  ;;  %v2437_v47 = vmul.f32 0.6931472, %v3275_v20  ;;  %3292 = vrcp.f32 %v2578_v44  ;;  %v2671_v11 = vmul.f32 %v5480_v55, %v2639_v40  ;;  %v2351_v20 = vpop.xlane.xlu2 %2350 }
 0x4c7   : > { %v3279_v42 = vpop.eup %3278  ;;  %v2579_v38 = vadd.f32 1e-06, %v3277_v13  ;;  %3294 = vpow2.f32 %v2526_v53  ;;  %v2670_v46 = vmul.f32 %v5460_v52, %v2638_v41  ;;  %v2398_v53 = vmax.f32 %v2351_v20, 1.0  ;;  %v2349_v40 = vpop.xlane.xlu1 %2348 }
 0x4c8   : > { %v3281_v8 = vpop.eup %3280  ;;  %v2580_v12 = vadd.f32 1e-06, %v3279_v42  ;;  %3296 = vlog2.f32 %v2396_v21  ;;  %v2489_v29 = vmul.f32 0.3, %v2437_v47  ;;  %v2397_v14 = vmax.f32 %v2349_v40, 1.0 }
 0x4c9   : > { %v3283_v28 = vpop.eup %3282  ;;  %v2439_v58 = vmul.f32 0.6931472, %v3281_v8  ;;  %3298 = vpow2.f32 %v2528_v63  ;;  %v2702_v55 = vadd.f32 %v2671_v11, %v2670_v46  ;;  %v6087_v8 = vld [vmem:[#allocation107_spill] sm:$0xff] }
 0x4ca   : > { %v3285_v48 = vpop.eup %3284  ;;  %v2640_v56 = vmul.f32 0.5, %v3283_v28  ;;  %3300 = vrcp.f32 %v2579_v38  ;;  %v2532_v41 = vmul.f32 1.442695, %v2489_v29  ;;  %v1147_v54 = vmax.f32 %v6087_v8, 1.0 }
 0x4cb   : > { %v3287_v7 = vpop.eup %3286  ;;  %v2641_v49 = vmul.f32 0.5, %v3285_v48  ;;  %3302 = vrcp.f32 %v2580_v12  ;;  %v2490_v10 = vmul.f32 0.3, %v2439_v58  ;;  %v1199_v38 = vmul.f32 0.6931472, %v5564_v26 }
 0x4cc   : > { %v3289_v57 = vpop.eup %3288  ;;  %v2581_v44 = vadd.f32 1e-06, %v3287_v7  ;;  %3304 = vpow2.f32 %v2530_v31  ;;  %v2672_v63 = vmul.f32 %v5483_v17, %v2640_v56  ;;  %v1207_v26 = vmul.f32 0.6931472, %v5566_v23 }
 0x4cd   : > { %v5577_v13 = vpop.eup %3290  ;;  %v2441_v52 = vmul.f32 0.6931472, %v3289_v57  ;;  %3306 = vpow2.f32 %v1304_v60  ;;  %v2673_v28 = vmul.f32 %v5501_v15, %v2641_v49  ;;  %v2534_v48 = vmul.f32 1.442695, %v2490_v10 }
 0x4ce   : > { %v3293_v42 = vpop.eup %3292  ;;  %3308 = vlog2.f32 %v2398_v53  ;;  %v2703_v11 = vadd.f32 %v2702_v55, %v2672_v63  ;;  %v1237_v20 = vmul.f32 0.3, %v1199_v38  ;;  %v1241_v38 = vmul.f32 0.3, %v1207_v26 }
 0x4cf   : > { %v3295_v21 = vpop.eup %3294  ;;  %3310 = vrcp.f32 %v2581_v44  ;;  %v2642_v46 = vmul.f32 0.5, %v3293_v42  ;;  %v2491_v31 = vmul.f32 0.3, %v2441_v52  ;;  %v2353_v44 = vpop.xlane.xlu0 %2352 }
 0x4d0   : > { %v3297_v47 = vpop.eup %3296  ;;  %3312 = vlog2.f32 %v2397_v14  ;;  %v2582_v60 = vadd.f32 1e-06, %v3295_v21  ;;  %v2704_v17 = vadd.f32 %v2703_v11, %v2673_v28  ;;  %v2399_v52 = vmax.f32 %v2353_v44, 1.0 }
 0x4d1   : > { %v3299_v7 = vpop.eup %3298  ;;  %v2443_v12 = vmul.f32 0.6931472, %v3297_v47  ;;  %3314 = vpow2.f32 %v2532_v41  ;;  %v2674_v53 = vmul.f32 %v5503_v45, %v2642_v46  ;;  %v2536_v55 = vmul.f32 1.442695, %v2491_v31 }
 0x4d2   : > { %v3301_v58 = vpop.eup %3300  ;;  %3316 = vlog2.f32 %v1147_v54  ;;  %v2583_v56 = vadd.f32 1e-06, %v3299_v7  ;;  %v1294_v7 = vmul.f32 1.442695, %v1237_v20 }
 0x4d3   : > { %v3303_v57 = vpop.eup %3302  ;;  %v2492_v15 = vmul.f32 0.3, %v2443_v12  ;;  %3318 = vpow2.f32 %v2534_v48  ;;  %v2643_v42 = vmul.f32 0.5, %v3301_v58  ;;  %v2705_v47 = vadd.f32 %v2704_v17, %v2674_v53  ;;  %v2357_v48 = vpop.xlane.xlu2 %2356 }
 0x4d4   : > { %v3305_v29 = vpop.eup %3304  ;;  %v2644_v21 = vmul.f32 0.5, %v3303_v57  ;;  %3320 = vrcp.f32 %v2582_v60  ;;  %v2401_v46 = vmax.f32 %v2357_v48, 1.0 }
 0x4d5   : > { %v5583_v49 = vpop.eup %3306  ;;  %v2584_v41 = vadd.f32 1e-06, %v3305_v29  ;;  %3322 = vrcp.f32 %v2583_v56  ;;  %v2538_v8 = vmul.f32 1.442695, %v2492_v15  ;;  %v2675_v45 = vmul.f32 %v5520_v3, %v2643_v42  ;;  %v2355_v29 = vpop.xlane.xlu1 %2354 }
 0x4d6   : > { %v3309_v10 = vpop.eup %3308  ;;  %3324 = vlog2.f32 %v2399_v52  ;;  %v2676_v58 = vmul.f32 %v5529_v6, %v2644_v21  ;;  %v2400_v20 = vmax.f32 %v2355_v29, 1.0  ;;  %v1302_v42 = vmul.f32 1.442695, %v1241_v38 }
 0x4d7   : > { %v3311_v40 = vpop.eup %3310  ;;  %v2447_v63 = vmul.f32 0.6931472, %v3309_v10  ;;  %3326 = vpow2.f32 %v2536_v55  ;;  %v2706_v31 = vadd.f32 %v2705_v47, %v2675_v45  ;;  %v1205_v10 = vmul.f32 0.6931472, %v5577_v13  ;;  %v2359_v45 = vpop.xlane.xlu0 %2358 }
 0x4d8   : > { %v3313_v14 = vpop.eup %3312  ;;  %3328 = vrcp.f32 %v2584_v41  ;;  %v2645_v57 = vmul.f32 0.5, %v3311_v40 }
 0x4d9   : > { %v3315_v54 = vpop.eup %3314  ;;  %v2445_v28 = vmul.f32 0.6931472, %v3313_v14  ;;  %3330 = vpow2.f32 %v2538_v8  ;;  %v2494_v56 = vmul.f32 0.3, %v2447_v63  ;;  %v2707_v6 = vadd.f32 %v2706_v31, %v2676_v58 }
 0x4da   : > { %v3317_v23 = vpop.eup %3316  ;;  %v2585_v60 = vadd.f32 1e-06, %v3315_v54  ;;  %3332 = vlog2.f32 %v2401_v46  ;;  %v2677_v55 = vmul.f32 %v5532_v2, %v2645_v57  ;;  %v1240_v63 = vmul.f32 0.3, %v1205_v10 }
 0x4db   : > { %v3319_v12 = vpop.eup %3318  ;;  %v2493_v11 = vmul.f32 0.3, %v2445_v28  ;;  %3334 = vpow2.f32 %v1294_v7  ;;  %v2542_v14 = vmul.f32 1.442695, %v2494_v56  ;;  %v1211_v28 = vmul.f32 0.6931472, %v3317_v23 }
 0x4dc   : > { %v3321_v17 = vpop.eup %3320  ;;  %v2586_v3 = vadd.f32 1e-06, %v3319_v12  ;;  %v2708_v13 = vadd.f32 %v2707_v6, %v2677_v55  ;;  %v2402_v12 = vmax.f32 %v2359_v45, 1.0 }
 0x4dd   : > { %v2540_v15 = vmul.f32 1.442695, %v2493_v11  ;;  %v3323_v26 = vpop.eup %3322  ;;  %v2646_v21 = vmul.f32 0.5, %v3321_v17 }
 0x4de   : > { %v3325_v44 = vpop.eup %3324  ;;  %v2647_v41 = vmul.f32 0.5, %v3323_v26  ;;  %v1243_v26 = vmul.f32 0.3, %v1211_v28 }
 0x4df   : > { %3336 = vpow2.f32 %v2540_v15  ;;  %v3327_v53 = vpop.eup %3326  ;;  %v2449_v52 = vmul.f32 0.6931472, %v3325_v44  ;;  %v2678_v11 = vmul.f32 %v5543_v61, %v2646_v21  ;;  %v2363_v44 = vpop.xlane.xlu2 %2362 }
 0x4e0   : > { %3338 = vlog2.f32 %v2400_v20  ;;  %v3329_v40 = vpop.eup %3328  ;;  %v2587_v7 = vadd.f32 1e-06, %v3327_v53  ;;  %v2679_v46 = vmul.f32 %v5545_v1, %v2647_v41  ;;  %v2404_v1 = vmax.f32 %v2363_v44, 1.0 }
 0x4e1   : > { %3340 = vrcp.f32 %v2585_v60  ;;  %v3331_v47 = vpop.eup %3330  ;;  %v2495_v8 = vmul.f32 0.3, %v2449_v52  ;;  %v2648_v60 = vmul.f32 0.5, %v3329_v40  ;;  %v2709_v56 = vadd.f32 %v2708_v13, %v2678_v11  ;;  %v2361_v52 = vpop.xlane.xlu1 %2360 }
 0x4e2   : > { %3342 = vrcp.f32 %v2586_v3  ;;  %v3333_v54 = vpop.eup %3332  ;;  %v2588_v31 = vadd.f32 1e-06, %v3331_v47  ;;  %v1300_v53 = vmul.f32 1.442695, %v1240_v63  ;;  %v1326_v13 = vadd.f32 1e-06, %v5549_v19 }
 0x4e3   : > { %v5591_v48 = vpop.eup %3334  ;;  %3344 = vpow2.f32 %v1302_v42  ;;  %v2544_v2 = vmul.f32 1.442695, %v2495_v8  ;;  %v2453_v38 = vmul.f32 0.6931472, %v3333_v54  ;;  %v2710_v10 = vadd.f32 %v2709_v56, %v2679_v46  ;;  %v2365_v46 = vpop.xlane.xlu0 %2364 }
 0x4e4   : > { %3346 = vpow2.f32 %v2542_v14  ;;  %v2680_v42 = vmul.f32 %v5547_v9, %v2648_v60  ;;  %v2403_v14 = vmax.f32 %v2361_v52, 1.0  ;;  %v1306_v8 = vmul.f32 1.442695, %v1243_v26 }
 0x4e5   : > { %v3337_v58 = vpop.eup %3336  ;;  %3348 = vpow2.f32 %v2544_v2  ;;  %v2497_v23 = vmul.f32 0.3, %v2453_v38 }
 0x4e6   : > { %v3339_v57 = vpop.eup %3338  ;;  %v2589_v29 = vadd.f32 1e-06, %v3337_v58  ;;  %3350 = vlog2.f32 %v2402_v12  ;;  %v2711_v28 = vadd.f32 %v2710_v10, %v2680_v42 }
 0x4e7   : > { %v3341_v17 = vpop.eup %3340  ;;  %v2451_v15 = vmul.f32 0.6931472, %v3339_v57  ;;  %3352 = vrcp.f32 %v2587_v7  ;;  %v2548_v3 = vmul.f32 1.442695, %v2497_v23  ;;  %v2369_v52 = vpop.xlane.xlu2 %2368 }
 0x4e8   : > { %v3343_v20 = vpop.eup %3342  ;;  %3354 = vrcp.f32 %v2588_v31  ;;  %v2649_v55 = vmul.f32 0.5, %v3341_v17 }
 0x4e9   : > { %v2496_v61 = vmul.f32 0.3, %v2451_v15  ;;  %v5595_v6 = vpop.eup %3344  ;;  %3356 = vrcp.f32 %v2589_v29  ;;  %v2650_v21 = vmul.f32 0.5, %v3343_v20  ;;  %v2405_v29 = vmax.f32 %v2365_v46, 1.0 }
 0x4ea   : > { %v3347_v40 = vpop.eup %3346  ;;  %3358 = vlog2.f32 %v2404_v1  ;;  %v2681_v2 = vmul.f32 %v5457_v0, %v2649_v55  ;;  %v1329_v0 = vadd.f32 1e-06, %v5552_v50  ;;  %v1327_v46 = vadd.f32 1e-06, %v5560_v51 }
 0x4eb   : > { %v2546_v41 = vmul.f32 1.442695, %v2496_v61  ;;  %v3349_v47 = vpop.eup %3348  ;;  %3360 = vpow2.f32 %v2548_v3  ;;  %v2590_v63 = vadd.f32 1e-06, %v3347_v40  ;;  %v2682_v38 = vmul.f32 %v5473_v25, %v2650_v21 }
 0x4ec   : > { %v3351_v54 = vpop.eup %3350  ;;  %v2591_v12 = vadd.f32 1e-06, %v3349_v47  ;;  %v2712_v57 = vadd.f32 %v2711_v28, %v2681_v2 }
 0x4ed   : > { %3362 = vpow2.f32 %v2546_v41  ;;  %v3353_v7 = vpop.eup %3352  ;;  %v2455_v45 = vmul.f32 0.6931472, %v3351_v54  ;;  %v2407_v41 = vmax.f32 %v2369_v52, 1.0  ;;  %v1328_v54 = vadd.f32 1e-06, %v5554_v62 }
 0x4ee   : > { %3364 = vlog2.f32 %v2403_v14  ;;  %v3355_v9 = vpop.eup %3354  ;;  %v2651_v60 = vmul.f32 0.5, %v3353_v7  ;;  %v2713_v15 = vadd.f32 %v2712_v57, %v2682_v38 }
 0x4ef   : > { %3366 = vpow2.f32 %v1300_v53  ;;  %v3357_v58 = vpop.eup %3356  ;;  %v2498_v11 = vmul.f32 0.3, %v2455_v45  ;;  %v2652_v20 = vmul.f32 0.5, %v3355_v9  ;;  %v2375_v51 = vpop.xlane.xlu2 %2374 }
 0x4f0   : > { %3368 = vpow2.f32 %v1306_v8  ;;  %v3359_v31 = vpop.eup %3358  ;;  %v2683_v10 = vmul.f32 %v5486_v37, %v2651_v60  ;;  %v2653_v61 = vmul.f32 0.5, %v3357_v58  ;;  %v2367_v37 = vpop.xlane.xlu1 %2366 }
 0x4f1   : > { %3370 = vrcp.f32 %v1326_v13  ;;  %v3361_v19 = vpop.eup %3360  ;;  %v2550_v23 = vmul.f32 1.442695, %v2498_v11  ;;  %v2459_v17 = vmul.f32 0.6931472, %v3359_v31  ;;  %v2684_v47 = vmul.f32 %v5498_v4, %v2652_v20  ;;  %v2371_v8 = vpop.xlane.xlu0 %2370 }
 0x4f2   : > { %3372 = vrcp.f32 %v2590_v63  ;;  %v2593_v42 = vadd.f32 1e-06, %v3361_v19  ;;  %v2714_v50 = vadd.f32 %v2713_v15, %v2683_v10  ;;  %v2685_v13 = vmul.f32 %v5463_v5, %v2653_v61  ;;  %v6088_v15 = vld [vmem:[#allocation82_spill] sm:$0xff] }
 0x4f3   : > { %v3363_v56 = vpop.eup %3362  ;;  %3374 = vrcp.f32 %v2591_v12  ;;  %v2500_v3 = vmul.f32 0.3, %v2459_v17  ;;  %v2406_v63 = vmax.f32 %v2367_v37, 1.0  ;;  %v2408_v9 = vmax.f32 %v2371_v8, 1.0 }
 0x4f4   : > { %v3365_v25 = vpop.eup %3364  ;;  %v2592_v26 = vadd.f32 1e-06, %v3363_v56  ;;  %3376 = vpow2.f32 %v2550_v23  ;;  %v2715_v38 = vadd.f32 %v2714_v50, %v2684_v47  ;;  %v2410_v61 = vmax.f32 %v2375_v51, 1.0 }
 0x4f5   : > { %v5602_v44 = vpop.eup %3366  ;;  %v2457_v1 = vmul.f32 0.6931472, %v3365_v25  ;;  %3378 = vlog2.f32 %v2405_v29  ;;  %v2554_v55 = vmul.f32 1.442695, %v2500_v3 }
 0x4f6   : > { %v5605_v53 = vpop.eup %3368  ;;  %3380 = vrcp.f32 %v2592_v26  ;;  %v2716_v31 = vadd.f32 %v2715_v38, %v2685_v13 }
 0x4f7   : > { %v5607_v40 = vpop.eup %3370  ;;  %v2499_v21 = vmul.f32 0.3, %v2457_v1  ;;  %3382 = vrcp.f32 %v1329_v0  ;;  %v2180_v0 = vmul.f32 -70.0, %v6088_v15 }
 0x4f8   : > { %v3373_v14 = vpop.eup %3372  ;;  %3384 = vpow2.f32 %v2554_v55  ;;  %v2373_v26 = vpop.xlane.xlu1 %2372 }
 0x4f9   : > { %v3375_v28 = vpop.eup %3374  ;;  %v2552_v7 = vmul.f32 1.442695, %v2499_v21  ;;  %3386 = vlog2.f32 %v2407_v41  ;;  %v2654_v12 = vmul.f32 0.5, %v3373_v14  ;;  %v2409_v1 = vmax.f32 %v2373_v26, 1.0 }
 0x4fa   : > { %v3377_v45 = vpop.eup %3376  ;;  %3388 = vrcp.f32 %v2593_v42  ;;  %v2655_v57 = vmul.f32 0.5, %v3375_v28  ;;  %v2377_v42 = vpop.xlane.xlu0 %2376  ;;  %v1332_v28 = vadd.f32 1e-06, %v5557_v22 }
 0x4fb   : > { %v3379_v2 = vpop.eup %3378  ;;  %v2594_v58 = vadd.f32 1e-06, %v3377_v45  ;;  %3390 = vpow2.f32 %v2552_v7  ;;  %v2686_v19 = vmul.f32 %v5477_v24, %v2654_v12  ;;  %v2411_v47 = vmax.f32 %v2377_v42, 1.0 }
 0x4fc   : > { %v3381_v4 = vpop.eup %3380  ;;  %v2461_v11 = vmul.f32 0.6931472, %v3379_v2  ;;  %3392 = vlog2.f32 %v2406_v63  ;;  %v2687_v24 = vmul.f32 %v5492_v35, %v2655_v57 }
 0x4fd   : > { %v5613_v62 = vpop.eup %3382  ;;  %3394 = vrcp.f32 %v1328_v54  ;;  %v2656_v23 = vmul.f32 0.5, %v3381_v4  ;;  %v2717_v10 = vadd.f32 %v2716_v31, %v2686_v19 }
 0x4fe   : > { %v3385_v5 = vpop.eup %3384  ;;  %v2501_v60 = vmul.f32 0.3, %v2461_v11  ;;  %3396 = vlog2.f32 %v2408_v9  ;;  %v5620_v9 = vmul.f32 1.442695, %v2180_v0  ;;  %v5626_v15 = vmul.f32 2.0, %v5613_v62 }
 0x4ff   : > { %v3387_v29 = vpop.eup %3386  ;;  %3398 = vrcp.f32 %v2594_v58  ;;  %v2596_v17 = vadd.f32 1e-06, %v3385_v5  ;;  %v2688_v41 = vmul.f32 %v5510_v27, %v2656_v23  ;;  %v2718_v7 = vadd.f32 %v2717_v10, %v2687_v24 }
 0x500   : > { %v3389_v56 = vpop.eup %3388  ;;  %v2556_v25 = vmul.f32 1.442695, %v2501_v60  ;;  %v2465_v20 = vmul.f32 0.6931472, %v3387_v29  ;;  %3400 = vrcp.f32 %v1327_v46  ;;  %v1330_v27 = vadd.f32 1e-06, %v5570_v43  ;;  %v2379_v46 = vpop.xlane.xlu2 %2378 }
 0x501   : > { %v3391_v3 = vpop.eup %3390  ;;  %3402 = vrcp.f32 %v2596_v17  ;;  %v2657_v8 = vmul.f32 0.5, %v3389_v56  ;;  %v2719_v38 = vadd.f32 %v2718_v7, %v2688_v41  ;;  %v2381_v31 = vpop.xlane.xlu1 %2380  ;;  %v1390_v5 = vmul.f32 2.0, %v5607_v40 }
 0x502   : > { %v3393_v55 = vpop.eup %3392  ;;  %v2595_v52 = vadd.f32 1e-06, %v3391_v3  ;;  %3404 = vpow2.f32 %v2556_v25  ;;  %v2503_v50 = vmul.f32 0.3, %v2465_v20  ;;  %v2412_v19 = vmax.f32 %v2379_v46, 1.0  ;;  %v1091_v43 = vpop.xlane.xlu0 %1090 }
 0x503   : > { %v3395_v21 = vpop.eup %3394  ;;  %v2463_v14 = vmul.f32 0.6931472, %v3393_v55  ;;  %3406 = vlog2.f32 %v2410_v61  ;;  %v2689_v11 = vmul.f32 %v5513_v30, %v2657_v8  ;;  %v2413_v56 = vmax.f32 %v2381_v31, 1.0 }
 0x504   : > { %v3397_v37 = vpop.eup %3396  ;;  %3408 = vrcp.f32 %v2595_v52  ;;  %v2560_v54 = vmul.f32 1.442695, %v2503_v50  ;;  %v1331_v40 = vadd.f32 1e-06, %v5562_v39  ;;  %v1392_v3 = vmul.f32 2.0, %v3395_v21 }
 0x505   : > { %v3399_v13 = vpop.eup %3398  ;;  %v2502_v63 = vmul.f32 0.3, %v2463_v14  ;;  %v2467_v45 = vmul.f32 0.6931472, %v3397_v37  ;;  %3410 = vlog2.f32 %v2409_v1  ;;  %v2720_v0 = vadd.f32 %v2719_v38, %v2689_v11 }
 0x506   : > { %v3401_v35 = vpop.eup %3400  ;;  %3412 = vpow2.f32 %v2560_v54  ;;  %v2658_v22 = vmul.f32 0.5, %v3399_v13  ;;  %v1334_v13 = vadd.f32 1e-06, %v5572_v32  ;;  %v5635_v7 = vadd.f32 1e-06, %v5568_v59 }
 0x507   : > { %v3403_v2 = vpop.eup %3402  ;;  %v2558_v12 = vmul.f32 1.442695, %v2502_v63  ;;  %v2504_v58 = vmul.f32 0.3, %v2467_v45  ;;  %3414 = vlog2.f32 %v2411_v47  ;;  %v1391_v14 = vmul.f32 2.0, %v3401_v35 }
 0x508   : > { %v3405_v4 = vpop.eup %3404  ;;  %3416 = vrcp.f32 %v1332_v28  ;;  %v2690_v61 = vmul.f32 %v5527_v16, %v2658_v22  ;;  %v2660_v41 = vmul.f32 0.5, %v3403_v2  ;;  %v1089_v8 = vpop.xlane.xlu2 %1088  ;;  %v1333_v2 = vadd.f32 1e-06, %v5591_v48 }
 0x509   : > { %v3407_v57 = vpop.eup %3406  ;;  %v2597_v60 = vadd.f32 1e-06, %v3405_v4  ;;  %3418 = vpow2.f32 %v2558_v12  ;;  %v2562_v29 = vmul.f32 1.442695, %v2504_v58  ;;  %v1422_v28 = vmul.f32 %v1390_v5, %v1089_v8 }
 0x50a   : > { %v3409_v23 = vpop.eup %3408  ;;  %v2471_v17 = vmul.f32 0.6931472, %v3407_v57  ;;  %3420 = vrcp.f32 %v1330_v27  ;;  %v2721_v39 = vadd.f32 %v2720_v0, %v2690_v61  ;;  %v1097_v27 = vpop.xlane.xlu0 %1096  ;;  %v1423_v58 = vmul.f32 %v1391_v14, %v1091_v43 }
 0x50b   : > { %v3411_v30 = vpop.eup %3410  ;;  %v2659_v25 = vmul.f32 0.5, %v3409_v23  ;;  %3422 = vrcp.f32 %v2597_v60  ;;  %v1453_v4 = vadd.f32 %v5247_v18, %v1422_v28  ;;  %v2692_v22 = vmul.f32 %v5466_v33, %v2660_v41  ;;  %v6090_v28 = vld [vmem:[#allocation6_spill] sm:$0xff] }
 0x50c   : > { %v3413_v20 = vpop.eup %3412  ;;  %3424 = vpow2.f32 %v2562_v29  ;;  %v2506_v51 = vmul.f32 0.3, %v2471_v17  ;;  %v2469_v26 = vmul.f32 0.6931472, %v3411_v30 }
 0x50d   : > { %v3415_v10 = vpop.eup %3414  ;;  %v2691_v1 = vmul.f32 %v5536_v36, %v2659_v25  ;;  %v2599_v42 = vadd.f32 1e-06, %v3413_v20  ;;  %3426 = vlog2.f32 %v2412_v19  ;;  %v1093_v36 = vpop.xlane.xlu1 %1092  ;;  %v1454_v57 = vadd.f32 %v1453_v4, %v1423_v58 }
 0x50e   : > { %v5631_v62 = vpop.eup %3416  ;;  %v2566_v55 = vmul.f32 1.442695, %v2506_v51  ;;  %v2505_v24 = vmul.f32 0.3, %v2469_v26  ;;  %v2473_v52 = vmul.f32 0.6931472, %v3415_v10  ;;  %3428 = vlog2.f32 %v2413_v56 }
 0x50f   : > { %v3419_v50 = vpop.eup %3418  ;;  %3430 = vrcp.f32 %v1331_v40  ;;  %v2722_v45 = vadd.f32 %v2721_v39, %v2691_v1  ;;  %v1424_v5 = vmul.f32 %v1392_v3, %v1093_v36  ;;  %v1337_v36 = vadd.f32 1e-06, %v5595_v6 }
 0x510   : > { %v3421_v47 = vpop.eup %3420  ;;  %v2598_v21 = vadd.f32 1e-06, %v3419_v50  ;;  %3432 = vpow2.f32 %v2566_v55  ;;  %v2564_v37 = vmul.f32 1.442695, %v2505_v24  ;;  %v2507_v16 = vmul.f32 0.3, %v2473_v52  ;;  %v1095_v25 = vpop.xlane.xlu2 %1094 }
 0x511   : > { %v3423_v54 = vpop.eup %3422  ;;  %3434 = vrcp.f32 %v2599_v42  ;;  %v2723_v29 = vadd.f32 %v2722_v45, %v2692_v22  ;;  %v1394_v19 = vmul.f32 2.0, %v3421_v47  ;;  %v1455_v18 = vadd.f32 %v1454_v57, %v1424_v5  ;;  %v6089_v52 = vld [vmem:[#allocation10_spill] sm:$0xff]  ;;  %v6091_v22 = vld [vmem:[#allocation103_spill] sm:$0xff] }
 0x512   : > { %v3425_v63 = vpop.eup %3424  ;;  %3436 = vrcp.f32 %v2598_v21  ;;  %v2568_v35 = vmul.f32 1.442695, %v2507_v16  ;;  %v2661_v32 = vmul.f32 0.5, %v3423_v54  ;;  %v1425_v10 = vmul.f32 %v5626_v15, %v1095_v25  ;;  %v1103_v14 = vpop.xlane.xlu0 %1102 }
 0x513   : > { %v3427_v38 = vpop.eup %3426  ;;  %v2600_v12 = vadd.f32 1e-06, %v3425_v63  ;;  %3438 = vpow2.f32 %v2564_v37  ;;  %v1426_v0 = vmul.f32 %v1394_v19, %v1097_v27  ;;  %v1336_v47 = vadd.f32 1e-06, %v5602_v44  ;;  %v6092_v19 = vld [vmem:[#allocation101_spill] sm:$0xff] }
 0x514   : > { %v3429_v11 = vpop.eup %3428  ;;  %3440 = vpow2.f32 %v2568_v35  ;;  %v2475_v59 = vmul.f32 0.6931472, %v3427_v38  ;;  %v2693_v33 = vmul.f32 %v5469_v34, %v2661_v32  ;;  %v1456_v39 = vadd.f32 %v1455_v18, %v1425_v10 }
 0x515   : > { %v3431_v46 = vpop.eup %3430  ;;  %3442 = vrcp.f32 %v2600_v12  ;;  %v2477_v31 = vmul.f32 0.6931472, %v3429_v11  ;;  %v1099_v20 = vpop.xlane.xlu1 %1098  ;;  %v1396_v45 = vmul.f32 2.0, %v5631_v62  ;;  %v1338_v6 = vadd.f32 1e-06, %v5583_v49 }
 0x516   : > { %v3433_v60 = vpop.eup %3432  ;;  %v2508_v48 = vmul.f32 0.3, %v2475_v59  ;;  %3444 = vrcp.f32 %v1334_v13  ;;  %v1395_v40 = vmul.f32 2.0, %v3431_v46  ;;  %v2724_v1 = vadd.f32 %v2723_v29, %v2693_v33  ;;  %v6093_v33 = vld [vmem:[#allocation45_spill] sm:$0xff] }
 0x517   : > { %v3435_v23 = vpop.eup %3434  ;;  %v2602_v43 = vadd.f32 1e-06, %v3433_v60  ;;  %v2509_v17 = vmul.f32 0.3, %v2477_v31  ;;  %3446 = vrcp.f32 %v1333_v2  ;;  %v1457_v16 = vadd.f32 %v1456_v39, %v1426_v0 }
 0x518   : > { %v3437_v56 = vpop.eup %3436  ;;  %v2570_v30 = vmul.f32 1.442695, %v2508_v48  ;;  %v2663_v42 = vmul.f32 0.5, %v3435_v23  ;;  %v1427_v15 = vmul.f32 %v1395_v40, %v1099_v20  ;;  %v1101_v27 = vpop.xlane.xlu2 %1100  ;;  %v1339_v60 = vadd.f32 1e-06, %v5605_v53 }
 0x519   : > { %v3439_v51 = vpop.eup %3438  ;;  %v2662_v26 = vmul.f32 0.5, %v3437_v56  ;;  %3448 = vrcp.f32 %v2602_v43  ;;  %v2572_v3 = vmul.f32 1.442695, %v2509_v17 }
 0x51a   : > { %v3441_v61 = vpop.eup %3440  ;;  %v2601_v55 = vadd.f32 1e-06, %v3439_v51  ;;  %3450 = vpow2.f32 %v2570_v30  ;;  %v2695_v13 = vmul.f32 %v6090_v28, %v2663_v42  ;;  %v1458_v63 = vadd.f32 %v1457_v16, %v1427_v15  ;;  %v1109_v56 = vpop.xlane.xlu0 %1108 }
 0x51b   : > { %v3443_v24 = vpop.eup %3442  ;;  %v2694_v50 = vmul.f32 %v6089_v52, %v2662_v26  ;;  %v2603_v34 = vadd.f32 1e-06, %v3441_v61  ;;  %3452 = vpow2.f32 %v2572_v3 }
 0x51c   : > { %v3445_v41 = vpop.eup %3444  ;;  %3454 = vrcp.f32 %v2601_v55  ;;  %v2664_v8 = vmul.f32 0.5, %v3443_v24 }
 0x51d   : > { %v3447_v21 = vpop.eup %3446  ;;  %v2725_v37 = vadd.f32 %v2724_v1, %v2694_v50  ;;  %3456 = vrcp.f32 %v2603_v34  ;;  %v1398_v2 = vmul.f32 2.0, %v3445_v41  ;;  %v1105_v38 = vpop.xlane.xlu1 %1104  ;;  %v6094_v1 = vld [vmem:[#allocation37_spill] sm:$0xff] }
 0x51e   : > { %3458 = vrcp.f32 %v5635_v7  ;;  %v1397_v44 = vmul.f32 2.0, %v3447_v21  ;;  %v1428_v7 = vmul.f32 %v1396_v45, %v1101_v27 }
 0x51f   : > { %v3449_v54 = vpop.eup %3448  ;;  %3460 = vpow2.f32 %v5620_v9  ;;  %v2726_v58 = vadd.f32 %v2725_v37, %v2695_v13  ;;  %v2696_v9 = vmul.f32 %v6091_v22, %v2664_v8  ;;  %v1430_v49 = vmul.f32 %v1398_v2, %v1105_v38 }
 0x520   : > { %v3451_v35 = vpop.eup %3450  ;;  %3462 = vrcp.f32 %v1336_v47  ;;  %v1429_v59 = vmul.f32 %v1397_v44, %v1103_v14  ;;  %v2666_v62 = vmul.f32 0.5, %v3449_v54  ;;  %v1459_v5 = vadd.f32 %v1458_v63, %v1428_v7  ;;  %v1107_v51 = vpop.xlane.xlu2 %1106  ;;  %v6095_v47 = vld [vmem:[#allocation30_spill] sm:$0xff] }
 0x521   : > { %v3453_v12 = vpop.eup %3452  ;;  %v2604_v4 = vadd.f32 1e-06, %v3451_v35  ;;  %3464 = vrcp.f32 %v1337_v36  ;;  %v2727_v48 = vadd.f32 %v2726_v58, %v2696_v9 }
 0x522   : > { %v3455_v11 = vpop.eup %3454  ;;  %v2605_v32 = vadd.f32 1e-06, %v3453_v12  ;;  %v1460_v43 = vadd.f32 %v1459_v5, %v1429_v59  ;;  %v2698_v30 = vmul.f32 %v6093_v33, %v2666_v62  ;;  %v1115_v63 = vpop.xlane.xlu0 %1114 }
 0x523   : > { %v3457_v46 = vpop.eup %3456  ;;  %v2665_v31 = vmul.f32 0.5, %v3455_v11  ;;  %3466 = vrcp.f32 %v2604_v4 }
 0x524   : > { %v3459_v57 = vpop.eup %3458  ;;  %3468 = vrcp.f32 %v2605_v32  ;;  %v2667_v18 = vmul.f32 0.5, %v3457_v46  ;;  %v1461_v25 = vadd.f32 %v1460_v43, %v1430_v49 }
 0x525   : > { %v3461_v29 = vpop.eup %3460  ;;  %v2697_v23 = vmul.f32 %v6092_v19, %v2665_v31  ;;  %3470 = vrcp.f32 %v1338_v6  ;;  %v1399_v40 = vmul.f32 2.0, %v3459_v57  ;;  %v1111_v24 = vpop.xlane.xlu1 %1110 }
 0x526   : > { %v3463_v17 = vpop.eup %3462  ;;  %3472 = vrcp.f32 %v1339_v60  ;;  %v2699_v42 = vmul.f32 %v6094_v1, %v2667_v18 }
 0x527   : > { %v2728_v0 = vadd.f32 %v2727_v48, %v2697_v23  ;;  %v3465_v20 = vpop.eup %3464  ;;  %v1400_v3 = vmul.f32 2.0, %v3463_v17  ;;  %v1431_v10 = vmul.f32 %v1399_v40, %v1107_v51 }
 0x528   : > { %v1401_v39 = vmul.f32 2.0, %v3465_v20  ;;  %v1113_v45 = vpop.xlane.xlu2 %1112 }
 0x529   : > { %v3467_v26 = vpop.eup %3466  ;;  %v2729_v53 = vadd.f32 %v2728_v0, %v2698_v30  ;;  %v1432_v50 = vmul.f32 %v1400_v3, %v1109_v56  ;;  %v1462_v34 = vadd.f32 %v1461_v25, %v1431_v10 }
 0x52a   : > { %v3469_v61 = vpop.eup %3468  ;;  %v2668_v55 = vmul.f32 0.5, %v3467_v26  ;;  %v1433_v37 = vmul.f32 %v1401_v39, %v1111_v24 }
 0x52b   : > { %v2669_v52 = vmul.f32 0.5, %v3469_v61  ;;  %v3471_v41 = vpop.eup %3470  ;;  %v2730_v14 = vadd.f32 %v2729_v53, %v2699_v42  ;;  %v1463_v15 = vadd.f32 %v1462_v34, %v1432_v50 }
 0x52c   : > { %v2700_v21 = vmul.f32 %v6095_v47, %v2668_v55  ;;  %v3473_v16 = vpop.eup %3472  ;;  %v1402_v28 = vmul.f32 2.0, %v3471_v41 }
 0x52d   : > { %v2701_v36 = vmul.f32 %v3461_v29, %v2669_v52  ;;  %v1464_v54 = vadd.f32 %v1463_v15, %v1433_v37  ;;  %v1403_v35 = vmul.f32 2.0, %v3473_v16 }
 0x52e   : > { %v2731_v8 = vadd.f32 %v2730_v14, %v2700_v21  ;;  %v1434_v44 = vmul.f32 %v1402_v28, %v1113_v45 }
 0x52f   : > { %v1435_v2 = vmul.f32 %v1403_v35, %v1115_v63 }
 0x530   : > { %v2732_v13 = vadd.f32 %v2731_v8, %v2701_v36  ;;  %v1465_v38 = vadd.f32 %v1464_v54, %v1434_v44 }
 0x532   : > { %v2733_v27 = vrot.slane %v2732_v13, 4  ;;  %v1466_v58 = vadd.f32 %v1465_v38, %v1435_v2 }
 0x534   : > { %v2734_v12 = vadd.f32 %v2733_v27, %v2732_v13  ;;  %v1467_v7 = vrot.slane %v1466_v58, 4 }
 0x536   : > { %v2735_v4 = vrot.slane %v2734_v12, 2  ;;  %v1468_v11 = vadd.f32 %v1467_v7, %v1466_v58 }
 0x538   : > { %v2736_v6 = vadd.f32 %v2735_v4, %v2734_v12  ;;  %v1469_v9 = vrot.slane %v1468_v11, 2 }
 0x53a   : > { %v2737_v22 = vrot.slane %v2736_v6, 1  ;;  %v1470_v59 = vadd.f32 %v1469_v9, %v1468_v11 }
 0x53c   : > { %v2738_v32 = vadd.f32 %v2737_v22, %v2736_v6  ;;  %v1471_v62 = vrot.slane %v1470_v59, 1 }
 0x53e   : > { %v2739_v46 = vmul.f32 0.00390625, %v2738_v32  ;;  %v1472_v5 = vadd.f32 %v1471_v62, %v1470_v59 }
 0x540   : > { %v2740_v31 = vsub.f32 1.0, %v2739_v46  ;;  %v1473_v57 = vmul.f32 0.0078125, %v1472_v5 }
 0x542   : > { %2741 = vst.msk [vmem:[%s324_s18] sm:$0x1] %vm1475_vm10, %v2740_v31  ;;  %v1474_v60 = vsub.f32 1.0, %v1473_v57 }
 0x544   : > { %1476 = vst.msk [vmem:[%s321_s23] sm:$0x1] %vm1475_vm10, %v1474_v60 }
 0x545 PF: > { %s17_s21 = sadd.s32 1, %s3480_s21  }
 0x546   : > { %p14_p4 = scmp.ge.s32.totalorder %s17_s21, 4  }
 0x548   :  { %16 = sbr.rel (!%p14_p4) target bundleno = 1 (0x1), region = 94 }

// kernel: _lambda_.4
= control target key start
LH: loop header
LB: loop body
LE: loop exit
PB: predicated region body
PF: predicated region fallthrough
CT: control target
= control target key end

     0   :  { %s2045_s21 = smov 0   ;;  %s2982_s0 = inlined_call_operand.vmem [shape: f32[2,128,8], index: 0, kind: input, shape index: {}]   ;;  %s2983_s1 = inlined_call_operand.vmem [shape: f32[2,3,128], index: 1, kind: input, shape index: {}]   ;;  %s2984_s2 = inlined_call_operand.vmem [shape: f32[2,3,3], index: 2, kind: input, shape index: {}]   ;;  %s2985_s3 = inlined_call_operand.vmem [shape: f32[2,3,1], index: 3, kind: input, shape index: {}]   ;;  %s2986_s4 = inlined_call_operand.vmem [shape: f32[2,3,1], index: 4, kind: input, shape index: {}]   ;;  %s2987_s5 = inlined_call_operand.vmem [shape: f32[2,1,1], index: 5, kind: output, shape index: {0}]   ;;  %s2988_s6 = inlined_call_operand.vmem [shape: f32[2,1,1], index: 6, kind: output, shape index: {1}]  }
   0x1 LB: > { %s1674_s22 = sadd.s32 4294967295, %s2003_s21   ;;  %p1678_p0 = scmp.ge.s32.totalorder %s2003_s21, 1  ;;  %s2003_s21 = sphi %s2045_s21, %s17_s21  }
   0x2   : > { %p251_p1 = scmp.lt.s32.totalorder %s2003_s21, 3 }
   0x4   : > { %p252_p2 = pnand %p1678_p0, %p251_p1 }
   0x6   : > { %255 = sbr.rel (%p252_p2) target bundleno = 1095 (0x447), region = 40 }
   0xb   : > { %p298_p3 = scmp.lt.s32.totalorder %s1674_s22, 1  ;;  %v2005_v0 = vmov 1   ;;  %v2006_v1 = vmov 0   ;;  %v2007_v5 = vmov 2   ;;  %v2989_v10 = vmov 1.0  }
   0xc   : > { %1768 = vset.pattern.permute.xlu1 %v2005_v0  ;;  %1767 = vset.pattern.permute.xlu0 %v2006_v1  ;;  %388 = vst [vmem:[#allocation2 + $0x3] sm:$0x1] %v2989_v10  ;;  %v2991_v11 = vmov 0.0   ;;  %vm379_vm0 = vcmask 1042432   ;;  %vm392_vm1 = vcmask 64512  }
   0xd   : > { %s3032_s22 = smov (!%p298_p3, %s1674_s22), 1  ;;  %1770 = vset.pattern.permute.xlu2 %v2006_v1  ;;  %390 = vst [vmem:[#allocation2 + $0x5] sm:$0x7] %v2991_v11 }
   0xe   : > { %s1681_s23 = sshll.u32 %s3032_s22, 2  ;;  %s1751_s12 = sshll.u32 %s3032_s22, 7 }
   0xf   : > { %s314_s26 = scalar_lea.vmem %s2985_s3, %s1681_s23  ;;  %s310_s29 = scalar_lea.vmem %s2984_s2, %s1681_s23 }
  0x10   : > { %v343_v2 = vld [vmem:[%s314_s26] sm:$0x7]  ;;  %s318_s8 = scalar_lea.vmem %s2986_s4, %s1681_s23  ;;  %s306_s11 = scalar_lea.vmem %s2983_s1, %s1681_s23 }
  0x11   : > { %347 = vperm.xlu0 %1767, %v343_v2   ;;  %v342_v3 = vld [vmem:[%s310_s29] sm:$0x7]  ;;  %s2074_s15 = scalar_lea.vmem %s2982_s0, %s1751_s12  ;;  %s321_s18 = scalar_lea.vmem %s2987_s5, %s3032_s22 }
  0x12   : > { %v344_v4 = vld [vmem:[%s318_s8] sm:$0x7]  ;;  %359 = vperm.xlu1 %1768, %v342_v3   ;;  %v331_v34 = vld [vmem:[%s2074_s15 + $0x30] sm:$0xff]  ;;  %v326_v36 = vld [vmem:[%s2074_s15 + $0x8] sm:$0xff]  ;;  %s324_s23 = scalar_lea.vmem %s2988_s6, %s3032_s22 }
  0x13   : > { %374 = vperm.xlu2 %1770, %v344_v4   ;;  %v341_v6 = vld [vmem:[%s306_s11] sm:$0x7]  ;;  %v332_v37 = vld [vmem:[%s2074_s15 + $0x38] sm:$0xff]  ;;  %v338_v38 = vld [vmem:[%s2074_s15 + $0x68] sm:$0xff] }
  0x14   : > { %v325_v32 = vld [vmem:[%s2074_s15] sm:$0xff]  ;;  %v327_v39 = vld [vmem:[%s2074_s15 + $0x10] sm:$0xff]  ;;  %v328_v42 = vld [vmem:[%s2074_s15 + $0x18] sm:$0xff] }
  0x15   : > { %v337_v35 = vld [vmem:[%s2074_s15 + $0x60] sm:$0xff]  ;;  %v339_v41 = vld [vmem:[%s2074_s15 + $0x70] sm:$0xff]  ;;  %v334_v43 = vld [vmem:[%s2074_s15 + $0x48] sm:$0xff] }
  0x16   : > { %v333_v40 = vld [vmem:[%s2074_s15 + $0x40] sm:$0xff]  ;;  %v340_v44 = vld [vmem:[%s2074_s15 + $0x78] sm:$0xff]  ;;  %v335_v46 = vld [vmem:[%s2074_s15 + $0x50] sm:$0xff] }
  0x17   : > { %v329_v45 = vld [vmem:[%s2074_s15 + $0x20] sm:$0xff]  ;;  %v330_v47 = vld [vmem:[%s2074_s15 + $0x28] sm:$0xff]  ;;  %v336_v48 = vld [vmem:[%s2074_s15 + $0x58] sm:$0xff] }
  0x19   : > { %353 = vperm.xlu0 %1767, %v342_v3  }
  0x1a   : > { %1769 = vset.pattern.permute.xlu1 %v2007_v5 }
  0x1b   : > { %366 = vperm.xlu1 %1769, %v342_v3  }
  0x6d   : > { %v375_v21 = vpop.permute.xlu2 %374 }
  0x83   : > { %v348_v7 = vpop.permute.xlu0 %347 }
  0x84   : > { %v350_v8 = vsub.f32 %v341_v6, %v348_v7  ;;  %v360_v9 = vpop.permute.xlu1 %359 }
  0x86   : > { %v362_v12 = vperm.slane %v350_v8, 1  ;;  %v356_v13 = vperm.slane %v350_v8, 0  ;;  %v369_v17 = vperm.slane %v350_v8, 2 }
  0x88   : > { %v363_v15 = vmul.f32 %v362_v12, %v360_v9 }
  0x8b   : > { %v354_v14 = vpop.permute.xlu0 %353 }
  0x8c   : > { %v357_v16 = vmul.f32 %v356_v13, %v354_v14 }
  0x8d   : > { %v367_v18 = vpop.permute.xlu1 %366 }
  0x8e   : > { %v364_v19 = vadd.f32 %v363_v15, %v357_v16  ;;  %v370_v20 = vmul.f32 %v369_v17, %v367_v18 }
  0x90   : > { %v371_v22 = vadd.f32 %v370_v20, %v364_v19 }
  0x92   : > { %v377_v23 = vmul.f32 %v375_v21, %v371_v22 }
  0x94   : > { %v378_v24 = vmul.f32 %v377_v23, %v377_v23  ;;  %387 = vst [vmem:[#allocation2] sm:$0x7] %v377_v23 }
  0x96   : > { %v380_v25 = vsel %vm379_vm0, %v378_v24, 0.0 }
  0x97   : > { %v381_v26 = vrot.slane %v380_v25, 4 }
  0x99   : > { %v382_v27 = vadd.f32 %v381_v26, %v380_v25 }
  0x9b   : > { %v383_v28 = vrot.slane %v382_v27, 2 }
  0x9d   : > { %v384_v29 = vadd.f32 %v383_v28, %v382_v27 }
  0x9f   : > { %v385_v30 = vrot.slane %v384_v29, 1 }
  0xa1   : > { %v386_v31 = vadd.f32 %v385_v30, %v384_v29 }
  0xa3   : > { %389 = vst [vmem:[#allocation2 + $0x4] sm:$0x1] %v386_v31 }
  0xaa   : > { %v391_v33 = vld [vmem:[#allocation2] sm:$0xff] }
  0xab   : > { %456 = vmatpush.msra.mxu0 %v391_v33  ;;  %1752 = vmatpush.msra.mxu2 %v391_v33 }
  0xac   : > { %1753 = vmatpush.msra.mxu3 %v391_v33  ;;  %1685 = vmatmul.msk.f32.vlgmr.msra.gmra.mxu0 %vm392_vm1, %v325_v32 }
  0xad   : > { %1691 = vmatmul.msk.f32.vlgmr.msra.gmra.mxu2 %vm392_vm1, %v331_v34  ;;  %1697 = vmatmul.msk.f32.vlgmr.msra.gmra.mxu3 %vm392_vm1, %v337_v35  ;;  %v522_v35 = vlaneseq }
  0xb4   : > { %1686 = vmatmul.msk.f32.gmra.mxu0 %vm392_vm1, %v326_v36 }
  0xb5   : > { %1692 = vmatmul.msk.f32.gmra.mxu2 %vm392_vm1, %v332_v37  ;;  %1698 = vmatmul.msk.f32.gmra.mxu3 %vm392_vm1, %v338_v38  ;;  %v2170_v38 = vshrl.u32 %v522_v35, 7 }
  0xbc   : > { %1687 = vmatmul.msk.f32.gmra.mxu0 %vm392_vm1, %v327_v39 }
  0xbd   : > { %1693 = vmatmul.msk.f32.gmra.mxu2 %vm392_vm1, %v333_v40  ;;  %1699 = vmatmul.msk.f32.gmra.mxu3 %vm392_vm1, %v339_v41  ;;  %v2175_v41 = vadd.s32 24, %v2170_v38 }
  0xc4   : > { %1688 = vmatmul.msk.f32.gmra.mxu0 %vm392_vm1, %v328_v42  ;;  %v2178_v42 = vadd.s32 56, %v2170_v38 }
  0xc5   : > { %1694 = vmatmul.msk.f32.gmra.mxu2 %vm392_vm1, %v334_v43  ;;  %1700 = vmatmul.msk.f32.gmra.mxu3 %vm392_vm1, %v340_v44  ;;  %v2181_v43 = vadd.s32 88, %v2170_v38  ;;  %v2184_v44 = vadd.s32 120, %v2170_v38 }
  0xcc   : > { %1689 = vmatmul.msk.f32.gmra.mxu0 %vm392_vm1, %v329_v45 }
  0xcd   : > { %1695 = vmatmul.msk.f32.gmra.mxu2 %vm392_vm1, %v335_v46  ;;  %v2189_v46 = vadd.s32 8, %v2170_v38 }
  0xd4   : > { %1690 = vmatmul.msk.f32.gmra.mxu0 %vm392_vm1, %v330_v47  ;;  %v2192_v47 = vadd.s32 16, %v2170_v38 }
  0xd5   : > { %1696 = vmatmul.msk.f32.gmra.mxu2 %vm392_vm1, %v336_v48  ;;  %v2195_v48 = vadd.s32 32, %v2170_v38 }
 0x129   : > { %v458_v49 = vpop.f32.mrf.mxu0 }
 0x12a   : > { %v2125_v5 = vmax.f32 %v458_v49, 0.0  ;;  %v2198_v49 = vadd.s32 40, %v2170_v38 }
 0x130   : > { %v476_v50 = vpop.f32.mrf.mxu2  ;;  %v494_v51 = vpop.f32.mrf.mxu3 }
 0x131   : > { %v2108_v52 = vmax.f32 %v494_v51, 0.0  ;;  %v461_v53 = vpop.f32.mrf.mxu0  ;;  %v2127_v6 = vmax.f32 %v476_v50, 0.0  ;;  %v2201_v50 = vadd.s32 48, %v2170_v38 }
 0x132   : > { %v2123_v3 = vmax.f32 %v461_v53, 0.0 }
 0x133   : > { %957 = vmin.xlane.f32.xlu2 %v2108_v52 }
 0x138   : > { %v479_v54 = vpop.f32.mrf.mxu2  ;;  %v497_v55 = vpop.f32.mrf.mxu3 }
 0x139   : > { %v2111_v56 = vmax.f32 %v497_v55, 0.0  ;;  %v464_v57 = vpop.f32.mrf.mxu0  ;;  %v2145_v17 = vmax.f32 %v479_v54, 0.0  ;;  %v2214_v54 = vadd.s32 64, %v2170_v38  ;;  %v2217_v55 = vadd.s32 72, %v2170_v38 }
 0x13a   : > { %v2135_v13 = vmax.f32 %v464_v57, 0.0  ;;  %v2220_v57 = vadd.s32 80, %v2170_v38 }
 0x13b   : > { %959 = vmin.xlane.f32.xlu1 %v2111_v56 }
 0x13c   : > { %v543_v18 = vmin.f32 %v2135_v13, %v2127_v6 }
 0x140   : > { %v482_v58 = vpop.f32.mrf.mxu2  ;;  %v500_v59 = vpop.f32.mrf.mxu3 }
 0x141   : > { %v2114_v60 = vmax.f32 %v500_v59, 0.0  ;;  %v467_v61 = vpop.f32.mrf.mxu0  ;;  %v2149_v19 = vmax.f32 %v482_v58, 0.0  ;;  %v2223_v58 = vadd.s32 96, %v2170_v38  ;;  %v2226_v59 = vadd.s32 104, %v2170_v38 }
 0x142   : > { %v2141_v15 = vmax.f32 %v467_v61, 0.0 }
 0x143   : > { %961 = vmin.xlane.f32.xlu0 %v2114_v60 }
 0x144   : > { %v544_v22 = vmin.f32 %v2141_v15, %v2145_v17 }
 0x148   : > { %v485_v62 = vpop.f32.mrf.mxu2  ;;  %v503_v63 = vpop.f32.mrf.mxu3 }
 0x149   : > { %v2117_v0 = vmax.f32 %v485_v62, 0.0  ;;  %v2119_v1 = vmax.f32 %v503_v63, 0.0  ;;  %v470_v2 = vpop.f32.mrf.mxu0 }
 0x14a   : > { %v2129_v7 = vmax.f32 %v470_v2, 0.0  ;;  %v2231_v2 = vadd.s32 112, %v2170_v38 }
 0x14b   : > { %963 = vmin.xlane.f32.xlu2 %v2119_v1  ;;  %951 = vmin.xlane.f32.xlu1 %v2117_v0 }
 0x14c   : > { %v541_v16 = vmin.f32 %v2125_v5, %v2129_v7 }
 0x14e   : > { %v545_v23 = vmin.f32 %v541_v16, %v2149_v19 }
 0x150   : > { %v488_v4 = vpop.f32.mrf.mxu2  ;;  %v549_v28 = vmin.f32 %v545_v23, %v2108_v52 }
 0x151   : > { %v2131_v8 = vmax.f32 %v488_v4, 0.0  ;;  %v473_v9 = vpop.f32.mrf.mxu0 }
 0x152   : > { %v2133_v12 = vmax.f32 %v473_v9, 0.0 }
 0x153   : > { %945 = vmin.xlane.f32.xlu1 %v2127_v6  ;;  %953 = vmin.xlane.f32.xlu0 %v2131_v8  ;;  %v547_v24 = vmin.f32 %v543_v18, %v2131_v8 }
 0x154   : > { %v542_v14 = vmin.f32 %v2123_v3, %v2133_v12 }
 0x155   : > { %v551_v29 = vmin.f32 %v547_v24, %v2114_v60 }
 0x156   : > { %v546_v20 = vmin.f32 %v542_v14, %v2117_v0 }
 0x158   : > { %v491_v21 = vpop.f32.mrf.mxu2  ;;  %v550_v26 = vmin.f32 %v546_v20, %v2111_v56 }
 0x159   : > { %v2156_v25 = vmax.f32 %v491_v21, 0.0 }
 0x15a   : > { %v553_v31 = vmin.f32 %v549_v28, %v550_v26 }
 0x15b   : > { %v548_v27 = vmin.f32 %v544_v22, %v2156_v25  ;;  %947 = vmin.xlane.f32.xlu0 %v2145_v17  ;;  %955 = vmin.xlane.f32.xlu2 %v2156_v25 }
 0x15c   : > { %939 = vmin.xlane.f32.xlu1 %v2141_v15 }
 0x15d   : > { %v552_v30 = vmin.f32 %v548_v27, %v2119_v1 }
 0x15f   : > { %v554_v32 = vmin.f32 %v551_v29, %v552_v30 }
 0x161   : > { %v555_v33 = vmin.f32 %v553_v31, %v554_v32 }
 0x163   : > { %v556_v34 = vrot.slane %v555_v33, 4  ;;  %949 = vmin.xlane.f32.xlu2 %v2149_v19  ;;  %941 = vmin.xlane.f32.xlu0 %v2129_v7 }
 0x164   : > { %933 = vmin.xlane.f32.xlu1 %v2125_v5 }
 0x165   : > { %v557_v36 = vmin.f32 %v555_v33, %v556_v34 }
 0x167   : > { %v558_v37 = vrot.slane %v557_v36, 2 }
 0x169   : > { %v559_v39 = vmin.f32 %v557_v36, %v558_v37 }
 0x16b   : > { %v560_v40 = vrot.slane %v559_v39, 1  ;;  %935 = vmin.xlane.f32.xlu0 %v2123_v3  ;;  %943 = vmin.xlane.f32.xlu2 %v2133_v12 }
 0x16d   : > { %v2186_v45 = vmin.f32 %v559_v39, %v560_v40 }
 0x16f   : > { %vm565_vm2 = vcmp.le.f32.partialorder %v2141_v15, %v2186_v45  ;;  %vm569_vm3 = vcmp.le.f32.partialorder %v2145_v17, %v2186_v45  ;;  %vm573_vm4 = vcmp.le.f32.partialorder %v2156_v25, %v2186_v45  ;;  %vm577_vm5 = vcmp.le.f32.partialorder %v2119_v1, %v2186_v45 }
 0x170   : > { %v581_v51 = vsel %vm565_vm2, %v2175_v41, 128  ;;  %v585_v53 = vsel %vm569_vm3, %v2178_v42, 128  ;;  %v589_v61 = vsel %vm573_vm4, %v2181_v43, 128  ;;  %v593_v62 = vsel %vm577_vm5, %v2184_v44, 128 }
 0x171   : > { %vm600_vm6 = vcmp.lt.s32.totalorder %v581_v51, %v585_v53  ;;  %vm562_vm8 = vcmp.le.f32.partialorder %v2125_v5, %v2186_v45  ;;  %vm563_vm9 = vcmp.le.f32.partialorder %v2123_v3, %v2186_v45  ;;  %vm564_vm10 = vcmp.le.f32.partialorder %v2135_v13, %v2186_v45 }
 0x172   : > { %v601_v63 = vsel %vm600_vm6, %v581_v51, %v585_v53  ;;  %vm566_vm11 = vcmp.le.f32.partialorder %v2129_v7, %v2186_v45  ;;  %vm567_vm12 = vcmp.le.f32.partialorder %v2133_v12, %v2186_v45  ;;  %vm568_vm13 = vcmp.le.f32.partialorder %v2127_v6, %v2186_v45 }
 0x173   : > { %vm608_vm7 = vcmp.lt.s32.totalorder %v601_v63, %v589_v61  ;;  %937 = vmin.xlane.f32.xlu2 %v2135_v13  ;;  %vm570_vm15 = vcmp.le.f32.partialorder %v2149_v19, %v2186_v45  ;;  %vm571_vm0 = vcmp.le.f32.partialorder %v2117_v0, %v2186_v45  ;;  %vm572_vm1 = vcmp.le.f32.partialorder %v2131_v8, %v2186_v45 }
 0x174   : > { %v609_v4 = vsel %vm608_vm7, %v601_v63, %v589_v61  ;;  %vm574_vm2 = vcmp.le.f32.partialorder %v2108_v52, %v2186_v45  ;;  %v578_v9 = vsel %vm562_vm8, %v2170_v38, 128  ;;  %v579_v14 = vsel %vm563_vm9, %v2189_v46, 128 }
 0x175   : > { %vm616_vm14 = vcmp.lt.s32.totalorder %v609_v4, %v593_v62  ;;  %v580_v16 = vsel %vm564_vm10, %v2192_v47, 128  ;;  %vm575_vm3 = vcmp.le.f32.partialorder %v2111_v56, %v2186_v45  ;;  %v582_v18 = vsel %vm566_vm11, %v2195_v48, 128 }
 0x176   : > { %v583_v20 = vsel %vm567_vm12, %v2198_v49, 128  ;;  %v584_v21 = vsel %vm568_vm13, %v2201_v50, 128  ;;  %v617_v22 = vsel %vm616_vm14, %v609_v4, %v593_v62  ;;  %vm576_vm4 = vcmp.le.f32.partialorder %v2114_v60, %v2186_v45 }
 0x177   : > { %v586_v23 = vsel %vm570_vm15, %v2214_v54, 128  ;;  %v587_v24 = vsel %vm571_vm0, %v2217_v55, 128  ;;  %v588_v26 = vsel %vm572_vm1, %v2220_v57, 128  ;;  %vm594_vm5 = vcmp.lt.s32.totalorder %v578_v9, %v582_v18 }
 0x178   : > { %vm596_vm6 = vcmp.lt.s32.totalorder %v579_v14, %v583_v20  ;;  %vm598_vm7 = vcmp.lt.s32.totalorder %v580_v16, %v584_v21  ;;  %v590_v27 = vsel %vm574_vm2, %v2223_v58, 128  ;;  %v595_v28 = vsel %vm594_vm5, %v578_v9, %v582_v18 }
 0x179   : > { %v597_v29 = vsel %vm596_vm6, %v579_v14, %v583_v20  ;;  %v599_v30 = vsel %vm598_vm7, %v580_v16, %v584_v21  ;;  %v591_v31 = vsel %vm575_vm3, %v2226_v59, 128  ;;  %vm602_vm8 = vcmp.lt.s32.totalorder %v595_v28, %v586_v23 }
 0x17a   : > { %vm604_vm9 = vcmp.lt.s32.totalorder %v597_v29, %v587_v24  ;;  %vm606_vm10 = vcmp.lt.s32.totalorder %v599_v30, %v588_v26  ;;  %v592_v32 = vsel %vm576_vm4, %v2231_v2, 128  ;;  %v603_v33 = vsel %vm602_vm8, %v595_v28, %v586_v23 }
 0x17b   : > { %v605_v34 = vsel %vm604_vm9, %v597_v29, %v587_v24  ;;  %v607_v36 = vsel %vm606_vm10, %v599_v30, %v588_v26  ;;  %vm610_vm11 = vcmp.lt.s32.totalorder %v603_v33, %v590_v27  ;;  %v2287_v18 = vand.u32 127, %v522_v35 }
 0x17c   : > { %vm612_vm12 = vcmp.lt.s32.totalorder %v605_v34, %v591_v31  ;;  %vm614_vm13 = vcmp.lt.s32.totalorder %v607_v36, %v592_v32  ;;  %v611_v37 = vsel %vm610_vm11, %v603_v33, %v590_v27 }
 0x17d   : > { %v613_v39 = vsel %vm612_vm12, %v605_v34, %v591_v31  ;;  %v615_v40 = vsel %vm614_vm13, %v607_v36, %v592_v32 }
 0x17e   : > { %vm618_vm14 = vcmp.lt.s32.totalorder %v611_v37, %v613_v39  ;;  %vm620_vm15 = vcmp.lt.s32.totalorder %v615_v40, %v617_v22 }
 0x17f   : > { %v619_v51 = vsel %vm618_vm14, %v611_v37, %v613_v39  ;;  %v621_v53 = vsel %vm620_vm15, %v615_v40, %v617_v22 }
 0x180   : > { %vm622_vm0 = vcmp.lt.s32.totalorder %v619_v51, %v621_v53 }
 0x181   : > { %v623_v61 = vsel %vm622_vm0, %v619_v51, %v621_v53 }
 0x182   : > { %v624_v62 = vrot.slane %v623_v61, 4 }
 0x184   : > { %vm625_vm1 = vcmp.lt.s32.totalorder %v623_v61, %v624_v62 }
 0x185   : > { %v626_v63 = vsel %vm625_vm1, %v623_v61, %v624_v62 }
 0x186   : > { %v627_v4 = vrot.slane %v626_v63, 2 }
 0x188   : > { %vm628_vm2 = vcmp.lt.s32.totalorder %v626_v63, %v627_v4 }
 0x189   : > { %v629_v9 = vsel %vm628_vm2, %v626_v63, %v627_v4 }
 0x18a   : > { %v630_v14 = vrot.slane %v629_v9, 1 }
 0x18c   : > { %vm631_vm3 = vcmp.lt.s32.totalorder %v629_v9, %v630_v14 }
 0x18d   : > { %v2276_v16 = vsel %vm631_vm3, %v629_v9, %v630_v14 }
 0x18e   : > { %vm639_vm4 = vcmp.eq.s32.totalorder %v2201_v50, %v2276_v16  ;;  %vm642_vm5 = vcmp.eq.s32.totalorder %v2217_v55, %v2276_v16  ;;  %vm645_vm6 = vcmp.eq.s32.totalorder %v2223_v58, %v2276_v16  ;;  %vm648_vm7 = vcmp.eq.s32.totalorder %v2184_v44, %v2276_v16 }
 0x1a6   : > { %v2289_v20 = vpop.xlane.xlu2 %957 }
 0x1a7   : > { %vm977_vm8 = vcmp.le.f32.partialorder %v2108_v52, %v2289_v20 }
 0x1a8   : > { %v2294_v21 = vsel %vm977_vm8, %v2287_v18, 128 }
 0x1a9   : > { %v1166_v22 = vshra.s32 %v2294_v21, 16 }
 0x1ab   : > { %v2297_v23 = vcvt.s32.f32 %v1166_v22 }
 0x1ad   : > { %1169 = vmin.xlane.f32.xlu2 %v2297_v23 }
 0x1ae   : > { %v2300_v24 = vpop.xlane.xlu1 %959 }
 0x1af   : > { %vm978_vm9 = vcmp.le.f32.partialorder %v2111_v56, %v2300_v24 }
 0x1b0   : > { %v2305_v35 = vsel %vm978_vm9, %v2287_v18, 128 }
 0x1b1   : > { %v1180_v26 = vshra.s32 %v2305_v35, 16 }
 0x1b3   : > { %v2308_v52 = vcvt.s32.f32 %v1180_v26 }
 0x1b5   : > { %1183 = vmin.xlane.f32.xlu1 %v2308_v52 }
 0x1b6   : > { %v2311_v27 = vpop.xlane.xlu0 %961 }
 0x1b7   : > { %vm979_vm10 = vcmp.le.f32.partialorder %v2114_v60, %v2311_v27 }
 0x1b8   : > { %v2316_v28 = vsel %vm979_vm10, %v2287_v18, 128 }
 0x1b9   : > { %v1194_v29 = vshra.s32 %v2316_v28, 16 }
 0x1bb   : > { %v2319_v56 = vcvt.s32.f32 %v1194_v29 }
 0x1bd   : > { %1197 = vmin.xlane.f32.xlu0 %v2319_v56 }
 0x1be   : > { %v2322_v30 = vpop.xlane.xlu2 %963  ;;  %v2324_v31 = vpop.xlane.xlu1 %951 }
 0x1bf   : > { %3005 = vst [vmem:[#allocation3_spill] sm:$0xff] %v2322_v30  ;;  %vm980_vm11 = vcmp.le.f32.partialorder %v2119_v1, %v2322_v30  ;;  %vm974_vm12 = vcmp.le.f32.partialorder %v2117_v0, %v2324_v31 }
 0x1c0   : > { %v2329_v32 = vsel %vm980_vm11, %v2287_v18, 128  ;;  %v2337_v34 = vsel %vm974_vm12, %v2287_v18, 128 }
 0x1c1   : > { %v1208_v60 = vshra.s32 %v2329_v32, 16  ;;  %v1124_v1 = vshra.s32 %v2337_v34, 16 }
 0x1c3   : > { %v2334_v33 = vcvt.s32.f32 %v1208_v60  ;;  %v2355_v51 = vcvt.s32.f32 %v1124_v1 }
 0x1c5   : > { %1211 = vmin.xlane.f32.xlu2 %v2334_v33 }
 0x1c6   : > { %v2340_v36 = vpop.xlane.xlu1 %945  ;;  %v2342_v37 = vpop.xlane.xlu0 %953 }
 0x1c7   : > { %3006 = vst [vmem:[#allocation4_spill] sm:$0xff] %v2340_v36  ;;  %vm975_vm13 = vcmp.le.f32.partialorder %v2131_v8, %v2342_v37  ;;  %vm971_vm14 = vcmp.le.f32.partialorder %v2127_v6, %v2340_v36 }
 0x1c8   : > { %3007 = vst [vmem:[#allocation5_spill] sm:$0xff] %v2342_v37  ;;  %v2348_v0 = vsel %vm975_vm13, %v2287_v18, 128  ;;  %v2358_v53 = vsel %vm971_vm14, %v2287_v18, 128 }
 0x1c9   : > { %v1138_v39 = vshra.s32 %v2348_v0, 16  ;;  %v1082_v62 = vshra.s32 %v2358_v53, 16 }
 0x1cb   : > { %v2353_v40 = vcvt.s32.f32 %v1138_v39  ;;  %v2379_v14 = vcvt.s32.f32 %v1082_v62 }
 0x1cd   : > { %1141 = vmin.xlane.f32.xlu1 %v2353_v40  ;;  %1127 = vmin.xlane.f32.xlu2 %v2355_v51 }
 0x1ce   : > { %v2362_v8 = vpop.xlane.xlu0 %947  ;;  %v2364_v61 = vpop.xlane.xlu2 %955 }
 0x1cf   : > { %3008 = vst [vmem:[#allocation6_spill] sm:$0xff] %v2362_v8  ;;  %vm972_vm15 = vcmp.le.f32.partialorder %v2145_v17, %v2362_v8  ;;  %v2368_v6 = vpop.xlane.xlu1 %939  ;;  %vm976_vm3 = vcmp.le.f32.partialorder %v2156_v25, %v2364_v61 }
 0x1d0   : > { %3009 = vst [vmem:[#allocation7_spill] sm:$0xff] %v2364_v61  ;;  %v2372_v63 = vsel %vm972_vm15, %v2287_v18, 128  ;;  %vm968_vm0 = vcmp.le.f32.partialorder %v2141_v15, %v2368_v6 }
 0x1d1   : > { %3010 = vst [vmem:[#allocation8_spill] sm:$0xff] %v2368_v6  ;;  %v1096_v4 = vshra.s32 %v2372_v63, 16  ;;  %v2382_v22 = vsel %vm968_vm0, %v2287_v18, 128  ;;  %v1165_v6 = vand.u32 65535, %v2294_v21  ;;  %v1193_v21 = vand.u32 65535, %v2316_v28 }
 0x1d2   : > { %v1040_v29 = vshra.s32 %v2382_v22, 16  ;;  %v1137_v28 = vand.u32 65535, %v2348_v0  ;;  %v1095_v0 = vand.u32 65535, %v2372_v63  ;;  %v1039_v63 = vand.u32 65535, %v2382_v22 }
 0x1d3   : > { %v2377_v9 = vcvt.s32.f32 %v1096_v4  ;;  %v2414_v4 = vsel %vm976_vm3, %v2287_v18, 128  ;;  %v1167_v8 = vcvt.s32.f32 %v1165_v6  ;;  %v1195_v6 = vcvt.s32.f32 %v1193_v21 }
 0x1d4   : > { %v1151_v22 = vand.u32 65535, %v2414_v4 }
 0x1d5   : > { %1099 = vmin.xlane.f32.xlu1 %v2377_v9  ;;  %1085 = vmin.xlane.f32.xlu2 %v2379_v14 }
 0x1d6   : > { %v2386_v17 = vpop.xlane.xlu2 %949  ;;  %v2388_v26 = vpop.xlane.xlu0 %941 }
 0x1d7   : > { %3011 = vst [vmem:[#allocation9_spill] sm:$0xff] %v2386_v17  ;;  %vm973_vm1 = vcmp.le.f32.partialorder %v2149_v19, %v2386_v17  ;;  %v2392_v15 = vpop.xlane.xlu1 %933  ;;  %vm969_vm2 = vcmp.le.f32.partialorder %v2129_v7, %v2388_v26  ;;  %v2411_v7 = vcvt.s32.f32 %v1040_v29  ;;  %v1152_v29 = vshra.s32 %v2414_v4, 16 }
 0x1d8   : > { %3012 = vst [vmem:[#allocation10_spill] sm:$0xff] %v2388_v26  ;;  %v2398_v60 = vsel %vm973_vm1, %v2287_v18, 128  ;;  %v2401_v1 = vsel %vm969_vm2, %v2287_v18, 128  ;;  %vm965_vm8 = vcmp.le.f32.partialorder %v2125_v5, %v2392_v15 }
 0x1d9   : > { %3013 = vst [vmem:[#allocation11_spill] sm:$0xff] %v2392_v15  ;;  %v1110_v19 = vshra.s32 %v2398_v60, 16  ;;  %v1054_v39 = vshra.s32 %v2401_v1, 16  ;;  %v2417_v10 = vsel %vm965_vm8, %v2287_v18, 128  ;;  %v2438_v26 = vcvt.s32.f32 %v1152_v29 }
 0x1db   : > { %v2409_v62 = vcvt.s32.f32 %v1110_v19  ;;  %v2419_v11 = vcvt.s32.f32 %v1054_v39  ;;  %v998_v19 = vshra.s32 %v2417_v10, 16 }
 0x1dd   : > { %1113 = vmin.xlane.f32.xlu0 %v2409_v62  ;;  %1043 = vmin.xlane.f32.xlu2 %v2411_v7  ;;  %v2442_v17 = vcvt.s32.f32 %v998_v19 }
 0x1de   : > { %1057 = vmin.xlane.f32.xlu1 %v2419_v11  ;;  %v2424_v5 = vpop.xlane.xlu0 %935  ;;  %v2426_v25 = vpop.xlane.xlu2 %943 }
 0x1df   : > { %3014 = vst [vmem:[#allocation12_spill] sm:$0xff] %v2424_v5  ;;  %vm966_vm9 = vcmp.le.f32.partialorder %v2123_v3, %v2424_v5  ;;  %vm970_vm10 = vcmp.le.f32.partialorder %v2133_v12, %v2426_v25 }
 0x1e0   : > { %3015 = vst [vmem:[#allocation13_spill] sm:$0xff] %v2426_v25  ;;  %v2433_v39 = vsel %vm966_vm9, %v2287_v18, 128  ;;  %v2445_v3 = vsel %vm970_vm10, %v2287_v18, 128 }
 0x1e1   : > { %v1012_v30 = vshra.s32 %v2433_v39, 16  ;;  %v1068_v12 = vshra.s32 %v2445_v3, 16 }
 0x1e3   : > { %v2440_v15 = vcvt.s32.f32 %v1012_v30  ;;  %v2455_v30 = vcvt.s32.f32 %v1068_v12  ;;  %v1179_v12 = vand.u32 65535, %v2305_v35  ;;  %v1207_v35 = vand.u32 65535, %v2329_v32 }
 0x1e5   : > { %1155 = vmin.xlane.f32.xlu0 %v2438_v26  ;;  %1001 = vmin.xlane.f32.xlu2 %v2442_v17  ;;  %v1181_v37 = vcvt.s32.f32 %v1179_v12 }
 0x1e6   : > { %1015 = vmin.xlane.f32.xlu1 %v2440_v15  ;;  %v2450_v5 = vpop.xlane.xlu2 %937 }
 0x1e7   : > { %3016 = vst [vmem:[#allocation14_spill] sm:$0xff] %v2450_v5  ;;  %vm967_vm11 = vcmp.le.f32.partialorder %v2135_v13, %v2450_v5 }
 0x1e8   : > { %v2458_v29 = vsel %vm967_vm11, %v2287_v18, 128 }
 0x1e9   : > { %v1026_v19 = vshra.s32 %v2458_v29, 16 }
 0x1eb   : > { %v2462_v25 = vcvt.s32.f32 %v1026_v19 }
 0x1ed   : > { %1071 = vmin.xlane.f32.xlu0 %v2455_v30 }
 0x1f5   : > { %1029 = vmin.xlane.f32.xlu0 %v2462_v25 }
 0x220   : > { %v2466_v61 = vpop.xlane.xlu2 %1169 }
 0x221   : > { %vm1171_vm12 = vcmp.eq.f32.partialorder %v2297_v23, %v2466_v61 }
 0x222   : > { %v1172_v13 = vsel %vm1171_vm12, %v1167_v8, inf }
 0x223   : > { %1173 = vmin.xlane.f32.xlu0 %v1172_v13  ;;  %v1209_v13 = vcvt.s32.f32 %v1207_v35  ;;  %v1097_v35 = vcvt.s32.f32 %v1095_v0 }
 0x228   : > { %v2471_v5 = vpop.xlane.xlu1 %1183 }
 0x229   : > { %vm1185_vm13 = vcmp.eq.f32.partialorder %v2308_v52, %v2471_v5 }
 0x22a   : > { %v1186_v19 = vsel %vm1185_vm13, %v1181_v37, inf  ;;  %v1123_v37 = vand.u32 65535, %v2337_v34  ;;  %v1081_v34 = vand.u32 65535, %v2358_v53  ;;  %v1053_v53 = vand.u32 65535, %v2401_v1 }
 0x22b   : > { %1187 = vmin.xlane.f32.xlu2 %v1186_v19  ;;  %v997_v1 = vand.u32 65535, %v2417_v10 }
 0x22c   : > { %v1125_v21 = vcvt.s32.f32 %v1123_v37  ;;  %v1041_v37 = vcvt.s32.f32 %v1039_v63 }
 0x230   : > { %v2476_v36 = vpop.xlane.xlu0 %1197 }
 0x231   : > { %vm1199_vm14 = vcmp.eq.f32.partialorder %v2319_v56, %v2476_v36  ;;  %v1139_v56 = vcvt.s32.f32 %v1137_v28 }
 0x232   : > { %v1200_v23 = vsel %vm1199_vm14, %v1195_v6, inf  ;;  %vm635_vm14 = vcmp.eq.s32.totalorder %v2192_v47, %v2276_v16 }
 0x233   : > { %1201 = vmin.xlane.f32.xlu1 %v1200_v23 }
 0x238   : > { %v2481_v8 = vpop.xlane.xlu2 %1211 }
 0x239   : > { %vm1213_vm15 = vcmp.eq.f32.partialorder %v2334_v33, %v2481_v8  ;;  %v1218_v58 = vcvt.f32.s32 %v2481_v8 }
 0x23a   : > { %v1214_v52 = vsel %vm1213_vm15, %v1209_v13, inf  ;;  %v1083_v13 = vcvt.s32.f32 %v1081_v34  ;;  %v1153_v34 = vcvt.s32.f32 %v1151_v22  ;;  %vm634_vm15 = vcmp.eq.s32.totalorder %v2189_v46, %v2276_v16 }
 0x23b   : > { %1215 = vmin.xlane.f32.xlu0 %v1214_v52 }
 0x240   : > { %v2487_v12 = vpop.xlane.xlu1 %1141  ;;  %v2489_v19 = vpop.xlane.xlu2 %1127 }
 0x241   : > { %vm1143_vm0 = vcmp.eq.f32.partialorder %v2353_v40, %v2487_v12  ;;  %vm1129_vm1 = vcmp.eq.f32.partialorder %v2355_v51, %v2489_v19 }
 0x242   : > { %v1144_v32 = vsel %vm1143_vm0, %v1139_v56, inf  ;;  %v1130_v33 = vsel %vm1129_vm1, %v1125_v21, inf  ;;  %v1055_v21 = vcvt.s32.f32 %v1053_v53  ;;  %vm638_vm1 = vcmp.eq.s32.totalorder %v2198_v49, %v2276_v16 }
 0x243   : > { %1145 = vmin.xlane.f32.xlu2 %v1144_v32  ;;  %1131 = vmin.xlane.f32.xlu0 %v1130_v33  ;;  %v1011_v32 = vand.u32 65535, %v2433_v39  ;;  %v1025_v49 = vand.u32 65535, %v2458_v29 }
 0x248   : > { %v2497_v6 = vpop.xlane.xlu1 %1099  ;;  %v2499_v23 = vpop.xlane.xlu2 %1085 }
 0x249   : > { %vm1101_vm2 = vcmp.eq.f32.partialorder %v2377_v9, %v2497_v6  ;;  %vm1087_vm3 = vcmp.eq.f32.partialorder %v2379_v14, %v2499_v23 }
 0x24a   : > { %v1102_v40 = vsel %vm1101_vm2, %v1097_v35, inf  ;;  %v1088_v51 = vsel %vm1087_vm3, %v1083_v13, inf  ;;  %v999_v35 = vcvt.s32.f32 %v997_v1  ;;  %v1109_v13 = vand.u32 65535, %v2398_v60 }
 0x24b   : > { %1103 = vmin.xlane.f32.xlu2 %v1102_v40  ;;  %1089 = vmin.xlane.f32.xlu0 %v1088_v51  ;;  %v3017_v40 = vmov 0.0   ;;  %v1067_v60 = vand.u32 65535, %v2445_v3  ;;  %vm637_vm2 = vcmp.eq.s32.totalorder %v2195_v48, %v2276_v16  ;;  %v1027_v48 = vcvt.s32.f32 %v1025_v49 }
 0x24c   : > { %v1703_v51 = vsel %vm635_vm14, 1.0, %v3017_v40  ;;  %v1702_v63 = vsel %vm634_vm15, 1.0, %v3017_v40  ;;  %v2555_v53 = vsel %vm637_vm2, 1.0, %v3017_v40  ;;  %vm636_vm14 = vcmp.eq.s32.totalorder %v2175_v41, %v2276_v16 }
 0x24d   : > { %v1069_v47 = vcvt.s32.f32 %v1067_v60  ;;  %vm647_vm15 = vcmp.eq.s32.totalorder %v2231_v2, %v2276_v16  ;;  %v2631_v22 = vsel %vm645_vm6, 1.0, %v3017_v40  ;;  %v2638_v50 = vsel %vm648_vm7, 1.0, %v3017_v40 }
 0x24e   : > { %v1148_v49 = vcvt.f32.s32 %v2487_v12 }
 0x250   : > { %v2507_v52 = vpop.xlane.xlu0 %1113  ;;  %v2509_v28 = vpop.xlane.xlu2 %1043 }
 0x251   : > { %v2511_v56 = vpop.xlane.xlu1 %1057  ;;  %vm1045_vm8 = vcmp.eq.f32.partialorder %v2411_v7, %v2509_v28  ;;  %vm1115_vm13 = vcmp.eq.f32.partialorder %v2409_v62, %v2507_v52  ;;  %v2551_v62 = vsel %vm638_vm1, 1.0, %v3017_v40  ;;  %v1120_v12 = vcvt.f32.s32 %v2507_v52 }
 0x252   : > { %vm1059_vm9 = vcmp.eq.f32.partialorder %v2419_v11, %v2511_v56  ;;  %v1046_v9 = vsel %vm1045_vm8, %v1041_v37, inf  ;;  %v1013_v11 = vcvt.s32.f32 %v1011_v32  ;;  %vm641_vm8 = vcmp.eq.s32.totalorder %v2214_v54, %v2276_v16 }
 0x253   : > { %v1060_v14 = vsel %vm1059_vm9, %v1055_v21, inf  ;;  %1047 = vmin.xlane.f32.xlu0 %v1046_v9  ;;  %vm640_vm9 = vcmp.eq.s32.totalorder %v2178_v42, %v2276_v16  ;;  %v2568_v37 = vsel %vm641_vm8, 1.0, %v3017_v40  ;;  %v681_v42 = vmul.f32 -70.0, %v2186_v45 }
 0x254   : > { %1061 = vmin.xlane.f32.xlu2 %v1060_v14  ;;  %v2572_v21 = vsel %vm640_vm9, 1.0, %v3017_v40  ;;  %v2605_v45 = vsel %vm647_vm15, 1.0, %v3017_v40  ;;  %v2617_v9 = vsel %vm639_vm4, 1.0, %v3017_v40  ;;  %v2624_v14 = vsel %vm642_vm5, 1.0, %v3017_v40 }
 0x255   : > { %v1121_v52 = vshll.u32 %v1120_v12, 16 }
 0x258   : > { %v2520_v33 = vpop.xlane.xlu0 %1155  ;;  %v2522_v0 = vpop.xlane.xlu2 %1001 }
 0x259   : > { %v2524_v7 = vpop.xlane.xlu1 %1015  ;;  %vm1157_vm10 = vcmp.eq.f32.partialorder %v2438_v26, %v2520_v33  ;;  %vm1003_vm11 = vcmp.eq.f32.partialorder %v2442_v17, %v2522_v0  ;;  %v1111_v26 = vcvt.s32.f32 %v1109_v13 }
 0x25a   : > { %v1158_v4 = vsel %vm1157_vm10, %v1153_v34, inf  ;;  %vm1017_vm12 = vcmp.eq.f32.partialorder %v2440_v15, %v2524_v7  ;;  %v1004_v10 = vsel %vm1003_vm11, %v999_v35, inf  ;;  %vm643_vm10 = vcmp.eq.s32.totalorder %v2220_v57, %v2276_v16 }
 0x25b   : > { %1159 = vmin.xlane.f32.xlu1 %v1158_v4  ;;  %v1018_v39 = vsel %vm1017_vm12, %v1013_v11, inf  ;;  %1005 = vmin.xlane.f32.xlu0 %v1004_v10  ;;  %v1116_v15 = vsel %vm1115_vm13, %v1111_v26, inf  ;;  %vm633_vm11 = vcmp.eq.s32.totalorder %v2170_v38, %v2276_v16  ;;  %vm644_vm12 = vcmp.eq.s32.totalorder %v2181_v43, %v2276_v16 }
 0x25c   : > { %1019 = vmin.xlane.f32.xlu2 %v1018_v39  ;;  %v2583_v54 = vsel %vm643_vm10, 1.0, %v3017_v40  ;;  %v2588_v29 = vsel %vm644_vm12, 1.0, %v3017_v40  ;;  %v682_v57 = vmul.f32 1.442695, %v681_v42  ;;  %vm646_vm13 = vcmp.eq.s32.totalorder %v2226_v59, %v2276_v16 }
 0x25d   : > { %v2598_v38 = vsel %vm646_vm13, 1.0, %v3017_v40  ;;  %v2601_v43 = vsel %vm636_vm14, 1.0, %v3017_v40  ;;  %v1204_v34 = vcvt.f32.s32 %v2476_v36  ;;  %v1190_v11 = vcvt.f32.s32 %v2471_v5 }
 0x25e   : > { %1771 = vpow2.f32 %v682_v57  ;;  %v1176_v10 = vcvt.f32.s32 %v2466_v61  ;;  %v1219_v39 = vshll.u32 %v1218_v58, 16  ;;  %v3018_v5 = vmov 1.0  }
 0x25f   : > { %v1205_v16 = vshll.u32 %v1204_v34, 16 }
 0x260   : > { %v2539_v17 = vpop.xlane.xlu0 %1071  ;;  %v1177_v36 = vshll.u32 %v1176_v10, 16 }
 0x261   : > { %vm1073_vm0 = vcmp.eq.f32.partialorder %v2455_v30, %v2539_v17 }
 0x262   : > { %v1074_v46 = vsel %vm1073_vm0, %v1069_v47, inf }
 0x263   : > { %1117 = vmin.xlane.f32.xlu1 %v1116_v15  ;;  %688 = vadd.xlane.f32.xlu0 %v1703_v51  ;;  %v1191_v15 = vshll.u32 %v1190_v11, 16  ;;  %v1106_v11 = vcvt.f32.s32 %v2497_v6 }
 0x264   : > { %686 = vadd.xlane.f32.xlu2 %v1702_v63  ;;  %v2609_v41 = vpop.eup %1771 }
 0x265   : > { %v718_v2 = vmul.f32 %v2609_v41, %v1703_v51  ;;  %v717_v1 = vmul.f32 %v2609_v41, %v1702_v63  ;;  %v1107_v10 = vshll.u32 %v1106_v11, 16 }
 0x268   : > { %v2557_v3 = vpop.xlane.xlu0 %1029 }
 0x269   : > { %vm1031_vm3 = vcmp.eq.f32.partialorder %v2462_v25, %v2557_v3  ;;  %v1701_v25 = vsel %vm633_vm11, 1.0, %v3017_v40 }
 0x26a   : > { %v1032_v30 = vsel %vm1031_vm3, %v1027_v48, inf  ;;  %v716_v59 = vmul.f32 %v2609_v41, %v1701_v25  ;;  %v1162_v48 = vcvt.f32.s32 %v2520_v33 }
 0x26b   : > { %1075 = vmin.xlane.f32.xlu1 %v1074_v46  ;;  %694 = vadd.xlane.f32.xlu0 %v2551_v62 }
 0x26c   : > { %692 = vadd.xlane.f32.xlu2 %v2555_v53 }
 0x273   : > { %1033 = vmin.xlane.f32.xlu1 %v1032_v30  ;;  %700 = vadd.xlane.f32.xlu0 %v2568_v37  ;;  %v1134_v30 = vcvt.f32.s32 %v2489_v19  ;;  %v1092_v19 = vcvt.f32.s32 %v2499_v23 }
 0x274   : > { %698 = vadd.xlane.f32.xlu2 %v2572_v21 }
 0x275   : > { %v1135_v34 = vshll.u32 %v1134_v30, 16  ;;  %v1093_v23 = vshll.u32 %v1092_v19, 16 }
 0x27b   : > { %704 = vadd.xlane.f32.xlu0 %v2583_v54  ;;  %684 = vadd.xlane.f32.xlu1 %v1701_v25 }
 0x27c   : > { %706 = vadd.xlane.f32.xlu2 %v2588_v29 }
 0x283   : > { %710 = vadd.xlane.f32.xlu0 %v2598_v38  ;;  %690 = vadd.xlane.f32.xlu1 %v2601_v43 }
 0x284   : > { %712 = vadd.xlane.f32.xlu2 %v2605_v45 }
 0x28b   : > { %696 = vadd.xlane.f32.xlu1 %v2617_v9  ;;  %732 = vadd.xlane.f32.xlu0 %v716_v59  ;;  %v1149_v59 = vshll.u32 %v1148_v49, 16 }
 0x28c   : > { %736 = vadd.xlane.f32.xlu2 %v718_v2  ;;  %v1163_v2 = vshll.u32 %v1162_v48, 16 }
 0x293   : > { %702 = vadd.xlane.f32.xlu1 %v2624_v14 }
 0x296   : > { %v1174_v55 = vpop.xlane.xlu0 %1173 }
 0x297   : > { %v1175_v51 = vcvt.f32.s32 %v1174_v55 }
 0x299   : > { %v2658_v61 = vadd.s32 %v1177_v36, %v1175_v51  ;;  %v1078_v36 = vcvt.f32.s32 %v2539_v17 }
 0x29b   : > { %708 = vadd.xlane.f32.xlu1 %v2631_v22  ;;  %vm1233_vm7 = vcmp.eq.s32.totalorder %v2287_v18, %v2658_v61  ;;  %v1079_v17 = vshll.u32 %v1078_v36, 16 }
 0x29e   : > { %v1188_v35 = vpop.xlane.xlu2 %1187 }
 0x29f   : > { %v1189_v13 = vcvt.f32.s32 %v1188_v35 }
 0x2a1   : > { %v2650_v8 = vadd.s32 %v1191_v15, %v1189_v13  ;;  %v1064_v15 = vcvt.f32.s32 %v2511_v56 }
 0x2a3   : > { %714 = vadd.xlane.f32.xlu1 %v2638_v50  ;;  %vm1234_vm6 = vcmp.eq.s32.totalorder %v2287_v18, %v2650_v8  ;;  %v1065_v56 = vshll.u32 %v1064_v15, 16  ;;  %v720_v8 = vmul.f32 %v2609_v41, %v2555_v53  ;;  %v724_v53 = vmul.f32 %v2609_v41, %v2568_v37 }
 0x2a4   : > { %v729_v37 = vmul.f32 %v2609_v41, %v2598_v38 }
 0x2a6   : > { %v1202_v32 = vpop.xlane.xlu1 %1201 }
 0x2a7   : > { %v1203_v4 = vcvt.f32.s32 %v1202_v32 }
 0x2a9   : > { %v2646_v63 = vadd.s32 %v1205_v16, %v1203_v4 }
 0x2ab   : > { %734 = vadd.xlane.f32.xlu1 %v717_v1  ;;  %vm1235_vm5 = vcmp.eq.s32.totalorder %v2287_v18, %v2646_v63  ;;  %v721_v63 = vmul.f32 %v2609_v41, %v2551_v62  ;;  %v725_v62 = vmul.f32 %v2609_v41, %v2624_v14  ;;  %v1281_v14 = vmul.f32 -70.0, %v2289_v20 }
 0x2ac   : > { %v1278_v20 = vmul.f32 -70.0, %v2324_v31 }
 0x2ae   : > { %v1216_v44 = vpop.xlane.xlu0 %1215  ;;  %v1303_v31 = vmul.f32 1.442695, %v1278_v20 }
 0x2af   : > { %v1217_v26 = vcvt.f32.s32 %v1216_v44 }
 0x2b1   : > { %v2648_v60 = vadd.s32 %v1219_v39, %v1217_v26 }
 0x2b3   : > { %vm1236_vm4 = vcmp.eq.s32.totalorder %v2287_v18, %v2648_v60 }
 0x2b4   : > { %1733 = vmatpush.msk.msra.mxu1 %vm1236_vm4, %v3018_v5  ;;  %v1732_v61 = vsel %vm1236_vm4, 1.0, %v3017_v40  ;;  %vm931_vm4 = vcmask 0  }
 0x2b6   : > { %1734 = vmatpush.msk.msra.mxu1 %vm1235_vm5, %v3018_v5  ;;  %v1146_v47 = vpop.xlane.xlu2 %1145  ;;  %v1132_v46 = vpop.xlane.xlu0 %1131 }
 0x2b7   : > { %v1147_v42 = vcvt.f32.s32 %v1146_v47  ;;  %v1133_v55 = vcvt.f32.s32 %v1132_v46  ;;  %v1050_v46 = vcvt.f32.s32 %v2509_v28 }
 0x2b8   : > { %1735 = vmatpush.msk.msra.mxu1 %vm1234_vm6, %v3018_v5 }
 0x2b9   : > { %v2681_v58 = vadd.s32 %v1149_v59, %v1147_v42  ;;  %v2687_v33 = vadd.s32 %v1135_v34, %v1133_v55  ;;  %v1051_v28 = vshll.u32 %v1050_v46, 16  ;;  %v1022_v59 = vcvt.f32.s32 %v2524_v7 }
 0x2ba   : > { %1736 = vmatpush.msk.msra.mxu1 %vm1233_vm7, %v3018_v5  ;;  %v1036_v55 = vcvt.f32.s32 %v2557_v3  ;;  %v1008_v34 = vcvt.f32.s32 %v2522_v0 }
 0x2bb   : > { %vm1231_vm1 = vcmp.eq.s32.totalorder %v2287_v18, %v2681_v58  ;;  %vm1230_vm2 = vcmp.eq.s32.totalorder %v2287_v18, %v2687_v33  ;;  %v1023_v12 = vshll.u32 %v1022_v59, 16  ;;  %v1729_v33 = vsel %vm1233_vm7, 1.0, %v3017_v40 }
 0x2bc   : > { %v1037_v7 = vshll.u32 %v1036_v55, 16  ;;  %v1730_v58 = vsel %vm1234_vm6, 1.0, %v3017_v40 }
 0x2be   : > { %v1104_v25 = vpop.xlane.xlu2 %1103  ;;  %v1090_v32 = vpop.xlane.xlu0 %1089 }
 0x2bf   : > { %v1105_v4 = vcvt.f32.s32 %v1104_v25  ;;  %v1091_v44 = vcvt.f32.s32 %v1090_v32 }
 0x2c1   : > { %v2708_v13 = vadd.s32 %v1107_v10, %v1105_v4  ;;  %v2714_v47 = vadd.s32 %v1093_v23, %v1091_v44  ;;  %v1009_v10 = vshll.u32 %v1008_v34, 16 }
 0x2c3   : > { %vm1228_vm8 = vcmp.eq.s32.totalorder %v2287_v18, %v2708_v13  ;;  %vm1227_vm9 = vcmp.eq.s32.totalorder %v2287_v18, %v2714_v47  ;;  %v1726_v13 = vsel %vm1230_vm2, 1.0, %v3017_v40  ;;  %v1727_v47 = vsel %vm1231_vm1, 1.0, %v3017_v40 }
 0x2c6   : > { %v1048_v51 = vpop.xlane.xlu0 %1047 }
 0x2c7   : > { %v1062_v39 = vpop.xlane.xlu2 %1061  ;;  %v1049_v30 = vcvt.f32.s32 %v1048_v51 }
 0x2c8   : > { %v1063_v49 = vcvt.f32.s32 %v1062_v39 }
 0x2ca   : > { %v1066_v25 = vadd.s32 %v1065_v56, %v1063_v49 }
 0x2cc   : > { %vm1225_vm11 = vcmp.eq.s32.totalorder %v2287_v18, %v1066_v25 }
 0x2cd   : > { %v1721_v49 = vsel %vm1225_vm11, 1.0, %v3017_v40 }
 0x2ce   : > { %v1160_v57 = vpop.xlane.xlu1 %1159  ;;  %v1006_v32 = vpop.xlane.xlu0 %1005 }
 0x2cf   : > { %v1161_v1 = vcvt.f32.s32 %v1160_v57  ;;  %v1007_v3 = vcvt.f32.s32 %v1006_v32 }
 0x2d1   : > { %v2683_v35 = vadd.s32 %v1163_v2, %v1161_v1  ;;  %v1020_v2 = vpop.xlane.xlu2 %1019  ;;  %v1052_v1 = vadd.s32 %v1051_v28, %v1049_v30  ;;  %v1723_v28 = vsel %vm1227_vm9, 1.0, %v3017_v40 }
 0x2d2   : > { %v1021_v11 = vcvt.f32.s32 %v1020_v2 }
 0x2d3   : > { %vm1232_vm0 = vcmp.eq.s32.totalorder %v2287_v18, %v2683_v35  ;;  %vm1224_vm12 = vcmp.eq.s32.totalorder %v2287_v18, %v1052_v1  ;;  %v1731_v35 = vsel %vm1235_vm5, 1.0, %v3017_v40 }
 0x2d4   : > { %1737 = vmatpush.msk.msra.mxu1 %vm1232_vm0, %v3018_v5  ;;  %v1024_v0 = vadd.s32 %v1023_v12, %v1021_v11 }
 0x2d6   : > { %v1118_v6 = vpop.xlane.xlu1 %1117  ;;  %1738 = vmatpush.msk.msra.mxu1 %vm1231_vm1, %v3018_v5  ;;  %vm1222_vm14 = vcmp.eq.s32.totalorder %v2287_v18, %v1024_v0 }
 0x2d7   : > { %v1119_v16 = vcvt.f32.s32 %v1118_v6  ;;  %v1718_v39 = vsel %vm1222_vm14, 1.0, %v3017_v40 }
 0x2d8   : > { %1739 = vmatpush.msk.msra.mxu1 %vm1230_vm2, %v3018_v5 }
 0x2d9   : > { %v2710_v26 = vadd.s32 %v1121_v52, %v1119_v16  ;;  %v1010_v52 = vadd.s32 %v1009_v10, %v1007_v3  ;;  %v723_v3 = vmul.f32 %v2609_v41, %v2572_v21 }
 0x2db   : > { %vm1229_vm3 = vcmp.eq.s32.totalorder %v2287_v18, %v2710_v26  ;;  %vm1221_vm15 = vcmp.eq.s32.totalorder %v2287_v18, %v1010_v52  ;;  %v1728_v26 = vsel %vm1232_vm0, 1.0, %v3017_v40 }
 0x2dc   : > { %1740 = vmatpush.msk.msra.mxu1 %vm1229_vm3, %v3018_v5  ;;  %v1717_v23 = vsel %vm1221_vm15, 1.0, %v3017_v40 }
 0x2de   : > { %v1076_v48 = vpop.xlane.xlu1 %1075  ;;  %1741 = vmatpush.msk.msra.mxu1 %vm1228_vm8, %v3018_v5 }
 0x2df   : > { %v1077_v42 = vcvt.f32.s32 %v1076_v48 }
 0x2e0   : > { %1742 = vmatpush.msk.msra.mxu1 %vm1227_vm9, %v3018_v5 }
 0x2e1   : > { %v1080_v57 = vadd.s32 %v1079_v17, %v1077_v42  ;;  %v1724_v42 = vsel %vm1228_vm8, 1.0, %v3017_v40 }
 0x2e3   : > { %vm1226_vm10 = vcmp.eq.s32.totalorder %v2287_v18, %v1080_v57  ;;  %v1725_v57 = vsel %vm1229_vm3, 1.0, %v3017_v40 }
 0x2e4   : > { %1743 = vmatpush.msk.msra.mxu1 %vm1226_vm10, %v3018_v5  ;;  %v1722_v17 = vsel %vm1226_vm10, 1.0, %v3017_v40 }
 0x2e6   : > { %v1034_v19 = vpop.xlane.xlu1 %1033  ;;  %1744 = vmatpush.msk.msra.mxu1 %vm1225_vm11, %v3018_v5 }
 0x2e7   : > { %v1035_v4 = vcvt.f32.s32 %v1034_v19 }
 0x2e8   : > { %1745 = vmatpush.msk.msra.mxu1 %vm1224_vm12, %v3018_v5 }
 0x2e9   : > { %v1038_v6 = vadd.s32 %v1037_v7, %v1035_v4  ;;  %v719_v7 = vmul.f32 %v2609_v41, %v2601_v43  ;;  %v689_v4 = vpop.xlane.xlu0 %688  ;;  %v726_v43 = vmul.f32 %v2609_v41, %v2583_v54  ;;  %v728_v54 = vmul.f32 %v2609_v41, %v2631_v22 }
 0x2ea   : > { %v766_v0 = vmax.f32 %v689_v4, 1.0  ;;  %v730_v22 = vmul.f32 %v2609_v41, %v2605_v45 }
 0x2eb   : > { %vm1223_vm13 = vcmp.eq.s32.totalorder %v2287_v18, %v1038_v6  ;;  %v722_v18 = vmul.f32 %v2609_v41, %v2617_v9  ;;  %v727_v6 = vmul.f32 %v2609_v41, %v2588_v29  ;;  %v1283_v29 = vmul.f32 -70.0, %v2311_v27  ;;  %v3020_v27 = vld [vmem:[#allocation5_spill] sm:$0xff] }
 0x2ec   : > { %1746 = vmatpush.msk.msra.mxu1 %vm1223_vm13, %v3018_v5  ;;  %v1719_v15 = vsel %vm1223_vm13, 1.0, %v3017_v40  ;;  %1773 = vlog2.f32 %v766_v0 }
 0x2ee   : > { %1747 = vmatpush.msk.msra.mxu1 %vm1222_vm14, %v3018_v5  ;;  %v2817_v10 = vpop.xlane.xlu1 %684 }
 0x2f0   : > { %1748 = vmatpush.msk.msra.mxu1 %vm1221_vm15, %v3018_v5 }
 0x2f1   : > { %1333 = vmatmul.f32.vlgmr.msra.gmra.mxu1 %v3018_v5  ;;  %v1720_v5 = vsel %vm1224_vm12, 1.0, %v3017_v40  ;;  %v687_v40 = vpop.xlane.xlu2 %686  ;;  %v695_v21 = vpop.xlane.xlu0 %694 }
 0x2f2   : > { %v765_v52 = vmax.f32 %v687_v40, 1.0 }
 0x2f4   : > { %1775 = vlog2.f32 %v765_v52 }
 0x2f6   : > { %v2827_v60 = vpop.xlane.xlu1 %690 }
 0x2f9   : > { %v693_v9 = vpop.xlane.xlu2 %692 }
 0x2fa   : > { %v768_v38 = vmax.f32 %v693_v9, 1.0 }
 0x36e   : > { %v1334_v44 = vpop.f32.mrf.mxu1 }
 0x36f   : > { %v1337_v16 = vperm.slane %v1334_v44, 0  ;;  %v1282_v44 = vmul.f32 -70.0, %v2300_v24  ;;  %v731_v24 = vmul.f32 %v2609_v41, %v2638_v50 }
 0x371   : > { %v1339_v51 = vmul.f32 %v1718_v39, %v1337_v16  ;;  %v1338_v36 = vmul.f32 %v1717_v23, %v1337_v16  ;;  %v1340_v46 = vmul.f32 %v1719_v15, %v1337_v16  ;;  %v1342_v56 = vmul.f32 %v1721_v49, %v1337_v16  ;;  %v701_v39 = vpop.xlane.xlu0 %700  ;;  %v2837_v23 = vpop.xlane.xlu1 %696 }
 0x372   : > { %v1341_v48 = vmul.f32 %v1720_v5, %v1337_v16  ;;  %v1343_v30 = vmul.f32 %v1722_v17, %v1337_v16  ;;  %v1345_v25 = vmul.f32 %v1724_v42, %v1337_v16  ;;  %v1344_v59 = vmul.f32 %v1723_v28, %v1337_v16  ;;  %v3019_v5 = vld [vmem:[#allocation4_spill] sm:$0xff]  ;;  %v3022_v28 = vld [vmem:[#allocation7_spill] sm:$0xff] }
 0x373   : > { %1356 = vadd.xlane.f32.xlu2 %v1339_v51  ;;  %1354 = vadd.xlane.f32.xlu1 %v1338_v36  ;;  %v1346_v2 = vmul.f32 %v1725_v57, %v1337_v16  ;;  %v1347_v55 = vmul.f32 %v1726_v13, %v1337_v16  ;;  %v1348_v1 = vmul.f32 %v1727_v47, %v1337_v16  ;;  %v1309_v15 = vmul.f32 1.442695, %v1281_v14  ;;  %v699_v36 = vpop.xlane.xlu2 %698  ;;  %v3023_v57 = vld [vmem:[#allocation8_spill] sm:$0xff] }
 0x374   : > { %1358 = vadd.xlane.f32.xlu0 %v1340_v46  ;;  %v1349_v32 = vmul.f32 %v1728_v26, %v1337_v16  ;;  %v1350_v34 = vmul.f32 %v1729_v33, %v1337_v16  ;;  %v1351_v11 = vmul.f32 %v1730_v58, %v1337_v16  ;;  %v1352_v12 = vmul.f32 %v1731_v35, %v1337_v16  ;;  %v1774_v46 = vpop.eup %1773  ;;  %v3025_v58 = vld [vmem:[#allocation11_spill] sm:$0xff] }
 0x375   : > { %v1353_v19 = vmul.f32 %v1732_v61, %v1337_v16  ;;  %v769_v16 = vmax.f32 %v695_v21, 1.0  ;;  %v1311_v51 = vmul.f32 1.442695, %v1282_v44  ;;  %v1313_v49 = vmul.f32 1.442695, %v1283_v29  ;;  %v1776_v41 = vpop.eup %1775 }
 0x376   : > { %v772_v17 = vmax.f32 %v701_v39, 1.0  ;;  %v771_v42 = vmax.f32 %v699_v36, 1.0  ;;  %v783_v61 = vmul.f32 0.6931472, %v1776_v41  ;;  %v767_v44 = vmax.f32 %v2827_v60, 1.0  ;;  %v3026_v36 = vld [vmem:[#allocation10_spill] sm:$0xff] }
 0x377   : > { %1777 = vlog2.f32 %v769_v16  ;;  %v3028_v41 = vld [vmem:[#allocation13_spill] sm:$0xff] }
 0x378   : > { %1779 = vpow2.f32 %v1309_v15 }
 0x379   : > { %1781 = vlog2.f32 %v768_v38  ;;  %v705_v26 = vpop.xlane.xlu0 %704 }
 0x37a   : > { %1783 = vpow2.f32 %v1311_v51 }
 0x37b   : > { %1362 = vadd.xlane.f32.xlu2 %v1342_v56  ;;  %1360 = vadd.xlane.f32.xlu1 %v1341_v48  ;;  %v1275_v56 = vmul.f32 -70.0, %v3019_v5  ;;  %v1279_v48 = vmul.f32 -70.0, %v3020_v27  ;;  %1785 = vpow2.f32 %v1313_v49  ;;  %v707_v21 = vpop.xlane.xlu2 %706 }
 0x37c   : > { %1364 = vadd.xlane.f32.xlu0 %v1343_v30  ;;  %v3021_v30 = vld [vmem:[#allocation6_spill] sm:$0xff]  ;;  %1787 = vlog2.f32 %v772_v17 }
 0x37d   : > { %v1276_v45 = vmul.f32 -70.0, %v3021_v30  ;;  %v1297_v50 = vmul.f32 1.442695, %v1275_v56  ;;  %v1778_v13 = vpop.eup %1777  ;;  %v1305_v47 = vmul.f32 1.442695, %v1279_v48  ;;  %1789 = vlog2.f32 %v771_v42 }
 0x37e   : > { %1791 = vpow2.f32 %v1303_v31  ;;  %v770_v30 = vmax.f32 %v2837_v23, 1.0  ;;  %v3027_v31 = vld [vmem:[#allocation12_spill] sm:$0xff] }
 0x37f   : > { %v1299_v33 = vmul.f32 1.442695, %v1276_v45  ;;  %1793 = vpow2.f32 %v1297_v50  ;;  %v1274_v50 = vmul.f32 -70.0, %v3028_v41 }
 0x380   : > { %1795 = vpow2.f32 %v1305_v47 }
 0x381   : > { %1797 = vpow2.f32 %v1299_v33  ;;  %v711_v38 = vpop.xlane.xlu0 %710 }
 0x382   : > { %v777_v5 = vmax.f32 %v711_v38, 1.0 }
 0x383   : > { %1368 = vadd.xlane.f32.xlu2 %v1345_v25  ;;  %1366 = vadd.xlane.f32.xlu1 %v1344_v59  ;;  %v1280_v25 = vmul.f32 -70.0, %v3022_v28  ;;  %v785_v59 = vmul.f32 0.6931472, %v1774_v46  ;;  %v775_v46 = vmax.f32 %v707_v21, 1.0  ;;  %v1270_v28 = vmul.f32 -70.0, %v3027_v31 }
 0x384   : > { %1370 = vadd.xlane.f32.xlu0 %v1346_v2  ;;  %v1272_v2 = vmul.f32 -70.0, %v3023_v57 }
 0x385   : > { %v1307_v35 = vmul.f32 1.442695, %v1280_v25  ;;  %v713_v25 = vpop.xlane.xlu2 %712  ;;  %v1287_v33 = vmul.f32 1.442695, %v1270_v28 }
 0x387   : > { %1799 = vpow2.f32 %v1307_v35 }
 0x38b   : > { %1372 = vadd.xlane.f32.xlu2 %v1347_v55  ;;  %1374 = vadd.xlane.f32.xlu1 %v1348_v1  ;;  %v3024_v55 = vld [vmem:[#allocation9_spill] sm:$0xff] }
 0x38c   : > { %1376 = vadd.xlane.f32.xlu0 %v1349_v32  ;;  %v1277_v1 = vmul.f32 -70.0, %v3024_v55  ;;  %v2851_v32 = vpop.xlane.xlu1 %702 }
 0x393   : > { %1378 = vadd.xlane.f32.xlu2 %v1350_v34  ;;  %1380 = vadd.xlane.f32.xlu1 %v1351_v11  ;;  %v1269_v34 = vmul.f32 -70.0, %v3025_v58  ;;  %v2854_v11 = vpop.eup %1779 }
 0x394   : > { %1382 = vadd.xlane.f32.xlu0 %v1352_v12  ;;  %v814_v12 = vmul.f32 0.3, %v785_v59 }
 0x39b   : > { %1384 = vadd.xlane.f32.xlu2 %v1353_v19  ;;  %740 = vadd.xlane.f32.xlu1 %v720_v8  ;;  %v1782_v19 = vpop.eup %1781  ;;  %v1291_v8 = vmul.f32 1.442695, %v1272_v2 }
 0x39c   : > { %738 = vadd.xlane.f32.xlu0 %v719_v7  ;;  %v791_v7 = vmul.f32 0.6931472, %v1778_v13  ;;  %v3029_v13 = vld [vmem:[#allocation14_spill] sm:$0xff] }
 0x39d   : > { %1801 = vpow2.f32 %v1291_v8  ;;  %v1271_v47 = vmul.f32 -70.0, %v3029_v13 }
 0x39e   : > { %v817_v0 = vmul.f32 0.3, %v791_v7 }
 0x39f   : > { %v1289_v8 = vmul.f32 1.442695, %v1271_v47 }
 0x3a0   : > { %v838_v20 = vmul.f32 1.442695, %v817_v0 }
 0x3a3   : > { %742 = vadd.xlane.f32.xlu2 %v721_v63  ;;  %746 = vadd.xlane.f32.xlu1 %v723_v3  ;;  %v2856_v63 = vpop.eup %1783  ;;  %v1301_v3 = vmul.f32 1.442695, %v1277_v1 }
 0x3a4   : > { %744 = vadd.xlane.f32.xlu0 %v722_v18  ;;  %v2858_v4 = vpop.eup %1785  ;;  %v1285_v18 = vmul.f32 1.442695, %v1269_v34 }
 0x3a5   : > { %v1788_v40 = vpop.eup %1787  ;;  %1803 = vpow2.f32 %v1301_v3 }
 0x3a6   : > { %v1790_v9 = vpop.eup %1789  ;;  %1805 = vpow2.f32 %v1285_v18  ;;  %v797_v52 = vmul.f32 0.6931472, %v1788_v40  ;;  %v773_v18 = vmax.f32 %v2851_v32, 1.0 }
 0x3a7   : > { %v795_v15 = vmul.f32 0.6931472, %v1790_v9 }
 0x3a8   : > { %v820_v49 = vmul.f32 0.3, %v797_v52 }
 0x3a9   : > { %v819_v48 = vmul.f32 0.3, %v795_v15 }
 0x3aa   : > { %v844_v57 = vmul.f32 1.442695, %v820_v49 }
 0x3ab   : > { %748 = vadd.xlane.f32.xlu2 %v724_v53  ;;  %752 = vadd.xlane.f32.xlu1 %v726_v43  ;;  %v832_v53 = vmul.f32 1.442695, %v814_v12  ;;  %v813_v43 = vmul.f32 0.3, %v783_v61  ;;  %v842_v55 = vmul.f32 1.442695, %v819_v48 }
 0x3ac   : > { %750 = vadd.xlane.f32.xlu0 %v725_v62  ;;  %v789_v62 = vmul.f32 0.6931472, %v1782_v19  ;;  %v1295_v12 = vmul.f32 1.442695, %v1274_v50 }
 0x3ad   : > { %1807 = vpow2.f32 %v832_v53  ;;  %v830_v39 = vmul.f32 1.442695, %v813_v43 }
 0x3ae   : > { %v816_v29 = vmul.f32 0.3, %v789_v62 }
 0x3b0   : > { %v836_v27 = vmul.f32 1.442695, %v816_v29 }
 0x3b3   : > { %754 = vadd.xlane.f32.xlu2 %v727_v6  ;;  %758 = vadd.xlane.f32.xlu1 %v729_v37  ;;  %v774_v6 = vmax.f32 %v705_v26, 1.0  ;;  %v2860_v37 = vpop.eup %1791  ;;  %v778_v26 = vmax.f32 %v713_v25, 1.0 }
 0x3b4   : > { %756 = vadd.xlane.f32.xlu0 %v728_v54  ;;  %v764_v54 = vmax.f32 %v2817_v10, 1.0  ;;  %v2863_v14 = vpop.eup %1793 }
 0x3b5   : > { %v2866_v16 = vpop.eup %1795  ;;  %1809 = vlog2.f32 %v774_v6 }
 0x3b6   : > { %v2870_v51 = vpop.eup %1797  ;;  %1811 = vlog2.f32 %v764_v54 }
 0x3b7   : > { %v2872_v10 = vpop.eup %1799  ;;  %1813 = vlog2.f32 %v767_v44 }
 0x3b8   : > { %v2875_v60 = vpop.eup %1801  ;;  %1815 = vpow2.f32 %v830_v39 }
 0x3b9   : > { %v2877_v56 = vpop.eup %1803  ;;  %1817 = vpow2.f32 %v838_v20 }
 0x3ba   : > { %v2879_v17 = vpop.eup %1805  ;;  %1819 = vlog2.f32 %v775_v46 }
 0x3bb   : > { %760 = vadd.xlane.f32.xlu2 %v730_v22  ;;  %v2868_v22 = vpop.xlane.xlu1 %708  ;;  %v1808_v45 = vpop.eup %1807  ;;  %1821 = vlog2.f32 %v777_v5 }
 0x3bc   : > { %762 = vadd.xlane.f32.xlu0 %v731_v24  ;;  %v1273_v24 = vmul.f32 -70.0, %v3026_v36  ;;  %v1810_v59 = vpop.eup %1809  ;;  %1823 = vpow2.f32 %v836_v27  ;;  %v862_v53 = vadd.f32 1e-06, %v1808_v45  ;;  %v2892_v27 = vpop.xlane.xlu2 %736  ;;  %v776_v47 = vmax.f32 %v2868_v22, 1.0 }
 0x3bd   : > { %v1812_v2 = vpop.eup %1811  ;;  %1825 = vlog2.f32 %v770_v30  ;;  %v801_v58 = vmul.f32 0.6931472, %v1810_v59 }
 0x3be   : > { %v1293_v42 = vmul.f32 1.442695, %v1273_v24  ;;  %v1814_v1 = vpop.eup %1813  ;;  %v781_v61 = vmul.f32 0.6931472, %v1812_v2 }
 0x3bf   : > { %v1816_v23 = vpop.eup %1815  ;;  %v787_v7 = vmul.f32 0.6931472, %v1814_v1  ;;  %v822_v43 = vmul.f32 0.3, %v801_v58 }
 0x3c0   : > { %1827 = vpow2.f32 %v1293_v42  ;;  %v1818_v35 = vpop.eup %1817  ;;  %v861_v21 = vadd.f32 1e-06, %v1816_v23  ;;  %v812_v0 = vmul.f32 0.3, %v781_v61  ;;  %v2898_v42 = vpop.xlane.xlu0 %732 }
 0x3c1   : > { %1829 = vpow2.f32 %v844_v57  ;;  %v1820_v19 = vpop.eup %1819  ;;  %v865_v54 = vadd.f32 1e-06, %v1818_v35  ;;  %v815_v44 = vmul.f32 0.3, %v787_v7  ;;  %v848_v32 = vmul.f32 1.442695, %v822_v43 }
 0x3c2   : > { %1831 = vpow2.f32 %v842_v55  ;;  %v1822_v3 = vpop.eup %1821  ;;  %v803_v9 = vmul.f32 0.6931472, %v1820_v19  ;;  %v828_v24 = vmul.f32 1.442695, %v812_v0 }
 0x3c3   : > { %v2885_v34 = vpop.xlane.xlu1 %714  ;;  %1833 = vlog2.f32 %v778_v26  ;;  %v1824_v40 = vpop.eup %1823  ;;  %v807_v52 = vmul.f32 0.6931472, %v1822_v3  ;;  %v834_v5 = vmul.f32 1.442695, %v815_v44 }
 0x3c4   : > { %1835 = vpow2.f32 %v1287_v33  ;;  %v1826_v62 = vpop.eup %1825  ;;  %v864_v29 = vadd.f32 1e-06, %v1824_v40  ;;  %v823_v36 = vmul.f32 0.3, %v803_v9 }
 0x3c5   : > { %1837 = vpow2.f32 %v1295_v12  ;;  %v793_v38 = vmul.f32 0.6931472, %v1826_v62  ;;  %v825_v49 = vmul.f32 0.3, %v807_v52 }
 0x3c6   : > { %v2888_v6 = vpop.eup %1827  ;;  %1839 = vpow2.f32 %v1289_v8  ;;  %v850_v50 = vmul.f32 1.442695, %v823_v36 }
 0x3c7   : > { %v1830_v39 = vpop.eup %1829  ;;  %1841 = vlog2.f32 %v773_v18  ;;  %v818_v59 = vmul.f32 0.3, %v793_v38  ;;  %v854_v2 = vmul.f32 1.442695, %v825_v49  ;;  %v779_v38 = vmax.f32 %v2885_v34, 1.0 }
 0x3c8   : > { %v1832_v15 = vpop.eup %1831  ;;  %1843 = vrcp.f32 %v862_v53  ;;  %v868_v45 = vadd.f32 1e-06, %v1830_v39 }
 0x3c9   : > { %v1834_v20 = vpop.eup %1833  ;;  %1845 = vrcp.f32 %v861_v21  ;;  %v867_v28 = vadd.f32 1e-06, %v1832_v15  ;;  %v840_v26 = vmul.f32 1.442695, %v818_v59 }
 0x3ca   : > { %v2890_v46 = vpop.eup %1835  ;;  %1847 = vrcp.f32 %v865_v54  ;;  %v809_v25 = vmul.f32 0.6931472, %v1834_v20 }
 0x3cb   : > { %v2894_v48 = vpop.xlane.xlu1 %734  ;;  %v2896_v30 = vpop.eup %1837  ;;  %1849 = vrcp.f32 %v864_v29 }
 0x3cc   : > { %v2900_v31 = vpop.eup %1839  ;;  %1851 = vpow2.f32 %v848_v32  ;;  %v826_v1 = vmul.f32 0.3, %v809_v25 }
 0x3cd   : > { %v1842_v41 = vpop.eup %1841  ;;  %1853 = vpow2.f32 %v828_v24 }
 0x3ce   : > { %v2902_v57 = vpop.eup %1843  ;;  %1855 = vpow2.f32 %v834_v5  ;;  %v799_v23 = vmul.f32 0.6931472, %v1842_v41  ;;  %v856_v22 = vmul.f32 1.442695, %v826_v1 }
 0x3cf   : > { %v2904_v13 = vpop.eup %1845  ;;  %1857 = vrcp.f32 %v868_v45 }
 0x3d0   : > { %v2907_v55 = vpop.eup %1847  ;;  %1859 = vrcp.f32 %v867_v28  ;;  %v821_v18 = vmul.f32 0.3, %v799_v23 }
 0x3d1   : > { %v2909_v33 = vpop.eup %1849  ;;  %1861 = vpow2.f32 %v850_v50 }
 0x3d2   : > { %v1852_v58 = vpop.eup %1851  ;;  %1863 = vpow2.f32 %v854_v2  ;;  %v846_v52 = vmul.f32 1.442695, %v821_v18 }
 0x3d3   : > { %v1854_v61 = vpop.eup %1853  ;;  %1865 = vlog2.f32 %v776_v47  ;;  %v870_v43 = vadd.f32 1e-06, %v1852_v58 }
 0x3d4   : > { %v1856_v3 = vpop.eup %1855  ;;  %1867 = vpow2.f32 %v840_v26  ;;  %v860_v21 = vadd.f32 1e-06, %v1854_v61 }
 0x3d5   : > { %v2911_v53 = vpop.eup %1857  ;;  %v863_v0 = vadd.f32 1e-06, %v1856_v3 }
 0x3d6   : > { %v2913_v62 = vpop.eup %1859 }
 0x3d7   : > { %v2915_v9 = vpop.eup %1861 }
 0x3d8   : > { %v2917_v54 = vpop.eup %1863 }
 0x3d9   : > { %v1866_v44 = vpop.eup %1865 }
 0x3da   : > { %v1868_v39 = vpop.eup %1867  ;;  %v805_v5 = vmul.f32 0.6931472, %v1866_v44 }
 0x3db   : > { %v866_v59 = vadd.f32 1e-06, %v1868_v39 }
 0x3dc   : > { %v824_v23 = vmul.f32 0.3, %v805_v5 }
 0x3e6   : > { %v1357_v35 = vpop.xlane.xlu2 %1356  ;;  %v1355_v12 = vpop.xlane.xlu1 %1354 }
 0x3e7   : > { %v1387_v19 = vmax.f32 %v1357_v35, 1.0  ;;  %v1386_v8 = vmax.f32 %v1355_v12, 1.0  ;;  %v1359_v7 = vpop.xlane.xlu0 %1358 }
 0x3e8   : > { %v1388_v40 = vmax.f32 %v1359_v7, 1.0 }
 0x3e9   : > { %1869 = vlog2.f32 %v1387_v19 }
 0x3ea   : > { %1871 = vlog2.f32 %v1386_v8 }
 0x3eb   : > { %1873 = vlog2.f32 %v1388_v40 }
 0x3ec   : > { %1875 = vpow2.f32 %v856_v22 }
 0x3ed   : > { %1877 = vrcp.f32 %v870_v43 }
 0x3ee   : > { %1879 = vrcp.f32 %v860_v21  ;;  %v1363_v29 = vpop.xlane.xlu2 %1362  ;;  %v1361_v15 = vpop.xlane.xlu1 %1360 }
 0x3ef   : > { %v1870_v32 = vpop.eup %1869  ;;  %1881 = vrcp.f32 %v863_v0  ;;  %v1390_v20 = vmax.f32 %v1363_v29, 1.0  ;;  %v1389_v36 = vmax.f32 %v1361_v15, 1.0  ;;  %v1365_v24 = vpop.xlane.xlu0 %1364  ;;  %v852_v0 = vmul.f32 1.442695, %v824_v23 }
 0x3f0   : > { %v1872_v49 = vpop.eup %1871  ;;  %1883 = vpow2.f32 %v846_v52  ;;  %v1405_v45 = vmul.f32 0.6931472, %v1870_v32  ;;  %v1391_v28 = vmax.f32 %v1365_v24, 1.0 }
 0x3f1   : > { %v1874_v25 = vpop.eup %1873  ;;  %v1403_v41 = vmul.f32 0.6931472, %v1872_v49  ;;  %1885 = vlog2.f32 %v1390_v20 }
 0x3f2   : > { %v2920_v50 = vpop.eup %1875  ;;  %v1435_v2 = vmul.f32 0.3, %v1405_v45  ;;  %v1407_v47 = vmul.f32 0.6931472, %v1874_v25  ;;  %1887 = vlog2.f32 %v1389_v36 }
 0x3f3   : > { %v2922_v1 = vpop.eup %1877  ;;  %v1434_v34 = vmul.f32 0.3, %v1403_v41  ;;  %1889 = vlog2.f32 %v1391_v28 }
 0x3f4   : > { %v2924_v26 = vpop.eup %1879  ;;  %1891 = vlog2.f32 %v779_v38  ;;  %v1452_v58 = vmul.f32 1.442695, %v1435_v2  ;;  %v1436_v35 = vmul.f32 0.3, %v1407_v47 }
 0x3f5   : > { %v2926_v12 = vpop.eup %1881  ;;  %1893 = vrcp.f32 %v866_v59  ;;  %v1450_v61 = vmul.f32 1.442695, %v1434_v34 }
 0x3f6   : > { %v1884_v19 = vpop.eup %1883  ;;  %1895 = vpow2.f32 %v1452_v58  ;;  %v1454_v8 = vmul.f32 1.442695, %v1436_v35  ;;  %v1369_v7 = vpop.xlane.xlu2 %1368 }
 0x3f7   : > { %v1367_v3 = vpop.xlane.xlu1 %1366  ;;  %v1886_v22 = vpop.eup %1885  ;;  %1897 = vpow2.f32 %v1450_v61  ;;  %v1393_v18 = vmax.f32 %v1369_v7, 1.0  ;;  %v869_v29 = vadd.f32 1e-06, %v1884_v19 }
 0x3f8   : > { %v1392_v40 = vmax.f32 %v1367_v3, 1.0  ;;  %v1371_v43 = vpop.xlane.xlu0 %1370  ;;  %v1888_v21 = vpop.eup %1887  ;;  %1899 = vpow2.f32 %v1454_v8  ;;  %v1411_v52 = vmul.f32 0.6931472, %v1886_v22 }
 0x3f9   : > { %v1394_v44 = vmax.f32 %v1371_v43, 1.0  ;;  %v1890_v39 = vpop.eup %1889  ;;  %v1409_v15 = vmul.f32 0.6931472, %v1888_v21  ;;  %1901 = vlog2.f32 %v1393_v18 }
 0x3fa   : > { %v1892_v32 = vpop.eup %1891  ;;  %v1438_v38 = vmul.f32 0.3, %v1411_v52  ;;  %v1413_v20 = vmul.f32 0.6931472, %v1890_v39  ;;  %1903 = vlog2.f32 %v1392_v40 }
 0x3fb   : > { %v2928_v36 = vpop.eup %1893  ;;  %v1437_v24 = vmul.f32 0.3, %v1409_v15  ;;  %1905 = vlog2.f32 %v1394_v44 }
 0x3fc   : > { %v1896_v49 = vpop.eup %1895  ;;  %1907 = vpow2.f32 %v852_v0  ;;  %v1458_v5 = vmul.f32 1.442695, %v1438_v38  ;;  %v1439_v45 = vmul.f32 0.3, %v1413_v20 }
 0x3fd   : > { %v1898_v28 = vpop.eup %1897  ;;  %1909 = vrcp.f32 %v869_v29  ;;  %v1483_v25 = vadd.f32 1e-06, %v1896_v49  ;;  %v1456_v2 = vmul.f32 1.442695, %v1437_v24 }
 0x3fe   : > { %v1900_v59 = vpop.eup %1899  ;;  %v1482_v41 = vadd.f32 1e-06, %v1898_v28  ;;  %1911 = vpow2.f32 %v1458_v5  ;;  %v1373_v47 = vpop.xlane.xlu2 %1372  ;;  %v1460_v35 = vmul.f32 1.442695, %v1439_v45 }
 0x3ff   : > { %v1375_v34 = vpop.xlane.xlu1 %1374  ;;  %v1902_v23 = vpop.eup %1901  ;;  %1913 = vrcp.f32 %v1483_v25  ;;  %v1484_v58 = vadd.f32 1e-06, %v1900_v59  ;;  %v1395_v7 = vmax.f32 %v1373_v47, 1.0  ;;  %v893_v59 = vmul.f32 %v2904_v13, %v2894_v48 }
 0x400   : > { %v1377_v61 = vpop.xlane.xlu0 %1376  ;;  %v1904_v19 = vpop.eup %1903  ;;  %1915 = vrcp.f32 %v1482_v41  ;;  %v1417_v8 = vmul.f32 0.6931472, %v1902_v23  ;;  %v1396_v18 = vmax.f32 %v1375_v34, 1.0  ;;  %v892_v47 = vmul.f32 %v2924_v26, %v2898_v42  ;;  %v3030_v42 = vld [vmem:[#allocation3_spill] sm:$0xff] }
 0x401   : > { %v1906_v3 = vpop.eup %1905  ;;  %1917 = vrcp.f32 %v1484_v58  ;;  %v1415_v22 = vmul.f32 0.6931472, %v1904_v19  ;;  %v1397_v5 = vmax.f32 %v1377_v61, 1.0  ;;  %v811_v34 = vmul.f32 0.6931472, %v1892_v32 }
 0x402   : > { %v2930_v40 = vpop.eup %1907  ;;  %1919 = vpow2.f32 %v1456_v2  ;;  %v1441_v43 = vmul.f32 0.3, %v1417_v8  ;;  %v1419_v21 = vmul.f32 0.6931472, %v1906_v3  ;;  %v908_v3 = vadd.f32 %v893_v59, %v892_v47 }
 0x403   : > { %v2932_v0 = vpop.eup %1909  ;;  %1921 = vpow2.f32 %v1460_v35  ;;  %v1440_v52 = vmul.f32 0.3, %v1415_v22  ;;  %v2941_v26 = vmul.f32 -70.0, %v3030_v42 }
 0x404   : > { %v1912_v44 = vpop.eup %1911  ;;  %v1464_v39 = vmul.f32 1.442695, %v1441_v43  ;;  %v1442_v29 = vmul.f32 0.3, %v1419_v21  ;;  %1923 = vlog2.f32 %v1395_v7  ;;  %v894_v21 = vmul.f32 %v2902_v57, %v2892_v27 }
 0x405   : > { %v1914_v15 = vpop.eup %1913  ;;  %v1486_v38 = vadd.f32 1e-06, %v1912_v44  ;;  %v1462_v20 = vmul.f32 1.442695, %v1440_v52  ;;  %1925 = vlog2.f32 %v1396_v18 }
 0x406   : > { %v1916_v24 = vpop.eup %1915  ;;  %1927 = vpow2.f32 %v1464_v39  ;;  %v1466_v49 = vmul.f32 1.442695, %v1442_v29  ;;  %v1379_v45 = vpop.xlane.xlu2 %1378  ;;  %v1515_v58 = vmul.f32 %v1914_v15, %v2890_v46  ;;  %v827_v39 = vmul.f32 0.3, %v811_v34 }
 0x407   : > { %v1381_v28 = vpop.xlane.xlu1 %1380  ;;  %v1918_v25 = vpop.eup %1917  ;;  %1929 = vrcp.f32 %v1486_v38  ;;  %v1398_v61 = vmax.f32 %v1379_v45, 1.0  ;;  %v1514_v8 = vmul.f32 %v1916_v24, %v2879_v17  ;;  %v909_v45 = vadd.f32 %v908_v3, %v894_v21 }
 0x408   : > { %v1383_v41 = vpop.xlane.xlu0 %1382  ;;  %v1920_v2 = vpop.eup %1919  ;;  %1931 = vpow2.f32 %v1462_v20  ;;  %v1399_v48 = vmax.f32 %v1381_v28, 1.0 }
 0x409   : > { %v1922_v23 = vpop.eup %1921  ;;  %v1485_v35 = vadd.f32 1e-06, %v1920_v2  ;;  %1933 = vpow2.f32 %v1466_v49  ;;  %v1400_v46 = vmax.f32 %v1383_v41, 1.0  ;;  %v1530_v29 = vadd.f32 %v1515_v58, %v1514_v8 }
 0x40a   : > { %v1924_v19 = vpop.eup %1923  ;;  %v1487_v7 = vadd.f32 1e-06, %v1922_v23  ;;  %1935 = vlog2.f32 %v1397_v5  ;;  %v1516_v41 = vmul.f32 %v1918_v25, %v2900_v31 }
 0x40b   : > { %v1926_v13 = vpop.eup %1925  ;;  %1937 = vrcp.f32 %v1485_v35  ;;  %v1421_v22 = vmul.f32 0.6931472, %v1924_v19  ;;  %v858_v35 = vmul.f32 1.442695, %v827_v39 }
 0x40c   : > { %v1928_v18 = vpop.eup %1927  ;;  %1939 = vrcp.f32 %v1487_v7  ;;  %v1423_v32 = vmul.f32 0.6931472, %v1926_v13 }
 0x40d   : > { %v1930_v43 = vpop.eup %1929  ;;  %v1489_v52 = vadd.f32 1e-06, %v1928_v18  ;;  %v1443_v17 = vmul.f32 0.3, %v1421_v22  ;;  %1941 = vlog2.f32 %v1398_v61  ;;  %v1531_v61 = vadd.f32 %v1530_v29, %v1516_v41 }
 0x40e   : > { %v1932_v44 = vpop.eup %1931  ;;  %v1444_v15 = vmul.f32 0.3, %v1423_v32  ;;  %1943 = vlog2.f32 %v1399_v48  ;;  %v1385_v38 = vpop.xlane.xlu2 %1384  ;;  %v1518_v7 = vmul.f32 %v1930_v43, %v2888_v6 }
 0x40f   : > { %v741_v20 = vpop.xlane.xlu1 %740  ;;  %v1934_v24 = vpop.eup %1933  ;;  %1945 = vrcp.f32 %v1489_v52  ;;  %v1488_v49 = vadd.f32 1e-06, %v1932_v44  ;;  %v1468_v5 = vmul.f32 1.442695, %v1443_v17  ;;  %v1401_v34 = vmax.f32 %v1385_v38, 1.0 }
 0x410   : > { %v739_v28 = vpop.xlane.xlu0 %738  ;;  %v1936_v59 = vpop.eup %1935  ;;  %v1490_v27 = vadd.f32 1e-06, %v1934_v24  ;;  %v1470_v57 = vmul.f32 1.442695, %v1444_v15  ;;  %1947 = vlog2.f32 %v1400_v46  ;;  %v896_v22 = vmul.f32 %v2909_v33, %v741_v20 }
 0x411   : > { %v1938_v2 = vpop.eup %1937  ;;  %1949 = vrcp.f32 %v1488_v49  ;;  %v1425_v47 = vmul.f32 0.6931472, %v1936_v59  ;;  %v895_v23 = vmul.f32 %v2926_v12, %v739_v28  ;;  %v871_v12 = vadd.f32 1e-06, %v2915_v9 }
 0x412   : > { %v1940_v58 = vpop.eup %1939  ;;  %v1517_v19 = vmul.f32 %v1938_v2, %v2875_v60  ;;  %1951 = vrcp.f32 %v1490_v27 }
 0x413   : > { %v1942_v8 = vpop.eup %1941  ;;  %1953 = vpow2.f32 %v1468_v5  ;;  %v1445_v31 = vmul.f32 0.3, %v1425_v47  ;;  %v910_v25 = vadd.f32 %v909_v45, %v895_v23  ;;  %v1519_v21 = vmul.f32 %v1940_v58, %v2896_v30 }
 0x414   : > { %v1944_v48 = vpop.eup %1943  ;;  %v1532_v13 = vadd.f32 %v1531_v61, %v1517_v19  ;;  %1955 = vpow2.f32 %v1470_v57  ;;  %v1427_v3 = vmul.f32 0.6931472, %v1942_v8 }
 0x415   : > { %v1946_v18 = vpop.eup %1945  ;;  %v1472_v42 = vmul.f32 1.442695, %v1445_v31  ;;  %v1429_v32 = vmul.f32 0.6931472, %v1944_v48  ;;  %1957 = vlog2.f32 %v1401_v34  ;;  %v911_v52 = vadd.f32 %v910_v25, %v896_v22 }
 0x416   : > { %v1948_v60 = vpop.eup %1947  ;;  %v1533_v46 = vadd.f32 %v1532_v13, %v1518_v7  ;;  %v1446_v6 = vmul.f32 0.3, %v1427_v3  ;;  %v743_v43 = vpop.xlane.xlu2 %742  ;;  %v1521_v30 = vmul.f32 %v1946_v18, %v2870_v51  ;;  %v1315_v3 = vmul.f32 1.442695, %v2941_v26 }
 0x417   : > { %v747_v17 = vpop.xlane.xlu1 %746  ;;  %v1950_v44 = vpop.eup %1949  ;;  %1959 = vpow2.f32 %v1472_v42  ;;  %v1447_v39 = vmul.f32 0.3, %v1429_v32  ;;  %v1431_v29 = vmul.f32 0.6931472, %v1948_v60  ;;  %v897_v33 = vmul.f32 %v2907_v55, %v743_v43 }
 0x418   : > { %v745_v15 = vpop.xlane.xlu0 %744  ;;  %v1952_v38 = vpop.eup %1951  ;;  %1961 = vpow2.f32 %v858_v35  ;;  %v1534_v9 = vadd.f32 %v1533_v46, %v1519_v21  ;;  %v1520_v20 = vmul.f32 %v1950_v44, %v2863_v14  ;;  %v1474_v24 = vmul.f32 1.442695, %v1446_v6 }
 0x419   : > { %v1954_v49 = vpop.eup %1953  ;;  %v1476_v5 = vmul.f32 1.442695, %v1447_v39  ;;  %v1448_v45 = vmul.f32 0.3, %v1431_v29  ;;  %v912_v28 = vadd.f32 %v911_v52, %v897_v33  ;;  %v898_v57 = vmul.f32 %v2928_v36, %v745_v15 }
 0x41a   : > { %v1956_v59 = vpop.eup %1955  ;;  %v1535_v41 = vadd.f32 %v1534_v9, %v1520_v20  ;;  %v1491_v27 = vadd.f32 1e-06, %v1954_v49  ;;  %1963 = vpow2.f32 %v1474_v24  ;;  %v1522_v2 = vmul.f32 %v1952_v38, %v2877_v56 }
 0x41b   : > { %v1958_v55 = vpop.eup %1957  ;;  %v1492_v47 = vadd.f32 1e-06, %v1956_v59  ;;  %1965 = vpow2.f32 %v1476_v5  ;;  %v1478_v34 = vmul.f32 1.442695, %v1448_v45  ;;  %v913_v58 = vadd.f32 %v912_v28, %v898_v57 }
 0x41c   : > { %v1536_v14 = vadd.f32 %v1535_v41, %v1521_v30  ;;  %1967 = vrcp.f32 %v1491_v27  ;;  %v1433_v23 = vmul.f32 0.6931472, %v1958_v55  ;;  %v872_v35 = vadd.f32 1e-06, %v2930_v40 }
 0x41d   : > { %v1960_v51 = vpop.eup %1959  ;;  %1969 = vrcp.f32 %v1492_v47  ;;  %v899_v61 = vmul.f32 %v2913_v62, %v747_v17  ;;  %v873_v46 = vadd.f32 1e-06, %v2917_v54  ;;  %v874_v43 = vadd.f32 1e-06, %v2920_v50 }
 0x41e   : > { %v1962_v19 = vpop.eup %1961  ;;  %v1537_v8 = vadd.f32 %v1536_v14, %v1522_v2  ;;  %v1493_v7 = vadd.f32 1e-06, %v1960_v51  ;;  %1971 = vpow2.f32 %v1478_v34  ;;  %v1449_v36 = vmul.f32 0.3, %v1433_v23  ;;  %v749_v31 = vpop.xlane.xlu2 %748 }
 0x41f   : > { %1973 = vrcp.f32 %v871_v12  ;;  %v900_v56 = vmul.f32 %v2911_v53, %v749_v31  ;;  %v914_v25 = vadd.f32 %v913_v58, %v899_v61  ;;  %v753_v40 = vpop.xlane.xlu1 %752  ;;  %v875_v29 = vadd.f32 1e-06, %v1962_v19 }
 0x420   : > { %v751_v48 = vpop.xlane.xlu0 %750  ;;  %v1964_v13 = vpop.eup %1963  ;;  %1975 = vrcp.f32 %v1493_v7  ;;  %v1480_v22 = vmul.f32 1.442695, %v1449_v36  ;;  %v902_v52 = vmul.f32 %v2922_v1, %v753_v40 }
 0x421   : > { %v1966_v18 = vpop.eup %1965  ;;  %1977 = vrcp.f32 %v872_v35  ;;  %v1494_v62 = vadd.f32 1e-06, %v1964_v13  ;;  %v915_v42 = vadd.f32 %v914_v25, %v900_v56  ;;  %v901_v32 = vmul.f32 %v2932_v0, %v751_v48 }
 0x422   : > { %v1968_v60 = vpop.eup %1967  ;;  %v1495_v12 = vadd.f32 1e-06, %v1966_v18  ;;  %1979 = vpow2.f32 %v1480_v22 }
 0x423   : > { %v1970_v53 = vpop.eup %1969  ;;  %v1523_v21 = vmul.f32 %v1968_v60, %v2860_v37  ;;  %1981 = vrcp.f32 %v1494_v62  ;;  %v916_v6 = vadd.f32 %v915_v42, %v901_v32 }
 0x424   : > { %v1972_v26 = vpop.eup %1971  ;;  %1983 = vrcp.f32 %v1495_v12  ;;  %v1524_v0 = vmul.f32 %v1970_v53, %v2866_v16 }
 0x425   : > { %v1974_v17 = vpop.eup %1973  ;;  %1985 = vpow2.f32 %v1315_v3  ;;  %v1538_v44 = vadd.f32 %v1537_v8, %v1523_v21  ;;  %v1496_v39 = vadd.f32 1e-06, %v1972_v26  ;;  %v917_v15 = vadd.f32 %v916_v6, %v902_v52 }
 0x426   : > { %v1976_v54 = vpop.eup %1975  ;;  %1987 = vrcp.f32 %v873_v46  ;;  %v755_v33 = vpop.xlane.xlu2 %754 }
 0x427   : > { %v1978_v37 = vpop.eup %1977  ;;  %v1539_v38 = vadd.f32 %v1538_v44, %v1524_v0  ;;  %v1525_v9 = vmul.f32 %v1976_v54, %v2872_v10  ;;  %1989 = vrcp.f32 %v1496_v39  ;;  %v903_v50 = vmul.f32 %v1974_v17, %v755_v33  ;;  %v759_v59 = vpop.xlane.xlu1 %758 }
 0x428   : > { %v757_v20 = vpop.xlane.xlu0 %756  ;;  %v1980_v24 = vpop.eup %1979  ;;  %1991 = vrcp.f32 %v874_v43 }
 0x429   : > { %v1982_v1 = vpop.eup %1981  ;;  %v1540_v49 = vadd.f32 %v1539_v38, %v1525_v9  ;;  %v1497_v30 = vadd.f32 1e-06, %v1980_v24  ;;  %v918_v5 = vadd.f32 %v917_v15, %v903_v50  ;;  %v904_v16 = vmul.f32 %v1978_v37, %v757_v20 }
 0x42a   : > { %v1984_v45 = vpop.eup %1983  ;;  %1993 = vrcp.f32 %v875_v29  ;;  %v1526_v28 = vmul.f32 %v1982_v1, %v2854_v11 }
 0x42b   : > { %v1986_v41 = vpop.eup %1985  ;;  %1995 = vrcp.f32 %v1497_v30  ;;  %v919_v27 = vadd.f32 %v918_v5, %v904_v16  ;;  %v1527_v55 = vmul.f32 %v1984_v45, %v2856_v63 }
 0x42c   : > { %v1988_v57 = vpop.eup %1987  ;;  %v1541_v10 = vadd.f32 %v1540_v49, %v1526_v28 }
 0x42d   : > { %v1990_v2 = vpop.eup %1989  ;;  %v905_v47 = vmul.f32 %v1988_v57, %v759_v59 }
 0x42e   : > { %v1992_v34 = vpop.eup %1991  ;;  %v1542_v14 = vadd.f32 %v1541_v10, %v1527_v55  ;;  %v1528_v23 = vmul.f32 %v1990_v2, %v2858_v4  ;;  %v761_v58 = vpop.xlane.xlu2 %760 }
 0x42f   : > { %v906_v51 = vmul.f32 %v1992_v34, %v761_v58  ;;  %v920_v35 = vadd.f32 %v919_v27, %v905_v47 }
 0x430   : > { %v763_v61 = vpop.xlane.xlu0 %762  ;;  %v1994_v19 = vpop.eup %1993  ;;  %v1543_v11 = vadd.f32 %v1542_v14, %v1528_v23 }
 0x431   : > { %v1996_v8 = vpop.eup %1995  ;;  %v921_v7 = vadd.f32 %v920_v35, %v906_v51  ;;  %v907_v36 = vmul.f32 %v1994_v19, %v763_v61 }
 0x432   : > { %v1529_v31 = vmul.f32 %v1996_v8, %v1986_v41 }
 0x433   : > { %v922_v56 = vadd.f32 %v921_v7, %v907_v36 }
 0x434   : > { %v1544_v25 = vadd.f32 %v1543_v11, %v1529_v31 }
 0x435   : > { %v923_v63 = vrot.slane %v922_v56, 4 }
 0x436   : > { %v1545_v48 = vrot.slane %v1544_v25, 4 }
 0x437   : > { %v924_v13 = vadd.f32 %v923_v63, %v922_v56 }
 0x438   : > { %v1546_v3 = vadd.f32 %v1545_v48, %v1544_v25 }
 0x439   : > { %v925_v22 = vrot.slane %v924_v13, 2 }
 0x43a   : > { %v1547_v4 = vrot.slane %v1546_v3, 2 }
 0x43b   : > { %v926_v40 = vadd.f32 %v925_v22, %v924_v13 }
 0x43c   : > { %v1548_v18 = vadd.f32 %v1547_v4, %v1546_v3 }
 0x43d   : > { %v927_v62 = vrot.slane %v926_v40, 1 }
 0x43e   : > { %v1549_v42 = vrot.slane %v1548_v18, 1 }
 0x43f   : > { %v928_v32 = vadd.f32 %v927_v62, %v926_v40 }
 0x440   : > { %v1550_v60 = vadd.f32 %v1549_v42, %v1548_v18 }
 0x441   : > { %v929_v46 = vmul.f32 0.0078125, %v928_v32 }
 0x442   : > { %v1551_v12 = vmul.f32 0.0078125, %v1550_v60 }
 0x443   : > { %v930_v53 = vsub.f32 1.0, %v929_v46 }
 0x444   : > { %v1552_v21 = vsub.f32 1.0, %v1551_v12 }
 0x445   : > { %932 = vst.msk [vmem:[%s321_s18] sm:$0x1] %vm931_vm4, %v930_v53 }
 0x446   : > { %1553 = vst.msk [vmem:[%s324_s23] sm:$0x1] %vm931_vm4, %v1552_v21 }
 0x447 PF: > { %s17_s21 = sadd.s32 1, %s2003_s21  }
 0x448   : > { %p14_p4 = scmp.ge.s32.totalorder %s17_s21, 4  }
 0x44a   :  { %16 = sbr.rel (!%p14_p4) target bundleno = 1 (0x1), region = 94 }

</bundles_post_ra>
